<compile_context>
chip_gen: v5e
topology: v5e:2x2
jax: 0.10.0
libtpu: 0.0.40
codegen_flags: <defaults>
</compile_context>

<pallas_src>
import functools

import numpy as np

import jax
import jax.numpy as jnp
from jax import lax
from jax.experimental import pallas as pl
from jax.experimental.pallas import tpu as pltpu


_CANVAS = 32      # power of two; 32*32 = 1024 = 8*128 -> lane-dense slabs
_OFF = 3          # top-left offset of the HxW image inside the canvas (>= 3)
_MAX_TILE = 8     # cap on images per grid step (VMEM / vreg pressure)


# --------------------------- fused Pallas kernel -----------------------------

def caccm_kernel(tm_ref, x_ref, mask_ref, w1_ref, wtaps_ref, bias_ref, head_ref,
                 dens_ref, score_ref, xg_ref, *, canvas, b_tile, hw_inv):
    """One batch TILE (b_tile images) per grid step.

    Layout: (channels, b_tile * canvas^2) slabs; channels on sublanes, the
    images' flattened canvases concatenated along lanes.  Dilated-conv taps are
    static lane rolls; per-layer zero padding is a footprint-mask select.
    """
    n = canvas * canvas
    N = b_tile * n
    c = x_ref.shape[1]                      # vision channels
    cout = wtaps_ref.shape[1]               # hidden == out channels
    neg = jnp.finfo(jnp.float32).min
    pos = jnp.finfo(jnp.float32).max

    # Precomputed footprint masks (hoisted to the wrapper; constants in HBM,
    # DMA'd once since their block index never changes).
    okA = mask_ref[0:1, :] > 0.5            # 16x16 region: x / conv1-out / output
    okB = mask_ref[1:2, :] > 0.5            # 18x18 region: conv2/conv3 outputs

    x = x_ref[0]                            # (c, N); zero outside footprint A
    xg_ref[0:c, :] = x                      # rows 0..c-1 of the 1x1-conv operand

    # ---- SCGM per image: sim = mean_L(t) @ x, min-max normalized over the
    #      valid region; guide written as row c of the concat operand ----
    tmv = tm_ref[0]                         # (b_tile, c) per-image mean text feat
    for img in range(b_tile):
        lo, hi = img * n, (img + 1) * n
        sim = jnp.dot(tmv[img:img + 1, :], x[:, lo:hi],
                      preferred_element_type=jnp.float32)          # (1, n)
        ok = okA[:, lo:hi]
        mx = jnp.max(jnp.where(ok, sim, neg), axis=1, keepdims=True)
        mn = jnp.min(jnp.where(ok, sim, pos), axis=1, keepdims=True)
        # norm_mode='01'.  approx=False: exact reciprocal (one scalar/image);
        # mx==mn reproduces the reference's 0/0 NaN for that image only.
        sim = (sim - mn) * pl.reciprocal(mx - mn, approx=False)
        # where (not *mask): keeps a NaN/inf guide of a constant-sim image from
        # leaking into neighbouring images' lanes through the roll taps.
        xg_ref[c:c + 1, lo:hi] = jnp.where(ok, sim, 0.0)
    # TODO(synk): norm_mode='-11' and guide_mode='mul' branches are not
    # exercised; defaults ('01', 'cat') are implemented.

    biasv = bias_ref[...]                   # (cout, 4) = [b1 b2 b3 b4]

    # ---- 1x1 conv (guide channel folded into the matmul) + ReLU ----
    y = jnp.dot(w1_ref[...], xg_ref[...], preferred_element_type=jnp.float32)
    y = jnp.where(okA, jnp.maximum(y + biasv[:, 0:1], 0.0), 0.0)

    # ---- dilated 3x3 convs: 9 shifted whole-slab matmuls each ----
    def dconv(u, layer, d):
        acc = jnp.zeros((cout, N), jnp.float32)
        for ky in range(3):
            for kx in range(3):
                off = ((ky - 1) * canvas + (kx - 1)) * d
                us = u if off == 0 else pltpu.roll(u, shift=(-off) % N, axis=1)
                acc = acc + jnp.dot(wtaps_ref[layer * 9 + ky * 3 + kx], us,
                                    preferred_element_type=jnp.float32)
        return acc + biasv[:, layer + 1:layer + 2]
    # TODO(synk): v6e/v7x -- fuse the 9 taps into one K=9*Cin matmul via a
    # stacked VMEM scratch (or use MRB accumulation on v7x); per-tap register
    # accumulation kept as the portable form (v5e store-slot / XLU friendly).

    y = jnp.where(okB, dconv(y, 0, 1), 0.0)                      # 16x16 -> 18x18
    y = jnp.where(okB, dconv(y, 1, 2), 0.0)                      # 18x18 -> 18x18
    y = jnp.where(okA, jnp.maximum(dconv(y, 2, 3), 0.0), 0.0)    # 18x18 -> 16x16

    dens_ref[0] = y                          # lane-dense (cout, N) store

    # ---- ClsHead fused: per-image masked global-average pool + fc ----
    hv = head_ref[...]                       # (nc, cout+1); last column = bias
    for img in range(b_tile):
        lo, hi = img * n, (img + 1) * n
        pooled = jnp.sum(y[:, lo:hi], axis=1, keepdims=True) * hw_inv   # (cout,1)
        score_ref[img] = (jnp.dot(hv[:, 0:cout], pooled,
                                  preferred_element_type=jnp.float32)
                          + hv[:, cout:cout + 1])


# --------------------------- forward wrapper ---------------------------------

def _make_masks(canvas, off, h, w, b_tile):
    """Batch-invariant footprint masks, built with numpy -> baked constants."""
    idx = np.arange(canvas * canvas)
    r, col = idx // canvas, idx % canvas

    def fp(lo, nr, ncl):
        return ((r >= lo) & (r < lo + nr) & (col >= lo) & (col < lo + ncl))

    mA = fp(off, h, w).astype(np.float32)               # 16x16 valid region
    mB = fp(off - 1, h + 2, w + 2).astype(np.float32)   # 18x18 valid region
    return jnp.asarray(np.tile(np.stack([mA, mB], 0), (1, b_tile)))   # (2, N)


def caccm_forward(x_nchw, t, params, b_tile=None):
    b, c, h, w = x_nchw.shape
    hid = params['w1'].shape[1]
    cout = params['w2'].shape[-1]
    nc = params['wfc'].shape[-1]
    assert hid == cout, "module only type-checks when hidden_dim == out_dim"
    assert _CANVAS & (_CANVAS - 1) == 0
    assert h + 6 <= _CANVAS and w + 6 <= _CANVAS, "enlarge _CANVAS"
    n = _CANVAS * _CANVAS

    # Images per grid step: largest divisor of b that is <= _MAX_TILE (no dummy
    # padding images -> no NaN-guide hazards from all-zero images).
    # NOTE: on v7x with small b, prefer b_tile = b//2 so two grid steps split
    # across the two TensorCores.
    if b_tile is None:
        b_tile = max(d for d in range(1, min(b, _MAX_TILE) + 1) if b % d == 0)
    steps = b // b_tile
    N = b_tile * n

    # Canvas-pad x once and lane-stack b_tile images per step: (steps, c, N).
    xcan = jnp.pad(x_nchw, ((0, 0), (0, 0),
                            (_OFF, _CANVAS - _OFF - h),
                            (_OFF, _CANVAS - _OFF - w)))
    xcan = xcan.reshape(steps, b_tile, c, n).transpose(0, 2, 1, 3).reshape(
        steps, c, N)

    tm = jnp.mean(t, axis=1).reshape(steps, b_tile, c)   # mean_L folded (linear)

    masks = _make_masks(_CANVAS, _OFF, h, w, b_tile)      # (2, N)

    # ---- packed parameters (fewer, larger input buffers) ----
    w1t = params['w1'].T                                          # (hid, c+1)
    w1p = jnp.concatenate([w1t[:, 1:], w1t[:, :1]], axis=1)       # x chans, then sim

    def taps(wk):                      # (3,3,Cin,Cout) -> (9, Cout, Cin)
        return jnp.transpose(wk, (0, 1, 3, 2)).reshape(9, wk.shape[3], wk.shape[2])

    wtaps = jnp.concatenate([taps(params['w2']), taps(params['w3']),
                             taps(params['w4'])], axis=0)          # (27, cout, cout)
    biases = jnp.stack([params['b1'].reshape(-1), params['b2'].reshape(-1),
                        params['b3'].reshape(-1), params['b4'].reshape(-1)],
                       axis=1)                                     # (cout, 4)
    head = jnp.concatenate([params['wfc'].T, params['bfc'].reshape(nc, 1)],
                           axis=1)                                 # (nc, cout+1)

    kern = functools.partial(caccm_kernel, canvas=_CANVAS, b_tile=b_tile,
                             hw_inv=1.0 / (h * w))

    full2 = lambda i: (0, 0)
    full3 = lambda i: (0, 0, 0)

    dens_can, score = pl.pallas_call(
        kern,
        out_shape=(jax.ShapeDtypeStruct((steps, cout, N), jnp.float32),
                   jax.ShapeDtypeStruct((b, nc, 1), jnp.float32)),
        grid=(steps,),
        in_specs=[
            pl.BlockSpec((1, b_tile, c), lambda i: (i, 0, 0)),   # mean text feat
            pl.BlockSpec((1, c, N), lambda i: (i, 0, 0)),        # lane-stacked x
            pl.BlockSpec((2, N), full2),                         # footprint masks
            pl.BlockSpec((hid, c + 1), full2),                   # 1x1 conv weight
            pl.BlockSpec((27, cout, cout), full3),               # conv2/3/4 taps
            pl.BlockSpec((cout, 4), full2),                      # b1..b4 packed
            pl.BlockSpec((nc, cout + 1), full2),                 # fc weight|bias
        ],
        out_specs=(
            pl.BlockSpec((1, cout, N), lambda i: (i, 0, 0)),     # density (canvas)
            pl.BlockSpec((b_tile, nc, 1), lambda i: (i, 0, 0)),  # class scores
        ),
        scratch_shapes=[pltpu.VMEM((c + 1, N), jnp.float32)],    # [x ; guide] slab
        compiler_params=pltpu.CompilerParams(dimension_semantics=("parallel",)),
    )(tm, xcan, masks, w1p, wtaps, biases, head)

    # TODO(synk): this crop is an extra XLA copy of the largest tensor in the
    # op; drop it if the downstream consumer can read the canvas layout.
    dens = dens_can.reshape(steps, cout, b_tile, _CANVAS, _CANVAS)
    dens = dens.transpose(0, 2, 1, 3, 4).reshape(b, cout, _CANVAS, _CANVAS)
    density = dens[:, :, _OFF:_OFF + h, _OFF:_OFF + w]
    return density, score[:, :, 0]


# --------------------------- parameters --------------------------------------

def init_params(key, in_channels, hidden_dim, out_dim, num_classes=4):
    ks = jax.random.split(key, 10)

    def rnd(k, shape, scale=0.1):
        return scale * jax.random.normal(k, shape, jnp.float32)

    return dict(
        w1=rnd(ks[0], (in_channels + 1, hidden_dim)),     # 1x1 conv (guide='cat')
        b1=rnd(ks[1], (1, hidden_dim)),
        w2=rnd(ks[2], (3, 3, hidden_dim, out_dim)),       # dil=1, pad=2
        b2=rnd(ks[3], (1, out_dim)),
        w3=rnd(ks[4], (3, 3, out_dim, out_dim)),          # dil=2, pad=2
        b3=rnd(ks[5], (1, out_dim)),
        w4=rnd(ks[6], (3, 3, out_dim, out_dim)),          # dil=3, pad=2
        b4=rnd(ks[7], (1, out_dim)),
        wfc=rnd(ks[8], (out_dim, num_classes)),           # fc of ClsHead
        bfc=rnd(ks[9], (1, num_classes)),
    )


# --------------------------- pure-JAX reference ------------------------------

def reference_forward(x_nchw, t, p):
    b, c, h, w = x_nchw.shape
    xf = x_nchw.reshape(b, c, h * w)
    s = jnp.einsum('blc,bcn->bln', t, xf)
    sim = s.mean(axis=1)
    mx = sim.max(axis=1, keepdims=True)
    mn = sim.min(axis=1, keepdims=True)
    sim = (sim - mn) / (mx - mn)
    sim_map = sim.reshape(b, 1, h, w)
    xc = jnp.concatenate([sim_map, x_nchw], axis=1)

    def conv(x, wk, bk, dilation, pad):
        out = lax.conv_general_dilated(
            x, wk, window_strides=(1, 1), padding=[(pad, pad), (pad, pad)],
            rhs_dilation=(dilation, dilation),
            dimension_numbers=('NCHW', 'HWIO', 'NCHW'))
        return out + bk.reshape(1, -1, 1, 1)

    y = conv(xc, p['w1'].reshape(1, 1, *p['w1'].shape), p['b1'], 1, 0)
    y = jnp.maximum(y, 0.0)
    y = conv(y, p['w2'], p['b2'], 1, 2)
    y = conv(y, p['w3'], p['b3'], 2, 2)
    y = conv(y, p['w4'], p['b4'], 3, 2)
    y = jnp.maximum(y, 0.0)
    pooled = y.mean(axis=(2, 3))
    score = pooled @ p['wfc'] + p['bfc'].reshape(1, -1)
    return y, score


# ------------------------------- main -----------------------------------------

if __name__ == "__main__":
    key = jax.random.PRNGKey(0)
    kx, kt, kp = jax.random.split(key, 3)

    b, c, h, w = 2, 4, 16, 16      # x: vision feature, NCHW
    L = 8                          # t: text feature, (b, L, c)
    hidden_dim = out_dim = 8       # module requires hidden_dim == out_dim

    x = jax.random.normal(kx, (b, c, h, w), jnp.float32)
    t = jax.random.normal(kt, (b, L, c), jnp.float32)
    params = init_params(kp, c, hidden_dim, out_dim, num_classes=4)

    density, score = jax.block_until_ready(caccm_forward(x, t, params))

    d_ref, s_ref = reference_forward(x, t, params)
    assert density.shape == (b, out_dim, h, w), density.shape
    assert score.shape == (b, 4), score.shape
    assert jnp.allclose(density, d_ref, atol=5e-4, rtol=5e-4)
    assert jnp.allclose(score, s_ref, atol=5e-4, rtol=5e-4)

    print("KERNEL_OK")
</pallas_src>

<mosaic_0001>
module attributes {stable_mosaic.version = 11 : i64} {
  func.func @caccm_kernel(%arg0: i32, %arg1: memref<1x2x4xf32, #tpu.memory_space<vmem>>, %arg2: memref<1x4x2048xf32, #tpu.memory_space<vmem>>, %arg3: memref<2x2048xf32, #tpu.memory_space<vmem>>, %arg4: memref<8x5xf32, #tpu.memory_space<vmem>>, %arg5: memref<27x8x8xf32, #tpu.memory_space<vmem>>, %arg6: memref<8x4xf32, #tpu.memory_space<vmem>>, %arg7: memref<4x9xf32, #tpu.memory_space<vmem>>, %arg8: memref<1x8x2048xf32, #tpu.memory_space<vmem>>, %arg9: memref<2x4x1xf32, #tpu.memory_space<vmem>>, %arg10: memref<5x2048xf32, #tpu.memory_space<vmem>>) attributes {dimension_semantics = [#tpu.dimension_semantics<parallel>], iteration_bounds = array<i64: 1>, scalar_prefetch = 0 : i64, scratch_operands = 1 : i64, tpu.core_type = #tpu.core_type<tc>, window_params = [{transform_indices = @transform_0, window_bounds = array<i64: 1, 2, 4>}, {transform_indices = @transform_1, window_bounds = array<i64: 1, 4, 2048>}, {pipeline_mode = #tpu.pipeline_mode<synchronous>, transform_indices = @transform_2, window_bounds = array<i64: 2, 2048>}, {pipeline_mode = #tpu.pipeline_mode<synchronous>, transform_indices = @transform_3, window_bounds = array<i64: 8, 5>}, {pipeline_mode = #tpu.pipeline_mode<synchronous>, transform_indices = @transform_4, window_bounds = array<i64: 27, 8, 8>}, {pipeline_mode = #tpu.pipeline_mode<synchronous>, transform_indices = @transform_5, window_bounds = array<i64: 8, 4>}, {pipeline_mode = #tpu.pipeline_mode<synchronous>, transform_indices = @transform_6, window_bounds = array<i64: 4, 9>}, {transform_indices = @transform_7, window_bounds = array<i64: 1, 8, 2048>}, {transform_indices = @transform_8, window_bounds = array<i64: 2, 4, 1>}]} {
    %c0 = arith.constant 0 : index
    %c0_0 = arith.constant 0 : index
    %0 = vector.load %arg3[%c0, %c0_0] : memref<2x2048xf32, #tpu.memory_space<vmem>>, vector<1x2048xf32>
    %cst = arith.constant 5.000000e-01 : f32
    %1 = vector.broadcast %cst : f32 to vector<1x2048xf32>
    %2 = arith.cmpf ogt, %0, %1 : vector<1x2048xf32>
    %c1 = arith.constant 1 : index
    %c0_1 = arith.constant 0 : index
    %3 = vector.load %arg3[%c1, %c0_1] : memref<2x2048xf32, #tpu.memory_space<vmem>>, vector<1x2048xf32>
    %cst_2 = arith.constant 5.000000e-01 : f32
    %4 = vector.broadcast %cst_2 : f32 to vector<1x2048xf32>
    %5 = arith.cmpf ogt, %3, %4 : vector<1x2048xf32>
    %c0_3 = arith.constant 0 : index
    %c0_4 = arith.constant 0 : index
    %c0_5 = arith.constant 0 : index
    %6 = vector.load %arg2[%c0_3, %c0_4, %c0_5] : memref<1x4x2048xf32, #tpu.memory_space<vmem>>, vector<1x4x2048xf32>
    %7 = vector.shape_cast %6 : vector<1x4x2048xf32> to vector<4x2048xf32>
    %c0_6 = arith.constant 0 : index
    %c0_7 = arith.constant 0 : index
    %8 = vector.load %arg10[%c0_6, %c0_7] : memref<5x2048xf32, #tpu.memory_space<vmem>>, vector<4x2048xf32>
    tpu.vector_store %arg10[%c0_6, %c0_7], %7 {strides = array<i32>} : memref<5x2048xf32, #tpu.memory_space<vmem>>, vector<4x2048xf32>,
    %c0_8 = arith.constant 0 : index
    %c0_9 = arith.constant 0 : index
    %c0_10 = arith.constant 0 : index
    %9 = vector.load %arg1[%c0_8, %c0_9, %c0_10] : memref<1x2x4xf32, #tpu.memory_space<vmem>>, vector<1x2x4xf32>
    %10 = vector.shape_cast %9 : vector<1x2x4xf32> to vector<2x4xf32>
    %11 = vector.extract_strided_slice %10 {offsets = [0, 0], sizes = [1, 4], strides = [1, 1]} : vector<2x4xf32> to vector<1x4xf32>
    %12 = vector.extract_strided_slice %7 {offsets = [0, 0], sizes = [4, 1024], strides = [1, 1]} : vector<4x2048xf32> to vector<4x1024xf32>
    %cst_11 = arith.constant dense<0.000000e+00> : vector<1x1024xf32>
    %13 = tpu.matmul %11, %12, %cst_11 {dimension_numbers = #tpu.dot_dimension_numbers<[1], [0], [0], [1], [0, 0, 1, 1], [], []>} : vector<1x4xf32>, vector<4x1024xf32>, vector<1x1024xf32> -> vector<1x1024xf32>
    %14 = vector.extract_strided_slice %2 {offsets = [0, 0], sizes = [1, 1024], strides = [1, 1]} : vector<1x2048xi1> to vector<1x1024xi1>
    %cst_12 = arith.constant -3.40282347E+38 : f32
    %15 = vector.broadcast %cst_12 : f32 to vector<1x1024xf32>
    %16 = arith.select %14, %13, %15 : vector<1x1024xi1>, vector<1x1024xf32>
    %cst_13 = arith.constant dense<0xFF800000> : vector<1xf32>
    %17 = vector.multi_reduction <maximumf>, %16, %cst_13 [1] : vector<1x1024xf32> to vector<1xf32>
    %18 = vector.shape_cast %17 : vector<1xf32> to vector<1x1xf32>
    %cst_14 = arith.constant 3.40282347E+38 : f32
    %19 = vector.broadcast %cst_14 : f32 to vector<1x1024xf32>
    %20 = arith.select %14, %13, %19 : vector<1x1024xi1>, vector<1x1024xf32>
    %cst_15 = arith.constant dense<0x7F800000> : vector<1xf32>
    %21 = vector.multi_reduction <minimumf>, %20, %cst_15 [1] : vector<1x1024xf32> to vector<1xf32>
    %22 = vector.shape_cast %21 : vector<1xf32> to vector<1x1xf32>
    %23 = vector.broadcast %22 : vector<1x1xf32> to vector<1x1024xf32>
    %24 = arith.subf %13, %23 : vector<1x1024xf32>
    %25 = arith.subf %18, %22 : vector<1x1xf32>
    %26 = tpu.reciprocal %25 : vector<1x1xf32> -> vector<1x1xf32>
    %27 = vector.broadcast %26 : vector<1x1xf32> to vector<1x1024xf32>
    %28 = arith.mulf %24, %27 : vector<1x1024xf32>
    %cst_16 = arith.constant 0.000000e+00 : f32
    %29 = vector.broadcast %cst_16 : f32 to vector<1x1024xf32>
    %30 = arith.select %14, %28, %29 : vector<1x1024xi1>, vector<1x1024xf32>
    %c4 = arith.constant 4 : index
    %c0_17 = arith.constant 0 : index
    %31 = vector.load %arg10[%c4, %c0_17] : memref<5x2048xf32, #tpu.memory_space<vmem>>, vector<1x1024xf32>
    tpu.vector_store %arg10[%c4, %c0_17], %30 {strides = array<i32>} : memref<5x2048xf32, #tpu.memory_space<vmem>>, vector<1x1024xf32>,
    %32 = vector.extract_strided_slice %10 {offsets = [1, 0], sizes = [1, 4], strides = [1, 1]} : vector<2x4xf32> to vector<1x4xf32>
    %33 = vector.extract_strided_slice %7 {offsets = [0, 1024], sizes = [4, 1024], strides = [1, 1]} : vector<4x2048xf32> to vector<4x1024xf32>
    %cst_18 = arith.constant dense<0.000000e+00> : vector<1x1024xf32>
    %34 = tpu.matmul %32, %33, %cst_18 {dimension_numbers = #tpu.dot_dimension_numbers<[1], [0], [0], [1], [0, 0, 1, 1], [], []>} : vector<1x4xf32>, vector<4x1024xf32>, vector<1x1024xf32> -> vector<1x1024xf32>
    %35 = vector.extract_strided_slice %2 {offsets = [0, 1024], sizes = [1, 1024], strides = [1, 1]} : vector<1x2048xi1> to vector<1x1024xi1>
    %cst_19 = arith.constant -3.40282347E+38 : f32
    %36 = vector.broadcast %cst_19 : f32 to vector<1x1024xf32>
    %37 = arith.select %35, %34, %36 : vector<1x1024xi1>, vector<1x1024xf32>
    %cst_20 = arith.constant dense<0xFF800000> : vector<1xf32>
    %38 = vector.multi_reduction <maximumf>, %37, %cst_20 [1] : vector<1x1024xf32> to vector<1xf32>
    %39 = vector.shape_cast %38 : vector<1xf32> to vector<1x1xf32>
    %cst_21 = arith.constant 3.40282347E+38 : f32
    %40 = vector.broadcast %cst_21 : f32 to vector<1x1024xf32>
    %41 = arith.select %35, %34, %40 : vector<1x1024xi1>, vector<1x1024xf32>
    %cst_22 = arith.constant dense<0x7F800000> : vector<1xf32>
    %42 = vector.multi_reduction <minimumf>, %41, %cst_22 [1] : vector<1x1024xf32> to vector<1xf32>
    %43 = vector.shape_cast %42 : vector<1xf32> to vector<1x1xf32>
    %44 = vector.broadcast %43 : vector<1x1xf32> to vector<1x1024xf32>
    %45 = arith.subf %34, %44 : vector<1x1024xf32>
    %46 = arith.subf %39, %43 : vector<1x1xf32>
    %47 = tpu.reciprocal %46 : vector<1x1xf32> -> vector<1x1xf32>
    %48 = vector.broadcast %47 : vector<1x1xf32> to vector<1x1024xf32>
    %49 = arith.mulf %45, %48 : vector<1x1024xf32>
    %cst_23 = arith.constant 0.000000e+00 : f32
    %50 = vector.broadcast %cst_23 : f32 to vector<1x1024xf32>
    %51 = arith.select %35, %49, %50 : vector<1x1024xi1>, vector<1x1024xf32>
    %c4_24 = arith.constant 4 : index
    %c1024 = arith.constant 1024 : index
    %52 = vector.load %arg10[%c4_24, %c1024] : memref<5x2048xf32, #tpu.memory_space<vmem>>, vector<1x1024xf32>
    tpu.vector_store %arg10[%c4_24, %c1024], %51 {strides = array<i32>} : memref<5x2048xf32, #tpu.memory_space<vmem>>, vector<1x1024xf32>,
    %c0_25 = arith.constant 0 : index
    %c0_26 = arith.constant 0 : index
    %53 = vector.load %arg6[%c0_25, %c0_26] : memref<8x4xf32, #tpu.memory_space<vmem>>, vector<8x4xf32>
    %c0_27 = arith.constant 0 : index
    %c0_28 = arith.constant 0 : index
    %54 = vector.load %arg4[%c0_27, %c0_28] : memref<8x5xf32, #tpu.memory_space<vmem>>, vector<8x5xf32>
    %c0_29 = arith.constant 0 : index
    %c0_30 = arith.constant 0 : index
    %55 = vector.load %arg10[%c0_29, %c0_30] : memref<5x2048xf32, #tpu.memory_space<vmem>>, vector<5x2048xf32>
    %cst_31 = arith.constant dense<0.000000e+00> : vector<8x2048xf32>
    %56 = tpu.matmul %54, %55, %cst_31 {dimension_numbers = #tpu.dot_dimension_numbers<[1], [0], [0], [1], [0, 0, 1, 1], [], []>} : vector<8x5xf32>, vector<5x2048xf32>, vector<8x2048xf32> -> vector<8x2048xf32>
    %57 = vector.extract_strided_slice %53 {offsets = [0, 0], sizes = [8, 1], strides = [1, 1]} : vector<8x4xf32> to vector<8x1xf32>
    %58 = vector.broadcast %57 : vector<8x1xf32> to vector<8x2048xf32>
    %59 = arith.addf %56, %58 : vector<8x2048xf32>
    %cst_32 = arith.constant 0.000000e+00 : f32
    %60 = vector.broadcast %cst_32 : f32 to vector<8x2048xf32>
    %61 = arith.maximumf %59, %60 : vector<8x2048xf32>
    %cst_33 = arith.constant 0.000000e+00 : f32
    %62 = vector.shape_cast %2 : vector<1x2048xi1> to vector<1x2048xi1>
    %63 = vector.broadcast %62 : vector<1x2048xi1> to vector<8x2048xi1>
    %64 = vector.broadcast %cst_33 : f32 to vector<8x2048xf32>
    %65 = arith.select %63, %61, %64 : vector<8x2048xi1>, vector<8x2048xf32>
    %cst_34 = arith.constant 0.000000e+00 : f32
    %66 = vector.broadcast %cst_34 : f32 to vector<8x2048xf32>
    %c33_i32 = arith.constant 33 : i32
    %67 = tpu.dynamic_rotate %65 by %c33_i32 dim 1 : vector<8x2048xf32>, i32 -> vector<8x2048xf32>
    %c0_35 = arith.constant 0 : index
    %c0_36 = arith.constant 0 : index
    %c0_37 = arith.constant 0 : index
    %68 = vector.load %arg5[%c0_35, %c0_36, %c0_37] : memref<27x8x8xf32, #tpu.memory_space<vmem>>, vector<1x8x8xf32>
    %69 = vector.shape_cast %68 : vector<1x8x8xf32> to vector<8x8xf32>
    %cst_38 = arith.constant dense<0.000000e+00> : vector<8x2048xf32>
    %70 = tpu.matmul %69, %67, %cst_38 {dimension_numbers = #tpu.dot_dimension_numbers<[1], [0], [0], [1], [0, 0, 1, 1], [], []>} : vector<8x8xf32>, vector<8x2048xf32>, vector<8x2048xf32> -> vector<8x2048xf32>
    %71 = arith.addf %66, %70 : vector<8x2048xf32>
    %c32_i32 = arith.constant 32 : i32
    %72 = tpu.dynamic_rotate %65 by %c32_i32 dim 1 : vector<8x2048xf32>, i32 -> vector<8x2048xf32>
    %c1_39 = arith.constant 1 : index
    %c0_40 = arith.constant 0 : index
    %c0_41 = arith.constant 0 : index
    %73 = vector.load %arg5[%c1_39, %c0_40, %c0_41] : memref<27x8x8xf32, #tpu.memory_space<vmem>>, vector<1x8x8xf32>
    %74 = vector.shape_cast %73 : vector<1x8x8xf32> to vector<8x8xf32>
    %cst_42 = arith.constant dense<0.000000e+00> : vector<8x2048xf32>
    %75 = tpu.matmul %74, %72, %cst_42 {dimension_numbers = #tpu.dot_dimension_numbers<[1], [0], [0], [1], [0, 0, 1, 1], [], []>} : vector<8x8xf32>, vector<8x2048xf32>, vector<8x2048xf32> -> vector<8x2048xf32>
    %76 = arith.addf %71, %75 : vector<8x2048xf32>
    %c31_i32 = arith.constant 31 : i32
    %77 = tpu.dynamic_rotate %65 by %c31_i32 dim 1 : vector<8x2048xf32>, i32 -> vector<8x2048xf32>
    %c2 = arith.constant 2 : index
    %c0_43 = arith.constant 0 : index
    %c0_44 = arith.constant 0 : index
    %78 = vector.load %arg5[%c2, %c0_43, %c0_44] : memref<27x8x8xf32, #tpu.memory_space<vmem>>, vector<1x8x8xf32>
    %79 = vector.shape_cast %78 : vector<1x8x8xf32> to vector<8x8xf32>
    %cst_45 = arith.constant dense<0.000000e+00> : vector<8x2048xf32>
    %80 = tpu.matmul %79, %77, %cst_45 {dimension_numbers = #tpu.dot_dimension_numbers<[1], [0], [0], [1], [0, 0, 1, 1], [], []>} : vector<8x8xf32>, vector<8x2048xf32>, vector<8x2048xf32> -> vector<8x2048xf32>
    %81 = arith.addf %76, %80 : vector<8x2048xf32>
    %c1_i32 = arith.constant 1 : i32
    %82 = tpu.dynamic_rotate %65 by %c1_i32 dim 1 : vector<8x2048xf32>, i32 -> vector<8x2048xf32>
    %c3 = arith.constant 3 : index
    %c0_46 = arith.constant 0 : index
    %c0_47 = arith.constant 0 : index
    %83 = vector.load %arg5[%c3, %c0_46, %c0_47] : memref<27x8x8xf32, #tpu.memory_space<vmem>>, vector<1x8x8xf32>
    %84 = vector.shape_cast %83 : vector<1x8x8xf32> to vector<8x8xf32>
    %cst_48 = arith.constant dense<0.000000e+00> : vector<8x2048xf32>
    %85 = tpu.matmul %84, %82, %cst_48 {dimension_numbers = #tpu.dot_dimension_numbers<[1], [0], [0], [1], [0, 0, 1, 1], [], []>} : vector<8x8xf32>, vector<8x2048xf32>, vector<8x2048xf32> -> vector<8x2048xf32>
    %86 = arith.addf %81, %85 : vector<8x2048xf32>
    %c4_49 = arith.constant 4 : index
    %c0_50 = arith.constant 0 : index
    %c0_51 = arith.constant 0 : index
    %87 = vector.load %arg5[%c4_49, %c0_50, %c0_51] : memref<27x8x8xf32, #tpu.memory_space<vmem>>, vector<1x8x8xf32>
    %88 = vector.shape_cast %87 : vector<1x8x8xf32> to vector<8x8xf32>
    %cst_52 = arith.constant dense<0.000000e+00> : vector<8x2048xf32>
    %89 = tpu.matmul %88, %65, %cst_52 {dimension_numbers = #tpu.dot_dimension_numbers<[1], [0], [0], [1], [0, 0, 1, 1], [], []>} : vector<8x8xf32>, vector<8x2048xf32>, vector<8x2048xf32> -> vector<8x2048xf32>
    %90 = arith.addf %86, %89 : vector<8x2048xf32>
    %c2047_i32 = arith.constant 2047 : i32
    %91 = tpu.dynamic_rotate %65 by %c2047_i32 dim 1 : vector<8x2048xf32>, i32 -> vector<8x2048xf32>
    %c5 = arith.constant 5 : index
    %c0_53 = arith.constant 0 : index
    %c0_54 = arith.constant 0 : index
    %92 = vector.load %arg5[%c5, %c0_53, %c0_54] : memref<27x8x8xf32, #tpu.memory_space<vmem>>, vector<1x8x8xf32>
    %93 = vector.shape_cast %92 : vector<1x8x8xf32> to vector<8x8xf32>
    %cst_55 = arith.constant dense<0.000000e+00> : vector<8x2048xf32>
    %94 = tpu.matmul %93, %91, %cst_55 {dimension_numbers = #tpu.dot_dimension_numbers<[1], [0], [0], [1], [0, 0, 1, 1], [], []>} : vector<8x8xf32>, vector<8x2048xf32>, vector<8x2048xf32> -> vector<8x2048xf32>
    %95 = arith.addf %90, %94 : vector<8x2048xf32>
    %c2017_i32 = arith.constant 2017 : i32
    %96 = tpu.dynamic_rotate %65 by %c2017_i32 dim 1 : vector<8x2048xf32>, i32 -> vector<8x2048xf32>
    %c6 = arith.constant 6 : index
    %c0_56 = arith.constant 0 : index
    %c0_57 = arith.constant 0 : index
    %97 = vector.load %arg5[%c6, %c0_56, %c0_57] : memref<27x8x8xf32, #tpu.memory_space<vmem>>, vector<1x8x8xf32>
    %98 = vector.shape_cast %97 : vector<1x8x8xf32> to vector<8x8xf32>
    %cst_58 = arith.constant dense<0.000000e+00> : vector<8x2048xf32>
    %99 = tpu.matmul %98, %96, %cst_58 {dimension_numbers = #tpu.dot_dimension_numbers<[1], [0], [0], [1], [0, 0, 1, 1], [], []>} : vector<8x8xf32>, vector<8x2048xf32>, vector<8x2048xf32> -> vector<8x2048xf32>
    %100 = arith.addf %95, %99 : vector<8x2048xf32>
    %c2016_i32 = arith.constant 2016 : i32
    %101 = tpu.dynamic_rotate %65 by %c2016_i32 dim 1 : vector<8x2048xf32>, i32 -> vector<8x2048xf32>
    %c7 = arith.constant 7 : index
    %c0_59 = arith.constant 0 : index
    %c0_60 = arith.constant 0 : index
    %102 = vector.load %arg5[%c7, %c0_59, %c0_60] : memref<27x8x8xf32, #tpu.memory_space<vmem>>, vector<1x8x8xf32>
    %103 = vector.shape_cast %102 : vector<1x8x8xf32> to vector<8x8xf32>
    %cst_61 = arith.constant dense<0.000000e+00> : vector<8x2048xf32>
    %104 = tpu.matmul %103, %101, %cst_61 {dimension_numbers = #tpu.dot_dimension_numbers<[1], [0], [0], [1], [0, 0, 1, 1], [], []>} : vector<8x8xf32>, vector<8x2048xf32>, vector<8x2048xf32> -> vector<8x2048xf32>
    %105 = arith.addf %100, %104 : vector<8x2048xf32>
    %c2015_i32 = arith.constant 2015 : i32
    %106 = tpu.dynamic_rotate %65 by %c2015_i32 dim 1 : vector<8x2048xf32>, i32 -> vector<8x2048xf32>
    %c8 = arith.constant 8 : index
    %c0_62 = arith.constant 0 : index
    %c0_63 = arith.constant 0 : index
    %107 = vector.load %arg5[%c8, %c0_62, %c0_63] : memref<27x8x8xf32, #tpu.memory_space<vmem>>, vector<1x8x8xf32>
    %108 = vector.shape_cast %107 : vector<1x8x8xf32> to vector<8x8xf32>
    %cst_64 = arith.constant dense<0.000000e+00> : vector<8x2048xf32>
    %109 = tpu.matmul %108, %106, %cst_64 {dimension_numbers = #tpu.dot_dimension_numbers<[1], [0], [0], [1], [0, 0, 1, 1], [], []>} : vector<8x8xf32>, vector<8x2048xf32>, vector<8x2048xf32> -> vector<8x2048xf32>
    %110 = arith.addf %105, %109 : vector<8x2048xf32>
    %111 = vector.extract_strided_slice %53 {offsets = [0, 1], sizes = [8, 1], strides = [1, 1]} : vector<8x4xf32> to vector<8x1xf32>
    %112 = vector.broadcast %111 : vector<8x1xf32> to vector<8x2048xf32>
    %113 = arith.addf %110, %112 : vector<8x2048xf32>
    %cst_65 = arith.constant 0.000000e+00 : f32
    %114 = vector.shape_cast %5 : vector<1x2048xi1> to vector<1x2048xi1>
    %115 = vector.broadcast %114 : vector<1x2048xi1> to vector<8x2048xi1>
    %116 = vector.broadcast %cst_65 : f32 to vector<8x2048xf32>
    %117 = arith.select %115, %113, %116 : vector<8x2048xi1>, vector<8x2048xf32>
    %cst_66 = arith.constant 0.000000e+00 : f32
    %118 = vector.broadcast %cst_66 : f32 to vector<8x2048xf32>
    %c66_i32 = arith.constant 66 : i32
    %119 = tpu.dynamic_rotate %117 by %c66_i32 dim 1 : vector<8x2048xf32>, i32 -> vector<8x2048xf32>
    %c9 = arith.constant 9 : index
    %c0_67 = arith.constant 0 : index
    %c0_68 = arith.constant 0 : index
    %120 = vector.load %arg5[%c9, %c0_67, %c0_68] : memref<27x8x8xf32, #tpu.memory_space<vmem>>, vector<1x8x8xf32>
    %121 = vector.shape_cast %120 : vector<1x8x8xf32> to vector<8x8xf32>
    %cst_69 = arith.constant dense<0.000000e+00> : vector<8x2048xf32>
    %122 = tpu.matmul %121, %119, %cst_69 {dimension_numbers = #tpu.dot_dimension_numbers<[1], [0], [0], [1], [0, 0, 1, 1], [], []>} : vector<8x8xf32>, vector<8x2048xf32>, vector<8x2048xf32> -> vector<8x2048xf32>
    %123 = arith.addf %118, %122 : vector<8x2048xf32>
    %c64_i32 = arith.constant 64 : i32
    %124 = tpu.dynamic_rotate %117 by %c64_i32 dim 1 : vector<8x2048xf32>, i32 -> vector<8x2048xf32>
    %c10 = arith.constant 10 : index
    %c0_70 = arith.constant 0 : index
    %c0_71 = arith.constant 0 : index
    %125 = vector.load %arg5[%c10, %c0_70, %c0_71] : memref<27x8x8xf32, #tpu.memory_space<vmem>>, vector<1x8x8xf32>
    %126 = vector.shape_cast %125 : vector<1x8x8xf32> to vector<8x8xf32>
    %cst_72 = arith.constant dense<0.000000e+00> : vector<8x2048xf32>
    %127 = tpu.matmul %126, %124, %cst_72 {dimension_numbers = #tpu.dot_dimension_numbers<[1], [0], [0], [1], [0, 0, 1, 1], [], []>} : vector<8x8xf32>, vector<8x2048xf32>, vector<8x2048xf32> -> vector<8x2048xf32>
    %128 = arith.addf %123, %127 : vector<8x2048xf32>
    %c62_i32 = arith.constant 62 : i32
    %129 = tpu.dynamic_rotate %117 by %c62_i32 dim 1 : vector<8x2048xf32>, i32 -> vector<8x2048xf32>
    %c11 = arith.constant 11 : index
    %c0_73 = arith.constant 0 : index
    %c0_74 = arith.constant 0 : index
    %130 = vector.load %arg5[%c11, %c0_73, %c0_74] : memref<27x8x8xf32, #tpu.memory_space<vmem>>, vector<1x8x8xf32>
    %131 = vector.shape_cast %130 : vector<1x8x8xf32> to vector<8x8xf32>
    %cst_75 = arith.constant dense<0.000000e+00> : vector<8x2048xf32>
    %132 = tpu.matmul %131, %129, %cst_75 {dimension_numbers = #tpu.dot_dimension_numbers<[1], [0], [0], [1], [0, 0, 1, 1], [], []>} : vector<8x8xf32>, vector<8x2048xf32>, vector<8x2048xf32> -> vector<8x2048xf32>
    %133 = arith.addf %128, %132 : vector<8x2048xf32>
    %c2_i32 = arith.constant 2 : i32
    %134 = tpu.dynamic_rotate %117 by %c2_i32 dim 1 : vector<8x2048xf32>, i32 -> vector<8x2048xf32>
    %c12 = arith.constant 12 : index
    %c0_76 = arith.constant 0 : index
    %c0_77 = arith.constant 0 : index
    %135 = vector.load %arg5[%c12, %c0_76, %c0_77] : memref<27x8x8xf32, #tpu.memory_space<vmem>>, vector<1x8x8xf32>
    %136 = vector.shape_cast %135 : vector<1x8x8xf32> to vector<8x8xf32>
    %cst_78 = arith.constant dense<0.000000e+00> : vector<8x2048xf32>
    %137 = tpu.matmul %136, %134, %cst_78 {dimension_numbers = #tpu.dot_dimension_numbers<[1], [0], [0], [1], [0, 0, 1, 1], [], []>} : vector<8x8xf32>, vector<8x2048xf32>, vector<8x2048xf32> -> vector<8x2048xf32>
    %138 = arith.addf %133, %137 : vector<8x2048xf32>
    %c13 = arith.constant 13 : index
    %c0_79 = arith.constant 0 : index
    %c0_80 = arith.constant 0 : index
    %139 = vector.load %arg5[%c13, %c0_79, %c0_80] : memref<27x8x8xf32, #tpu.memory_space<vmem>>, vector<1x8x8xf32>
    %140 = vector.shape_cast %139 : vector<1x8x8xf32> to vector<8x8xf32>
    %cst_81 = arith.constant dense<0.000000e+00> : vector<8x2048xf32>
    %141 = tpu.matmul %140, %117, %cst_81 {dimension_numbers = #tpu.dot_dimension_numbers<[1], [0], [0], [1], [0, 0, 1, 1], [], []>} : vector<8x8xf32>, vector<8x2048xf32>, vector<8x2048xf32> -> vector<8x2048xf32>
    %142 = arith.addf %138, %141 : vector<8x2048xf32>
    %c2046_i32 = arith.constant 2046 : i32
    %143 = tpu.dynamic_rotate %117 by %c2046_i32 dim 1 : vector<8x2048xf32>, i32 -> vector<8x2048xf32>
    %c14 = arith.constant 14 : index
    %c0_82 = arith.constant 0 : index
    %c0_83 = arith.constant 0 : index
    %144 = vector.load %arg5[%c14, %c0_82, %c0_83] : memref<27x8x8xf32, #tpu.memory_space<vmem>>, vector<1x8x8xf32>
    %145 = vector.shape_cast %144 : vector<1x8x8xf32> to vector<8x8xf32>
    %cst_84 = arith.constant dense<0.000000e+00> : vector<8x2048xf32>
    %146 = tpu.matmul %145, %143, %cst_84 {dimension_numbers = #tpu.dot_dimension_numbers<[1], [0], [0], [1], [0, 0, 1, 1], [], []>} : vector<8x8xf32>, vector<8x2048xf32>, vector<8x2048xf32> -> vector<8x2048xf32>
    %147 = arith.addf %142, %146 : vector<8x2048xf32>
    %c1986_i32 = arith.constant 1986 : i32
    %148 = tpu.dynamic_rotate %117 by %c1986_i32 dim 1 : vector<8x2048xf32>, i32 -> vector<8x2048xf32>
    %c15 = arith.constant 15 : index
    %c0_85 = arith.constant 0 : index
    %c0_86 = arith.constant 0 : index
    %149 = vector.load %arg5[%c15, %c0_85, %c0_86] : memref<27x8x8xf32, #tpu.memory_space<vmem>>, vector<1x8x8xf32>
    %150 = vector.shape_cast %149 : vector<1x8x8xf32> to vector<8x8xf32>
    %cst_87 = arith.constant dense<0.000000e+00> : vector<8x2048xf32>
    %151 = tpu.matmul %150, %148, %cst_87 {dimension_numbers = #tpu.dot_dimension_numbers<[1], [0], [0], [1], [0, 0, 1, 1], [], []>} : vector<8x8xf32>, vector<8x2048xf32>, vector<8x2048xf32> -> vector<8x2048xf32>
    %152 = arith.addf %147, %151 : vector<8x2048xf32>
    %c1984_i32 = arith.constant 1984 : i32
    %153 = tpu.dynamic_rotate %117 by %c1984_i32 dim 1 : vector<8x2048xf32>, i32 -> vector<8x2048xf32>
    %c16 = arith.constant 16 : index
    %c0_88 = arith.constant 0 : index
    %c0_89 = arith.constant 0 : index
    %154 = vector.load %arg5[%c16, %c0_88, %c0_89] : memref<27x8x8xf32, #tpu.memory_space<vmem>>, vector<1x8x8xf32>
    %155 = vector.shape_cast %154 : vector<1x8x8xf32> to vector<8x8xf32>
    %cst_90 = arith.constant dense<0.000000e+00> : vector<8x2048xf32>
    %156 = tpu.matmul %155, %153, %cst_90 {dimension_numbers = #tpu.dot_dimension_numbers<[1], [0], [0], [1], [0, 0, 1, 1], [], []>} : vector<8x8xf32>, vector<8x2048xf32>, vector<8x2048xf32> -> vector<8x2048xf32>
    %157 = arith.addf %152, %156 : vector<8x2048xf32>
    %c1982_i32 = arith.constant 1982 : i32
    %158 = tpu.dynamic_rotate %117 by %c1982_i32 dim 1 : vector<8x2048xf32>, i32 -> vector<8x2048xf32>
    %c17 = arith.constant 17 : index
    %c0_91 = arith.constant 0 : index
    %c0_92 = arith.constant 0 : index
    %159 = vector.load %arg5[%c17, %c0_91, %c0_92] : memref<27x8x8xf32, #tpu.memory_space<vmem>>, vector<1x8x8xf32>
    %160 = vector.shape_cast %159 : vector<1x8x8xf32> to vector<8x8xf32>
    %cst_93 = arith.constant dense<0.000000e+00> : vector<8x2048xf32>
    %161 = tpu.matmul %160, %158, %cst_93 {dimension_numbers = #tpu.dot_dimension_numbers<[1], [0], [0], [1], [0, 0, 1, 1], [], []>} : vector<8x8xf32>, vector<8x2048xf32>, vector<8x2048xf32> -> vector<8x2048xf32>
    %162 = arith.addf %157, %161 : vector<8x2048xf32>
    %163 = vector.extract_strided_slice %53 {offsets = [0, 2], sizes = [8, 1], strides = [1, 1]} : vector<8x4xf32> to vector<8x1xf32>
    %164 = vector.broadcast %163 : vector<8x1xf32> to vector<8x2048xf32>
    %165 = arith.addf %162, %164 : vector<8x2048xf32>
    %cst_94 = arith.constant 0.000000e+00 : f32
    %166 = vector.shape_cast %5 : vector<1x2048xi1> to vector<1x2048xi1>
    %167 = vector.broadcast %166 : vector<1x2048xi1> to vector<8x2048xi1>
    %168 = vector.broadcast %cst_94 : f32 to vector<8x2048xf32>
    %169 = arith.select %167, %165, %168 : vector<8x2048xi1>, vector<8x2048xf32>
    %cst_95 = arith.constant 0.000000e+00 : f32
    %170 = vector.broadcast %cst_95 : f32 to vector<8x2048xf32>
    %c99_i32 = arith.constant 99 : i32
    %171 = tpu.dynamic_rotate %169 by %c99_i32 dim 1 : vector<8x2048xf32>, i32 -> vector<8x2048xf32>
    %c18 = arith.constant 18 : index
    %c0_96 = arith.constant 0 : index
    %c0_97 = arith.constant 0 : index
    %172 = vector.load %arg5[%c18, %c0_96, %c0_97] : memref<27x8x8xf32, #tpu.memory_space<vmem>>, vector<1x8x8xf32>
    %173 = vector.shape_cast %172 : vector<1x8x8xf32> to vector<8x8xf32>
    %cst_98 = arith.constant dense<0.000000e+00> : vector<8x2048xf32>
    %174 = tpu.matmul %173, %171, %cst_98 {dimension_numbers = #tpu.dot_dimension_numbers<[1], [0], [0], [1], [0, 0, 1, 1], [], []>} : vector<8x8xf32>, vector<8x2048xf32>, vector<8x2048xf32> -> vector<8x2048xf32>
    %175 = arith.addf %170, %174 : vector<8x2048xf32>
    %c96_i32 = arith.constant 96 : i32
    %176 = tpu.dynamic_rotate %169 by %c96_i32 dim 1 : vector<8x2048xf32>, i32 -> vector<8x2048xf32>
    %c19 = arith.constant 19 : index
    %c0_99 = arith.constant 0 : index
    %c0_100 = arith.constant 0 : index
    %177 = vector.load %arg5[%c19, %c0_99, %c0_100] : memref<27x8x8xf32, #tpu.memory_space<vmem>>, vector<1x8x8xf32>
    %178 = vector.shape_cast %177 : vector<1x8x8xf32> to vector<8x8xf32>
    %cst_101 = arith.constant dense<0.000000e+00> : vector<8x2048xf32>
    %179 = tpu.matmul %178, %176, %cst_101 {dimension_numbers = #tpu.dot_dimension_numbers<[1], [0], [0], [1], [0, 0, 1, 1], [], []>} : vector<8x8xf32>, vector<8x2048xf32>, vector<8x2048xf32> -> vector<8x2048xf32>
    %180 = arith.addf %175, %179 : vector<8x2048xf32>
    %c93_i32 = arith.constant 93 : i32
    %181 = tpu.dynamic_rotate %169 by %c93_i32 dim 1 : vector<8x2048xf32>, i32 -> vector<8x2048xf32>
    %c20 = arith.constant 20 : index
    %c0_102 = arith.constant 0 : index
    %c0_103 = arith.constant 0 : index
    %182 = vector.load %arg5[%c20, %c0_102, %c0_103] : memref<27x8x8xf32, #tpu.memory_space<vmem>>, vector<1x8x8xf32>
    %183 = vector.shape_cast %182 : vector<1x8x8xf32> to vector<8x8xf32>
    %cst_104 = arith.constant dense<0.000000e+00> : vector<8x2048xf32>
    %184 = tpu.matmul %183, %181, %cst_104 {dimension_numbers = #tpu.dot_dimension_numbers<[1], [0], [0], [1], [0, 0, 1, 1], [], []>} : vector<8x8xf32>, vector<8x2048xf32>, vector<8x2048xf32> -> vector<8x2048xf32>
    %185 = arith.addf %180, %184 : vector<8x2048xf32>
    %c3_i32 = arith.constant 3 : i32
    %186 = tpu.dynamic_rotate %169 by %c3_i32 dim 1 : vector<8x2048xf32>, i32 -> vector<8x2048xf32>
    %c21 = arith.constant 21 : index
    %c0_105 = arith.constant 0 : index
    %c0_106 = arith.constant 0 : index
    %187 = vector.load %arg5[%c21, %c0_105, %c0_106] : memref<27x8x8xf32, #tpu.memory_space<vmem>>, vector<1x8x8xf32>
    %188 = vector.shape_cast %187 : vector<1x8x8xf32> to vector<8x8xf32>
    %cst_107 = arith.constant dense<0.000000e+00> : vector<8x2048xf32>
    %189 = tpu.matmul %188, %186, %cst_107 {dimension_numbers = #tpu.dot_dimension_numbers<[1], [0], [0], [1], [0, 0, 1, 1], [], []>} : vector<8x8xf32>, vector<8x2048xf32>, vector<8x2048xf32> -> vector<8x2048xf32>
    %190 = arith.addf %185, %189 : vector<8x2048xf32>
    %c22 = arith.constant 22 : index
    %c0_108 = arith.constant 0 : index
    %c0_109 = arith.constant 0 : index
    %191 = vector.load %arg5[%c22, %c0_108, %c0_109] : memref<27x8x8xf32, #tpu.memory_space<vmem>>, vector<1x8x8xf32>
    %192 = vector.shape_cast %191 : vector<1x8x8xf32> to vector<8x8xf32>
    %cst_110 = arith.constant dense<0.000000e+00> : vector<8x2048xf32>
    %193 = tpu.matmul %192, %169, %cst_110 {dimension_numbers = #tpu.dot_dimension_numbers<[1], [0], [0], [1], [0, 0, 1, 1], [], []>} : vector<8x8xf32>, vector<8x2048xf32>, vector<8x2048xf32> -> vector<8x2048xf32>
    %194 = arith.addf %190, %193 : vector<8x2048xf32>
    %c2045_i32 = arith.constant 2045 : i32
    %195 = tpu.dynamic_rotate %169 by %c2045_i32 dim 1 : vector<8x2048xf32>, i32 -> vector<8x2048xf32>
    %c23 = arith.constant 23 : index
    %c0_111 = arith.constant 0 : index
    %c0_112 = arith.constant 0 : index
    %196 = vector.load %arg5[%c23, %c0_111, %c0_112] : memref<27x8x8xf32, #tpu.memory_space<vmem>>, vector<1x8x8xf32>
    %197 = vector.shape_cast %196 : vector<1x8x8xf32> to vector<8x8xf32>
    %cst_113 = arith.constant dense<0.000000e+00> : vector<8x2048xf32>
    %198 = tpu.matmul %197, %195, %cst_113 {dimension_numbers = #tpu.dot_dimension_numbers<[1], [0], [0], [1], [0, 0, 1, 1], [], []>} : vector<8x8xf32>, vector<8x2048xf32>, vector<8x2048xf32> -> vector<8x2048xf32>
    %199 = arith.addf %194, %198 : vector<8x2048xf32>
    %c1955_i32 = arith.constant 1955 : i32
    %200 = tpu.dynamic_rotate %169 by %c1955_i32 dim 1 : vector<8x2048xf32>, i32 -> vector<8x2048xf32>
    %c24 = arith.constant 24 : index
    %c0_114 = arith.constant 0 : index
    %c0_115 = arith.constant 0 : index
    %201 = vector.load %arg5[%c24, %c0_114, %c0_115] : memref<27x8x8xf32, #tpu.memory_space<vmem>>, vector<1x8x8xf32>
    %202 = vector.shape_cast %201 : vector<1x8x8xf32> to vector<8x8xf32>
    %cst_116 = arith.constant dense<0.000000e+00> : vector<8x2048xf32>
    %203 = tpu.matmul %202, %200, %cst_116 {dimension_numbers = #tpu.dot_dimension_numbers<[1], [0], [0], [1], [0, 0, 1, 1], [], []>} : vector<8x8xf32>, vector<8x2048xf32>, vector<8x2048xf32> -> vector<8x2048xf32>
    %204 = arith.addf %199, %203 : vector<8x2048xf32>
    %c1952_i32 = arith.constant 1952 : i32
    %205 = tpu.dynamic_rotate %169 by %c1952_i32 dim 1 : vector<8x2048xf32>, i32 -> vector<8x2048xf32>
    %c25 = arith.constant 25 : index
    %c0_117 = arith.constant 0 : index
    %c0_118 = arith.constant 0 : index
    %206 = vector.load %arg5[%c25, %c0_117, %c0_118] : memref<27x8x8xf32, #tpu.memory_space<vmem>>, vector<1x8x8xf32>
    %207 = vector.shape_cast %206 : vector<1x8x8xf32> to vector<8x8xf32>
    %cst_119 = arith.constant dense<0.000000e+00> : vector<8x2048xf32>
    %208 = tpu.matmul %207, %205, %cst_119 {dimension_numbers = #tpu.dot_dimension_numbers<[1], [0], [0], [1], [0, 0, 1, 1], [], []>} : vector<8x8xf32>, vector<8x2048xf32>, vector<8x2048xf32> -> vector<8x2048xf32>
    %209 = arith.addf %204, %208 : vector<8x2048xf32>
    %c1949_i32 = arith.constant 1949 : i32
    %210 = tpu.dynamic_rotate %169 by %c1949_i32 dim 1 : vector<8x2048xf32>, i32 -> vector<8x2048xf32>
    %c26 = arith.constant 26 : index
    %c0_120 = arith.constant 0 : index
    %c0_121 = arith.constant 0 : index
    %211 = vector.load %arg5[%c26, %c0_120, %c0_121] : memref<27x8x8xf32, #tpu.memory_space<vmem>>, vector<1x8x8xf32>
    %212 = vector.shape_cast %211 : vector<1x8x8xf32> to vector<8x8xf32>
    %cst_122 = arith.constant dense<0.000000e+00> : vector<8x2048xf32>
    %213 = tpu.matmul %212, %210, %cst_122 {dimension_numbers = #tpu.dot_dimension_numbers<[1], [0], [0], [1], [0, 0, 1, 1], [], []>} : vector<8x8xf32>, vector<8x2048xf32>, vector<8x2048xf32> -> vector<8x2048xf32>
    %214 = arith.addf %209, %213 : vector<8x2048xf32>
    %215 = vector.extract_strided_slice %53 {offsets = [0, 3], sizes = [8, 1], strides = [1, 1]} : vector<8x4xf32> to vector<8x1xf32>
    %216 = vector.broadcast %215 : vector<8x1xf32> to vector<8x2048xf32>
    %217 = arith.addf %214, %216 : vector<8x2048xf32>
    %cst_123 = arith.constant 0.000000e+00 : f32
    %218 = vector.broadcast %cst_123 : f32 to vector<8x2048xf32>
    %219 = arith.maximumf %217, %218 : vector<8x2048xf32>
    %cst_124 = arith.constant 0.000000e+00 : f32
    %220 = vector.shape_cast %2 : vector<1x2048xi1> to vector<1x2048xi1>
    %221 = vector.broadcast %220 : vector<1x2048xi1> to vector<8x2048xi1>
    %222 = vector.broadcast %cst_124 : f32 to vector<8x2048xf32>
    %223 = arith.select %221, %219, %222 : vector<8x2048xi1>, vector<8x2048xf32>
    %c0_125 = arith.constant 0 : index
    %c0_126 = arith.constant 0 : index
    %c0_127 = arith.constant 0 : index
    %224 = vector.load %arg8[%c0_125, %c0_126, %c0_127] : memref<1x8x2048xf32, #tpu.memory_space<vmem>>, vector<1x8x2048xf32>
    %225 = vector.shape_cast %224 : vector<1x8x2048xf32> to vector<8x2048xf32>
    %226 = vector.shape_cast %223 : vector<8x2048xf32> to vector<1x8x2048xf32>
    tpu.vector_store %arg8[%c0_125, %c0_126, %c0_127], %226 {strides = array<i32>} : memref<1x8x2048xf32, #tpu.memory_space<vmem>>, vector<1x8x2048xf32>,
    %c0_128 = arith.constant 0 : index
    %c0_129 = arith.constant 0 : index
    %227 = vector.load %arg7[%c0_128, %c0_129] : memref<4x9xf32, #tpu.memory_space<vmem>>, vector<4x9xf32>
    %228 = vector.extract_strided_slice %223 {offsets = [0, 0], sizes = [8, 1024], strides = [1, 1]} : vector<8x2048xf32> to vector<8x1024xf32>
    %cst_130 = arith.constant dense<0.000000e+00> : vector<8xf32>
    %229 = vector.multi_reduction <add>, %228, %cst_130 [1] : vector<8x1024xf32> to vector<8xf32>
    %230 = vector.shape_cast %229 : vector<8xf32> to vector<8x1xf32>
    %cst_131 = arith.constant 3.906250e-03 : f32
    %231 = vector.broadcast %cst_131 : f32 to vector<8x1xf32>
    %232 = arith.mulf %230, %231 : vector<8x1xf32>
    %233 = vector.extract_strided_slice %227 {offsets = [0, 0], sizes = [4, 8], strides = [1, 1]} : vector<4x9xf32> to vector<4x8xf32>
    %cst_132 = arith.constant dense<0.000000e+00> : vector<4x1xf32>
    %234 = tpu.matmul %233, %232, %cst_132 {dimension_numbers = #tpu.dot_dimension_numbers<[1], [0], [0], [1], [0, 0, 1, 1], [], []>} : vector<4x8xf32>, vector<8x1xf32>, vector<4x1xf32> -> vector<4x1xf32>
    %235 = vector.extract_strided_slice %227 {offsets = [0, 8], sizes = [4, 1], strides = [1, 1]} : vector<4x9xf32> to vector<4x1xf32>
    %236 = arith.addf %234, %235 : vector<4x1xf32>
    %c0_133 = arith.constant 0 : index
    %c0_134 = arith.constant 0 : index
    %c0_135 = arith.constant 0 : index
    %237 = vector.load %arg9[%c0_133, %c0_134, %c0_135] : memref<2x4x1xf32, #tpu.memory_space<vmem>>, vector<1x4x1xf32>
    %238 = vector.shape_cast %237 : vector<1x4x1xf32> to vector<4x1xf32>
    %239 = vector.shape_cast %236 : vector<4x1xf32> to vector<1x4x1xf32>
    tpu.vector_store %arg9[%c0_133, %c0_134, %c0_135], %239 {strides = array<i32>} : memref<2x4x1xf32, #tpu.memory_space<vmem>>, vector<1x4x1xf32>,
    %240 = vector.extract_strided_slice %223 {offsets = [0, 1024], sizes = [8, 1024], strides = [1, 1]} : vector<8x2048xf32> to vector<8x1024xf32>
    %cst_136 = arith.constant dense<0.000000e+00> : vector<8xf32>
    %241 = vector.multi_reduction <add>, %240, %cst_136 [1] : vector<8x1024xf32> to vector<8xf32>
    %242 = vector.shape_cast %241 : vector<8xf32> to vector<8x1xf32>
    %cst_137 = arith.constant 3.906250e-03 : f32
    %243 = vector.broadcast %cst_137 : f32 to vector<8x1xf32>
    %244 = arith.mulf %242, %243 : vector<8x1xf32>
    %245 = vector.extract_strided_slice %227 {offsets = [0, 0], sizes = [4, 8], strides = [1, 1]} : vector<4x9xf32> to vector<4x8xf32>
    %cst_138 = arith.constant dense<0.000000e+00> : vector<4x1xf32>
    %246 = tpu.matmul %245, %244, %cst_138 {dimension_numbers = #tpu.dot_dimension_numbers<[1], [0], [0], [1], [0, 0, 1, 1], [], []>} : vector<4x8xf32>, vector<8x1xf32>, vector<4x1xf32> -> vector<4x1xf32>
    %247 = vector.extract_strided_slice %227 {offsets = [0, 8], sizes = [4, 1], strides = [1, 1]} : vector<4x9xf32> to vector<4x1xf32>
    %248 = arith.addf %246, %247 : vector<4x1xf32>
    %c1_139 = arith.constant 1 : index
    %c0_140 = arith.constant 0 : index
    %c0_141 = arith.constant 0 : index
    %249 = vector.load %arg9[%c1_139, %c0_140, %c0_141] : memref<2x4x1xf32, #tpu.memory_space<vmem>>, vector<1x4x1xf32>
    %250 = vector.shape_cast %249 : vector<1x4x1xf32> to vector<4x1xf32>
    %251 = vector.shape_cast %248 : vector<4x1xf32> to vector<1x4x1xf32>
    tpu.vector_store %arg9[%c1_139, %c0_140, %c0_141], %251 {strides = array<i32>} : memref<2x4x1xf32, #tpu.memory_space<vmem>>, vector<1x4x1xf32>,
    return
  }
  func.func @transform_0(%arg0: i32) -> (i32, i32, i32) {
    %c0_i32 = arith.constant 0 : i32
    %c0_i32_0 = arith.constant 0 : i32
    %c0_i32_1 = arith.constant 0 : i32
    return %arg0, %c0_i32, %c0_i32_0 : i32, i32, i32
  }
  func.func @transform_1(%arg0: i32) -> (i32, i32, i32) {
    %c0_i32 = arith.constant 0 : i32
    %c0_i32_0 = arith.constant 0 : i32
    %c0_i32_1 = arith.constant 0 : i32
    return %arg0, %c0_i32, %c0_i32_0 : i32, i32, i32
  }
  func.func @transform_2(%arg0: i32) -> (i32, i32) {
    %c0_i32 = arith.constant 0 : i32
    %c0_i32_0 = arith.constant 0 : i32
    %c0_i32_1 = arith.constant 0 : i32
    return %c0_i32, %c0_i32_0 : i32, i32
  }
  func.func @transform_3(%arg0: i32) -> (i32, i32) {
    %c0_i32 = arith.constant 0 : i32
    %c0_i32_0 = arith.constant 0 : i32
    %c0_i32_1 = arith.constant 0 : i32
    return %c0_i32, %c0_i32_0 : i32, i32
  }
  func.func @transform_4(%arg0: i32) -> (i32, i32, i32) {
    %c0_i32 = arith.constant 0 : i32
    %c0_i32_0 = arith.constant 0 : i32
    %c0_i32_1 = arith.constant 0 : i32
    %c0_i32_2 = arith.constant 0 : i32
    return %c0_i32, %c0_i32_0, %c0_i32_1 : i32, i32, i32
  }
  func.func @transform_5(%arg0: i32) -> (i32, i32) {
    %c0_i32 = arith.constant 0 : i32
    %c0_i32_0 = arith.constant 0 : i32
    %c0_i32_1 = arith.constant 0 : i32
    return %c0_i32, %c0_i32_0 : i32, i32
  }
  func.func @transform_6(%arg0: i32) -> (i32, i32) {
    %c0_i32 = arith.constant 0 : i32
    %c0_i32_0 = arith.constant 0 : i32
    %c0_i32_1 = arith.constant 0 : i32
    return %c0_i32, %c0_i32_0 : i32, i32
  }
  func.func @transform_7(%arg0: i32) -> (i32, i32, i32) {
    %c0_i32 = arith.constant 0 : i32
    %c0_i32_0 = arith.constant 0 : i32
    %c0_i32_1 = arith.constant 0 : i32
    return %arg0, %c0_i32, %c0_i32_0 : i32, i32, i32
  }
  func.func @transform_8(%arg0: i32) -> (i32, i32, i32) {
    %c0_i32 = arith.constant 0 : i32
    %c0_i32_0 = arith.constant 0 : i32
    %c0_i32_1 = arith.constant 0 : i32
    return %arg0, %c0_i32, %c0_i32_0 : i32, i32, i32
  }
}

</mosaic_0001>

<bundles_post_ra>
// kernel: tpu_custom_call.1
= control target key start
LH: loop header
LB: loop body
LE: loop exit
PB: predicated region body
PF: predicated region fallthrough
CT: control target
= control target key end

     0   :  { %s17846_s0 = inlined_call_operand.vmem [shape: f32[1,2,4], index: 0, kind: input, shape index: {}]   ;;  %s17847_s1 = inlined_call_operand.vmem [shape: f32[1,4,2048], index: 1, kind: input, shape index: {}]   ;;  %s17848_s2 = inlined_call_operand.vmem [shape: f32[2,2048], index: 2, kind: input, shape index: {}]   ;;  %s17849_s3 = inlined_call_operand.vmem [shape: f32[8,5], index: 3, kind: input, shape index: {}]   ;;  %s17850_s4 = inlined_call_operand.vmem [shape: f32[27,8,8], index: 4, kind: input, shape index: {}]   ;;  %s17851_s5 = inlined_call_operand.vmem [shape: f32[8,4], index: 5, kind: input, shape index: {}]   ;;  %s17852_s6 = inlined_call_operand.vmem [shape: f32[4,9], index: 6, kind: input, shape index: {}]   ;;  %s17853_s7 = inlined_call_operand.hbm [shape: f32[1,8,2048], index: 7, kind: output, shape index: {0}]   ;;  %s17854_s8 = inlined_call_operand.vmem [shape: f32[2,4,1], index: 8, kind: output, shape index: {1}]  }
   0x1   :  { %v41_v0 = vld [vmem:[%s17847_s1 + $0x8] sm:$0xff]  ;;  %v40_v1 = vld [vmem:[%s17847_s1] sm:$0xff]  ;;  %v43_v2 = vld [vmem:[%s17847_s1 + $0x18] sm:$0xff] }
   0x2   :  { %58 = vst [vmem:[#allocation1 + $0x10] ss:$2 sm:$0xff] %v41_v0  ;;  %v13217_v3 = vld [vmem:[%s17847_s1 + $0x10] sm:$0xff] }
   0x3   :  { %56 = vst [vmem:[#allocation1] ss:$2 sm:$0xff] %v40_v1 }
   0x4   :  { %62 = vst [vmem:[#allocation1 + $0x30] ss:$2 sm:$0xff] %v43_v2 }
   0x5   :  { %14 = vsyncpa [#allocation4], 0  ;;  %60 = vst [vmem:[#allocation1 + $0x20] ss:$2 sm:$0xff] %v13217_v3  ;;  %v45_v4 = vld [vmem:[%s17847_s1 + $0x28] sm:$0xff]  ;;  %v44_v7 = vld [vmem:[%s17847_s1 + $0x20] sm:$0xff] }
   0x6   :  { %v47_v11 = vld [vmem:[%s17847_s1 + $0x38] sm:$0xff]  ;;  %v13232_v17 = vld [vmem:[%s17846_s0] sm:$0x3]  ;;  %vm135_vm0 = vcmask 1043456   ;;  %vm131_vm1 = vcmask 31744   ;;  %v46_v25 = vld [vmem:[%s17847_s1 + $0x30] sm:$0xff] }
   0x7   :  { %v469_v31 = vrot.slane %v13232_v17, 1  ;;  %vm329_vm2 = vcmask 1042434   ;;  %vm335_vm3 = vcmask 1046534   ;;  %vm327_vm4 = vcmask 1040384   ;;  %v13303_v55 = vld [vmem:[%s17848_s2] ss:$2 sm:$0xff] }
   0x8   :  { %vm331_vm5 = vcmask 1041408   ;;  %vm333_vm6 = vcmask 1044484   ;;  %vm337_vm7 = vcmask 1045508   ;;  %vm32_vm8 = vcmp.gt.f32.partialorder %v13303_v55, 0.5  ;;  %s13137_s29 = smov 33   ;;  %s13138_s30 = smov 31  }
   0x9   :  { %v65_v5 = vld.sshfl [vmem:[#allocation1 + $0x10] sm:$0xff pattern:$0x75316420]  ;;  %v66_v6 = vld.sshfl [vmem:[#allocation1 + $0x18] sm:$0xff pattern:$0x75316420] }
   0xa   :  { %72 = vst [vmem:[#allocation1 + $0x10] ss:$2 sm:$0xff] %v45_v4  ;;  %v63_v8 = vld.sshfl [vmem:[#allocation1] sm:$0xff pattern:$0x75316420]  ;;  %v18014_v55 = vmov 0 }
   0xb   :  { %101 = vst [vmem:[#allocation2 + $0x10] sm:$0xf] %v65_v5  ;;  %v64_v9 = vld.sshfl [vmem:[#allocation1 + $0x8] sm:$0xff pattern:$0x75316420]  ;;  %s13139_s9 = smov 1  }
   0xc   :  { %102 = vst [vmem:[#allocation2 + $0x18] sm:$0xf] %v66_v6  ;;  %v69_v10 = vld.sshfl [vmem:[#allocation1 + $0x30] sm:$0xff pattern:$0x75316420]  ;;  %s13140_s10 = smov 127  }
   0xd   :  { %71 = vst [vmem:[#allocation1] ss:$2 sm:$0xff] %v44_v7  ;;  %v70_v12 = vld.sshfl [vmem:[#allocation1 + $0x38] sm:$0xff pattern:$0x75316420]  ;;  %s13141_s13 = smov 97  }
   0xe   :  { %99 = vst [vmem:[#allocation2] sm:$0xf] %v63_v8  ;;  %v67_v22 = vld.sshfl [vmem:[#allocation1 + $0x20] sm:$0xff pattern:$0x75316420]  ;;  %s13142_s14 = smov 96  }
   0xf   :  { %100 = vst [vmem:[#allocation2 + $0x8] sm:$0xf] %v64_v9  ;;  %v68_v26 = vld.sshfl [vmem:[#allocation1 + $0x28] sm:$0xff pattern:$0x75316420]  ;;  %s13143_s15 = smov 95  }
  0x10   :  { %74 = vst [vmem:[#allocation1 + $0x30] ss:$2 sm:$0xff] %v47_v11  ;;  %s13147_s16 = smov 62   ;;  %s13148_s17 = smov 2  }
  0x11   :  { %v77_v13 = vld.sshfl [vmem:[#allocation1 + $0x10] sm:$0xff pattern:$0x75316420]  ;;  %v78_v14 = vld.sshfl [vmem:[#allocation1 + $0x18] sm:$0xff pattern:$0x75316420] }
  0x12   :  { %118 = vst [vmem:[#allocation1 + $0x10] ss:$2 sm:$0xff] %v41_v0  ;;  %s13149_s18 = smov 126   ;;  %s13156_s1 = smov 29  }
  0x13   :  { %109 = vst [vmem:[#allocation2 + $0x50] sm:$0xf] %v77_v13 }
  0x14   :  { %110 = vst [vmem:[#allocation2 + $0x58] sm:$0xf] %v78_v14  ;;  %v75_v15 = vld.sshfl [vmem:[#allocation1] sm:$0xff pattern:$0x75316420] }
  0x15   :  { %v76_v16 = vld.sshfl [vmem:[#allocation1 + $0x8] sm:$0xff pattern:$0x75316420]  ;;  %107 = vst [vmem:[#allocation2 + $0x40] sm:$0xf] %v75_v15 }
  0x16   :  { %116 = vst [vmem:[#allocation1] ss:$2 sm:$0xff] %v40_v1 }
  0x17   :  { %108 = vst [vmem:[#allocation2 + $0x48] sm:$0xf] %v76_v16  ;;  %v81_v18 = vld.sshfl [vmem:[#allocation1 + $0x30] sm:$0xff pattern:$0x75316420] }
  0x18   :  { %v82_v19 = vld.sshfl [vmem:[#allocation1 + $0x38] sm:$0xff pattern:$0x75316420]  ;;  %105 = vst [vmem:[#allocation2 + $0x30] sm:$0xf] %v69_v10 }
  0x19   :  { %v125_v20 = vld.sshfl [vmem:[#allocation1 + $0x10] sm:$0xff pattern:$0x75316420]  ;;  %v126_v21 = vld.sshfl [vmem:[#allocation1 + $0x18] sm:$0xff pattern:$0x75316420] }
  0x1a   :  { %11688 = vmatpush.msk.msra.mxu2 %vm135_vm0, %v125_v20  ;;  %11690 = vmatpush.msk.msra.mxu3 %vm135_vm0, %v126_v21  ;;  %472 = vst [vmem:[#allocation1 + $0x10] ss:$2 sm:$0xff] %v45_v4 }
  0x1b   :  { %11689 = vmatmul.msk.f32.vlgmr.msra.gmra.mxu2 %vm131_vm1, %v13232_v17  ;;  %11691 = vmatmul.msk.f32.vlgmr.msra.gmra.mxu3 %vm131_vm1, %v13232_v17  ;;  %122 = vst [vmem:[#allocation1 + $0x30] ss:$2 sm:$0xff] %v43_v2 }
  0x1c   :  { %106 = vst [vmem:[#allocation2 + $0x38] sm:$0xf] %v70_v12 }
  0x1d   :  { %v124_v23 = vld.sshfl [vmem:[#allocation1 + $0x8] sm:$0xff pattern:$0x75316420]  ;;  %v123_v24 = vld.sshfl [vmem:[#allocation1] sm:$0xff pattern:$0x75316420] }
  0x1e   :  { %11686 = vmatpush.msk.msra.mxu1 %vm135_vm0, %v124_v23  ;;  %11684 = vmatpush.msk.msra.mxu0 %vm135_vm0, %v123_v24  ;;  %470 = vst [vmem:[#allocation1] ss:$2 sm:$0xff] %v44_v7 }
  0x1f   :  { %11687 = vmatmul.msk.f32.vlgmr.msra.gmra.mxu1 %vm131_vm1, %v13232_v17  ;;  %11685 = vmatmul.msk.f32.vlgmr.msra.gmra.mxu0 %vm131_vm1, %v13232_v17  ;;  %113 = vst [vmem:[#allocation2 + $0x70] sm:$0xf] %v81_v18 }
  0x20   :  { %114 = vst [vmem:[#allocation2 + $0x78] sm:$0xf] %v82_v19 }
  0x21   :  { %73 = vst [vmem:[#allocation1 + $0x20] ss:$2 sm:$0xff] %v46_v25  ;;  %v479_v27 = vld.sshfl [vmem:[#allocation1 + $0x10] sm:$0xff pattern:$0x75316420] }
  0x22   :  { %v129_v28 = vld.sshfl [vmem:[#allocation1 + $0x30] sm:$0xff pattern:$0x75316420]  ;;  %v130_v29 = vld.sshfl [vmem:[#allocation1 + $0x38] sm:$0xff pattern:$0x75316420] }
  0x23   :  { %11696 = vmatpush.msk.msrb.mxu2 %vm135_vm0, %v129_v28  ;;  %11698 = vmatpush.msk.msrb.mxu3 %vm135_vm0, %v130_v29  ;;  %476 = vst [vmem:[#allocation1 + $0x30] ss:$2 sm:$0xff] %v47_v11  ;;  %v480_v30 = vld.sshfl [vmem:[#allocation1 + $0x18] sm:$0xff pattern:$0x75316420] }
  0x24   :  { %11697 = vmatmul.msk.f32.vlgmr.msrb.gmra.mxu2 %vm131_vm1, %v13232_v17  ;;  %11699 = vmatmul.msk.f32.vlgmr.msrb.gmra.mxu3 %vm131_vm1, %v13232_v17  ;;  %103 = vst [vmem:[#allocation2 + $0x20] sm:$0xf] %v67_v22 }
  0x25   :  { %104 = vst [vmem:[#allocation2 + $0x28] sm:$0xf] %v68_v26  ;;  %11704 = vmatpush.msk.msra.mxu2 %vm135_vm0, %v479_v27  ;;  %11706 = vmatpush.msk.msra.mxu3 %vm135_vm0, %v480_v30  ;;  %v477_v36 = vld.sshfl [vmem:[#allocation1] sm:$0xff pattern:$0x75316420] }
  0x26   :  { %v478_v37 = vld.sshfl [vmem:[#allocation1 + $0x8] sm:$0xff pattern:$0x75316420] }
  0x28   :  { %v79_v32 = vld.sshfl [vmem:[#allocation1 + $0x20] sm:$0xff pattern:$0x75316420]  ;;  %v80_v33 = vld.sshfl [vmem:[#allocation1 + $0x28] sm:$0xff pattern:$0x75316420] }
  0x29   :  { %120 = vst [vmem:[#allocation1 + $0x20] ss:$2 sm:$0xff] %v13217_v3 }
  0x2a   :  { %111 = vst [vmem:[#allocation2 + $0x60] sm:$0xf] %v79_v32  ;;  %v483_v34 = vld.sshfl [vmem:[#allocation1 + $0x30] sm:$0xff pattern:$0x75316420] }
  0x2b   :  { %112 = vst [vmem:[#allocation2 + $0x68] sm:$0xf] %v80_v33  ;;  %11712 = vmatpush.msk.msrb.mxu2 %vm135_vm0, %v483_v34  ;;  %v484_v35 = vld.sshfl [vmem:[#allocation1 + $0x38] sm:$0xff pattern:$0x75316420] }
  0x2c   :  { %11705 = vmatmul.msk.f32.vlgmr.msra.gmra.mxu2 %vm131_vm1, %v469_v31  ;;  %11707 = vmatmul.msk.f32.vlgmr.msra.gmra.mxu3 %vm131_vm1, %v469_v31 }
  0x2d   :  { %11714 = vmatpush.msk.msrb.mxu3 %vm135_vm0, %v484_v35 }
  0x30   :  { %v127_v38 = vld.sshfl [vmem:[#allocation1 + $0x20] sm:$0xff pattern:$0x75316420]  ;;  %v128_v39 = vld.sshfl [vmem:[#allocation1 + $0x28] sm:$0xff pattern:$0x75316420] }
  0x31   :  { %11692 = vmatpush.msk.msrb.mxu0 %vm135_vm0, %v127_v38  ;;  %11694 = vmatpush.msk.msrb.mxu1 %vm135_vm0, %v128_v39  ;;  %474 = vst [vmem:[#allocation1 + $0x20] ss:$2 sm:$0xff] %v46_v25 }
  0x32   :  { %11693 = vmatmul.msk.f32.vlgmr.msrb.gmra.mxu0 %vm131_vm1, %v13232_v17  ;;  %11695 = vmatmul.msk.f32.vlgmr.msrb.gmra.mxu1 %vm131_vm1, %v13232_v17 }
  0x33   :  { %11700 = vmatpush.msk.msra.mxu0 %vm135_vm0, %v477_v36  ;;  %11702 = vmatpush.msk.msra.mxu1 %vm135_vm0, %v478_v37 }
  0x34   :  { %11713 = vmatmul.msk.f32.vlgmr.msrb.gmra.mxu2 %vm131_vm1, %v469_v31  ;;  %11715 = vmatmul.msk.f32.vlgmr.msrb.gmra.mxu3 %vm131_vm1, %v469_v31 }
  0x38   :  { %v481_v40 = vld.sshfl [vmem:[#allocation1 + $0x20] sm:$0xff pattern:$0x75316420]  ;;  %v482_v41 = vld.sshfl [vmem:[#allocation1 + $0x28] sm:$0xff pattern:$0x75316420] }
  0x39   :  { %11708 = vmatpush.msk.msrb.mxu0 %vm135_vm0, %v481_v40  ;;  %11710 = vmatpush.msk.msrb.mxu1 %vm135_vm0, %v482_v41 }
  0x3a   :  { %11701 = vmatmul.msk.f32.vlgmr.msra.gmra.mxu0 %vm131_vm1, %v469_v31  ;;  %11703 = vmatmul.msk.f32.vlgmr.msra.gmra.mxu1 %vm131_vm1, %v469_v31 }
  0x42   :  { %11709 = vmatmul.msk.f32.vlgmr.msrb.gmra.mxu0 %vm131_vm1, %v469_v31  ;;  %11711 = vmatmul.msk.f32.vlgmr.msrb.gmra.mxu1 %vm131_vm1, %v469_v31  ;;  %vm841_vm1 = vcmask 1044480  }
  0x9c   :  { %v13283_v44 = vpop.f32.mrf.mxu0  ;;  %v13285_v45 = vpop.f32.mrf.mxu1 }
  0x9d   :  { %v320_v52 = vrot.slane %v13285_v45, 7 }
  0x9e   :  { %v13279_v42 = vpop.f32.mrf.mxu2  ;;  %v13281_v43 = vpop.f32.mrf.mxu3 }
  0x9f   :  { %v321_v48 = vrot.slane %v13279_v42, 6  ;;  %v322_v49 = vrot.slane %v13281_v43, 5  ;;  %v328_v0 = vsel %vm327_vm4, %v13283_v44, %v320_v52 }
  0xa1   :  { %v330_v56 = vsel %vm329_vm2, %v321_v48, %v322_v49 }
  0xa2   :  { %v332_v2 = vsel %vm331_vm5, %v328_v0, %v330_v56 }
  0xa7   :  { %v13287_v46 = vpop.f32.mrf.mxu2  ;;  %v13289_v47 = vpop.f32.mrf.mxu3 }
  0xa8   :  { %v325_v50 = vrot.slane %v13287_v46, 2  ;;  %v326_v51 = vrot.slane %v13289_v47, 1 }
  0xaa   :  { %v336_v59 = vsel %vm335_vm3, %v325_v50, %v326_v51 }
  0xaf   :  { %v13296_v53 = vpop.f32.mrf.mxu0  ;;  %v13298_v54 = vpop.f32.mrf.mxu1 }
  0xb0   :  { %v323_v57 = vrot.slane %v13296_v53, 4  ;;  %v324_v58 = vrot.slane %v13298_v54, 3  ;;  %v13309_v60 = vpop.f32.mrf.mxu2  ;;  %v13311_v61 = vpop.f32.mrf.mxu3 }
  0xb1   :  { %v672_v62 = vrot.slane %v13309_v60, 6  ;;  %v673_v63 = vrot.slane %v13311_v61, 5 }
  0xb2   :  { %v334_v1 = vsel %vm333_vm6, %v323_v57, %v324_v58 }
  0xb3   :  { %v338_v3 = vsel %vm337_vm7, %v334_v1, %v336_v59  ;;  %v679_v7 = vsel %vm329_vm2, %v672_v62, %v673_v63  ;;  %v13358_v59 = vld [vmem:[%s17848_s2 + $0x10] ss:$2 sm:$0xff] }
  0xb4   :  { %v339_v4 = vsel %vm135_vm0, %v332_v2, %v338_v3  ;;  %vm33_vm9 = vcmp.gt.f32.partialorder %v13358_v59, 0.5 }
  0xb5   :  { %v341_v5 = vsel %vm32_vm8, %v339_v4, -3.4028235e+38  ;;  %v376_v6 = vsel %vm32_vm8, %v339_v4, 3.4028235e+38 }
  0xb6   :  { %v343_v8 = vperm.slane %v341_v5, 0  ;;  %v344_v9 = vperm.slane %v341_v5, 1  ;;  %v345_v10 = vperm.slane %v341_v5, 2  ;;  %v346_v11 = vperm.slane %v341_v5, 3 }
  0xb7   :  { %v13327_v12 = vpop.f32.mrf.mxu0  ;;  %v13329_v13 = vpop.f32.mrf.mxu1  ;;  %v347_v14 = vperm.slane %v341_v5, 4  ;;  %v348_v15 = vperm.slane %v341_v5, 5  ;;  %v349_v16 = vperm.slane %v341_v5, 6  ;;  %v350_v17 = vperm.slane %v341_v5, 7 }
  0xb8   :  { %v671_v18 = vrot.slane %v13329_v13, 7  ;;  %v13332_v19 = vpop.f32.mrf.mxu2  ;;  %v13334_v20 = vpop.f32.mrf.mxu3  ;;  %v359_v21 = vsel %vm327_vm4, %v343_v8, -inf  ;;  %v360_v22 = vsel %vm327_vm4, %v344_v9, -inf  ;;  %v361_v23 = vsel %vm327_vm4, %v345_v10, -inf }
  0xb9   :  { %v676_v24 = vrot.slane %v13332_v19, 2  ;;  %v677_v25 = vrot.slane %v13334_v20, 1  ;;  %v362_v26 = vsel %vm327_vm4, %v346_v11, -inf  ;;  %v363_v27 = vsel %vm327_vm4, %v347_v14, -inf }
  0xba   :  { %v678_v28 = vsel %vm327_vm4, %v13327_v12, %v671_v18  ;;  %v364_v29 = vmax.f32 %v359_v21, %v363_v27  ;;  %v365_v30 = vsel %vm327_vm4, %v348_v15, -inf  ;;  %v367_v31 = vsel %vm327_vm4, %v349_v16, -inf }
  0xbb   :  { %v680_v32 = vsel %vm331_vm5, %v678_v28, %v679_v7  ;;  %v682_v33 = vsel %vm335_vm3, %v676_v24, %v677_v25  ;;  %v366_v34 = vmax.f32 %v360_v22, %v365_v30  ;;  %v368_v35 = vmax.f32 %v361_v23, %v367_v31 }
  0xbc   :  { %v369_v36 = vsel %vm327_vm4, %v350_v17, -inf  ;;  %v378_v37 = vperm.slane %v376_v6, 0  ;;  %v379_v38 = vperm.slane %v376_v6, 1  ;;  %v380_v39 = vperm.slane %v376_v6, 2 }
  0xbd   :  { %v370_v40 = vmax.f32 %v362_v26, %v369_v36  ;;  %v371_v41 = vmax.f32 %v364_v29, %v366_v34  ;;  %v381_v48 = vperm.slane %v376_v6, 3  ;;  %v382_v49 = vperm.slane %v376_v6, 4 }
  0xbe   :  { %v383_v50 = vperm.slane %v376_v6, 5  ;;  %v384_v51 = vperm.slane %v376_v6, 6  ;;  %v385_v52 = vperm.slane %v376_v6, 7  ;;  %v394_v56 = vsel %vm327_vm4, %v378_v37, inf }
  0xbf   :  { %v13351_v57 = vpop.f32.mrf.mxu0  ;;  %v13353_v58 = vpop.f32.mrf.mxu1  ;;  %v372_v62 = vmax.f32 %v368_v35, %v370_v40  ;;  %v395_v63 = vsel %vm327_vm4, %v379_v38, inf  ;;  %v396_v0 = vsel %vm327_vm4, %v380_v39, inf  ;;  %v397_v1 = vsel %vm327_vm4, %v381_v48, inf }
  0xc0   :  { %v674_v2 = vrot.slane %v13351_v57, 4  ;;  %v675_v3 = vrot.slane %v13353_v58, 3  ;;  %v398_v4 = vsel %vm327_vm4, %v382_v49, inf  ;;  %v400_v5 = vsel %vm327_vm4, %v383_v50, inf }
  0xc1   :  { %v373_v6 = vmax.f32 %v371_v41, %v372_v62  ;;  %v399_v7 = vmin.f32 %v394_v56, %v398_v4  ;;  %v401_v8 = vmin.f32 %v395_v63, %v400_v5  ;;  %v402_v9 = vsel %vm327_vm4, %v384_v51, inf }
  0xc2   :  { %v681_v10 = vsel %vm333_vm6, %v674_v2, %v675_v3  ;;  %v403_v11 = vmin.f32 %v396_v0, %v402_v9  ;;  %v404_v14 = vsel %vm327_vm4, %v385_v52, inf }
  0xc3   :  { %v683_v15 = vsel %vm337_vm7, %v681_v10, %v682_v33  ;;  %374 = vmax.xlane.f32.xlu0 %v373_v6  ;;  %v405_v16 = vmin.f32 %v397_v1, %v404_v14  ;;  %v406_v17 = vmin.f32 %v399_v7, %v401_v8 }
  0xc4   :  { %v684_v18 = vsel %vm135_vm0, %v680_v32, %v683_v15 }
  0xc5   :  { %v686_v21 = vsel %vm33_vm9, %v684_v18, -3.4028235e+38  ;;  %v721_v22 = vsel %vm33_vm9, %v684_v18, 3.4028235e+38  ;;  %v407_v23 = vmin.f32 %v403_v11, %v405_v16 }
  0xc6   :  { %v688_v24 = vperm.slane %v686_v21, 0  ;;  %v689_v25 = vperm.slane %v686_v21, 1  ;;  %v690_v26 = vperm.slane %v686_v21, 2  ;;  %v691_v27 = vperm.slane %v686_v21, 3 }
  0xc7   :  { %v408_v28 = vmin.f32 %v406_v17, %v407_v23  ;;  %v692_v29 = vperm.slane %v686_v21, 4  ;;  %v693_v30 = vperm.slane %v686_v21, 5  ;;  %v694_v31 = vperm.slane %v686_v21, 6 }
  0xc8   :  { %v695_v33 = vperm.slane %v686_v21, 7  ;;  %v704_v34 = vsel %vm327_vm4, %v688_v24, -inf  ;;  %v705_v32 = vsel %vm327_vm4, %v689_v25, -inf  ;;  %v706_v35 = vsel %vm327_vm4, %v690_v26, -inf }
  0xc9   :  { %v707_v36 = vsel %vm327_vm4, %v691_v27, -inf  ;;  %v708_v37 = vsel %vm327_vm4, %v692_v29, -inf  ;;  %v710_v38 = vsel %vm327_vm4, %v693_v30, -inf  ;;  %v712_v39 = vsel %vm327_vm4, %v694_v31, -inf }
  0xca   :  { %v709_v40 = vmax.f32 %v704_v34, %v708_v37  ;;  %v711_v41 = vmax.f32 %v705_v32, %v710_v38  ;;  %v713_v48 = vmax.f32 %v706_v35, %v712_v39  ;;  %v714_v49 = vsel %vm327_vm4, %v695_v33, -inf }
  0xcb   :  { %409 = vmin.xlane.f32.xlu0 %v408_v28  ;;  %v715_v50 = vmax.f32 %v707_v36, %v714_v49  ;;  %v723_v51 = vperm.slane %v721_v22, 0  ;;  %v724_v52 = vperm.slane %v721_v22, 1  ;;  %v725_v56 = vperm.slane %v721_v22, 2 }
  0xcc   :  { %v716_v62 = vmax.f32 %v709_v40, %v711_v41  ;;  %v726_v63 = vperm.slane %v721_v22, 3  ;;  %v727_v0 = vperm.slane %v721_v22, 4  ;;  %v728_v1 = vperm.slane %v721_v22, 5 }
  0xcd   :  { %v717_v2 = vmax.f32 %v713_v48, %v715_v50  ;;  %v729_v3 = vperm.slane %v721_v22, 6  ;;  %v730_v4 = vperm.slane %v721_v22, 7  ;;  %v739_v5 = vsel %vm327_vm4, %v723_v51, inf }
  0xce   :  { %v740_v6 = vsel %vm327_vm4, %v724_v52, inf  ;;  %v741_v7 = vsel %vm327_vm4, %v725_v56, inf  ;;  %v742_v8 = vsel %vm327_vm4, %v726_v63, inf  ;;  %v743_v9 = vsel %vm327_vm4, %v727_v0, inf }
  0xcf   :  { %v718_v10 = vmax.f32 %v716_v62, %v717_v2  ;;  %v744_v11 = vmin.f32 %v739_v5, %v743_v9  ;;  %v745_v14 = vsel %vm327_vm4, %v728_v1, inf  ;;  %v747_v15 = vsel %vm327_vm4, %v729_v3, inf }
  0xd0   :  { %v746_v16 = vmin.f32 %v740_v6, %v745_v14  ;;  %v748_v17 = vmin.f32 %v741_v7, %v747_v15  ;;  %v749_v18 = vsel %vm327_vm4, %v730_v4, inf }
  0xd1   :  { %719 = vmax.xlane.f32.xlu1 %v718_v10  ;;  %v750_v21 = vmin.f32 %v742_v8, %v749_v18 }
  0xd2   :  { %v751_v22 = vmin.f32 %v744_v11, %v746_v16 }
  0xd3   :  { %v752_v23 = vmin.f32 %v748_v17, %v750_v21 }
  0xd5   :  { %v753_v24 = vmin.f32 %v751_v22, %v752_v23 }
  0xd9   :  { %754 = vmin.xlane.f32.xlu1 %v753_v24 }
 0x136   :  { %v375_v25 = vpop.xlane.xlu0 %374 }
 0x13e   :  { %v410_v26 = vpop.xlane.xlu0 %409 }
 0x13f   :  { %v419_v27 = vsub.f32 %v375_v25, %v410_v26  ;;  %v412_v38 = vsub.f32 %v13285_v45, %v410_v26  ;;  %v413_v39 = vsub.f32 %v13279_v42, %v410_v26  ;;  %v414_v41 = vsub.f32 %v13281_v43, %v410_v26 }
 0x140   :  { %v415_v48 = vsub.f32 %v13296_v53, %v410_v26  ;;  %v416_v50 = vsub.f32 %v13298_v54, %v410_v26  ;;  %v417_v51 = vsub.f32 %v13287_v46, %v410_v26  ;;  %v418_v52 = vsub.f32 %v13289_v47, %v410_v26 }
 0x141   :  { %13102 = vrcp.f32 %v419_v27  ;;  %v431_v34 = vand.u32 2147483648, %v419_v27  ;;  %v429_v35 = vand.u32 2147483647, %v419_v27  ;;  %vm425_vm11 = vweird.f32 %v419_v27 }
 0x142   :  { %v411_v45 = vsub.f32 %v13283_v44, %v410_v26 }
 0x143   :  { %v432_v40 = vor.u32 1.1754944e-38, %v431_v34  ;;  %vm430_vm13 = vcmp.eq.f32.partialorder %v429_v35, 8.507059e+37 }
 0x144   :  { %v720_v28 = vpop.xlane.xlu1 %719 }
 0x147   :  { %v13103_v29 = vpop.eup %13102 }
 0x148   :  { %v421_v30 = vmul.f32 %v13103_v29, %v419_v27  ;;  %vm426_vm10 = vweird.f32 %v13103_v29 }
 0x149   :  { %vm427_vm12 = vmor %vm425_vm11, %vm426_vm10  ;;  %vm837_vm10 = vcmask 39936  }
 0x14a   :  { %v422_v31 = vsub.f32 1.0, %v421_v30 }
 0x14c   :  { %v13393_v33 = vpop.xlane.xlu1 %754  ;;  %v423_v32 = vmul.f32 %v13103_v29, %v422_v31 }
 0x14d   :  { %v764_v36 = vsub.f32 %v720_v28, %v13393_v33  ;;  %v757_v25 = vsub.f32 %v13329_v13, %v13393_v33  ;;  %v758_v26 = vsub.f32 %v13309_v60, %v13393_v33  ;;  %v759_v27 = vsub.f32 %v13311_v61, %v13393_v33  ;;  %v814_v61 = vld [vmem:[%s17851_s5] sm:$0xff] }
 0x14e   :  { %v424_v37 = vadd.f32 %v13103_v29, %v423_v32  ;;  %v761_v30 = vsub.f32 %v13353_v58, %v13393_v33  ;;  %v762_v34 = vsub.f32 %v13332_v19, %v13393_v33  ;;  %v763_v13 = vsub.f32 %v13334_v20, %v13393_v33  ;;  %v13436_v20 = vld [vmem:[%s17849_s3] sm:$0xff]  ;;  %s13136_s3 = smov 32  }
 0x14f   :  { %13104 = vrcp.f32 %v764_v36  ;;  %v776_v17 = vand.u32 2147483648, %v764_v36  ;;  %v774_v22 = vand.u32 2147483647, %v764_v36  ;;  %vm770_vm15 = vweird.f32 %v764_v36 }
 0x150   :  { %v428_v49 = vsel %vm427_vm12, %v13103_v29, %v424_v37  ;;  %v760_v29 = vsub.f32 %v13351_v57, %v13393_v33  ;;  %v756_v32 = vsub.f32 %v13327_v12, %v13393_v33  ;;  %v17855_v58 = vmov 0  }
 0x151   :  { %v433_v56 = vsel %vm430_vm13, %v432_v40, %v428_v49  ;;  %v777_v28 = vor.u32 1.1754944e-38, %v776_v17  ;;  %vm775_vm12 = vcmp.eq.f32.partialorder %v774_v22, 8.507059e+37  ;;  %12282 = vset.pattern.permute.xlu2 %v17855_v58 }
 0x152   :  { %v435_v62 = vmul.f32 %v433_v56, %v412_v38  ;;  %v436_v42 = vmul.f32 %v433_v56, %v413_v39  ;;  %v437_v63 = vmul.f32 %v433_v56, %v414_v41  ;;  %v438_v0 = vmul.f32 %v433_v56, %v415_v48  ;;  %834 = vperm.xlu2 %12282, %v814_v61  }
 0x153   :  { %v439_v1 = vmul.f32 %v433_v56, %v416_v50  ;;  %v440_v2 = vmul.f32 %v433_v56, %v417_v51  ;;  %v441_v43 = vmul.f32 %v433_v56, %v418_v52  ;;  %v434_v3 = vmul.f32 %v433_v56, %v411_v45 }
 0x154   :  { %v450_v53 = vrot.slane %v435_v62, 7  ;;  %v451_v4 = vrot.slane %v436_v42, 6  ;;  %v452_v5 = vrot.slane %v437_v63, 5  ;;  %v453_v54 = vrot.slane %v438_v0, 4 }
 0x155   :  { %v13105_v6 = vpop.eup %13104  ;;  %v454_v7 = vrot.slane %v439_v1, 3  ;;  %v455_v46 = vrot.slane %v440_v2, 2  ;;  %v456_v8 = vrot.slane %v441_v43, 1 }
 0x156   :  { %v457_v47 = vsel %vm327_vm4, %v434_v3, %v450_v53  ;;  %v458_v44 = vsel %vm329_vm2, %v451_v4, %v452_v5  ;;  %v766_v9 = vmul.f32 %v13105_v6, %v764_v36  ;;  %vm771_vm14 = vweird.f32 %v13105_v6 }
 0x157   :  { %v459_v10 = vsel %vm331_vm5, %v457_v47, %v458_v44  ;;  %v460_v11 = vsel %vm333_vm6, %v453_v54, %v454_v7  ;;  %v461_v14 = vsel %vm335_vm3, %v455_v46, %v456_v8  ;;  %vm772_vm11 = vmor %vm770_vm15, %vm771_vm14 }
 0x158   :  { %v462_v15 = vsel %vm337_vm7, %v460_v11, %v461_v14  ;;  %v767_v16 = vsub.f32 1.0, %v766_v9 }
 0x159   :  { %v463_v18 = vsel %vm135_vm0, %v459_v10, %v462_v15  ;;  %v1226_v15 = vsel %vm32_vm8, 1, %v17855_v58 }
 0x15a   :  { %v768_v21 = vmul.f32 %v13105_v6, %v767_v16  ;;  %v465_v23 = vsel %vm32_vm8, %v463_v18, 0.0  ;;  %v1228_v18 = vperm.slane %v1226_v15, 0  ;;  %v1229_v22 = vperm.slane %v1226_v15, 1 }
 0x15b   :  { %467 = vst [vmem:[#allocation2 + $0x4] ss:$8 sm:$0xf] %v465_v23 }
 0x15c   :  { %v769_v24 = vadd.f32 %v13105_v6, %v768_v21  ;;  %468 = vst [vmem:[#allocation2 + $0x4] ss:$8 sm:$0xf0] %v465_v23 }
 0x15e   :  { %v773_v31 = vsel %vm772_vm11, %v13105_v6, %v769_v24  ;;  %v1230_v24 = vperm.slane %v1226_v15, 2 }
 0x15f   :  { %v778_v60 = vsel %vm775_vm12, %v777_v28, %v773_v31 }
 0x160   :  { %v780_v57 = vmul.f32 %v778_v60, %v757_v25  ;;  %v781_v35 = vmul.f32 %v778_v60, %v758_v26  ;;  %v782_v36 = vmul.f32 %v778_v60, %v759_v27  ;;  %v783_v37 = vmul.f32 %v778_v60, %v760_v29 }
 0x161   :  { %v784_v38 = vmul.f32 %v778_v60, %v761_v30  ;;  %v785_v19 = vmul.f32 %v778_v60, %v762_v34  ;;  %v786_v39 = vmul.f32 %v778_v60, %v763_v13  ;;  %v779_v40 = vmul.f32 %v778_v60, %v756_v32 }
 0x162   :  { %v795_v41 = vrot.slane %v780_v57, 7  ;;  %v796_v48 = vrot.slane %v781_v35, 6  ;;  %v797_v12 = vrot.slane %v782_v36, 5  ;;  %v816_v33 = vld [vmem:[#allocation2] sm:$0x1f]  ;;  %v798_v49 = vrot.slane %v783_v37, 4 }
 0x163   :  { %v799_v50 = vrot.slane %v784_v38, 3  ;;  %v800_v51 = vrot.slane %v785_v19, 2  ;;  %v801_v52 = vrot.slane %v786_v39, 1  ;;  %11716 = vmatpush.msk.msra.mxu0 %vm841_vm1, %v816_v33  ;;  %v817_v56 = vld [vmem:[#allocation2 + $0x8] sm:$0x1f]  ;;  %v1231_v25 = vperm.slane %v1226_v15, 3 }
 0x164   :  { %v802_v45 = vsel %vm327_vm4, %v779_v40, %v795_v41  ;;  %v803_v62 = vsel %vm329_vm2, %v796_v48, %v797_v12  ;;  %11718 = vmatpush.msk.msra.mxu1 %vm841_vm1, %v817_v56  ;;  %v818_v42 = vld [vmem:[#allocation2 + $0x10] sm:$0x1f]  ;;  %v819_v63 = vld [vmem:[#allocation2 + $0x18] sm:$0x1f]  ;;  %11717 = vmatmul.msk.f32.vlgmr.msra.gmra.mxu0 %vm837_vm10, %v13436_v20  ;;  %v820_v0 = vld [vmem:[#allocation2 + $0x20] sm:$0x1f] }
 0x165   :  { %v804_v1 = vsel %vm331_vm5, %v802_v45, %v803_v62  ;;  %v805_v2 = vsel %vm333_vm6, %v798_v49, %v799_v50  ;;  %v806_v43 = vsel %vm335_vm3, %v800_v51, %v801_v52  ;;  %11720 = vmatpush.msk.msra.mxu2 %vm841_vm1, %v818_v42  ;;  %11722 = vmatpush.msk.msra.mxu3 %vm841_vm1, %v819_v63  ;;  %v821_v3 = vld [vmem:[#allocation2 + $0x28] sm:$0x1f]  ;;  %v822_v53 = vld [vmem:[#allocation2 + $0x30] sm:$0x1f]  ;;  %v823_v5 = vld [vmem:[#allocation2 + $0x38] sm:$0x1f] }
 0x166   :  { %v807_v4 = vsel %vm337_vm7, %v805_v2, %v806_v43  ;;  %11719 = vmatmul.msk.f32.vlgmr.msra.gmra.mxu1 %vm837_vm10, %v13436_v20  ;;  %11721 = vmatmul.msk.f32.vlgmr.msra.gmra.mxu2 %vm837_vm10, %v13436_v20  ;;  %v1232_v26 = vperm.slane %v1226_v15, 4  ;;  %v13509_v27 = vsel %vm33_vm9, 1, %v17855_v58  ;;  %v1233_v30 = vperm.slane %v1226_v15, 5 }
 0x167   :  { %11723 = vmatmul.msk.f32.vlgmr.msra.gmra.mxu3 %vm837_vm10, %v13436_v20  ;;  %11724 = vmatpush.msk.msrb.mxu0 %vm841_vm1, %v820_v0  ;;  %v808_v6 = vsel %vm135_vm0, %v804_v1, %v807_v4  ;;  %vm13511_vm0 = vcmp.eq.s32.totalorder %v1228_v18, 1  ;;  %vm13516_vm2 = vcmp.eq.s32.totalorder %v1229_v22, 1  ;;  %v18017_v34 = vmov 0 }
 0x168   :  { %11726 = vmatpush.msk.msrb.mxu1 %vm841_vm1, %v821_v3  ;;  %11728 = vmatpush.msk.msrb.mxu2 %vm841_vm1, %v822_v53  ;;  %v810_v54 = vsel %vm33_vm9, %v808_v6, 0.0  ;;  %v18015_v55 = vsel %vm13511_vm0, 4294967295, %v18014_v55  ;;  %v18018_v34 = vsel %vm13516_vm2, 4294967295, %v18017_v34  ;;  %vm13527_vm3 = vcmp.eq.s32.totalorder %v1230_v24, 1 }
 0x169   :  { %11730 = vmatpush.msk.msrb.mxu3 %vm841_vm1, %v823_v5  ;;  %812 = vst [vmem:[#allocation2 + $0x44] ss:$8 sm:$0xf] %v810_v54  ;;  %v18020_v32 = vmov 0  ;;  %vm13534_vm4 = vcmp.eq.s32.totalorder %v1231_v25, 1  ;;  %v18023_v35 = vmov 0 }
 0x16a   :  { %813 = vst [vmem:[#allocation2 + $0x44] ss:$8 sm:$0xf0] %v810_v54  ;;  %v18021_v32 = vsel %vm13527_vm3, 4294967295, %v18020_v32  ;;  %v18024_v35 = vsel %vm13534_vm4, 4294967295, %v18023_v35  ;;  %vm13540_vm5 = vcmp.eq.s32.totalorder %v1232_v26, 1 }
 0x16b   :  { %18016 = vst [vmem:[#allocation6_spill] sm:$0xff] %v18015_v55  ;;  %v18026_v19 = vmov 0  ;;  %vm13548_vm6 = vcmp.eq.s32.totalorder %v1233_v30, 1  ;;  %v18029_v40 = vmov 0  ;;  %v1234_v41 = vperm.slane %v1226_v15, 6 }
 0x16c   :  { %11725 = vmatmul.msk.f32.vlgmr.msrb.gmra.mxu0 %vm837_vm10, %v13436_v20  ;;  %18019 = vst [vmem:[#allocation7_spill] sm:$0xff] %v18018_v34  ;;  %v18027_v19 = vsel %vm13540_vm5, 4294967295, %v18026_v19  ;;  %v18030_v40 = vsel %vm13548_vm6, 4294967295, %v18029_v40  ;;  %v1236_v49 = vperm.slane %v13509_v27, 0  ;;  %v1235_v62 = vperm.slane %v1226_v15, 7 }
 0x16d   :  { %18022 = vst [vmem:[#allocation8_spill] sm:$0xff] %v18021_v32  ;;  %vm13587_vm7 = vcmp.eq.s32.totalorder %v1234_v41, 1  ;;  %v18032_v63 = vmov 0  ;;  %v18035_v6 = vmov 0  ;;  %v1239_v18 = vperm.slane %v13509_v27, 3 }
 0x16e   :  { %11727 = vmatmul.msk.f32.vlgmr.msrb.gmra.mxu1 %vm837_vm10, %v13436_v20  ;;  %11729 = vmatmul.msk.f32.vlgmr.msrb.gmra.mxu2 %vm837_vm10, %v13436_v20  ;;  %18025 = vst [vmem:[#allocation9_spill] sm:$0xff] %v18024_v35  ;;  %v18033_v63 = vsel %vm13587_vm7, 4294967295, %v18032_v63  ;;  %vm13610_vm8 = vcmp.eq.s32.totalorder %v1236_v49, 1  ;;  %vm13617_vm9 = vcmp.eq.s32.totalorder %v1235_v62, 1  ;;  %v1240_v24 = vperm.slane %v13509_v27, 4 }
 0x16f   :  { %11731 = vmatmul.msk.f32.vlgmr.msrb.gmra.mxu3 %vm837_vm10, %v13436_v20  ;;  %18028 = vst [vmem:[#allocation10_spill] sm:$0xff] %v18027_v19  ;;  %v18036_v6 = vsel %vm13610_vm8, 4294967295, %v18035_v6  ;;  %v18041_v41 = vmov 0  ;;  %vm13674_vm15 = vcmp.eq.s32.totalorder %v1239_v18, 1  ;;  %v18047_v62 = vmov 0 }
 0x170   :  { %v824_v7 = vld [vmem:[#allocation2 + $0x40] sm:$0x1f]  ;;  %v825_v46 = vld [vmem:[#allocation2 + $0x48] sm:$0x1f]  ;;  %v826_v8 = vld [vmem:[#allocation2 + $0x50] sm:$0x1f] }
 0x171   :  { %11732 = vmatpush.msk.msra.mxu0 %vm841_vm1, %v824_v7  ;;  %11734 = vmatpush.msk.msra.mxu1 %vm841_vm1, %v825_v46  ;;  %v827_v47 = vld [vmem:[#allocation2 + $0x58] sm:$0x1f]  ;;  %v828_v44 = vld [vmem:[#allocation2 + $0x60] sm:$0x1f]  ;;  %v829_v9 = vld [vmem:[#allocation2 + $0x68] sm:$0x1f] }
 0x172   :  { %11736 = vmatpush.msk.msra.mxu2 %vm841_vm1, %v826_v8  ;;  %11738 = vmatpush.msk.msra.mxu3 %vm841_vm1, %v827_v47  ;;  %v830_v10 = vld [vmem:[#allocation2 + $0x70] sm:$0x1f]  ;;  %v831_v11 = vld [vmem:[#allocation2 + $0x78] sm:$0x1f]  ;;  %18031 = vst [vmem:[#allocation11_spill] sm:$0xff] %v18030_v40  ;;  %v18038_v46 = vmov 0 }
 0x173   :  { %11740 = vmatpush.msk.msrb.mxu0 %vm841_vm1, %v828_v44  ;;  %11742 = vmatpush.msk.msrb.mxu1 %vm841_vm1, %v829_v9  ;;  %18034 = vst [vmem:[#allocation12_spill] sm:$0xff] %v18033_v63  ;;  %v18039_v46 = vsel %vm13617_vm9, 4294967295, %v18038_v46  ;;  %v18048_v62 = vsel %vm13674_vm15, 4294967295, %v18047_v62  ;;  %v1242_v18 = vperm.slane %v13509_v27, 6 }
 0x174   :  { %11733 = vmatmul.msk.f32.vlgmr.msra.gmra.mxu0 %vm837_vm10, %v13436_v20  ;;  %11744 = vmatpush.msk.msrb.mxu2 %vm841_vm1, %v830_v10  ;;  %18037 = vst [vmem:[#allocation13_spill] sm:$0xff] %v18036_v6  ;;  %v1237_v10 = vperm.slane %v13509_v27, 1 }
 0x175   :  { %11746 = vmatpush.msk.msrb.mxu3 %vm841_vm1, %v831_v11  ;;  %18040 = vst [vmem:[#allocation14_spill] sm:$0xff] %v18039_v46  ;;  %vm13683_vm1 = vcmp.eq.s32.totalorder %v1240_v24, 1  ;;  %v1243_v24 = vperm.slane %v13509_v27, 7  ;;  %vm13721_vm11 = vcmp.eq.s32.totalorder %v1242_v18, 1 }
 0x176   :  { %11735 = vmatmul.msk.f32.vlgmr.msra.gmra.mxu1 %vm837_vm10, %v13436_v20  ;;  %11737 = vmatmul.msk.f32.vlgmr.msra.gmra.mxu2 %vm837_vm10, %v13436_v20  ;;  %vm13660_vm13 = vcmp.eq.s32.totalorder %v1237_v10, 1  ;;  %18049 = vst [vmem:[#allocation17_spill] sm:$0xff] %v18048_v62 }
 0x177   :  { %11739 = vmatmul.msk.f32.vlgmr.msra.gmra.mxu3 %vm837_vm10, %v13436_v20  ;;  %v18042_v41 = vsel %vm13660_vm13, 4294967295, %v18041_v41  ;;  %vm13728_vm12 = vcmp.eq.s32.totalorder %v1243_v24, 1 }
 0x178   :  { %18043 = vst [vmem:[#allocation15_spill] sm:$0xff] %v18042_v41 }
 0x17c   :  { %11741 = vmatmul.msk.f32.vlgmr.msrb.gmra.mxu0 %vm837_vm10, %v13436_v20 }
 0x17e   :  { %11743 = vmatmul.msk.f32.vlgmr.msrb.gmra.mxu1 %vm837_vm10, %v13436_v20  ;;  %11745 = vmatmul.msk.f32.vlgmr.msrb.gmra.mxu2 %vm837_vm10, %v13436_v20 }
 0x17f   :  { %11747 = vmatmul.msk.f32.vlgmr.msrb.gmra.mxu3 %vm837_vm10, %v13436_v20 }
 0x1ac   :  { %v13498_v16 = vpop.permute.xlu2 %834 }
 0x1e1   :  { %v907_v14 = vpop.f32.mrf.mxu0 }
 0x1e2   :  { %v13504_v23 = vadd.f32 %v907_v14, %v13498_v16  ;;  %v1238_v14 = vperm.slane %v13509_v27, 2 }
 0x1e3   :  { %v927_v17 = vpop.f32.mrf.mxu1 }
 0x1e4   :  { %v13501_v21 = vadd.f32 %v927_v17, %v13498_v16  ;;  %v17873_v61 = vmax.f32 %v13504_v23, 0.0  ;;  %vm13664_vm14 = vcmp.eq.s32.totalorder %v1238_v14, 1 }
 0x1e6   :  { %v17872_v31 = vmax.f32 %v13501_v21, 0.0  ;;  %v13568_v50 = vsel %vm13511_vm0, %v17873_v61, 0.0 }
 0x1e8   :  { %v13556_v48 = vsel %vm13516_vm2, %v17872_v31, 0.0 }
 0x1e9   :  { %v947_v28 = vpop.f32.mrf.mxu2  ;;  %v987_v29 = vpop.f32.mrf.mxu0 }
 0x1ea   :  { %v13521_v13 = vadd.f32 %v947_v28, %v13498_v16  ;;  %v967_v60 = vpop.f32.mrf.mxu3  ;;  %v13524_v59 = vadd.f32 %v987_v29, %v13498_v16 }
 0x1eb   :  { %v13532_v57 = vadd.f32 %v967_v60, %v13498_v16  ;;  %v1007_v36 = vpop.f32.mrf.mxu1 }
 0x1ec   :  { %v17876_v37 = vmax.f32 %v13521_v13, 0.0  ;;  %v17869_v38 = vmax.f32 %v13524_v59, 0.0  ;;  %v13545_v39 = vadd.f32 %v1007_v36, %v13498_v16 }
 0x1ed   :  { %v17875_v20 = vmax.f32 %v13532_v57, 0.0 }
 0x1ee   :  { %v1262_v12 = vsel %vm13527_vm3, %v17876_v37, 0.0  ;;  %v17868_v33 = vmax.f32 %v13545_v39, 0.0  ;;  %v1264_v52 = vsel %vm13540_vm5, %v17869_v38, 0.0 }
 0x1ef   :  { %v1263_v51 = vsel %vm13534_vm4, %v17875_v20, 0.0  ;;  %v13579_v56 = vpack.i.bf16 %v1262_v12, %v13556_v48  ;;  %v13603_v53 = vpack.i.bf16 %v1264_v52, %v13568_v50 }
 0x1f0   :  { %v13585_v45 = vsel %vm13548_vm6, %v17868_v33, 0.0  ;;  %v13614_v54 = vpack.i.bf16 %v1263_v51, %v1262_v12  ;;  %v18044_v12 = vmov 0 }
 0x1f1   :  { %v1027_v42 = vpop.f32.mrf.mxu2  ;;  %12284 = vrot.lane.b32.xlu2 %v13579_v56, %s13136_s3  ;;  %v13594_v0 = vpack.i.bf16 %v13585_v45, %v1263_v51  ;;  %v1067_v1 = vpop.f32.mrf.mxu0  ;;  %v18045_v12 = vsel %vm13664_vm14, 4294967295, %v18044_v12 }
 0x1f2   :  { %v13597_v2 = vadd.f32 %v1027_v42, %v13498_v16  ;;  %v1047_v43 = vpop.f32.mrf.mxu3  ;;  %v13600_v3 = vadd.f32 %v1067_v1, %v13498_v16  ;;  %18046 = vst [vmem:[#allocation16_spill] sm:$0xff] %v18045_v12 }
 0x1f3   :  { %v13606_v4 = vadd.f32 %v1047_v43, %v13498_v16  ;;  %v1087_v5 = vpop.f32.mrf.mxu1  ;;  %12289 = vrot.lane.b32.xlu0 %v13594_v0, %s13136_s3 }
 0x1f4   :  { %v17874_v7 = vmax.f32 %v13597_v2, 0.0  ;;  %v17858_v8 = vmax.f32 %v13600_v3, 0.0  ;;  %v13624_v44 = vadd.f32 %v1087_v5, %v13498_v16  ;;  %v18051_v5 = vmov 0 }
 0x1f5   :  { %v17871_v47 = vmax.f32 %v13606_v4, 0.0  ;;  %v18052_v5 = vsel %vm13683_vm1, 4294967295, %v18051_v5 }
 0x1f6   :  { %v1266_v9 = vsel %vm13587_vm7, %v17874_v7, 0.0  ;;  %v13635_v11 = vsel %vm13610_vm8, %v17858_v8, 0.0  ;;  %v17857_v25 = vmax.f32 %v13624_v44, 0.0  ;;  %18053 = vst [vmem:[#allocation19_spill] sm:$0xff] %v18052_v5 }
 0x1f7   :  { %v1267_v15 = vsel %vm13617_vm9, %v17871_v47, 0.0  ;;  %v13642_v17 = vpack.i.bf16 %v1266_v9, %v1264_v52 }
 0x1f8   :  { %v13645_v22 = vpack.i.bf16 %v1267_v15, %v1266_v9  ;;  %v13650_v29 = vpack.i.bf16 %v13635_v11, %v1267_v15  ;;  %v1241_v9 = vperm.slane %v13509_v27, 5  ;;  %v13692_v10 = vsel %vm13660_vm13, %v17857_v25, 0.0 }
 0x1f9   :  { %v1107_v26 = vpop.f32.mrf.mxu2  ;;  %v1147_v28 = vpop.f32.mrf.mxu0 }
 0x1fa   :  { %v13653_v30 = vadd.f32 %v1107_v26, %v13498_v16  ;;  %v1127_v60 = vpop.f32.mrf.mxu3  ;;  %12294 = vrot.lane.b32.xlu1 %v13645_v22, %s13136_s3  ;;  %v13658_v36 = vadd.f32 %v1147_v28, %v13498_v16  ;;  %vm13710_vm10 = vcmp.eq.s32.totalorder %v1241_v9, 1 }
 0x1fb   :  { %v13669_v49 = vadd.f32 %v1127_v60, %v13498_v16  ;;  %v1167_v51 = vpop.f32.mrf.mxu1  ;;  %12299 = vrot.lane.b32.xlu0 %v13603_v53, %s13136_s3 }
 0x1fc   :  { %v17870_v52 = vmax.f32 %v13653_v30, 0.0  ;;  %v17859_v42 = vmax.f32 %v13658_v36, 0.0  ;;  %v13680_v1 = vadd.f32 %v1167_v51, %v13498_v16  ;;  %v18054_v51 = vmov 0 }
 0x1fd   :  { %v17860_v43 = vmax.f32 %v13669_v49, 0.0  ;;  %v18055_v51 = vsel %vm13710_vm10, 4294967295, %v18054_v51 }
 0x1fe   :  { %18050 = vst [vmem:[#allocation18_spill] sm:$0xff] %v13680_v1  ;;  %v1270_v14 = vsel %vm13664_vm14, %v17870_v52, 0.0  ;;  %v1272_v28 = vsel %vm13683_vm1, %v17859_v42, 0.0  ;;  %v17861_v60 = vmax.f32 %v13680_v1, 0.0  ;;  %v18057_v42 = vmov 0 }
 0x1ff   :  { %v1271_v15 = vsel %vm13674_vm15, %v17860_v43, 0.0  ;;  %v12303_v26 = vpack.i.bf16 %v1270_v14, %v13692_v10  ;;  %18056 = vst [vmem:[#allocation20_spill] sm:$0xff] %v18055_v51  ;;  %v18058_v42 = vsel %vm13721_vm11, 4294967295, %v18057_v42  ;;  %v18060_v43 = vmov 0 }
 0x200   :  { %v13719_v8 = vpack.i.bf16 %v1271_v15, %v1270_v14  ;;  %18059 = vst [vmem:[#allocation21_spill] sm:$0xff] %v18058_v42  ;;  %v18061_v43 = vsel %vm13728_vm12, 4294967295, %v18060_v43  ;;  %v13740_v14 = vsel %vm13710_vm10, %v17861_v60, 0.0  ;;  %vm17882_vm1 = vcmask 64512  }
 0x201   :  { %v1187_v58 = vpop.f32.mrf.mxu2  ;;  %12304 = vrot.lane.b32.xlu2 %v12303_v26, %s13136_s3  ;;  %18062 = vst [vmem:[#allocation22_spill] sm:$0xff] %v18061_v43 }
 0x202   :  { %v13716_v25 = vadd.f32 %v1187_v58, %v13498_v16  ;;  %v1207_v27 = vpop.f32.mrf.mxu3  ;;  %12324 = vrot.lane.b32.xlu1 %v13594_v0, %s13137_s29  ;;  %v13734_v58 = vpack.i.bf16 %v13568_v50, %v1272_v28 }
 0x203   :  { %v13726_v9 = vadd.f32 %v1207_v27, %v13498_v16  ;;  %12329 = vrot.lane.b32.xlu0 %v13645_v22, %s13137_s29  ;;  %v12308_v27 = vpack.i.bf16 %v13740_v14, %v1271_v15 }
 0x204   :  { %v17867_v18 = vmax.f32 %v13716_v25, 0.0 }
 0x205   :  { %v17862_v16 = vmax.f32 %v13726_v9, 0.0 }
 0x206   :  { %v1274_v24 = vsel %vm13721_vm11, %v17867_v18, 0.0 }
 0x207   :  { %v1275_v50 = vsel %vm13728_vm12, %v17862_v16, 0.0  ;;  %v12373_v16 = vpack.i.bf16 %v1272_v28, %v13635_v11  ;;  %v13799_v28 = vpack.i.bf16 %v13585_v45, %v13556_v48  ;;  %vm18064_vm12 = vcmask 64512  }
 0x208   :  { %v13754_v60 = vpack.i.bf16 %v1275_v50, %v1274_v24  ;;  %v12493_v24 = vpack.i.bf16 %v13740_v14, %v13692_v10  ;;  %vm18065_vm13 = vmmov %vm18064_vm12 }
 0x209   :  { %12309 = vrot.lane.b32.xlu2 %v12308_v27, %s13136_s3 }
 0x20a   :  { %12339 = vrot.lane.b32.xlu1 %v12303_v26, %s13137_s29 }
 0x20b   :  { %12344 = vrot.lane.b32.xlu0 %v12308_v27, %s13137_s29 }
 0x211   :  { %12314 = vrot.lane.b32.xlu2 %v13754_v60, %s13136_s3 }
 0x212   :  { %12349 = vrot.lane.b32.xlu1 %v13603_v53, %s13137_s29 }
 0x213   :  { %12354 = vrot.lane.b32.xlu0 %v13579_v56, %s13138_s30 }
 0x219   :  { %12319 = vrot.lane.b32.xlu2 %v13579_v56, %s13137_s29 }
 0x21a   :  { %12369 = vrot.lane.b32.xlu1 %v13645_v22, %s13138_s30 }
 0x21b   :  { %12374 = vrot.lane.b32.xlu0 %v12373_v16, %s13137_s29 }
 0x221   :  { %12334 = vrot.lane.b32.xlu2 %v12373_v16, %s13136_s3 }
 0x222   :  { %12384 = vrot.lane.b32.xlu1 %v12308_v27, %s13138_s30 }
 0x223   :  { %12399 = vrot.lane.b32.xlu0 %v13754_v60, %s13138_s30 }
 0x229   :  { %12359 = vrot.lane.b32.xlu2 %v13754_v60, %s13137_s29 }
 0x22a   :  { %12394 = vrot.lane.b32.xlu1 %v13579_v56, %s13139_s9  ;;  %v1308_v56 = vlaneseq }
 0x22b   :  { %12404 = vrot.lane.b32.xlu0 %v13594_v0, %s13139_s9 }
 0x231   :  { %12364 = vrot.lane.b32.xlu2 %v13594_v0, %s13138_s30  ;;  %v13781_v0 = vand.u32 127, %v1308_v56 }
 0x232   :  { %12414 = vrot.lane.b32.xlu1 %v12373_v16, %s13138_s30 }
 0x233   :  { %12419 = vrot.lane.b32.xlu0 %v12303_v26, %s13139_s9  ;;  %18063 = vst [vmem:[#allocation23_spill] sm:$0xff] %v13781_v0  ;;  %vm17887_vm10 = vcmp.lt.s32.totalorder %v13781_v0, 32  ;;  %vm18067_vm8 = vcmp.lt.s32.totalorder %v13781_v0, 32  ;;  %vm18074_vm11 = vcmp.lt.s32.totalorder %v13781_v0, 33 }
 0x239   :  { %12379 = vrot.lane.b32.xlu2 %v12303_v26, %s13138_s30  ;;  %v13793_v26 = vld [vmem:[%s17850_s4 + $0x8] sm:$0xff] }
 0x23a   :  { %12429 = vrot.lane.b32.xlu1 %v13754_v60, %s13139_s9 }
 0x23b   :  { %12434 = vrot.lane.b32.xlu0 %v13603_v53, %s13139_s9 }
 0x241   :  { %12389 = vrot.lane.b32.xlu2 %v13603_v53, %s13138_s30 }
 0x242   :  { %12444 = vrot.lane.b32.xlu1 %v13614_v54, %s13140_s10 }
 0x243   :  { %12449 = vrot.lane.b32.xlu0 %v13642_v17, %s13140_s10 }
 0x249   :  { %12409 = vrot.lane.b32.xlu2 %v13645_v22, %s13139_s9 }
 0x24a   :  { %12459 = vrot.lane.b32.xlu1 %v13719_v8, %s13140_s10 }
 0x24b   :  { %v12285_v11 = vpop.permute.xlu2 %12284  ;;  %12464 = vrot.lane.b32.xlu0 %v13734_v58, %s13140_s10 }
 0x24c   :  { %v12287_v53 = vunpack.i.h.bf16 %v12285_v11  ;;  %v12286_v15 = vunpack.i.l.bf16 %v12285_v11 }
 0x24e   :  { %v1374_v22 = vsel %vm17887_vm10, %v12286_v15, %v12287_v53 }
 0x24f   :  { %1438 = vmatpush.msra.mxu2 %v1374_v22 }
 0x250   :  { %11751 = vmatmul.msk.f32.vlgmr.msra.gmra.mxu2 %vm17882_vm1, %v13793_v26 }
 0x251   :  { %12424 = vrot.lane.b32.xlu2 %v12308_v27, %s13139_s9 }
 0x252   :  { %12469 = vrot.lane.b32.xlu1 %v13799_v28, %s13140_s10 }
 0x253   :  { %12474 = vrot.lane.b32.xlu0 %v13614_v54, %s13141_s13 }
 0x259   :  { %12439 = vrot.lane.b32.xlu2 %v12373_v16, %s13139_s9 }
 0x25a   :  { %12489 = vrot.lane.b32.xlu1 %v13650_v29, %s13141_s13 }
 0x25b   :  { %v13813_v50 = vpop.permute.xlu2 %12304  ;;  %12494 = vrot.lane.b32.xlu0 %v12493_v24, %s13140_s10 }
 0x25c   :  { %v12307_v18 = vunpack.i.h.bf16 %v13813_v50 }
 0x261   :  { %12454 = vrot.lane.b32.xlu2 %v13650_v29, %s13140_s10 }
 0x262   :  { %12504 = vrot.lane.b32.xlu1 %v13734_v58, %s13141_s13 }
 0x263   :  { %v13820_v27 = vpop.permute.xlu2 %12309  ;;  %12519 = vrot.lane.b32.xlu0 %v13754_v60, %s13141_s13 }
 0x264   :  { %v12311_v33 = vunpack.i.l.bf16 %v13820_v27  ;;  %v12312_v5 = vunpack.i.h.bf16 %v13820_v27 }
 0x265   :  { %v12290_v16 = vpop.permute.xlu0 %12289 }
 0x266   :  { %v12291_v56 = vunpack.i.l.bf16 %v12290_v16  ;;  %v12292_v38 = vunpack.i.h.bf16 %v12290_v16 }
 0x268   :  { %v1373_v11 = vsel %vm17887_vm10, %v12287_v53, %v12291_v56 }
 0x269   :  { %1458 = vmatpush.msra.mxu3 %v1373_v11  ;;  %12479 = vrot.lane.b32.xlu2 %v13754_v60, %s13140_s10  ;;  %v12306_v11 = vunpack.i.l.bf16 %v13813_v50  ;;  %v1365_v50 = vsel %vm17887_vm10, %v12307_v18, %v12311_v33 }
 0x26a   :  { %12514 = vrot.lane.b32.xlu1 %v13614_v54, %s13142_s14  ;;  %11752 = vmatmul.msk.f32.vlgmr.msra.gmra.mxu3 %vm17882_vm1, %v13793_v26 }
 0x26b   :  { %v12315_v22 = vpop.permute.xlu2 %12314  ;;  %12524 = vrot.lane.b32.xlu0 %v13642_v17, %s13142_s14 }
 0x26c   :  { %v12295_v53 = vpop.permute.xlu1 %12294  ;;  %v12316_v61 = vunpack.i.l.bf16 %v12315_v22  ;;  %v12317_v20 = vunpack.i.h.bf16 %v12315_v22 }
 0x26d   :  { %v12297_v52 = vunpack.i.h.bf16 %v12295_v53  ;;  %v12296_v47 = vunpack.i.l.bf16 %v12295_v53  ;;  %v12300_v31 = vpop.permute.xlu0 %12299 }
 0x26e   :  { %v12301_v7 = vunpack.i.l.bf16 %v12300_v31  ;;  %v12302_v37 = vunpack.i.h.bf16 %v12300_v31  ;;  %v1366_v31 = vsel %vm17887_vm10, %v12306_v11, %v12307_v18 }
 0x26f   :  { %v1370_v51 = vsel %vm17887_vm10, %v12292_v38, %v12296_v47  ;;  %v1369_v1 = vsel %vm17887_vm10, %v12296_v47, %v12297_v52 }
 0x270   :  { %1518 = vmatpush.msrb.mxu2 %v1370_v51  ;;  %1538 = vmatpush.msrb.mxu3 %v1369_v1  ;;  %v1376_v16 = vsel %vm17887_vm10, %v12317_v20, %v12301_v7  ;;  %v1375_v47 = vsel %vm17887_vm10, %v12301_v7, %v12286_v15  ;;  %v1362_v1 = vsel %vm17887_vm10, %v12312_v5, %v12316_v61 }
 0x271   :  { %11755 = vmatmul.msk.f32.vlgmr.msrb.gmra.mxu2 %vm17882_vm1, %v13793_v26  ;;  %12484 = vrot.lane.b32.xlu2 %v13642_v17, %s13141_s13  ;;  %v1372_v51 = vsel %vm17887_vm10, %v12291_v56, %v12302_v37  ;;  %v1371_v18 = vsel %vm17887_vm10, %v12302_v37, %v12292_v38  ;;  %vm17890_vm1 = vcmp.lt.s32.totalorder %v13781_v0, 33  ;;  %vm18066_vm10 = vmmov %vm18064_vm12  ;;  %v1361_v37 = vsel %vm18067_vm8, %v12316_v61, %v12317_v20 }
 0x272   :  { %1618 = vmatpush.msra.mxu3 %v1365_v50  ;;  %1598 = vmatpush.msra.mxu2 %v1366_v31  ;;  %vm18069_vm8 = vmmov %vm18066_vm10 }
 0x273   :  { %12534 = vrot.lane.b32.xlu1 %v12493_v24, %s13141_s13  ;;  %v13863_v22 = vpop.permute.xlu2 %12319  ;;  %1398 = vmatpush.msra.mxu0 %v1376_v16 }
 0x274   :  { %1678 = vmatpush.msrb.mxu2 %v1362_v1  ;;  %1418 = vmatpush.msra.mxu1 %v1375_v47  ;;  %v13865_v7 = vpop.permute.xlu1 %12324  ;;  %v12322_v15 = vunpack.i.h.bf16 %v13863_v22  ;;  %v12321_v53 = vunpack.i.l.bf16 %v13863_v22 }
 0x275   :  { %11749 = vmatmul.msk.f32.vlgmr.msra.gmra.mxu0 %vm18064_vm12, %v13793_v26  ;;  %11750 = vmatmul.msk.f32.vlgmr.msra.gmra.mxu1 %vm18065_vm13, %v13793_v26  ;;  %v13874_v24 = vpop.permute.xlu0 %12329  ;;  %vm18068_vm12 = vmmov %vm18066_vm10  ;;  %v12326_v56 = vunpack.i.l.bf16 %v13865_v7 }
 0x276   :  { %1478 = vmatpush.msrb.mxu0 %v1372_v51  ;;  %1498 = vmatpush.msrb.mxu1 %v1371_v18  ;;  %v1324_v38 = vsel %vm17890_vm1, %v12321_v53, %v12322_v15  ;;  %vm18070_vm13 = vmmov %vm18069_vm8  ;;  %v12331_v47 = vunpack.i.l.bf16 %v13874_v24  ;;  %v12332_v27 = vunpack.i.h.bf16 %v13874_v24 }
 0x277   :  { %11756 = vmatmul.msk.f32.vlgmr.msrb.gmra.mxu3 %vm18066_vm10, %v13793_v26  ;;  %12539 = vrot.lane.b32.xlu0 %v13719_v8, %s13142_s14  ;;  %vm18071_vm10 = vcmp.lt.s32.totalorder %v13781_v0, 32  ;;  %vm18073_vm1 = vmmov %vm18069_vm8  ;;  %v1323_v18 = vsel %vm18074_vm11, %v12322_v15, %v12326_v56 }
 0x278   :  { %1698 = vmatpush.msrb.mxu3 %v1361_v37  ;;  %v12327_v37 = vunpack.i.h.bf16 %v13865_v7 }
 0x279   :  { %11759 = vmatmul.msk.f32.vlgmr.msra.gmra.mxu2 %vm18068_vm12, %v13793_v26  ;;  %12499 = vrot.lane.b32.xlu2 %v13719_v8, %s13141_s13  ;;  %vm18072_vm12 = vmmov %vm18071_vm10 }
 0x27a   :  { %1761 = vmatpush.msra.mxu2 %v1324_v38 }
 0x27b   :  { %12559 = vrot.lane.b32.xlu1 %v13754_v60, %s13142_s14  ;;  %v12335_v61 = vpop.permute.xlu2 %12334 }
 0x27c   :  { %v13891_v20 = vpop.permute.xlu1 %12339  ;;  %v12337_v50 = vunpack.i.h.bf16 %v12335_v61  ;;  %v12336_v31 = vunpack.i.l.bf16 %v12335_v61 }
 0x27d   :  { %11753 = vmatmul.msk.f32.vlgmr.msrb.gmra.mxu0 %vm18069_vm8, %v13793_v26  ;;  %11754 = vmatmul.msk.f32.vlgmr.msrb.gmra.mxu1 %vm18070_vm13, %v13793_v26  ;;  %v13897_v16 = vpop.permute.xlu0 %12344  ;;  %vm18075_vm8 = vmmov %vm18071_vm10  ;;  %v12342_v24 = vunpack.i.h.bf16 %v13891_v20 }
 0x27e   :  { %v1368_v1 = vsel %vm18071_vm10, %v12297_v52, %v12336_v31  ;;  %v1367_v51 = vsel %vm18072_vm12, %v12336_v31, %v12306_v11  ;;  %v1364_v22 = vsel %vm18075_vm8, %v12311_v33, %v12337_v50  ;;  %vm18076_vm13 = vmmov %vm18075_vm8  ;;  %v1320_v11 = vsel %vm18074_vm11, %v12327_v37, %v12331_v47  ;;  %v13947_v31 = vld [vmem:[%s17850_s4] sm:$0xff] }
 0x27f   :  { %11760 = vmatmul.msk.f32.vlgmr.msra.gmra.mxu3 %vm18073_vm1, %v13793_v26  ;;  %12549 = vrot.lane.b32.xlu0 %v13799_v28, %s13142_s14  ;;  %v1363_v52 = vsel %vm18076_vm13, %v12337_v50, %v12312_v5  ;;  %vm18077_vm10 = vmmov %vm18073_vm1 }
 0x280   :  { %1781 = vmatpush.msra.mxu3 %v1323_v18  ;;  %1558 = vmatpush.msra.mxu0 %v1368_v1  ;;  %vm18078_vm12 = vmmov %vm18073_vm1  ;;  %v12346_v1 = vunpack.i.l.bf16 %v13897_v16 }
 0x281   :  { %1578 = vmatpush.msra.mxu1 %v1367_v51  ;;  %11763 = vmatmul.msk.f32.vlgmr.msrb.gmra.mxu2 %vm18073_vm1, %v13793_v26  ;;  %vm18079_vm8 = vmmov %vm18073_vm1 }
 0x282   :  { %1638 = vmatpush.msrb.mxu0 %v1364_v22  ;;  %1841 = vmatpush.msrb.mxu2 %v1320_v11  ;;  %vm18080_vm13 = vmmov %vm18074_vm11 }
 0x283   :  { %1658 = vmatpush.msrb.mxu1 %v1363_v52  ;;  %12509 = vrot.lane.b32.xlu2 %v13799_v28, %s13141_s13  ;;  %v12360_v33 = vpop.permute.xlu2 %12359  ;;  %v12341_v28 = vunpack.i.l.bf16 %v13891_v20  ;;  %vm18081_vm1 = vmmov %vm18074_vm11 }
 0x284   :  { %12564 = vrot.lane.b32.xlu1 %v13642_v17, %s13143_s15  ;;  %v12362_v5 = vunpack.i.h.bf16 %v12360_v33  ;;  %v12350_v7 = vpop.permute.xlu1 %12349  ;;  %v1319_v17 = vsel %vm18080_vm13, %v12331_v47, %v12332_v27  ;;  %vm18082_vm11 = vmmov %vm18081_vm1  ;;  %v12361_v52 = vunpack.i.l.bf16 %v12360_v33 }
 0x285   :  { %11757 = vmatmul.msk.f32.vlgmr.msra.gmra.mxu0 %vm18077_vm10, %v13793_v26  ;;  %11758 = vmatmul.msk.f32.vlgmr.msra.gmra.mxu1 %vm18078_vm12, %v13793_v26  ;;  %v12351_v15 = vunpack.i.l.bf16 %v12350_v7  ;;  %v13930_v38 = vpop.permute.xlu0 %12354  ;;  %v12352_v20 = vunpack.i.h.bf16 %v12350_v7  ;;  %vm18083_vm10 = vmmov %vm18079_vm8 }
 0x286   :  { %vm18084_vm12 = vmmov %vm18081_vm1  ;;  %v12357_v7 = vunpack.i.h.bf16 %v13930_v38 }
 0x287   :  { %11764 = vmatmul.msk.f32.vlgmr.msrb.gmra.mxu3 %vm18079_vm8, %v13793_v26  ;;  %12569 = vrot.lane.b32.xlu0 %v13650_v29, %s13143_s15  ;;  %v1326_v61 = vsel %vm18081_vm1, %v12362_v5, %v12351_v15  ;;  %v1325_v50 = vsel %vm18082_vm11, %v12351_v15, %v12321_v53  ;;  %v1316_v47 = vsel %vm18084_vm12, %v12341_v28, %v12342_v24  ;;  %vm18085_vm13 = vmmov %vm18079_vm8 }
 0x288   :  { %1861 = vmatpush.msrb.mxu3 %v1319_v17  ;;  %1721 = vmatpush.msra.mxu0 %v1326_v61  ;;  %v1322_v51 = vsel %vm18081_vm1, %v12326_v56, %v12352_v20  ;;  %vm18086_vm11 = vmmov %vm18081_vm1 }
 0x289   :  { %1741 = vmatpush.msra.mxu1 %v1325_v50  ;;  %11767 = vmatmul.msk.f32.vlgmr.msra.gmra.mxu2 %vm18083_vm10, %v13947_v31  ;;  %v1321_v18 = vsel %vm18086_vm11, %v12352_v20, %v12327_v37  ;;  %vm18087_vm10 = vmmov %vm18079_vm8 }
 0x28a   :  { %1921 = vmatpush.msra.mxu2 %v1316_v47  ;;  %vm18088_vm12 = vmmov %vm18081_vm1 }
 0x28b   :  { %12529 = vrot.lane.b32.xlu2 %v13650_v29, %s13142_s14  ;;  %v13956_v53 = vpop.permute.xlu2 %12364  ;;  %vm18090_vm11 = vmmov %vm18081_vm1 }
 0x28c   :  { %12574 = vrot.lane.b32.xlu1 %v13719_v8, %s13143_s15  ;;  %v1315_v8 = vsel %vm18088_vm12, %v12342_v24, %v12346_v1  ;;  %v13975_v56 = vpop.permute.xlu1 %12369  ;;  %vm18092_vm12 = vmmov %vm18079_vm8  ;;  %v12366_v24 = vunpack.i.l.bf16 %v13956_v53 }
 0x28d   :  { %11761 = vmatmul.msk.f32.vlgmr.msrb.gmra.mxu0 %vm18079_vm8, %v13793_v26  ;;  %11762 = vmatmul.msk.f32.vlgmr.msrb.gmra.mxu1 %vm18085_vm13, %v13793_v26  ;;  %v12375_v22 = vpop.permute.xlu0 %12374  ;;  %v12347_v26 = vunpack.i.h.bf16 %v13897_v16  ;;  %vm18089_vm13 = vmmov %vm18081_vm1  ;;  %v12371_v17 = vunpack.i.l.bf16 %v13975_v56 }
 0x28e   :  { %1801 = vmatpush.msrb.mxu0 %v1322_v51  ;;  %1821 = vmatpush.msrb.mxu1 %v1321_v18  ;;  %v12376_v29 = vunpack.i.l.bf16 %v12375_v22 }
 0x28f   :  { %11768 = vmatmul.msk.f32.vlgmr.msra.gmra.mxu3 %vm18087_vm10, %v13947_v31  ;;  %12579 = vrot.lane.b32.xlu0 %v13734_v58, %s13143_s15  ;;  %v1312_v37 = vsel %vm18089_vm13, %v12347_v26, %v12361_v52  ;;  %vm18091_vm10 = vmmov %vm18079_vm8 }
 0x290   :  { %1941 = vmatpush.msra.mxu3 %v1315_v8  ;;  %v1318_v11 = vsel %vm18081_vm1, %v12332_v27, %v12376_v29  ;;  %v1317_v33 = vsel %vm18090_vm11, %v12376_v29, %v12341_v28  ;;  %vm18093_vm13 = vmmov %vm18081_vm1  ;;  %vm2058_vm1 = vcmp.lt.s32.totalorder %v13781_v0, 31  ;;  %v12377_v27 = vunpack.i.h.bf16 %v12375_v22  ;;  %v14057_v29 = vld [vmem:[%s17850_s4 + $0x10] sm:$0xff] }
 0x291   :  { %11771 = vmatmul.msk.f32.vlgmr.msrb.gmra.mxu2 %vm18079_vm8, %v13947_v31  ;;  %vm18094_vm11 = vmmov %vm18079_vm8  ;;  %v12367_v28 = vunpack.i.h.bf16 %v13956_v53  ;;  %v2071_v61 = vsel %vm2058_vm1, %v12357_v7, %v12366_v24 }
 0x292   :  { %2001 = vmatpush.msrb.mxu2 %v1312_v37 }
 0x293   :  { %12544 = vrot.lane.b32.xlu2 %v13734_v58, %s13142_s14  ;;  %v13989_v16 = vpop.permute.xlu2 %12379  ;;  %v12356_v58 = vunpack.i.l.bf16 %v13930_v38  ;;  %v2068_v47 = vsel %vm2058_vm1, %v12367_v28, %v12371_v17 }
 0x294   :  { %12584 = vrot.lane.b32.xlu1 %v13754_v60, %s13143_s15  ;;  %v1311_v60 = vsel %vm18093_vm13, %v12361_v52, %v12362_v5  ;;  %v14004_v15 = vpop.permute.xlu1 %12384  ;;  %v12382_v52 = vunpack.i.h.bf16 %v13989_v16  ;;  %v12381_v8 = vunpack.i.l.bf16 %v13989_v16 }
 0x295   :  { %11765 = vmatmul.msk.f32.vlgmr.msra.gmra.mxu0 %vm18091_vm10, %v13947_v31  ;;  %11766 = vmatmul.msk.f32.vlgmr.msra.gmra.mxu1 %vm18092_vm12, %v13947_v31  ;;  %v2072_v38 = vsel %vm2058_vm1, %v12356_v58, %v12357_v7  ;;  %vm18095_vm10 = vmmov %vm18079_vm8  ;;  %v12400_v50 = vpop.permute.xlu0 %12399 }
 0x296   :  { %1881 = vmatpush.msra.mxu0 %v1318_v11  ;;  %1901 = vmatpush.msra.mxu1 %v1317_v33  ;;  %vm18096_vm12 = vmmov %vm18079_vm8  ;;  %v12402_v53 = vunpack.i.h.bf16 %v12400_v50  ;;  %v2064_v37 = vsel %vm2058_vm1, %v12381_v8, %v12382_v52  ;;  %v12386_v11 = vunpack.i.l.bf16 %v14004_v15  ;;  %v12401_v7 = vunpack.i.l.bf16 %v12400_v50 }
 0x297   :  { %11772 = vmatmul.msk.f32.vlgmr.msrb.gmra.mxu3 %vm18079_vm8, %v13947_v31  ;;  %4319 = vrot.lane.b32.xlu0 %v13556_v48, %s13143_s15  ;;  %vm18097_vm8 = vmmov %vm18093_vm13 }
 0x298   :  { %2021 = vmatpush.msrb.mxu3 %v1311_v60  ;;  %v1314_v48 = vsel %vm18097_vm8, %v12346_v1, %v12377_v27  ;;  %vm18098_vm13 = vmmov %vm18097_vm8  ;;  %v12372_v1 = vunpack.i.h.bf16 %v13975_v56  ;;  %v12387_v60 = vunpack.i.h.bf16 %v14004_v15 }
 0x299   :  { %11775 = vmatmul.msk.f32.vlgmr.msra.gmra.mxu2 %vm18094_vm11, %v13947_v31  ;;  %v1313_v5 = vsel %vm18098_vm13, %v12377_v27, %v12347_v26  ;;  %vm18099_vm11 = vmmov %vm18095_vm10 }
 0x29a   :  { %2135 = vmatpush.msra.mxu2 %v2072_v38  ;;  %vm18101_vm8 = vmmov %vm18095_vm10  ;;  %v2060_v27 = vsel %vm2058_vm1, %v12387_v60, %v12401_v7 }
 0x29b   :  { %12554 = vrot.lane.b32.xlu2 %v13614_v54, %s13143_s15  ;;  %v12390_v54 = vpop.permute.xlu2 %12389  ;;  %vm18102_vm13 = vmmov %vm18101_vm8 }
 0x29c   :  { %4335 = vrot.lane.b32.xlu1 %v13692_v10, %s13143_s15  ;;  %v12391_v20 = vunpack.i.l.bf16 %v12390_v54  ;;  %v14038_v51 = vpop.permute.xlu1 %12394  ;;  %v12392_v26 = vunpack.i.h.bf16 %v12390_v54 }
 0x29d   :  { %11769 = vmatmul.msk.f32.vlgmr.msrb.gmra.mxu0 %vm18095_vm10, %v13947_v31  ;;  %11770 = vmatmul.msk.f32.vlgmr.msrb.gmra.mxu1 %vm18096_vm12, %v13947_v31  ;;  %vm18100_vm12 = vmmov %vm18095_vm10  ;;  %v14059_v56 = vpop.permute.xlu0 %12404 }
 0x29e   :  { %1961 = vmatpush.msrb.mxu0 %v1314_v48  ;;  %1981 = vmatpush.msrb.mxu1 %v1313_v5  ;;  %v2074_v18 = vsel %vm2058_vm1, %v12402_v53, %v12391_v20  ;;  %v2073_v22 = vsel %vm2058_vm1, %v12391_v20, %v12356_v58  ;;  %v2070_v33 = vsel %vm2058_vm1, %v12366_v24, %v12392_v26  ;;  %v12397_v48 = vunpack.i.h.bf16 %v14038_v51 }
 0x29f   :  { %11776 = vmatmul.msk.f32.vlgmr.msra.gmra.mxu3 %vm18099_vm11, %v13947_v31  ;;  %4343 = vrot.lane.b32.xlu0 %v13740_v14, %s13143_s15  ;;  %vm18103_vm11 = vmmov %vm18101_vm8  ;;  %v2069_v16 = vsel %vm2058_vm1, %v12392_v26, %v12367_v28  ;;  %v12396_v5 = vunpack.i.l.bf16 %v14038_v51  ;;  %v12407_v51 = vunpack.i.h.bf16 %v14059_v56 }
 0x2a0   :  { %2155 = vmatpush.msra.mxu3 %v2071_v61  ;;  %v12406_v61 = vunpack.i.l.bf16 %v14059_v56 }
 0x2a1   :  { %11779 = vmatmul.msk.f32.vlgmr.msrb.gmra.mxu2 %vm18095_vm10, %v13947_v31  ;;  %vm18104_vm10 = vmmov %vm18101_vm8 }
 0x2a2   :  { %2215 = vmatpush.msrb.mxu2 %v2068_v47 }
 0x2a3   :  { %3945 = vrot.lane.b32.xlu2 %v13692_v10, %s13142_s14  ;;  %v2067_v10 = vsel %vm2058_vm1, %v12371_v17, %v12372_v1  ;;  %v12410_v17 = vpop.permute.xlu2 %12409 }
 0x2a4   :  { %v12415_v58 = vpop.permute.xlu1 %12414  ;;  %v12411_v47 = vunpack.i.l.bf16 %v12410_v17 }
 0x2a5   :  { %11773 = vmatmul.msk.f32.vlgmr.msra.gmra.mxu0 %vm18100_vm12, %v13947_v31  ;;  %11774 = vmatmul.msk.f32.vlgmr.msra.gmra.mxu1 %vm18101_vm8, %v13947_v31  ;;  %vm18105_vm12 = vmmov %vm18101_vm8  ;;  %v14087_v38 = vpop.permute.xlu0 %12419  ;;  %v12417_v28 = vunpack.i.h.bf16 %v12415_v58 }
 0x2a6   :  { %2095 = vmatpush.msra.mxu0 %v2074_v18  ;;  %2115 = vmatpush.msra.mxu1 %v2073_v22 }
 0x2a7   :  { %11780 = vmatmul.msk.f32.vlgmr.msrb.gmra.mxu3 %vm18102_vm13, %v13947_v31  ;;  %vm18106_vm13 = vmmov %vm18101_vm8  ;;  %v2062_v50 = vsel %vm2058_vm1, %v12386_v11, %v12417_v28  ;;  %v2061_v20 = vsel %vm2058_vm1, %v12417_v28, %v12387_v60 }
 0x2a8   :  { %2235 = vmatpush.msrb.mxu3 %v2067_v10 }
 0x2a9   :  { %11784 = vmatmul.msk.f32.vlgmr.msra.gmra.mxu2 %vm18103_vm11, %v14057_v29  ;;  %vm18107_vm11 = vmmov %vm18101_vm8 }
 0x2aa   :  { %2295 = vmatpush.msra.mxu2 %v2064_v37 }
 0x2ab   :  { %3953 = vrot.lane.b32.xlu2 %v13740_v14, %s13142_s14  ;;  %v2063_v14 = vsel %vm2058_vm1, %v12382_v52, %v12386_v11  ;;  %v12425_v26 = vpop.permute.xlu2 %12424  ;;  %v12422_v11 = vunpack.i.h.bf16 %v14087_v38 }
 0x2ac   :  { %v12430_v18 = vpop.permute.xlu1 %12429  ;;  %v12426_v60 = vunpack.i.l.bf16 %v12425_v26 }
 0x2ad   :  { %11777 = vmatmul.msk.f32.vlgmr.msrb.gmra.mxu0 %vm18104_vm10, %v13947_v31  ;;  %11778 = vmatmul.msk.f32.vlgmr.msrb.gmra.mxu1 %vm18105_vm12, %v13947_v31  ;;  %v12416_v31 = vunpack.i.l.bf16 %v12415_v58  ;;  %vm18108_vm10 = vmmov %vm18101_vm8  ;;  %v12432_v10 = vunpack.i.h.bf16 %v12430_v18 }
 0x2ae   :  { %2175 = vmatpush.msrb.mxu0 %v2070_v33  ;;  %2195 = vmatpush.msrb.mxu1 %v2069_v16  ;;  %vm18109_vm12 = vmmov %vm18101_vm8  ;;  %v12421_v33 = vunpack.i.l.bf16 %v14087_v38  ;;  %v12427_v38 = vunpack.i.h.bf16 %v12425_v26 }
 0x2af   :  { %11785 = vmatmul.msk.f32.vlgmr.msra.gmra.mxu3 %vm18101_vm8, %v14057_v29  ;;  %v2066_v15 = vsel %vm2058_vm1, %v12372_v1, %v12416_v31  ;;  %v2065_v24 = vsel %vm2058_vm1, %v12416_v31, %v12381_v8  ;;  %vm2448_vm8 = vcmp.lt.s32.totalorder %v13781_v0, 1  ;;  %v12435_v1 = vpop.permute.xlu0 %12434  ;;  %v12412_v8 = vunpack.i.h.bf16 %v12410_v17 }
 0x2b0   :  { %2315 = vmatpush.msra.mxu3 %v2063_v14  ;;  %v2462_v54 = vsel %vm2448_vm8, %v12396_v5, %v12397_v48  ;;  %v12436_v22 = vunpack.i.l.bf16 %v12435_v1  ;;  %v2458_v52 = vsel %vm2448_vm8, %v12407_v51, %v12411_v47  ;;  %v12437_v58 = vunpack.i.h.bf16 %v12435_v1 }
 0x2b1   :  { %11788 = vmatmul.msk.f32.vlgmr.msrb.gmra.mxu2 %vm18106_vm13, %v14057_v29  ;;  %vm18110_vm13 = vmmov %vm18108_vm10  ;;  %v2457_v16 = vsel %vm2448_vm8, %v12411_v47, %v12412_v8  ;;  %v2454_v14 = vsel %vm2448_vm8, %v12421_v33, %v12422_v11  ;;  %v18128_v47 = vmax.f32 %v13532_v57, 0.0  ;;  %v18132_v1 = vmax.f32 %v13504_v23, 0.0 }
 0x2b2   :  { %2375 = vmatpush.msrb.mxu2 %v2060_v27  ;;  %v2464_v56 = vsel %vm2448_vm8, %v12432_v10, %v12436_v22  ;;  %v2463_v37 = vsel %vm2448_vm8, %v12436_v22, %v12396_v5  ;;  %v2460_v31 = vsel %vm2448_vm8, %v12406_v61, %v12437_v58  ;;  %v2459_v27 = vsel %vm2448_vm8, %v12437_v58, %v12407_v51 }
 0x2b3   :  { %4327 = vrot.lane.b32.xlu2 %v13585_v45, %s13143_s15  ;;  %v2059_v45 = vsel %vm2058_vm1, %v12401_v7, %v12402_v53  ;;  %v2461_v53 = vsel %vm2448_vm8, %v12397_v48, %v12406_v61  ;;  %vm18114_vm1 = vmmov %vm18108_vm10  ;;  %v11798_v7 = vld [vmem:[%s17850_s4 + $0x18] sm:$0xff]  ;;  %v2453_v48 = vsel %vm2448_vm8, %v12422_v11, %v12426_v60  ;;  %v18124_v61 = vmax.f32 %v13521_v13, 0.0  ;;  %s13146_s15 = smov 66  }
 0x2b4   :  { %v18129_v13 = vmax.f32 %v13597_v2, 0.0  ;;  %v18133_v57 = vmax.f32 %v13501_v21, 0.0  ;;  %v14204_v2 = vld [vmem:[%s17850_s4 + $0x20] sm:$0xff]  ;;  %v14210_v23 = vpop.permute.xlu1 %12444  ;;  %v18137_v51 = vmax.f32 %v13653_v30, 0.0  ;;  %v18142_v30 = vmax.f32 %v13669_v49, 0.0 }
 0x2b5   :  { %11782 = vmatmul.msk.f32.vlgmr.msra.gmra.mxu0 %vm18107_vm11, %v14057_v29  ;;  %11783 = vmatmul.msk.f32.vlgmr.msra.gmra.mxu1 %vm18108_vm10, %v14057_v29  ;;  %vm18111_vm11 = vmmov %vm18108_vm10  ;;  %v18150_v11 = vmax.f32 %v13624_v44, 0.0 }
 0x2b6   :  { %2255 = vmatpush.msra.mxu0 %v2066_v15  ;;  %2275 = vmatpush.msra.mxu1 %v2065_v24  ;;  %v12431_v15 = vunpack.i.l.bf16 %v12430_v18  ;;  %v12440_v24 = vpop.permute.xlu2 %12439  ;;  %v18140_v18 = vmax.f32 %v13545_v39, 0.0  ;;  %v18144_v39 = vmax.f32 %v13716_v25, 0.0  ;;  %v18148_v25 = vmax.f32 %v13600_v3, 0.0 }
 0x2b7   :  { %11789 = vmatmul.msk.f32.vlgmr.msrb.gmra.mxu3 %vm18109_vm12, %v14057_v29  ;;  %vm18112_vm12 = vmmov %vm18108_vm10  ;;  %v12441_v5 = vunpack.i.l.bf16 %v12440_v24  ;;  %v14230_v22 = vpop.permute.xlu0 %12449 }
 0x2b8   :  { %2395 = vmatpush.msrb.mxu3 %v2059_v45  ;;  %v2449_v17 = vsel %vm2448_vm8, %v12431_v15, %v12432_v10  ;;  %v12451_v58 = vunpack.i.l.bf16 %v14230_v22 }
 0x2b9   :  { %11792 = vmatmul.msk.f32.vlgmr.msra.gmra.mxu2 %vm18110_vm13, %v14057_v29  ;;  %vm18113_vm13 = vmmov %vm18108_vm10  ;;  %v2456_v45 = vsel %vm2448_vm8, %v12412_v8, %v12441_v5  ;;  %v2455_v28 = vsel %vm2448_vm8, %v12441_v5, %v12421_v33  ;;  %v18152_v33 = vmax.f32 %v13726_v9, 0.0 }
 0x2ba   :  { %2525 = vmatpush.msra.mxu2 %v2462_v54  ;;  %v12442_v54 = vunpack.i.h.bf16 %v12440_v24 }
 0x2bc   :  { %v14250_v10 = vpop.permute.xlu1 %12459 }
 0x2bd   :  { %11786 = vmatmul.msk.f32.vlgmr.msrb.gmra.mxu0 %vm18111_vm11, %v14057_v29  ;;  %11787 = vmatmul.msk.f32.vlgmr.msrb.gmra.mxu1 %vm18108_vm10, %v14057_v29  ;;  %vm18115_vm11 = vmmov %vm18114_vm1 }
 0x2be   :  { %2335 = vmatpush.msrb.mxu0 %v2062_v50  ;;  %2355 = vmatpush.msrb.mxu1 %v2061_v20  ;;  %vm18116_vm10 = vmmov %vm18114_vm1  ;;  %v2452_v50 = vsel %vm2448_vm8, %v12426_v60, %v12442_v54  ;;  %v2451_v20 = vsel %vm2448_vm8, %v12442_v54, %v12427_v38  ;;  %v14254_v26 = vpop.permute.xlu2 %12454 }
 0x2bf   :  { %11793 = vmatmul.msk.f32.vlgmr.msra.gmra.mxu3 %vm18112_vm12, %v14057_v29  ;;  %vm18117_vm12 = vmmov %vm18114_vm1  ;;  %v12456_v60 = vunpack.i.l.bf16 %v14254_v26 }
 0x2c0   :  { %2545 = vmatpush.msra.mxu3 %v2461_v53  ;;  %v18135_v53 = vmax.f32 %v13606_v4, 0.0  ;;  %v18139_v4 = vmax.f32 %v13524_v59, 0.0 }
 0x2c1   :  { %11796 = vmatmul.msk.f32.vlgmr.msrb.gmra.mxu2 %vm18113_vm13, %v14057_v29  ;;  %vm18118_vm13 = vmmov %vm18114_vm1 }
 0x2c2   :  { %2605 = vmatpush.msrb.mxu2 %v2458_v52 }
 0x2c5   :  { %11790 = vmatmul.msk.f32.vlgmr.msra.gmra.mxu0 %vm18114_vm1, %v14057_v29  ;;  %11791 = vmatmul.msk.f32.vlgmr.msra.gmra.mxu1 %vm18115_vm11, %v14057_v29  ;;  %vm18119_vm11 = vmmov %vm18114_vm1 }
 0x2c6   :  { %2485 = vmatpush.msra.mxu0 %v2464_v56  ;;  %2505 = vmatpush.msra.mxu1 %v2463_v37  ;;  %v12447_v56 = vunpack.i.h.bf16 %v14210_v23  ;;  %v12446_v37 = vunpack.i.l.bf16 %v14210_v23  ;;  %v14305_v5 = vpop.permute.xlu2 %12479  ;;  %v12461_v23 = vunpack.i.l.bf16 %v14250_v10 }
 0x2c7   :  { %11797 = vmatmul.msk.f32.vlgmr.msrb.gmra.mxu3 %vm18116_vm10, %v14057_v29  ;;  %vm18120_vm10 = vmmov %vm18114_vm1 }
 0x2c8   :  { %2625 = vmatpush.msrb.mxu3 %v2457_v16  ;;  %v14277_v16 = vpop.permute.xlu0 %12464 }
 0x2c9   :  { %11801 = vmatmul.msk.f32.vlgmr.msra.gmra.mxu2 %vm18117_vm12, %v11798_v7  ;;  %vm18121_vm12 = vmmov %vm18114_vm1 }
 0x2ca   :  { %2685 = vmatpush.msra.mxu2 %v2454_v14 }
 0x2cd   :  { %11794 = vmatmul.msk.f32.vlgmr.msrb.gmra.mxu0 %vm18118_vm13, %v14057_v29  ;;  %11795 = vmatmul.msk.f32.vlgmr.msrb.gmra.mxu1 %vm18114_vm1, %v14057_v29  ;;  %v2450_v29 = vsel %vm2448_vm8, %v12427_v38, %v12431_v15  ;;  %vm18122_vm13 = vmmov %vm18114_vm1  ;;  %v18158_v38 = vld [vmem:[#allocation19_spill] sm:$0xff]  ;;  %v18160_v15 = vld [vmem:[#allocation18_spill] sm:$0xff] }
 0x2ce   :  { %2565 = vmatpush.msrb.mxu0 %v2460_v31  ;;  %2585 = vmatpush.msrb.mxu1 %v2459_v27  ;;  %vm18134_vm8 = vmmov %vm18114_vm1  ;;  %v12470_v31 = vpop.permute.xlu1 %12469  ;;  %v18157_v27 = vmax.f32 %v13658_v36, 0.0  ;;  %v18161_v24 = vmax.f32 %v18160_v15, 0.0 }
 0x2cf   :  { %11802 = vmatmul.msk.f32.vlgmr.msra.gmra.mxu3 %vm18119_vm11, %v11798_v7  ;;  %vm18123_vm11 = vmmov %vm18114_vm1  ;;  %v12471_v36 = vunpack.i.l.bf16 %v12470_v31 }
 0x2d0   :  { %2705 = vmatpush.msra.mxu3 %v2453_v48  ;;  %v18162_v48 = vld [vmem:[#allocation20_spill] sm:$0xff] }
 0x2d1   :  { %11805 = vmatmul.msk.f32.vlgmr.msrb.gmra.mxu2 %vm18120_vm10, %v11798_v7  ;;  %vm18125_vm10 = vmmov %vm18114_vm1 }
 0x2d2   :  { %2765 = vmatpush.msrb.mxu2 %v2450_v29 }
 0x2d3   :  { %v14214_v21 = vpop.f32.mrf.mxu2 }
 0x2d5   :  { %11799 = vmatmul.msk.f32.vlgmr.msra.gmra.mxu0 %vm18121_vm12, %v11798_v7  ;;  %11800 = vmatmul.msk.f32.vlgmr.msra.gmra.mxu1 %vm18122_vm13, %v11798_v7  ;;  %vm18126_vm12 = vmmov %vm18114_vm1 }
 0x2d6   :  { %2645 = vmatpush.msra.mxu0 %v2456_v45  ;;  %2665 = vmatpush.msra.mxu1 %v2455_v28  ;;  %vm18127_vm13 = vmmov %vm18114_vm1  ;;  %v12452_v45 = vunpack.i.h.bf16 %v14230_v22  ;;  %v14347_v22 = vpop.permute.xlu2 %12484 }
 0x2d7   :  { %11806 = vmatmul.msk.f32.vlgmr.msrb.gmra.mxu3 %vm18114_vm1, %v11798_v7 }
 0x2d8   :  { %2785 = vmatpush.msrb.mxu3 %v2449_v17 }
 0x2d9   :  { %11809 = vmatmul.msk.f32.vlgmr.msra.gmra.mxu2 %vm18123_vm11, %v11798_v7  ;;  %vm18130_vm11 = vmmov %vm18114_vm1 }
 0x2da   :  { %11820 = vmatpush.msk.msra.mxu2 %vm13527_vm3, %v18124_v61  ;;  %v12457_v61 = vunpack.i.h.bf16 %v14254_v26  ;;  %v12466_v26 = vunpack.i.l.bf16 %v14277_v16 }
 0x2dd   :  { %11803 = vmatmul.msk.f32.vlgmr.msrb.gmra.mxu0 %vm18125_vm10, %v11798_v7  ;;  %11804 = vmatmul.msk.f32.vlgmr.msrb.gmra.mxu1 %vm18126_vm12, %v11798_v7  ;;  %vm18131_vm10 = vmmov %vm18114_vm1 }
 0x2de   :  { %2725 = vmatpush.msrb.mxu0 %v2452_v50  ;;  %2745 = vmatpush.msrb.mxu1 %v2451_v20  ;;  %vm18136_vm12 = vmmov %vm18114_vm1  ;;  %v12467_v50 = vunpack.i.h.bf16 %v14277_v16  ;;  %v12481_v16 = vunpack.i.l.bf16 %v14305_v5 }
 0x2df   :  { %11810 = vmatmul.msk.f32.vlgmr.msra.gmra.mxu3 %vm18127_vm13, %v11798_v7  ;;  %vm18138_vm13 = vmmov %vm18114_vm1 }
 0x2e0   :  { %11822 = vmatpush.msk.msra.mxu3 %vm13534_vm4, %v18128_v47  ;;  %v14324_v47 = vpop.permute.xlu0 %12474 }
 0x2e1   :  { %11813 = vmatmul.msk.f32.vlgmr.msrb.gmra.mxu2 %vm18114_vm1, %v11798_v7 }
 0x2e2   :  { %11828 = vmatpush.msk.msrb.mxu2 %vm13587_vm7, %v18129_v13 }
 0x2e5   :  { %11807 = vmatmul.msk.f32.vlgmr.msra.gmra.mxu0 %vm18130_vm11, %v11798_v7  ;;  %11808 = vmatmul.msk.f32.vlgmr.msra.gmra.mxu1 %vm18131_vm10, %v11798_v7  ;;  %vm18141_vm11 = vmmov %vm18114_vm1 }
 0x2e6   :  { %11816 = vmatpush.msk.msra.mxu0 %vm13511_vm0, %v18132_v1  ;;  %11818 = vmatpush.msk.msra.mxu1 %vm13516_vm2, %v18133_v57  ;;  %vm18143_vm10 = vmmov %vm18114_vm1 }
 0x2e7   :  { %11814 = vmatmul.msk.f32.vlgmr.msrb.gmra.mxu3 %vm18134_vm8, %v11798_v7  ;;  %vm18145_vm8 = vnez %v18058_v42 }
 0x2e8   :  { %11830 = vmatpush.msk.msrb.mxu3 %vm13617_vm9, %v18135_v53  ;;  %v12462_v53 = vunpack.i.h.bf16 %v14250_v10 }
 0x2e9   :  { %11821 = vmatmul.msk.f32.vlgmr.msra.gmra.mxu2 %vm18136_vm12, %v14204_v2  ;;  %vm18146_vm12 = vmmov %vm18114_vm1 }
 0x2ea   :  { %11836 = vmatpush.msk.msra.mxu2 %vm13664_vm14, %v18137_v51 }
 0x2ed   :  { %11811 = vmatmul.msk.f32.vlgmr.msrb.gmra.mxu0 %vm18138_vm13, %v11798_v7  ;;  %11812 = vmatmul.msk.f32.vlgmr.msrb.gmra.mxu1 %vm18114_vm1, %v11798_v7  ;;  %v14238_v52 = vpop.f32.mrf.mxu3  ;;  %vm18147_vm13 = vmmov %vm18114_vm1  ;;  %vm18149_vm1 = vnez %v18036_v6 }
 0x2ee   :  { %11824 = vmatpush.msk.msrb.mxu0 %vm13540_vm5, %v18139_v4  ;;  %11826 = vmatpush.msk.msrb.mxu1 %vm13548_vm6, %v18140_v18  ;;  %v14345_v4 = vld [vmem:[%s17850_s4 + $0x28] sm:$0xff]  ;;  %v12472_v18 = vunpack.i.h.bf16 %v12470_v31  ;;  %v14373_v31 = vpop.permute.xlu1 %12489 }
 0x2ef   :  { %11823 = vmatmul.msk.f32.vlgmr.msra.gmra.mxu3 %vm18141_vm11, %v14204_v2  ;;  %vm18151_vm11 = vnez %v18042_v41 }
 0x2f0   :  { %11838 = vmatpush.msk.msra.mxu3 %vm13674_vm15, %v18142_v30 }
 0x2f1   :  { %11829 = vmatmul.msk.f32.vlgmr.msrb.gmra.mxu2 %vm18143_vm10, %v14204_v2 }
 0x2f2   :  { %v14240_v59 = vpop.f32.mrf.mxu0  ;;  %v14242_v8 = vpop.f32.mrf.mxu1  ;;  %11844 = vmatpush.msk.msrb.mxu2 %vm18145_vm8, %v18144_v39  ;;  %vm18154_vm8 = vmmov %vm18143_vm10 }
 0x2f4   :  { %v14252_v49 = vpop.f32.mrf.mxu2 }
 0x2f5   :  { %11817 = vmatmul.msk.f32.vlgmr.msra.gmra.mxu0 %vm18146_vm12, %v14204_v2  ;;  %11819 = vmatmul.msk.f32.vlgmr.msra.gmra.mxu1 %vm18147_vm13, %v14204_v2  ;;  %vm17893_vm12 = vcmp.lt.s32.totalorder %v13781_v0, 127  ;;  %vm18153_vm13 = vnez %v18061_v43 }
 0x2f6   :  { %11832 = vmatpush.msk.msra.mxu0 %vm18149_vm1, %v18148_v25  ;;  %11834 = vmatpush.msk.msra.mxu1 %vm18151_vm11, %v18150_v11  ;;  %v3192_v44 = vsel %vm17893_vm12, %v12446_v37, %v12447_v56  ;;  %vm18163_vm12 = vnez %v18162_v48 }
 0x2f7   :  { %11831 = vmatmul.msk.f32.vlgmr.msrb.gmra.mxu3 %vm18143_vm10, %v14204_v2  ;;  %vm18155_vm10 = vmmov %vm18154_vm8 }
 0x2f8   :  { %11846 = vmatpush.msk.msrb.mxu3 %vm18153_vm13, %v18152_v33  ;;  %vm18156_vm13 = vmmov %vm18154_vm8  ;;  %v12482_v33 = vunpack.i.h.bf16 %v14305_v5 }
 0x2f9   :  { %11837 = vmatmul.msk.f32.vlgmr.msra.gmra.mxu2 %vm18154_vm8, %v14204_v2  ;;  %vm18159_vm8 = vnez %v18158_v38 }
 0x2fa   :  { %v14279_v3 = vpop.f32.mrf.mxu3  ;;  %v14281_v7 = vpop.f32.mrf.mxu0  ;;  %3256 = vmatpush.msra.mxu2 %v3192_v44 }
 0x2fb   :  { %v14288_v14 = vpop.f32.mrf.mxu1  ;;  %v12495_v44 = vpop.permute.xlu0 %12494 }
 0x2fc   :  { %v14290_v9 = vpop.f32.mrf.mxu2 }
 0x2fd   :  { %11825 = vmatmul.msk.f32.vlgmr.msrb.gmra.mxu0 %vm18155_vm10, %v14204_v2  ;;  %11827 = vmatmul.msk.f32.vlgmr.msrb.gmra.mxu1 %vm18156_vm13, %v14204_v2  ;;  %vm18164_vm13 = vcmp.lt.s32.totalorder %v13781_v0, 127 }
 0x2fe   :  { %11840 = vmatpush.msk.msrb.mxu0 %vm18159_vm8, %v18157_v27  ;;  %11842 = vmatpush.msk.msrb.mxu1 %vm18163_vm12, %v18161_v24  ;;  %v3191_v29 = vsel %vm18164_vm13, %v12447_v56, %v12451_v58  ;;  %vm18165_vm8 = vmmov %vm18155_vm10 }
 0x2ff   :  { %11839 = vmatmul.msk.f32.vlgmr.msra.gmra.mxu3 %vm18155_vm10, %v14204_v2  ;;  %vm18166_vm15 = vmmov %vm18164_vm13 }
 0x300   :  { %3276 = vmatpush.msra.mxu3 %v3191_v29  ;;  %v3188_v54 = vsel %vm18166_vm15, %v12452_v45, %v12456_v60  ;;  %vm18167_vm10 = vmmov %vm18165_vm8  ;;  %v14390_v29 = vpop.permute.xlu2 %12499 }
 0x301   :  { %11845 = vmatmul.msk.f32.vlgmr.msrb.gmra.mxu2 %vm18165_vm8, %v14204_v2  ;;  %vm18168_vm13 = vmmov %vm18165_vm8 }
 0x302   :  { %v14312_v28 = vpop.f32.mrf.mxu3  ;;  %v14314_v17 = vpop.f32.mrf.mxu0  ;;  %3336 = vmatpush.msrb.mxu2 %v3188_v54  ;;  %vm18169_vm8 = vmmov %vm18166_vm15 }
 0x303   :  { %v14322_v20 = vpop.f32.mrf.mxu1  ;;  %v3194_v13 = vsel %vm18169_vm8, %v12467_v50, %v12471_v36  ;;  %vm18170_vm15 = vmmov %vm18169_vm8 }
 0x304   :  { %v3193_v1 = vsel %vm18170_vm15, %v12471_v36, %v12446_v37  ;;  %v14334_v57 = vpop.f32.mrf.mxu2  ;;  %vm18171_vm12 = vmmov %vm18167_vm10 }
 0x305   :  { %11833 = vmatmul.msk.f32.vlgmr.msra.gmra.mxu0 %vm18167_vm10, %v14204_v2  ;;  %11835 = vmatmul.msk.f32.vlgmr.msra.gmra.mxu1 %vm18168_vm13, %v14204_v2  ;;  %vm18172_vm10 = vmmov %vm18169_vm8 }
 0x306   :  { %3216 = vmatpush.msra.mxu0 %v3194_v13  ;;  %3236 = vmatpush.msra.mxu1 %v3193_v1  ;;  %v3187_v51 = vsel %vm18172_vm10, %v12456_v60, %v12457_v61  ;;  %vm18173_vm13 = vmmov %vm18171_vm12  ;;  %v3190_v37 = vsel %vm18172_vm10, %v12451_v58, %v12472_v18  ;;  %v12496_v58 = vunpack.i.l.bf16 %v12495_v44  ;;  %v12476_v13 = vunpack.i.l.bf16 %v14324_v47 }
 0x307   :  { %11847 = vmatmul.msk.f32.vlgmr.msrb.gmra.mxu3 %vm18171_vm12, %v14204_v2  ;;  %vm18174_vm12 = vmmov %vm18169_vm8 }
 0x308   :  { %3356 = vmatpush.msrb.mxu3 %v3187_v51  ;;  %v3184_v10 = vsel %vm18174_vm12, %v12461_v23, %v12462_v53  ;;  %vm18175_vm8 = vmmov %vm18173_vm13 }
 0x309   :  { %11851 = vmatmul.msk.f32.vlgmr.msra.gmra.mxu2 %vm18173_vm13, %v14345_v4  ;;  %vm18176_vm15 = vmmov %vm18175_vm8 }
 0x30a   :  { %v14349_v30 = vpop.f32.mrf.mxu3  ;;  %v14351_v39 = vpop.f32.mrf.mxu0  ;;  %3416 = vmatpush.msra.mxu2 %v3184_v10  ;;  %vm18177_vm14 = vmmov %vm18172_vm10 }
 0x30b   :  { %v14358_v56 = vpop.f32.mrf.mxu1  ;;  %v3189_v25 = vsel %vm18177_vm14, %v12472_v18, %v12452_v45  ;;  %vm18178_vm13 = vmmov %vm18175_vm8 }
 0x30c   :  { %v1763_v11 = vpop.f32.mrf.mxu2  ;;  %vm18179_vm12 = vmmov %vm18172_vm10 }
 0x30d   :  { %11841 = vmatmul.msk.f32.vlgmr.msrb.gmra.mxu0 %vm18175_vm8, %v14204_v2  ;;  %11843 = vmatmul.msk.f32.vlgmr.msrb.gmra.mxu1 %vm18176_vm15, %v14204_v2  ;;  %v14371_v60 = vadd.f32 %v1763_v11, %v14214_v21  ;;  %v3183_v2 = vsel %vm18179_vm12, %v12462_v53, %v12466_v26  ;;  %vm18180_vm14 = vmmov %vm18175_vm8 }
 0x30e   :  { %3296 = vmatpush.msrb.mxu0 %v3190_v37  ;;  %3316 = vmatpush.msrb.mxu1 %v3189_v25  ;;  %vm18181_vm8 = vmmov %vm18172_vm10 }
 0x30f   :  { %11852 = vmatmul.msk.f32.vlgmr.msra.gmra.mxu3 %vm18178_vm13, %v14345_v4  ;;  %v3180_v21 = vsel %vm18181_vm8, %v12481_v16, %v12482_v33  ;;  %vm18182_vm15 = vmmov %vm18178_vm13  ;;  %v3195_v53 = vsel %vm18181_vm8, %v12482_v33, %v12467_v50  ;;  %v12487_v33 = vunpack.i.h.bf16 %v14347_v22 }
 0x310   :  { %3436 = vmatpush.msra.mxu3 %v3183_v2  ;;  %vm18183_vm10 = vmmov %vm18178_vm13 }
 0x311   :  { %11855 = vmatmul.msk.f32.vlgmr.msrb.gmra.mxu2 %vm18180_vm14, %v14345_v4  ;;  %vm18184_vm13 = vmmov %vm18181_vm8 }
 0x312   :  { %v1783_v27 = vpop.f32.mrf.mxu3  ;;  %v14379_v15 = vpop.f32.mrf.mxu0  ;;  %3496 = vmatpush.msrb.mxu2 %v3180_v21  ;;  %v3186_v45 = vsel %vm18184_vm13, %v12457_v61, %v12496_v58  ;;  %vm18185_vm12 = vmmov %vm18181_vm8  ;;  %v12497_v61 = vunpack.i.h.bf16 %v12495_v44  ;;  %v12492_v21 = vunpack.i.h.bf16 %v14373_v31 }
 0x313   :  { %v14386_v24 = vadd.f32 %v1783_v27, %v14238_v52  ;;  %v14388_v5 = vpop.f32.mrf.mxu1  ;;  %v3185_v36 = vsel %vm18185_vm12, %v12496_v58, %v12461_v23  ;;  %v12477_v52 = vunpack.i.h.bf16 %v14324_v47  ;;  %vm18186_vm14 = vmmov %vm18183_vm10  ;;  %v14410_v23 = vpop.permute.xlu1 %12504  ;;  %v12486_v47 = vunpack.i.l.bf16 %v14347_v22 }
 0x314   :  { %v1843_v54 = vpop.f32.mrf.mxu2  ;;  %vm18187_vm13 = vmmov %vm18183_vm10  ;;  %v3181_v25 = vsel %vm18181_vm8, %v12497_v61, %v12481_v16  ;;  %v12510_v44 = vpop.permute.xlu2 %12509 }
 0x315   :  { %11849 = vmatmul.msk.f32.vlgmr.msra.gmra.mxu0 %vm18182_vm15, %v14345_v4  ;;  %11850 = vmatmul.msk.f32.vlgmr.msra.gmra.mxu1 %vm18183_vm10, %v14345_v4  ;;  %v14403_v1 = vadd.f32 %v1843_v54, %v14252_v49  ;;  %vm3569_vm15 = vcmp.lt.s32.totalorder %v13781_v0, 97  ;;  %vm18188_vm12 = vmmov %vm18183_vm10  ;;  %v14437_v58 = vpop.permute.xlu0 %12519  ;;  %v12511_v16 = vunpack.i.l.bf16 %v12510_v44 }
 0x316   :  { %3376 = vmatpush.msra.mxu0 %v3186_v45  ;;  %3396 = vmatpush.msra.mxu1 %v3185_v36  ;;  %v3582_v49 = vsel %vm3569_vm15, %v12476_v13, %v12477_v52  ;;  %v12507_v45 = vunpack.i.h.bf16 %v14410_v23 }
 0x317   :  { %11856 = vmatmul.msk.f32.vlgmr.msrb.gmra.mxu3 %vm18186_vm14, %v14345_v4  ;;  %vm18189_vm14 = vmmov %vm18181_vm8 }
 0x318   :  { %3516 = vmatpush.msrb.mxu3 %v3195_v53  ;;  %v3182_v37 = vsel %vm18189_vm14, %v12466_v26, %v12497_v61  ;;  %v3581_v26 = vsel %vm3569_vm15, %v12477_v52, %v12486_v47  ;;  %vm18192_vm14 = vmmov %vm18183_vm10  ;;  %v12502_v61 = vunpack.i.h.bf16 %v14390_v29 }
 0x319   :  { %11859 = vmatmul.msk.f32.vlgmr.msra.gmra.mxu2 %vm18183_vm10, %v14345_v4  ;;  %vm18193_vm8 = vmmov %vm18183_vm10 }
 0x31a   :  { %v1863_v51 = vpop.f32.mrf.mxu3  ;;  %v14412_v18 = vpop.f32.mrf.mxu0  ;;  %3646 = vmatpush.msra.mxu2 %v3582_v49 }
 0x31b   :  { %v14420_v10 = vadd.f32 %v1863_v51, %v14279_v3  ;;  %v14422_v50 = vpop.f32.mrf.mxu1  ;;  %v12491_v3 = vunpack.i.l.bf16 %v14373_v31  ;;  %v14456_v52 = vpop.permute.xlu1 %12514  ;;  %v3584_v31 = vsel %vm3569_vm15, %v12507_v45, %v12511_v16  ;;  %v12501_v51 = vunpack.i.l.bf16 %v14390_v29 }
 0x31c   :  { %v1923_v11 = vpop.f32.mrf.mxu2 }
 0x31d   :  { %11853 = vmatmul.msk.f32.vlgmr.msrb.gmra.mxu0 %vm18187_vm13, %v14345_v4  ;;  %11854 = vmatmul.msk.f32.vlgmr.msrb.gmra.mxu1 %vm18188_vm12, %v14345_v4  ;;  %v14435_v2 = vadd.f32 %v1923_v11, %v14290_v9  ;;  %vm18190_vm13 = vmmov %vm18183_vm10  ;;  %v3578_v9 = vsel %vm3569_vm15, %v12487_v33, %v12491_v3  ;;  %v14482_v11 = vpop.permute.xlu0 %12524 }
 0x31e   :  { %3456 = vmatpush.msrb.mxu0 %v3182_v37  ;;  %3476 = vmatpush.msrb.mxu1 %v3181_v25  ;;  %vm18191_vm12 = vmmov %vm18183_vm10  ;;  %v3577_v37 = vsel %vm3569_vm15, %v12491_v3, %v12492_v21  ;;  %v12512_v25 = vunpack.i.h.bf16 %v12510_v44  ;;  %v12506_v3 = vunpack.i.l.bf16 %v14410_v23 }
 0x31f   :  { %11860 = vmatmul.msk.f32.vlgmr.msra.gmra.mxu3 %vm18183_vm10, %v14345_v4  ;;  %vm18194_vm10 = vmmov %vm18193_vm8 }
 0x320   :  { %3666 = vmatpush.msra.mxu3 %v3581_v26  ;;  %v3580_v44 = vsel %vm3569_vm15, %v12486_v47, %v12512_v25  ;;  %v14513_v47 = vpop.permute.xlu2 %12529 }
 0x321   :  { %11863 = vmatmul.msk.f32.vlgmr.msrb.gmra.mxu2 %vm18190_vm13, %v14345_v4  ;;  %vm18195_vm13 = vmmov %vm18193_vm8 }
 0x322   :  { %v1943_v27 = vpop.f32.mrf.mxu3  ;;  %v14443_v22 = vpop.f32.mrf.mxu0  ;;  %3726 = vmatpush.msrb.mxu2 %v3578_v9  ;;  %v3579_v9 = vsel %vm3569_vm15, %v12512_v25, %v12487_v33 }
 0x323   :  { %v14452_v36 = vadd.f32 %v1943_v27, %v14312_v28  ;;  %v14454_v54 = vpop.f32.mrf.mxu1  ;;  %v3583_v28 = vsel %vm3569_vm15, %v12511_v16, %v12476_v13  ;;  %v14480_v13 = vld [vmem:[%s17850_s4 + $0x30] sm:$0xff] }
 0x324   :  { %v2003_v53 = vpop.f32.mrf.mxu2 }
 0x325   :  { %11857 = vmatmul.msk.f32.vlgmr.msra.gmra.mxu0 %vm18191_vm12, %v14345_v4  ;;  %11858 = vmatmul.msk.f32.vlgmr.msra.gmra.mxu1 %vm18192_vm14, %v14345_v4  ;;  %v14471_v49 = vadd.f32 %v2003_v53, %v14334_v57  ;;  %v3574_v57 = vsel %vm3569_vm15, %v12501_v51, %v12502_v61  ;;  %vm18196_vm12 = vmmov %vm18193_vm8  ;;  %v12535_v53 = vpop.permute.xlu1 %12534 }
 0x326   :  { %3606 = vmatpush.msra.mxu0 %v3584_v31  ;;  %3626 = vmatpush.msra.mxu1 %v3583_v28  ;;  %v12522_v28 = vunpack.i.h.bf16 %v14437_v58  ;;  %vm18197_vm14 = vmmov %vm18193_vm8  ;;  %v12536_v33 = vunpack.i.l.bf16 %v12535_v53 }
 0x327   :  { %11864 = vmatmul.msk.f32.vlgmr.msrb.gmra.mxu3 %vm18193_vm8, %v14345_v4 }
 0x328   :  { %3746 = vmatpush.msrb.mxu3 %v3577_v37 }
 0x329   :  { %11868 = vmatmul.msk.f32.vlgmr.msra.gmra.mxu2 %vm18194_vm10, %v14480_v13  ;;  %vm18198_vm10 = vmmov %vm18193_vm8 }
 0x32a   :  { %v2023_v29 = vpop.f32.mrf.mxu3  ;;  %v14484_v26 = vpop.f32.mrf.mxu0  ;;  %3806 = vmatpush.msra.mxu2 %v3574_v57 }
 0x32b   :  { %v14492_v16 = vadd.f32 %v2023_v29, %v14349_v30  ;;  %v14494_v27 = vpop.f32.mrf.mxu1  ;;  %v12521_v30 = vunpack.i.l.bf16 %v14437_v58 }
 0x32c   :  { %v2137_v31 = vpop.f32.mrf.mxu2 }
 0x32d   :  { %11861 = vmatmul.msk.f32.vlgmr.msrb.gmra.mxu0 %vm18195_vm13, %v14345_v4  ;;  %11862 = vmatmul.msk.f32.vlgmr.msrb.gmra.mxu1 %vm18196_vm12, %v14345_v4  ;;  %v14507_v37 = vadd.f32 %v2137_v31, %v14371_v60  ;;  %v3573_v4 = vsel %vm3569_vm15, %v12502_v61, %v12506_v3  ;;  %v3570_v60 = vsel %vm3569_vm15, %v12521_v30, %v12522_v28  ;;  %v14526_v61 = vpop.permute.xlu0 %12539  ;;  %vm18199_vm13 = vmmov %vm18193_vm8  ;;  %vm17913_vm12 = vcmp.lt.s32.totalorder %v13781_v0, 96 }
 0x32e   :  { %3686 = vmatpush.msrb.mxu0 %v3580_v44  ;;  %3706 = vmatpush.msrb.mxu1 %v3579_v9  ;;  %v3576_v44 = vsel %vm3569_vm15, %v12492_v21, %v12536_v33  ;;  %v3575_v9 = vsel %vm3569_vm15, %v12536_v33, %v12501_v51  ;;  %v3585_v21 = vsel %vm3569_vm15, %v12522_v28, %v12507_v45  ;;  %v12537_v51 = vunpack.i.h.bf16 %v12535_v53 }
 0x32f   :  { %11869 = vmatmul.msk.f32.vlgmr.msra.gmra.mxu3 %vm18197_vm14, %v14480_v13  ;;  %vm18200_vm14 = vmmov %vm18193_vm8 }
 0x330   :  { %3826 = vmatpush.msra.mxu3 %v3573_v4  ;;  %v12516_v4 = vunpack.i.l.bf16 %v14456_v52  ;;  %v3572_v45 = vsel %vm3569_vm15, %v12506_v3, %v12537_v51  ;;  %v3571_v28 = vsel %vm3569_vm15, %v12537_v51, %v12521_v30  ;;  %v12527_v3 = vunpack.i.h.bf16 %v14482_v11  ;;  %vm18204_vm15 = vmmov %vm18193_vm8 }
 0x331   :  { %11872 = vmatmul.msk.f32.vlgmr.msrb.gmra.mxu2 %vm18193_vm8, %v14480_v13 }
 0x332   :  { %v2157_v25 = vpop.f32.mrf.mxu3  ;;  %v14515_v29 = vpop.f32.mrf.mxu0  ;;  %3886 = vmatpush.msrb.mxu2 %v3570_v60 }
 0x333   :  { %v14522_v58 = vadd.f32 %v2157_v25, %v14386_v24  ;;  %v14524_v57 = vpop.f32.mrf.mxu1  ;;  %v12517_v24 = vunpack.i.h.bf16 %v14456_v52  ;;  %v12526_v52 = vunpack.i.l.bf16 %v14482_v11 }
 0x334   :  { %v2217_v31 = vpop.f32.mrf.mxu2 }
 0x335   :  { %11866 = vmatmul.msk.f32.vlgmr.msra.gmra.mxu0 %vm18198_vm10, %v14480_v13  ;;  %11867 = vmatmul.msk.f32.vlgmr.msra.gmra.mxu1 %vm18199_vm13, %v14480_v13  ;;  %v14539_v25 = vadd.f32 %v2217_v31, %v14403_v1  ;;  %v3972_v1 = vsel %vm17913_vm12, %v12516_v4, %v12517_v24  ;;  %vm18201_vm10 = vmmov %vm18193_vm8  ;;  %v12531_v31 = vunpack.i.l.bf16 %v14513_v47 }
 0x336   :  { %3766 = vmatpush.msra.mxu0 %v3576_v44  ;;  %3786 = vmatpush.msra.mxu1 %v3575_v9  ;;  %v14555_v44 = vpop.permute.xlu2 %12544  ;;  %vm18202_vm13 = vmmov %vm18193_vm8 }
 0x337   :  { %11873 = vmatmul.msk.f32.vlgmr.msrb.gmra.mxu3 %vm18200_vm14, %v14480_v13  ;;  %vm18203_vm14 = vmmov %vm18193_vm8 }
 0x338   :  { %3906 = vmatpush.msrb.mxu3 %v3585_v21 }
 0x339   :  { %11876 = vmatmul.msk.f32.vlgmr.msra.gmra.mxu2 %vm18193_vm8, %v14480_v13 }
 0x33a   :  { %v2237_v33 = vpop.f32.mrf.mxu3  ;;  %v14548_v60 = vpop.f32.mrf.mxu0  ;;  %4036 = vmatpush.msra.mxu2 %v3972_v1 }
 0x33b   :  { %v14558_v23 = vadd.f32 %v2237_v33, %v14420_v10  ;;  %v14560_v9 = vpop.f32.mrf.mxu1  ;;  %v12550_v10 = vpop.permute.xlu0 %12549  ;;  %v3971_v33 = vsel %vm17913_vm12, %v12517_v24, %v12526_v52 }
 0x33c   :  { %v2297_v53 = vpop.f32.mrf.mxu2  ;;  %v12551_v1 = vunpack.i.l.bf16 %v12550_v10 }
 0x33d   :  { %11870 = vmatmul.msk.f32.vlgmr.msrb.gmra.mxu0 %vm18201_vm10, %v14480_v13  ;;  %11871 = vmatmul.msk.f32.vlgmr.msrb.gmra.mxu1 %vm18202_vm13, %v14480_v13  ;;  %v14572_v21 = vadd.f32 %v2297_v53, %v14435_v2  ;;  %v3968_v2 = vsel %vm17913_vm12, %v12527_v3, %v12531_v31  ;;  %vm18205_vm10 = vmmov %vm18193_vm8 }
 0x33e   :  { %3846 = vmatpush.msrb.mxu0 %v3572_v45  ;;  %3866 = vmatpush.msrb.mxu1 %v3571_v28  ;;  %v12532_v45 = vunpack.i.h.bf16 %v14513_v47  ;;  %v17898_v28 = vunpack.i.h.bf16 %v14555_v44  ;;  %v14592_v11 = vpop.permute.xlu2 %12554  ;;  %vm18206_vm13 = vmmov %vm18193_vm8 }
 0x33f   :  { %11877 = vmatmul.msk.f32.vlgmr.msra.gmra.mxu3 %vm18203_vm14, %v14480_v13  ;;  %vm18207_vm14 = vmmov %vm18193_vm8  ;;  %v12556_v12 = vunpack.i.l.bf16 %v14592_v11 }
 0x340   :  { %4056 = vmatpush.msra.mxu3 %v3971_v33  ;;  %v3974_v47 = vsel %vm17913_vm12, %v17898_v28, %v12551_v1  ;;  %v3967_v42 = vsel %vm17913_vm12, %v12531_v31, %v12532_v45  ;;  %v12552_v28 = vunpack.i.h.bf16 %v12550_v10 }
 0x341   :  { %11880 = vmatmul.msk.f32.vlgmr.msrb.gmra.mxu2 %vm18204_vm15, %v14480_v13  ;;  %vm18209_vm15 = vmmov %vm18193_vm8 }
 0x342   :  { %v2317_v30 = vpop.f32.mrf.mxu3  ;;  %v14579_v51 = vpop.f32.mrf.mxu0  ;;  %4116 = vmatpush.msrb.mxu2 %v3968_v2  ;;  %v12541_v2 = vunpack.i.l.bf16 %v14526_v61  ;;  %v3970_v10 = vsel %vm17913_vm12, %v12526_v52, %v12552_v28  ;;  %v3969_v38 = vsel %vm17913_vm12, %v12552_v28, %v12527_v3 }
 0x343   :  { %v14588_v53 = vadd.f32 %v2317_v30, %v14452_v36  ;;  %v14590_v24 = vpop.f32.mrf.mxu1  ;;  %v3973_v36 = vsel %vm17913_vm12, %v12551_v1, %v12516_v4  ;;  %v12542_v30 = vunpack.i.h.bf16 %v14526_v61  ;;  %v14616_v4 = vld [vmem:[%s17850_s4 + $0x38] sm:$0xff]  ;;  %v12560_v1 = vpop.permute.xlu1 %12559 }
 0x344   :  { %v2377_v33 = vpop.f32.mrf.mxu2 }
 0x345   :  { %11874 = vmatmul.msk.f32.vlgmr.msra.gmra.mxu0 %vm18193_vm8, %v14480_v13  ;;  %11875 = vmatmul.msk.f32.vlgmr.msra.gmra.mxu1 %vm18205_vm10, %v14480_v13  ;;  %v14607_v43 = vadd.f32 %v2377_v33, %v14471_v49  ;;  %v3964_v49 = vsel %vm17913_vm12, %v12541_v2, %v12542_v30  ;;  %vm18210_vm10 = vmmov %vm18193_vm8 }
 0x346   :  { %3996 = vmatpush.msra.mxu0 %v3974_v47  ;;  %4016 = vmatpush.msra.mxu1 %v3973_v36  ;;  %v12546_v36 = vunpack.i.l.bf16 %v14555_v44 }
 0x347   :  { %11881 = vmatmul.msk.f32.vlgmr.msrb.gmra.mxu3 %vm18206_vm13, %v14480_v13  ;;  %vm18211_vm13 = vmmov %vm18193_vm8 }
 0x348   :  { %4136 = vmatpush.msrb.mxu3 %v3967_v42  ;;  %v14630_v42 = vpop.permute.xlu0 %12569  ;;  %v3963_v48 = vsel %vm17913_vm12, %v12542_v30, %v12546_v36 }
 0x349   :  { %11885 = vmatmul.msk.f32.vlgmr.msra.gmra.mxu2 %vm18207_vm14, %v14616_v4  ;;  %vm18212_vm14 = vmmov %vm18193_vm8  ;;  %v12571_v41 = vunpack.i.l.bf16 %v14630_v42 }
 0x34a   :  { %v2397_v61 = vpop.f32.mrf.mxu3  ;;  %v14618_v47 = vpop.f32.mrf.mxu0  ;;  %4196 = vmatpush.msra.mxu2 %v3964_v49 }
 0x34b   :  { %v14626_v31 = vadd.f32 %v2397_v61, %v14492_v16  ;;  %v14628_v33 = vpop.f32.mrf.mxu1  ;;  %v12562_v16 = vunpack.i.h.bf16 %v12560_v1  ;;  %v12561_v61 = vunpack.i.l.bf16 %v12560_v1  ;;  %v3946_v49 = vpop.permute.xlu2 %3945 }
 0x34c   :  { %v14640_v62 = vpop.f32.mrf.mxu2  ;;  %v14654_v28 = vpop.permute.xlu1 %12564  ;;  %v3965_v1 = vsel %vm17913_vm12, %v3946_v49, %v12541_v2 }
 0x34d   :  { %18208 = vst [vmem:[#allocation18_spill] sm:$0xff] %v14626_v31  ;;  %11878 = vmatmul.msk.f32.vlgmr.msrb.gmra.mxu0 %vm18209_vm15, %v14480_v13  ;;  %11879 = vmatmul.msk.f32.vlgmr.msrb.gmra.mxu1 %vm18193_vm8, %v14480_v13  ;;  %v3960_v3 = vsel %vm17913_vm12, %v12561_v61, %v12562_v16  ;;  %vm18213_vm15 = vmmov %vm18193_vm8  ;;  %vm4349_vm8 = vcmp.lt.s32.totalorder %v13781_v0, 95 }
 0x34e   :  { %4076 = vmatpush.msrb.mxu0 %v3970_v10  ;;  %4096 = vmatpush.msrb.mxu1 %v3969_v38  ;;  %v12557_v10 = vunpack.i.h.bf16 %v14592_v11 }
 0x34f   :  { %11886 = vmatmul.msk.f32.vlgmr.msra.gmra.mxu3 %vm18210_vm10, %v14616_v4 }
 0x350   :  { %4216 = vmatpush.msra.mxu3 %v3963_v48  ;;  %v3966_v48 = vsel %vm17913_vm12, %v12532_v45, %v3946_v49  ;;  %v18214_v45 = vunpack.i.h.bf16 %v14555_v44  ;;  %v4362_v11 = vsel %vm4349_vm8, %v12556_v12, %v12557_v10 }
 0x351   :  { %11889 = vmatmul.msk.f32.vlgmr.msrb.gmra.mxu2 %vm18211_vm13, %v14616_v4  ;;  %vm18215_vm13 = vmmov %vm18210_vm10 }
 0x352   :  { %v14646_v13 = vpop.f32.mrf.mxu3  ;;  %v14648_v52 = vpop.f32.mrf.mxu0  ;;  %4276 = vmatpush.msrb.mxu2 %v3960_v3  ;;  %v3975_v2 = vsel %vm17913_vm12, %v12562_v16, %v18214_v45 }
 0x353   :  { %v14656_v38 = vpop.f32.mrf.mxu1  ;;  %v14670_v3 = vpop.permute.xlu0 %12579 }
 0x354   :  { %v14666_v30 = vpop.f32.mrf.mxu2  ;;  %v3954_v49 = vpop.permute.xlu2 %3953  ;;  %v12582_v19 = vunpack.i.h.bf16 %v14670_v3 }
 0x355   :  { %11883 = vmatmul.msk.f32.vlgmr.msra.gmra.mxu0 %vm18212_vm14, %v14616_v4  ;;  %11884 = vmatmul.msk.f32.vlgmr.msra.gmra.mxu1 %vm18213_vm15, %v14616_v4  ;;  %v14690_v44 = vpop.permute.xlu1 %12574  ;;  %v3961_v16 = vsel %vm17913_vm12, %v3954_v49, %v12561_v61  ;;  %v3962_v45 = vsel %vm17913_vm12, %v12546_v36, %v3954_v49  ;;  %vm18216_vm14 = vmmov %vm18210_vm10  ;;  %v12567_v36 = vunpack.i.h.bf16 %v14654_v28 }
 0x356   :  { %4156 = vmatpush.msra.mxu0 %v3966_v48  ;;  %4176 = vmatpush.msra.mxu1 %v3965_v1  ;;  %v12566_v1 = vunpack.i.l.bf16 %v14654_v28  ;;  %vm18217_vm15 = vmmov %vm18210_vm10  ;;  %v12576_v40 = vunpack.i.l.bf16 %v14690_v44 }
 0x357   :  { %11890 = vmatmul.msk.f32.vlgmr.msrb.gmra.mxu3 %vm18210_vm10, %v14616_v4 }
 0x358   :  { %4296 = vmatpush.msrb.mxu3 %v3975_v2  ;;  %v4361_v61 = vsel %vm4349_vm8, %v12557_v10, %v12566_v1 }
 0x359   :  { %11893 = vmatmul.msk.f32.vlgmr.msra.gmra.mxu2 %vm18215_vm13, %v14616_v4  ;;  %vm18218_vm13 = vmmov %vm18210_vm10 }
 0x35a   :  { %v14679_v6 = vpop.f32.mrf.mxu3  ;;  %v14681_v46 = vpop.f32.mrf.mxu0  ;;  %4426 = vmatpush.msra.mxu2 %v4362_v11 }
 0x35b   :  { %v14688_v48 = vpop.f32.mrf.mxu1  ;;  %v4320_v49 = vpop.permute.xlu0 %4319 }
 0x35c   :  { %v14700_v2 = vpop.f32.mrf.mxu2  ;;  %v4363_v28 = vsel %vm4349_vm8, %v4320_v49, %v12556_v12  ;;  %v4364_v10 = vsel %vm4349_vm8, %v12582_v19, %v4320_v49  ;;  %v14739_v49 = vld [vmem:[%s17850_s4 + $0x40] sm:$0xff]  ;;  %v4328_v32 = vpop.permute.xlu2 %4327 }
 0x35d   :  { %11887 = vmatmul.msk.f32.vlgmr.msrb.gmra.mxu0 %vm18216_vm14, %v14616_v4  ;;  %11888 = vmatmul.msk.f32.vlgmr.msrb.gmra.mxu1 %vm18217_vm15, %v14616_v4  ;;  %vm18219_vm14 = vmmov %vm18210_vm10 }
 0x35e   :  { %4236 = vmatpush.msrb.mxu0 %v3962_v45  ;;  %4256 = vmatpush.msrb.mxu1 %v3961_v16  ;;  %v4358_v16 = vsel %vm4349_vm8, %v12567_v36, %v12571_v41  ;;  %v12572_v45 = vunpack.i.h.bf16 %v14630_v42  ;;  %vm18220_vm15 = vmmov %vm18210_vm10  ;;  %v12577_v42 = vunpack.i.h.bf16 %v14690_v44 }
 0x35f   :  { %11894 = vmatmul.msk.f32.vlgmr.msra.gmra.mxu3 %vm18210_vm10, %v14616_v4 }
 0x360   :  { %4446 = vmatpush.msra.mxu3 %v4361_v61  ;;  %v4357_v12 = vsel %vm4349_vm8, %v12571_v41, %v12572_v45  ;;  %v4354_v44 = vsel %vm4349_vm8, %v12576_v40, %v12577_v42 }
 0x361   :  { %11897 = vmatmul.msk.f32.vlgmr.msrb.gmra.mxu2 %vm18218_vm13, %v14616_v4  ;;  %vm18223_vm13 = vmmov %vm18210_vm10 }
 0x362   :  { %v14708_v11 = vpop.f32.mrf.mxu3  ;;  %v14710_v63 = vpop.f32.mrf.mxu0  ;;  %4506 = vmatpush.msrb.mxu2 %v4358_v16 }
 0x363   :  { %v14718_v35 = vpop.f32.mrf.mxu1  ;;  %v12585_v16 = vpop.permute.xlu1 %12584 }
 0x364   :  { %v14728_v61 = vpop.f32.mrf.mxu2  ;;  %v12586_v31 = vunpack.i.l.bf16 %v12585_v16 }
 0x365   :  { %11891 = vmatmul.msk.f32.vlgmr.msra.gmra.mxu0 %vm18219_vm14, %v14616_v4  ;;  %11892 = vmatmul.msk.f32.vlgmr.msra.gmra.mxu1 %vm18220_vm15, %v14616_v4  ;;  %vm18224_vm14 = vmmov %vm18210_vm10 }
 0x366   :  { %4386 = vmatpush.msra.mxu0 %v4364_v10  ;;  %4406 = vmatpush.msra.mxu1 %v4363_v28  ;;  %v12581_v28 = vunpack.i.l.bf16 %v14670_v3  ;;  %v4359_v10 = vsel %vm4349_vm8, %v4328_v32, %v12567_v36  ;;  %vm18225_vm15 = vmmov %vm18210_vm10 }
 0x367   :  { %11898 = vmatmul.msk.f32.vlgmr.msrb.gmra.mxu3 %vm18210_vm10, %v14616_v4 }
 0x368   :  { %4526 = vmatpush.msrb.mxu3 %v4357_v12  ;;  %v4360_v12 = vsel %vm4349_vm8, %v12566_v1, %v4328_v32  ;;  %v4353_v3 = vsel %vm4349_vm8, %v12577_v42, %v12581_v28 }
 0x369   :  { %11902 = vmatmul.msk.f32.vlgmr.msra.gmra.mxu2 %vm18223_vm13, %v14739_v49  ;;  %vm18226_vm13 = vmmov %vm18210_vm10 }
 0x36a   :  { %v14741_v55 = vpop.f32.mrf.mxu3  ;;  %v14743_v34 = vpop.f32.mrf.mxu0  ;;  %4586 = vmatpush.msra.mxu2 %v4354_v44 }
 0x36b   :  { %18221 = vst [vmem:[#allocation24_spill] sm:$0xff] %v14741_v55  ;;  %v14750_v41 = vpop.f32.mrf.mxu1  ;;  %v12587_v55 = vunpack.i.h.bf16 %v12585_v16  ;;  %v4336_v32 = vpop.permute.xlu1 %4335 }
 0x36c   :  { %18222 = vst [vmem:[#allocation25_spill] sm:$0xff] %v14743_v34  ;;  %v14760_v34 = vpop.f32.mrf.mxu2  ;;  %v4355_v44 = vsel %vm4349_vm8, %v4336_v32, %v12576_v40  ;;  %v4356_v42 = vsel %vm4349_vm8, %v12572_v45, %v4336_v32  ;;  %v13144_v40 = vmov 1   ;;  %v13106_v45 = vld [vmem:[%s17851_s5] sm:$0xff] }
 0x36d   :  { %11895 = vmatmul.msk.f32.vlgmr.msrb.gmra.mxu0 %vm18224_vm14, %v14616_v4  ;;  %11896 = vmatmul.msk.f32.vlgmr.msrb.gmra.mxu1 %vm18225_vm15, %v14616_v4  ;;  %v4350_v4 = vsel %vm4349_vm8, %v12586_v31, %v12587_v55  ;;  %vm18227_vm14 = vmmov %vm18210_vm10 }
 0x36e   :  { %4466 = vmatpush.msrb.mxu0 %v4360_v12  ;;  %4486 = vmatpush.msrb.mxu1 %v4359_v10  ;;  %vm18228_vm15 = vmmov %vm18210_vm10  ;;  %v4365_v12 = vsel %vm4349_vm8, %v12587_v55, %v12582_v19 }
 0x36f   :  { %11903 = vmatmul.msk.f32.vlgmr.msra.gmra.mxu3 %vm18210_vm10, %v14739_v49  ;;  %12588 = vset.pattern.permute.xlu2 %v13144_v40 }
 0x370   :  { %4606 = vmatpush.msra.mxu3 %v4353_v3  ;;  %4708 = vperm.xlu2 %12588, %v13106_v45   ;;  %v4344_v3 = vpop.permute.xlu0 %4343 }
 0x371   :  { %11906 = vmatmul.msk.f32.vlgmr.msrb.gmra.mxu2 %vm18226_vm13, %v14739_v49  ;;  %vm18229_vm13 = vmmov %vm18210_vm10  ;;  %v4351_v55 = vsel %vm4349_vm8, %v4344_v3, %v12586_v31  ;;  %v4352_v19 = vsel %vm4349_vm8, %v12581_v28, %v4344_v3 }
 0x372   :  { %v14766_v1 = vpop.f32.mrf.mxu3  ;;  %v14768_v36 = vpop.f32.mrf.mxu0  ;;  %4666 = vmatpush.msrb.mxu2 %v4350_v4  ;;  %vm18237_vm8 = vmmov %vm18210_vm10 }
 0x373   :  { %v14774_v16 = vpop.f32.mrf.mxu1 }
 0x374   :  { %v14784_v10 = vpop.f32.mrf.mxu2 }
 0x375   :  { %11900 = vmatmul.msk.f32.vlgmr.msra.gmra.mxu0 %vm18227_vm14, %v14739_v49  ;;  %11901 = vmatmul.msk.f32.vlgmr.msra.gmra.mxu1 %vm18228_vm15, %v14739_v49  ;;  %vm18230_vm14 = vmmov %vm18210_vm10 }
 0x376   :  { %4546 = vmatpush.msra.mxu0 %v4356_v42  ;;  %4566 = vmatpush.msra.mxu1 %v4355_v44  ;;  %vm18231_vm15 = vmmov %vm18210_vm10 }
 0x377   :  { %11907 = vmatmul.msk.f32.vlgmr.msrb.gmra.mxu3 %vm18210_vm10, %v14739_v49 }
 0x378   :  { %4686 = vmatpush.msrb.mxu3 %v4365_v12 }
 0x379   :  { %11910 = vmatmul.msk.f32.vlgmr.msra.gmra.mxu2 %vm18229_vm13, %v14739_v49  ;;  %vm18235_vm13 = vmmov %vm18210_vm10 }
 0x37a   :  { %v14793_v32 = vpop.f32.mrf.mxu3  ;;  %v14795_v4 = vpop.f32.mrf.mxu0 }
 0x37b   :  { %v14799_v44 = vpop.f32.mrf.mxu1 }
 0x37c   :  { %v14809_v42 = vpop.f32.mrf.mxu2 }
 0x37d   :  { %11904 = vmatmul.msk.f32.vlgmr.msrb.gmra.mxu0 %vm18230_vm14, %v14739_v49  ;;  %11905 = vmatmul.msk.f32.vlgmr.msrb.gmra.mxu1 %vm18231_vm15, %v14739_v49  ;;  %18232 = vst [vmem:[#allocation26_spill] sm:$0xff] %v14809_v42  ;;  %vm18238_vm14 = vmmov %vm18237_vm8 }
 0x37e   :  { %4626 = vmatpush.msrb.mxu0 %v4352_v19  ;;  %4646 = vmatpush.msrb.mxu1 %v4351_v55  ;;  %vm18240_vm15 = vmmov %vm18237_vm8 }
 0x37f   :  { %11911 = vmatmul.msk.f32.vlgmr.msra.gmra.mxu3 %vm18210_vm10, %v14739_v49  ;;  %vm18244_vm10 = vmmov %vm18237_vm8 }
 0x381   :  { %11914 = vmatmul.msk.f32.vlgmr.msrb.gmra.mxu2 %vm18235_vm13, %v14739_v49  ;;  %vm18245_vm13 = vmmov %vm18237_vm8 }
 0x382   :  { %v14813_v12 = vpop.f32.mrf.mxu3  ;;  %v14815_v40 = vpop.f32.mrf.mxu0 }
 0x383   :  { %18233 = vst [vmem:[#allocation27_spill] sm:$0xff] %v14813_v12  ;;  %v14819_v31 = vpop.f32.mrf.mxu1 }
 0x384   :  { %18234 = vst [vmem:[#allocation28_spill] sm:$0xff] %v14815_v40  ;;  %v14825_v28 = vpop.f32.mrf.mxu2 }
 0x385   :  { %18236 = vst [vmem:[#allocation29_spill] sm:$0xff] %v14819_v31  ;;  %11908 = vmatmul.msk.f32.vlgmr.msra.gmra.mxu0 %vm18237_vm8, %v14739_v49  ;;  %11909 = vmatmul.msk.f32.vlgmr.msra.gmra.mxu1 %vm18238_vm14, %v14739_v49 }
 0x386   :  { %18239 = vst [vmem:[#allocation30_spill] sm:$0xff] %v14825_v28 }
 0x387   :  { %11915 = vmatmul.msk.f32.vlgmr.msrb.gmra.mxu3 %vm18240_vm15, %v14739_v49 }
 0x38a   :  { %v14829_v45 = vpop.f32.mrf.mxu3  ;;  %v14831_v3 = vpop.f32.mrf.mxu0 }
 0x38b   :  { %18241 = vst [vmem:[#allocation31_spill] sm:$0xff] %v14829_v45  ;;  %v14833_v55 = vpop.f32.mrf.mxu1 }
 0x38c   :  { %18242 = vst [vmem:[#allocation32_spill] sm:$0xff] %v14831_v3  ;;  %v14839_v19 = vpop.f32.mrf.mxu2 }
 0x38d   :  { %18243 = vst [vmem:[#allocation33_spill] sm:$0xff] %v14833_v55  ;;  %11912 = vmatmul.msk.f32.vlgmr.msrb.gmra.mxu0 %vm18244_vm10, %v14739_v49  ;;  %11913 = vmatmul.msk.f32.vlgmr.msrb.gmra.mxu1 %vm18245_vm13, %v14739_v49 }
 0x38e   :  { %18246 = vst [vmem:[#allocation34_spill] sm:$0xff] %v14839_v19 }
 0x392   :  { %v14841_v0 = vpop.f32.mrf.mxu3  ;;  %v14843_v28 = vpop.f32.mrf.mxu0 }
 0x393   :  { %18247 = vst [vmem:[#allocation35_spill] sm:$0xff] %v14841_v0  ;;  %v14845_v31 = vpop.f32.mrf.mxu1 }
 0x394   :  { %18248 = vst [vmem:[#allocation36_spill] sm:$0xff] %v14843_v28  ;;  %v14847_v40 = vpop.f32.mrf.mxu2 }
 0x395   :  { %18249 = vst [vmem:[#allocation37_spill] sm:$0xff] %v14845_v31 }
 0x396   :  { %18250 = vst [vmem:[#allocation38_spill] sm:$0xff] %v14847_v40 }
 0x39a   :  { %v14849_v45 = vpop.f32.mrf.mxu3  ;;  %v14851_v3 = vpop.f32.mrf.mxu0 }
 0x39b   :  { %18251 = vst [vmem:[#allocation39_spill] sm:$0xff] %v14849_v45  ;;  %v14853_v55 = vpop.f32.mrf.mxu1 }
 0x39c   :  { %18252 = vst [vmem:[#allocation40_spill] sm:$0xff] %v14851_v3  ;;  %v14855_v12 = vpop.f32.mrf.mxu2 }
 0x39d   :  { %18253 = vst [vmem:[#allocation41_spill] sm:$0xff] %v14853_v55 }
 0x39e   :  { %18254 = vst [vmem:[#allocation42_spill] sm:$0xff] %v14855_v12 }
 0x3a2   :  { %v14857_v42 = vpop.f32.mrf.mxu3  ;;  %v14859_v49 = vpop.f32.mrf.mxu0 }
 0x3a3   :  { %18255 = vst [vmem:[#allocation43_spill] sm:$0xff] %v14857_v42  ;;  %v14861_v19 = vpop.f32.mrf.mxu1 }
 0x3a4   :  { %18256 = vst [vmem:[#allocation44_spill] sm:$0xff] %v14859_v49  ;;  %v14863_v0 = vpop.f32.mrf.mxu2 }
 0x3a5   :  { %18257 = vst [vmem:[#allocation45_spill] sm:$0xff] %v14861_v19 }
 0x3a6   :  { %18258 = vst [vmem:[#allocation46_spill] sm:$0xff] %v14863_v0 }
 0x3aa   :  { %v14865_v28 = vpop.f32.mrf.mxu3  ;;  %v14867_v31 = vpop.f32.mrf.mxu0 }
 0x3ab   :  { %18259 = vst [vmem:[#allocation47_spill] sm:$0xff] %v14865_v28  ;;  %v14869_v40 = vpop.f32.mrf.mxu1 }
 0x3ac   :  { %18260 = vst [vmem:[#allocation48_spill] sm:$0xff] %v14867_v31  ;;  %v14871_v45 = vpop.f32.mrf.mxu2 }
 0x3ad   :  { %18261 = vst [vmem:[#allocation49_spill] sm:$0xff] %v14869_v40 }
 0x3ae   :  { %18262 = vst [vmem:[#allocation50_spill] sm:$0xff] %v14871_v45 }
 0x3b2   :  { %v14873_v3 = vpop.f32.mrf.mxu3  ;;  %v14875_v55 = vpop.f32.mrf.mxu0 }
 0x3b3   :  { %18263 = vst [vmem:[#allocation51_spill] sm:$0xff] %v14873_v3  ;;  %v14877_v12 = vpop.f32.mrf.mxu1 }
 0x3b4   :  { %18264 = vst [vmem:[#allocation52_spill] sm:$0xff] %v14875_v55  ;;  %v14879_v42 = vpop.f32.mrf.mxu2 }
 0x3b5   :  { %18265 = vst [vmem:[#allocation53_spill] sm:$0xff] %v14877_v12 }
 0x3b6   :  { %18266 = vst [vmem:[#allocation54_spill] sm:$0xff] %v14879_v42 }
 0x3ba   :  { %v14881_v49 = vpop.f32.mrf.mxu3  ;;  %v14883_v19 = vpop.f32.mrf.mxu0 }
 0x3bb   :  { %18267 = vst [vmem:[#allocation55_spill] sm:$0xff] %v14881_v49  ;;  %v14885_v0 = vpop.f32.mrf.mxu1 }
 0x3bc   :  { %18268 = vst [vmem:[#allocation56_spill] sm:$0xff] %v14883_v19  ;;  %v14887_v28 = vpop.f32.mrf.mxu2 }
 0x3bd   :  { %18269 = vst [vmem:[#allocation57_spill] sm:$0xff] %v14885_v0 }
 0x3be   :  { %18270 = vst [vmem:[#allocation58_spill] sm:$0xff] %v14887_v28 }
 0x3c2   :  { %v14889_v31 = vpop.f32.mrf.mxu3  ;;  %v14891_v40 = vpop.f32.mrf.mxu0 }
 0x3c3   :  { %18271 = vst [vmem:[#allocation59_spill] sm:$0xff] %v14889_v31  ;;  %v14893_v45 = vpop.f32.mrf.mxu1 }
 0x3c4   :  { %18272 = vst [vmem:[#allocation60_spill] sm:$0xff] %v14891_v40  ;;  %v14895_v3 = vpop.f32.mrf.mxu2 }
 0x3c5   :  { %18273 = vst [vmem:[#allocation61_spill] sm:$0xff] %v14893_v45 }
 0x3c6   :  { %18274 = vst [vmem:[#allocation62_spill] sm:$0xff] %v14895_v3  ;;  %v11682_v3 = vld [vmem:[%s17848_s2 + $0x1] ss:$2 sm:$0xff] }
 0x3c7   :  { %vm38_vm8 = vcmp.gt.f32.partialorder %v11682_v3, 0.5  ;;  %v1884_v3 = vadd.f32 %v14443_v22, %v14314_v17 }
 0x3ca   :  { %v14897_v55 = vpop.f32.mrf.mxu3  ;;  %v14899_v12 = vpop.f32.mrf.mxu0 }
 0x3cb   :  { %18275 = vst [vmem:[#allocation63_spill] sm:$0xff] %v14897_v55  ;;  %v14901_v42 = vpop.f32.mrf.mxu1 }
 0x3cc   :  { %18276 = vst [vmem:[#allocation64_spill] sm:$0xff] %v14899_v12  ;;  %v14903_v49 = vpop.f32.mrf.mxu2  ;;  %v11683_v12 = vld [vmem:[%s17848_s2 + $0x11] ss:$2 sm:$0xff]  ;;  %s13145_s2 = smov 64  }
 0x3cd   :  { %18277 = vst [vmem:[#allocation65_spill] sm:$0xff] %v14901_v42  ;;  %vm39_vm14 = vcmp.gt.f32.partialorder %v11683_v12, 0.5  ;;  %v1824_v12 = vadd.f32 %v14422_v50, %v14288_v14  ;;  %v2792_v50 = vadd.f32 %v14640_v62, %v14507_v37  ;;  %v2800_v62 = vadd.f32 %v14700_v2, %v14572_v21 }
 0x3cf   :  { %v2405_v14 = vadd.f32 %v14560_v9, %v1824_v12  ;;  %v18296_v12 = vld [vmem:[#allocation35_spill] sm:$0xff] }
 0x3d1   :  { %v2795_v9 = vadd.f32 %v14688_v48, %v2405_v14  ;;  %v18289_v48 = vld [vmem:[#allocation34_spill] sm:$0xff] }
 0x3d2   :  { %v14905_v19 = vpop.f32.mrf.mxu3  ;;  %v14907_v0 = vpop.f32.mrf.mxu0 }
 0x3d3   :  { %18278 = vst [vmem:[#allocation66_spill] sm:$0xff] %v14905_v19  ;;  %v14909_v28 = vpop.f32.mrf.mxu1  ;;  %v1724_v19 = vadd.f32 %v14379_v15, %v14240_v59  ;;  %v1984_v59 = vadd.f32 %v14494_v27, %v14358_v56 }
 0x3d4   :  { %18279 = vst [vmem:[#allocation67_spill] sm:$0xff] %v14907_v0  ;;  %v14911_v31 = vpop.f32.mrf.mxu2 }
 0x3d5   :  { %18280 = vst [vmem:[#allocation68_spill] sm:$0xff] %v14909_v28  ;;  %v18285_v28 = vmov 0   ;;  %v2413_v56 = vadd.f32 %v14628_v33, %v1984_v59 }
 0x3d6   :  { %18281 = vst [vmem:[#allocation69_spill] sm:$0xff] %v14911_v31  ;;  %v14928_v31 = vsel %vm38_vm8, 1, %v18285_v28  ;;  %v14931_v0 = vsel %vm39_vm14, 1, %v18285_v28  ;;  %v1964_v28 = vadd.f32 %v14484_v26, %v14351_v39 }
 0x3d7   :  { %v14991_v21 = vadd.f32 %v14750_v41, %v2413_v56  ;;  %v18291_v41 = vld [vmem:[#allocation27_spill] sm:$0xff] }
 0x3d8   :  { %v2412_v39 = vadd.f32 %v14618_v47, %v1964_v28  ;;  %v18288_v47 = vld [vmem:[#allocation25_spill] sm:$0xff] }
 0x3da   :  { %v14919_v55 = vpop.f32.mrf.mxu3  ;;  %v14921_v42 = vpop.f32.mrf.mxu0  ;;  %v14988_v33 = vadd.f32 %v18288_v47, %v2412_v39  ;;  %v18301_v39 = vld [vmem:[#allocation39_spill] sm:$0xff] }
 0x3db   :  { %18282 = vst [vmem:[#allocation70_spill] sm:$0xff] %v14919_v55  ;;  %v14923_v45 = vpop.f32.mrf.mxu1  ;;  %v1744_v55 = vadd.f32 %v14388_v5, %v14242_v8  ;;  %v2400_v8 = vadd.f32 %v14515_v29, %v1724_v19  ;;  %v2408_v5 = vadd.f32 %v14579_v51, %v1884_v3  ;;  %v2796_v29 = vadd.f32 %v14666_v30, %v14539_v25  ;;  %v18295_v19 = vld [vmem:[#allocation31_spill] sm:$0xff]  ;;  %v18297_v3 = vld [vmem:[#allocation50_spill] sm:$0xff] }
 0x3dc   :  { %18283 = vst [vmem:[#allocation71_spill] sm:$0xff] %v14921_v42  ;;  %v14925_v40 = vpop.f32.mrf.mxu2  ;;  %v1804_v42 = vadd.f32 %v14412_v18, %v14281_v7  ;;  %v2804_v25 = vadd.f32 %v14728_v61, %v14607_v43  ;;  %v3136_v30 = vadd.f32 %v14799_v44, %v2795_v9  ;;  %v18309_v47 = vld [vmem:[#allocation51_spill] sm:$0xff] }
 0x3dd   :  { %18284 = vst [vmem:[#allocation72_spill] sm:$0xff] %v14925_v40  ;;  %v1904_v40 = vadd.f32 %v14454_v54, %v14322_v20  ;;  %v2401_v15 = vadd.f32 %v14524_v57, %v1744_v55  ;;  %v2793_v54 = vadd.f32 %v14646_v13, %v14522_v58  ;;  %v2790_v26 = vadd.f32 %v14648_v52, %v2400_v8  ;;  %v18298_v8 = vld [vmem:[#allocation36_spill] sm:$0xff] }
 0x3de   :  { %v2404_v7 = vadd.f32 %v14548_v60, %v1804_v42  ;;  %v2797_v57 = vadd.f32 %v14679_v6, %v14558_v23  ;;  %v2801_v58 = vadd.f32 %v14708_v11, %v14588_v53  ;;  %v2798_v51 = vadd.f32 %v14710_v63, %v2408_v5  ;;  %v18286_v6 = vld [vmem:[#allocation18_spill] sm:$0xff]  ;;  %v18287_v23 = vld [vmem:[#allocation24_spill] sm:$0xff] }
 0x3df   :  { %v2409_v20 = vadd.f32 %v14590_v24, %v1904_v40  ;;  %v2791_v27 = vadd.f32 %v14656_v38, %v2401_v15  ;;  %v3133_v13 = vadd.f32 %v14760_v34, %v2792_v50  ;;  %v3134_v53 = vadd.f32 %v14766_v1, %v2793_v54  ;;  %v18290_v11 = vld [vmem:[#allocation26_spill] sm:$0xff]  ;;  %v18292_v42 = vld [vmem:[#allocation28_spill] sm:$0xff]  ;;  %v18293_v40 = vld [vmem:[#allocation29_spill] sm:$0xff] }
 0x3e0   :  { %v2794_v60 = vadd.f32 %v14681_v46, %v2404_v7  ;;  %v2805_v46 = vadd.f32 %v18287_v23, %v18286_v6  ;;  %v3131_v63 = vadd.f32 %v14768_v36, %v2790_v26  ;;  %v3137_v52 = vadd.f32 %v14784_v10, %v2796_v29  ;;  %v18294_v10 = vld [vmem:[#allocation30_spill] sm:$0xff]  ;;  %v18299_v7 = vld [vmem:[#allocation37_spill] sm:$0xff]  ;;  %v18302_v50 = vld [vmem:[#allocation40_spill] sm:$0xff] }
 0x3e1   :  { %v2799_v24 = vadd.f32 %v14718_v35, %v2409_v20  ;;  %v3132_v35 = vadd.f32 %v14774_v16, %v2791_v27  ;;  %v3138_v43 = vadd.f32 %v14793_v32, %v2797_v57  ;;  %v3523_v2 = vadd.f32 %v18289_v48, %v3133_v13  ;;  %v18300_v5 = vld [vmem:[#allocation38_spill] sm:$0xff]  ;;  %v18303_v26 = vld [vmem:[#allocation41_spill] sm:$0xff]  ;;  %v15041_v48 = vpop.permute.xlu2 %4708 }
 0x3e2   :  { %v14954_v17 = vpop.f32.mrf.mxu3  ;;  %v14956_v18 = vpop.f32.mrf.mxu0  ;;  %v3135_v38 = vadd.f32 %v14795_v4, %v2794_v60  ;;  %v3141_v61 = vadd.f32 %v18290_v11, %v2800_v62  ;;  %v3142_v34 = vadd.f32 %v18291_v41, %v2801_v58  ;;  %v3139_v1 = vadd.f32 %v18292_v42, %v2798_v51  ;;  %v18304_v29 = vld [vmem:[#allocation42_spill] sm:$0xff]  ;;  %v18305_v62 = vld [vmem:[#allocation43_spill] sm:$0xff]  ;;  %v18306_v51 = vld [vmem:[#allocation44_spill] sm:$0xff] }
 0x3e3   :  { %v14963_v22 = vpop.f32.mrf.mxu1  ;;  %v3140_v36 = vadd.f32 %v18293_v40, %v2799_v24  ;;  %v3145_v32 = vadd.f32 %v18294_v10, %v2804_v25  ;;  %v3146_v4 = vadd.f32 %v18295_v19, %v2805_v46  ;;  %v3524_v44 = vadd.f32 %v18296_v12, %v3134_v53  ;;  %v18307_v25 = vld [vmem:[#allocation45_spill] sm:$0xff]  ;;  %v18308_v23 = vld [vmem:[#allocation46_spill] sm:$0xff]  ;;  %v18310_v53 = vld [vmem:[#allocation52_spill] sm:$0xff] }
 0x3e4   :  { %v14977_v37 = vpop.f32.mrf.mxu2  ;;  %v3913_v28 = vadd.f32 %v18297_v3, %v3523_v2  ;;  %v3521_v15 = vadd.f32 %v18298_v8, %v3131_v63  ;;  %v3522_v14 = vadd.f32 %v18299_v7, %v3132_v35  ;;  %v3527_v20 = vadd.f32 %v18300_v5, %v3137_v52 }
 0x3e5   :  { %v3528_v56 = vadd.f32 %v18301_v39, %v3138_v43  ;;  %v3525_v54 = vadd.f32 %v18302_v50, %v3135_v38  ;;  %v3526_v27 = vadd.f32 %v18303_v26, %v3136_v30  ;;  %v3531_v57 = vadd.f32 %v18304_v29, %v3141_v61  ;;  %v18312_v38 = vld [vmem:[#allocation53_spill] sm:$0xff]  ;;  %v18313_v61 = vld [vmem:[#allocation54_spill] sm:$0xff] }
 0x3e6   :  { %v4303_v60 = vadd.f32 %v14903_v49, %v3913_v28  ;;  %v3532_v58 = vadd.f32 %v18305_v62, %v3142_v34  ;;  %v15026_v24 = vadd.f32 %v18306_v51, %v3139_v1  ;;  %v15029_v6 = vadd.f32 %v18307_v25, %v3140_v36  ;;  %v18311_v49 = vld [vmem:[#allocation47_spill] sm:$0xff]  ;;  %v18315_v1 = vld [vmem:[#allocation66_spill] sm:$0xff]  ;;  %v18322_v39 = vld [vmem:[#allocation69_spill] sm:$0xff] }
 0x3e7   :  { %v15032_v46 = vadd.f32 %v18308_v23, %v3145_v32  ;;  %v3914_v13 = vadd.f32 %v18309_v47, %v3524_v44  ;;  %v3911_v63 = vadd.f32 %v18310_v53, %v3521_v15  ;;  %v4731_v52 = vperm.slane %v14928_v31, 2  ;;  %v18314_v34 = vld [vmem:[#allocation55_spill] sm:$0xff]  ;;  %v18317_v32 = vld [vmem:[#allocation56_spill] sm:$0xff]  ;;  %v18329_v29 = vld [vmem:[#allocation57_spill] sm:$0xff] }
 0x3e8   :  { %v15038_v43 = vadd.f32 %v18311_v49, %v3146_v4  ;;  %v3912_v30 = vadd.f32 %v18312_v38, %v3522_v14  ;;  %v4732_v2 = vperm.slane %v14928_v31, 3  ;;  %v4729_v11 = vperm.slane %v14928_v31, 0  ;;  %v18316_v36 = vld [vmem:[#allocation67_spill] sm:$0xff]  ;;  %v18318_v4 = vld [vmem:[#allocation68_spill] sm:$0xff] }
 0x3e9   :  { %v3917_v41 = vadd.f32 %v18313_v61, %v3527_v20  ;;  %v3918_v42 = vadd.f32 %v18314_v34, %v3528_v56  ;;  %v4304_v40 = vadd.f32 %v18315_v1, %v3914_v13  ;;  %v4301_v10 = vadd.f32 %v18316_v36, %v3911_v63  ;;  %v18338_v61 = vld [vmem:[#allocation71_spill] sm:$0xff] }
 0x3ea   :  { %v15006_v55 = vpop.f32.mrf.mxu3  ;;  %v15008_v16 = vpop.f32.mrf.mxu0  ;;  %v3915_v19 = vadd.f32 %v18317_v32, %v3525_v54  ;;  %v4302_v12 = vadd.f32 %v18318_v4, %v3912_v30  ;;  %v4730_v28 = vperm.slane %v14928_v31, 1  ;;  %v4735_v8 = vperm.slane %v14928_v31, 6  ;;  %v18339_v1 = vld [vmem:[#allocation59_spill] sm:$0xff] }
 0x3eb   :  { %v15014_v59 = vpop.f32.mrf.mxu1  ;;  %vm15056_vm15 = vcmp.eq.s32.totalorder %v4731_v52, 1  ;;  %v18319_v20 = vmov 0  ;;  %v4307_v56 = vadd.f32 %v18322_v39, %v3917_v41  ;;  %vm15061_vm10 = vcmp.eq.s32.totalorder %v4732_v2, 1 }
 0x3ec   :  { %v4428_v9 = vpop.f32.mrf.mxu2  ;;  %v18320_v20 = vsel %vm15056_vm15, 4294967295, %v18319_v20  ;;  %v18323_v50 = vmov 0  ;;  %vm15065_vm13 = vcmp.eq.s32.totalorder %v4729_v11, 1  ;;  %v18326_v54 = vmov 0 }
 0x3ed   :  { %v4693_v35 = vadd.f32 %v4428_v9, %v4303_v60  ;;  %18321 = vst [vmem:[#allocation18_spill] sm:$0xff] %v18320_v20  ;;  %v18324_v50 = vsel %vm15061_vm10, 4294967295, %v18323_v50  ;;  %v18327_v54 = vsel %vm15065_vm13, 4294967295, %v18326_v54  ;;  %v3916_v60 = vadd.f32 %v18329_v29, %v3526_v27  ;;  %v18330_v9 = vld [vmem:[#allocation58_spill] sm:$0xff] }
 0x3ee   :  { %18325 = vst [vmem:[#allocation24_spill] sm:$0xff] %v18324_v50  ;;  %v3921_v62 = vadd.f32 %v18330_v9, %v3531_v57  ;;  %vm15080_vm8 = vcmp.eq.s32.totalorder %v4730_v28, 1  ;;  %v18331_v13 = vmov 0  ;;  %vm15084_vm14 = vcmp.eq.s32.totalorder %v4735_v8, 1  ;;  %v18337_v27 = vld [vmem:[#allocation70_spill] sm:$0xff]  ;;  %v18351_v9 = vld [vmem:[#allocation61_spill] sm:$0xff] }
 0x3ef   :  { %v15054_v5 = vadd.f32 %v15041_v48, %v4693_v35  ;;  %18328 = vst [vmem:[#allocation25_spill] sm:$0xff] %v18327_v54  ;;  %v18332_v13 = vsel %vm15080_vm8, 4294967295, %v18331_v13  ;;  %v18334_v63 = vmov 0  ;;  %v4308_v57 = vadd.f32 %v18337_v27, %v3918_v42 }
 0x3f0   :  { %18333 = vst [vmem:[#allocation34_spill] sm:$0xff] %v18332_v13  ;;  %v18335_v63 = vsel %vm15084_vm14, 4294967295, %v18334_v63  ;;  %v4736_v2 = vperm.slane %v14928_v31, 7  ;;  %v4733_v11 = vperm.slane %v14928_v31, 4  ;;  %v4305_v41 = vadd.f32 %v18338_v61, %v3915_v19 }
 0x3f1   :  { %18336 = vst [vmem:[#allocation26_spill] sm:$0xff] %v18335_v63  ;;  %v15102_v49 = vsel %vm15056_vm15, %v15054_v5, 0.0  ;;  %v4734_v34 = vperm.slane %v14928_v31, 5  ;;  %v4306_v36 = vadd.f32 %v14923_v45, %v3916_v60  ;;  %v4739_v45 = vperm.slane %v14931_v0, 2 }
 0x3f2   :  { %v4448_v44 = vpop.f32.mrf.mxu3  ;;  %v4388_v3 = vpop.f32.mrf.mxu0  ;;  %vm15135_vm12 = vcmp.eq.s32.totalorder %v4736_v2, 1  ;;  %v18341_v8 = vmov 0  ;;  %vm15139_vm1 = vcmp.eq.s32.totalorder %v4733_v11, 1  ;;  %v18348_v29 = vmov 0 }
 0x3f3   :  { %v4694_v15 = vadd.f32 %v4448_v44, %v4304_v40  ;;  %v4691_v7 = vadd.f32 %v4388_v3, %v4301_v10  ;;  %v4408_v14 = vpop.f32.mrf.mxu1  ;;  %v3922_v40 = vadd.f32 %v18339_v1, %v3532_v58  ;;  %v18340_v3 = vld [vmem:[#allocation72_spill] sm:$0xff]  ;;  %v18342_v8 = vsel %vm15135_vm12, 4294967295, %v18341_v8 }
 0x3f4   :  { %v4692_v26 = vadd.f32 %v4408_v14, %v4302_v12  ;;  %v4508_v23 = vpop.f32.mrf.mxu2  ;;  %v4311_v28 = vadd.f32 %v18340_v3, %v3921_v62  ;;  %18343 = vst [vmem:[#allocation27_spill] sm:$0xff] %v18342_v8  ;;  %v18347_v14 = vld [vmem:[#allocation60_spill] sm:$0xff]  ;;  %vm15151_vm9 = vcmp.eq.s32.totalorder %v4734_v34, 1  ;;  %v3920_v62 = vadd.f32 %v18351_v9, %v15029_v6 }
 0x3f5   :  { %v15072_v51 = vadd.f32 %v15041_v48, %v4694_v15  ;;  %v15075_v25 = vadd.f32 %v15041_v48, %v4691_v7  ;;  %v4697_v53 = vadd.f32 %v4508_v23, %v4307_v56  ;;  %v18344_v15 = vmov 0  ;;  %v18352_v23 = vld [vmem:[#allocation62_spill] sm:$0xff] }
 0x3f6   :  { %v15078_v47 = vadd.f32 %v15041_v48, %v4692_v26  ;;  %v18345_v15 = vsel %vm15139_vm1, 4294967295, %v18344_v15  ;;  %v3919_v39 = vadd.f32 %v18347_v14, %v15026_v24  ;;  %v18349_v29 = vsel %vm15151_vm9, 4294967295, %v18348_v29 }
 0x3f7   :  { %v15092_v35 = vsel %vm15061_vm10, %v15072_v51, 0.0  ;;  %v15097_v52 = vsel %vm15065_vm13, %v15075_v25, 0.0  ;;  %v15105_v38 = vadd.f32 %v15041_v48, %v4697_v53  ;;  %18346 = vst [vmem:[#allocation28_spill] sm:$0xff] %v18345_v15  ;;  %v3925_v53 = vadd.f32 %v18352_v23, %v15032_v46  ;;  %v18362_v23 = vld [vmem:[#allocation32_spill] sm:$0xff] }
 0x3f8   :  { %v15109_v30 = vpack.i.bf16 %v15092_v35, %v15102_v49  ;;  %v15122_v10 = vsel %vm15080_vm8, %v15078_v47, 0.0  ;;  %18350 = vst [vmem:[#allocation29_spill] sm:$0xff] %v18349_v29  ;;  %vm15172_vm11 = vcmp.eq.s32.totalorder %v4739_v45, 1  ;;  %v18353_v11 = vmov 0 }
 0x3f9   :  { %v15127_v32 = vsel %vm15084_vm14, %v15105_v38, 0.0  ;;  %v18354_v11 = vsel %vm15172_vm11, 4294967295, %v18353_v11  ;;  %v4740_v6 = vperm.slane %v14931_v0, 3  ;;  %v4737_v34 = vperm.slane %v14931_v0, 0 }
 0x3fa   :  { %12590 = vrot.lane.b32.xlu1 %v15109_v30, %s13145_s2  ;;  %v4528_v31 = vpop.f32.mrf.mxu3  ;;  %v4468_v19 = vpop.f32.mrf.mxu0  ;;  %18355 = vst [vmem:[#allocation30_spill] sm:$0xff] %v18354_v11  ;;  %v4312_v1 = vadd.f32 %v14954_v17, %v3922_v40  ;;  %v4741_v3 = vperm.slane %v14931_v0, 4 }
 0x3fb   :  { %v4698_v4 = vadd.f32 %v4528_v31, %v4308_v57  ;;  %v4695_v58 = vadd.f32 %v4468_v19, %v4305_v41  ;;  %v4488_v12 = vpop.f32.mrf.mxu1  ;;  %v4310_v31 = vadd.f32 %v14963_v22, %v3920_v62  ;;  %v4315_v19 = vadd.f32 %v14977_v37, %v3925_v53 }
 0x3fc   :  { %v4696_v7 = vadd.f32 %v4488_v12, %v4306_v36  ;;  %v4588_v60 = vpop.f32.mrf.mxu2  ;;  %v4309_v36 = vadd.f32 %v14956_v18, %v3919_v39  ;;  %v4743_v37 = vperm.slane %v14931_v0, 6  ;;  %vm15208_vm7 = vcmp.eq.s32.totalorder %v4740_v6, 1 }
 0x3fd   :  { %v15146_v56 = vadd.f32 %v15041_v48, %v4698_v4  ;;  %v15149_v26 = vadd.f32 %v15041_v48, %v4695_v58  ;;  %v4701_v24 = vadd.f32 %v4588_v60, %v4311_v28  ;;  %v18356_v28 = vmov 0 }
 0x3fe   :  { %v15160_v27 = vadd.f32 %v15041_v48, %v4696_v7  ;;  %v18357_v28 = vsel %vm15208_vm7, 4294967295, %v18356_v28  ;;  %vm15212_vm5 = vcmp.eq.s32.totalorder %v4737_v34, 1  ;;  %v18359_v7 = vmov 0  ;;  %v18364_v34 = vld [vmem:[#allocation63_spill] sm:$0xff] }
 0x3ff   :  { %v15165_v57 = vsel %vm15135_vm12, %v15146_v56, 0.0  ;;  %v15170_v2 = vsel %vm15139_vm1, %v15149_v26, 0.0  ;;  %v15183_v61 = vadd.f32 %v15041_v48, %v4701_v24  ;;  %18358 = vst [vmem:[#allocation31_spill] sm:$0xff] %v18357_v28  ;;  %v18360_v7 = vsel %vm15212_vm5, 4294967295, %v18359_v7  ;;  %v18363_v24 = vld [vmem:[#allocation33_spill] sm:$0xff] }
 0x400   :  { %v15180_v46 = vsel %vm15151_vm9, %v15160_v27, 0.0  ;;  %v15187_v41 = vpack.i.bf16 %v15165_v57, %v15127_v32  ;;  %v12744_v17 = vpack.i.bf16 %v15170_v2, %v15092_v35  ;;  %18361 = vst [vmem:[#allocation35_spill] sm:$0xff] %v18360_v7  ;;  %v4738_v39 = vperm.slane %v14931_v0, 1 }
 0x401   :  { %v15197_v4 = vsel %vm15172_vm11, %v15183_v61, 0.0  ;;  %v12729_v45 = vpack.i.bf16 %v15180_v46, %v15097_v52  ;;  %v3143_v53 = vadd.f32 %v18362_v23, %v14988_v33  ;;  %v3144_v6 = vadd.f32 %v18363_v24, %v14991_v21 }
 0x402   :  { %v4608_v58 = vpop.f32.mrf.mxu3  ;;  %12595 = vrot.lane.b32.xlu0 %v15187_v41, %s13145_s2  ;;  %v4548_v12 = vpop.f32.mrf.mxu0  ;;  %vm15242_vm4 = vcmp.eq.s32.totalorder %v4743_v37, 1  ;;  %v18365_v33 = vmov 0  ;;  %vm15246_vm6 = vcmp.eq.s32.totalorder %v4738_v39, 1  ;;  %v18368_v21 = vmov 0  ;;  %v18372_v37 = vld [vmem:[#allocation49_spill] sm:$0xff] }
 0x403   :  { %v4702_v18 = vadd.f32 %v4608_v58, %v4312_v1  ;;  %v4699_v22 = vadd.f32 %v4548_v12, %v4309_v36  ;;  %v4568_v40 = vpop.f32.mrf.mxu1  ;;  %v3926_v1 = vadd.f32 %v18364_v34, %v15038_v43  ;;  %v18366_v33 = vsel %vm15242_vm4, 4294967295, %v18365_v33  ;;  %v18373_v34 = vld [vmem:[#allocation64_spill] sm:$0xff] }
 0x404   :  { %v4700_v14 = vadd.f32 %v4568_v40, %v4310_v31  ;;  %v4668_v62 = vpop.f32.mrf.mxu2  ;;  %18367 = vst [vmem:[#allocation50_spill] sm:$0xff] %v18366_v33  ;;  %v18369_v21 = vsel %vm15246_vm6, 4294967295, %v18368_v21  ;;  %v4742_v24 = vperm.slane %v14931_v0, 5  ;;  %vm15304_vm0 = vcmp.eq.s32.totalorder %v4741_v3, 1 }
 0x405   :  { %v15218_v60 = vadd.f32 %v15041_v48, %v4702_v18  ;;  %v15221_v9 = vadd.f32 %v15041_v48, %v4699_v22  ;;  %v4705_v36 = vadd.f32 %v4668_v62, %v4315_v19  ;;  %18370 = vst [vmem:[#allocation36_spill] sm:$0xff] %v18369_v21  ;;  %v4744_v19 = vperm.slane %v14931_v0, 7  ;;  %v18371_v22 = vld [vmem:[#allocation48_spill] sm:$0xff] }
 0x406   :  { %v15240_v12 = vadd.f32 %v15041_v48, %v4700_v14  ;;  %v3533_v40 = vadd.f32 %v18371_v22, %v3143_v53  ;;  %v4316_v14 = vadd.f32 %v15006_v55, %v3926_v1  ;;  %v3534_v62 = vadd.f32 %v18372_v37, %v3144_v6  ;;  %v18374_v1 = vld [vmem:[#allocation65_spill] sm:$0xff] }
 0x407   :  { %v15232_v31 = vsel %vm15208_vm7, %v15218_v60, 0.0  ;;  %v15237_v58 = vsel %vm15212_vm5, %v15221_v9, 0.0  ;;  %v15251_v43 = vadd.f32 %v15041_v48, %v4705_v36  ;;  %vm15276_vm3 = vcmp.eq.s32.totalorder %v4744_v19, 1 }
 0x408   :  { %v12599_v18 = vpack.i.bf16 %v15232_v31, %v15197_v4  ;;  %v3923_v36 = vadd.f32 %v18373_v34, %v3533_v40  ;;  %v15271_v53 = vsel %vm15246_vm6, %v15240_v12, 0.0  ;;  %v3924_v22 = vadd.f32 %v18374_v1, %v3534_v62 }
 0x409   :  { %v15262_v39 = vsel %vm15242_vm4, %v15251_v43, 0.0  ;;  %v18375_v37 = vmov 0  ;;  %vm15308_vm2 = vcmp.eq.s32.totalorder %v4742_v24, 1  ;;  %v12624_v3 = vpack.i.bf16 %v15237_v58, %v15271_v53 }
 0x40a   :  { %v4688_v23 = vpop.f32.mrf.mxu3  ;;  %12600 = vrot.lane.b32.xlu2 %v12599_v18, %s13145_s2  ;;  %v12604_v6 = vpack.i.bf16 %v15262_v39, %v15122_v10  ;;  %v18376_v37 = vsel %vm15276_vm3, 4294967295, %v18375_v37  ;;  %v4628_v34 = vpop.f32.mrf.mxu0 }
 0x40b   :  { %v4706_v55 = vadd.f32 %v4688_v23, %v4316_v14  ;;  %18377 = vst [vmem:[#allocation37_spill] sm:$0xff] %v18376_v37  ;;  %v4648_v44 = vpop.f32.mrf.mxu1  ;;  %v4313_v14 = vadd.f32 %v15008_v16, %v3923_v36  ;;  %v4314_v23 = vadd.f32 %v15014_v59, %v3924_v22  ;;  %v18381_v36 = vmov 0 }
 0x40c   :  { %12605 = vrot.lane.b32.xlu1 %v12604_v6, %s13145_s2  ;;  %v18382_v36 = vsel %vm15308_vm2, 4294967295, %v18381_v36  ;;  %v12734_v22 = vpack.i.bf16 %v15271_v53, %v15170_v2 }
 0x40d   :  { %v15283_v40 = vadd.f32 %v15041_v48, %v4706_v55  ;;  %v4703_v62 = vadd.f32 %v4628_v34, %v4313_v14  ;;  %v4704_v1 = vadd.f32 %v4648_v44, %v4314_v23  ;;  %v12614_v55 = vpack.i.bf16 %v15170_v2, %v15180_v46  ;;  %18383 = vst [vmem:[#allocation39_spill] sm:$0xff] %v18382_v36 }
 0x40e   :  { %v18378_v44 = vmov 0  ;;  %v18387_v2 = vpack.i.bf16 %v15197_v4, %v15180_v46 }
 0x40f   :  { %v4776_v19 = vsel %vm15276_vm3, %v15283_v40, 0.0  ;;  %v15299_v16 = vadd.f32 %v15041_v48, %v4703_v62  ;;  %v15302_v59 = vadd.f32 %v15041_v48, %v4704_v1  ;;  %v18379_v44 = vsel %vm15304_vm0, 4294967295, %v18378_v44 }
 0x410   :  { %v12609_v42 = vpack.i.bf16 %v15097_v52, %v4776_v19  ;;  %18380 = vst [vmem:[#allocation38_spill] sm:$0xff] %v18379_v44 }
 0x411   :  { %v4773_v0 = vsel %vm15304_vm0, %v15299_v16, 0.0  ;;  %v4774_v48 = vsel %vm15308_vm2, %v15302_v59, 0.0  ;;  %vm18390_vm0 = vcmask 64512  }
 0x412   :  { %12610 = vrot.lane.b32.xlu0 %v12609_v42, %s13145_s2  ;;  %12615 = vrot.lane.b32.xlu2 %v12614_v55, %s13145_s2  ;;  %v12634_v24 = vpack.i.bf16 %v4773_v0, %v4774_v48  ;;  %vm18394_vm4 = vmmov %vm18390_vm0 }
 0x414   :  { %12620 = vrot.lane.b32.xlu1 %v15109_v30, %s13146_s15 }
 0x41a   :  { %12625 = vrot.lane.b32.xlu0 %v12624_v3, %s13145_s2  ;;  %12630 = vrot.lane.b32.xlu2 %v15187_v41, %s13146_s15 }
 0x41c   :  { %12635 = vrot.lane.b32.xlu1 %v12634_v24, %s13145_s2 }
 0x422   :  { %12640 = vrot.lane.b32.xlu0 %v12599_v18, %s13146_s15  ;;  %12645 = vrot.lane.b32.xlu2 %v12604_v6, %s13146_s15 }
 0x424   :  { %12650 = vrot.lane.b32.xlu1 %v12609_v42, %s13146_s15 }
 0x42a   :  { %12655 = vrot.lane.b32.xlu0 %v12614_v55, %s13146_s15  ;;  %12660 = vrot.lane.b32.xlu2 %v15109_v30, %s13147_s16 }
 0x42c   :  { %12665 = vrot.lane.b32.xlu1 %v12624_v3, %s13146_s15 }
 0x432   :  { %12670 = vrot.lane.b32.xlu0 %v15187_v41, %s13147_s16  ;;  %12675 = vrot.lane.b32.xlu2 %v12634_v24, %s13146_s15  ;;  %s13151_s15 = smov 99  }
 0x434   :  { %12680 = vrot.lane.b32.xlu1 %v12599_v18, %s13147_s16 }
 0x43a   :  { %12685 = vrot.lane.b32.xlu0 %v12604_v6, %s13147_s16  ;;  %12690 = vrot.lane.b32.xlu2 %v12609_v42, %s13147_s16  ;;  %v12739_v42 = vpack.i.bf16 %v4774_v48, %v15237_v58 }
 0x43c   :  { %12695 = vrot.lane.b32.xlu1 %v12614_v55, %s13147_s16 }
 0x442   :  { %12700 = vrot.lane.b32.xlu0 %v15109_v30, %s13148_s17  ;;  %12705 = vrot.lane.b32.xlu2 %v12624_v3, %s13147_s16  ;;  %v12754_v30 = vpack.i.bf16 %v4773_v0, %v15232_v31 }
 0x444   :  { %12710 = vrot.lane.b32.xlu1 %v15187_v41, %s13148_s17  ;;  %v18384_v41 = vpack.i.bf16 %v15237_v58, %v15165_v57  ;;  %v15354_v57 = vld [vmem:[%s17850_s4 + $0x50] sm:$0xff] }
 0x44a   :  { %12715 = vrot.lane.b32.xlu0 %v12634_v24, %s13147_s16  ;;  %12720 = vrot.lane.b32.xlu2 %v12599_v18, %s13148_s17  ;;  %v18386_v18 = vpack.i.bf16 %v15127_v32, %v15122_v10  ;;  %v18391_v10 = vpack.i.bf16 %v15262_v39, %v15271_v53  ;;  %s13152_s16 = smov 93  }
 0x44c   :  { %12725 = vrot.lane.b32.xlu1 %v12604_v6, %s13148_s17 }
 0x452   :  { %5945 = vrot.lane.b32.xlu0 %v4776_v19, %s13148_s17  ;;  %12730 = vrot.lane.b32.xlu2 %v12729_v45, %s13148_s17  ;;  %v18385_v45 = vpack.i.bf16 %v15097_v52, %v15102_v49 }
 0x454   :  { %12735 = vrot.lane.b32.xlu1 %v12734_v22, %s13148_s17 }
 0x45a   :  { %12740 = vrot.lane.b32.xlu0 %v12739_v42, %s13148_s17  ;;  %5939 = vrot.lane.b32.xlu2 %v4773_v0, %s13148_s17  ;;  %s13154_s17 = smov 125  }
 0x45c   :  { %12745 = vrot.lane.b32.xlu1 %v12744_v17, %s13149_s18  ;;  %v18388_v17 = vld [vmem:[#allocation23_spill] sm:$0xff] }
 0x45d   :  { %vm4860_vm2 = vcmp.lt.s32.totalorder %v18388_v17, 64 }
 0x462   :  { %12750 = vrot.lane.b32.xlu0 %v18384_v41, %s13149_s18  ;;  %12755 = vrot.lane.b32.xlu2 %v12754_v30, %s13149_s18 }
 0x464   :  { %12760 = vrot.lane.b32.xlu1 %v18385_v45, %s13149_s18  ;;  %v15361_v49 = vpop.permute.xlu2 %12600 }
 0x465   :  { %v12603_v46 = vunpack.i.h.bf16 %v15361_v49  ;;  %v12602_v4 = vunpack.i.l.bf16 %v15361_v49 }
 0x467   :  { %v15381_v39 = vsel %vm4860_vm2, %v12602_v4, %v12603_v46 }
 0x468   :  { %18393 = vst [vmem:[#allocation42_spill] sm:$0xff] %v15381_v39 }
 0x46a   :  { %6676 = vrot.lane.b32.xlu0 %v4776_v19, %s13149_s18  ;;  %12765 = vrot.lane.b32.xlu2 %v18386_v18, %s13149_s18 }
 0x46c   :  { %v12591_v6 = vpop.permute.xlu1 %12590  ;;  %12770 = vrot.lane.b32.xlu1 %v18387_v2, %s13149_s18  ;;  %v12616_v53 = vpop.permute.xlu2 %12615 }
 0x46d   :  { %v12593_v34 = vunpack.i.h.bf16 %v12591_v6  ;;  %v12592_v35 = vunpack.i.l.bf16 %v12591_v6  ;;  %v12617_v62 = vunpack.i.l.bf16 %v12616_v53 }
 0x46f   :  { %v15358_v52 = vsel %vm4860_vm2, %v12592_v35, %v12593_v34 }
 0x470   :  { %18389 = vst [vmem:[#allocation40_spill] sm:$0xff] %v15358_v52  ;;  %4957 = vmatpush.msra.mxu3 %v15358_v52 }
 0x471   :  { %11921 = vmatmul.msk.f32.vlgmr.msra.gmra.mxu3 %vm18390_vm0, %v15354_v57 }
 0x472   :  { %12775 = vrot.lane.b32.xlu0 %v18391_v10, %s13149_s18  ;;  %6672 = vrot.lane.b32.xlu2 %v4774_v48, %s13149_s18  ;;  %v12618_v48 = vunpack.i.h.bf16 %v12616_v53  ;;  %s13155_s18 = smov 35  }
 0x474   :  { %v12596_v32 = vpop.permute.xlu0 %12595  ;;  %v15397_v3 = vpop.permute.xlu2 %12630 }
 0x475   :  { %v12598_v31 = vunpack.i.h.bf16 %v12596_v32  ;;  %v12597_v58 = vunpack.i.l.bf16 %v12596_v32  ;;  %v17931_v6 = vunpack.i.h.bf16 %v15397_v3  ;;  %v15425_v32 = vsel %vm4860_vm2, %v12593_v34, %v12618_v48 }
 0x477   :  { %v15372_v14 = vsel %vm4860_vm2, %v12597_v58, %v12598_v31  ;;  %v15395_v0 = vsel %vm4860_vm2, %v12617_v62, %v12597_v58  ;;  %v15433_v58 = vsel %vm4860_vm2, %v12618_v48, %v12617_v62 }
 0x478   :  { %18392 = vst [vmem:[#allocation41_spill] sm:$0xff] %v15372_v14  ;;  %5037 = vmatpush.msrb.mxu3 %v15372_v14 }
 0x479   :  { %11925 = vmatmul.msk.f32.vlgmr.msrb.gmra.mxu3 %vm18390_vm0, %v15354_v57  ;;  %18396 = vst [vmem:[#allocation44_spill] sm:$0xff] %v15395_v0 }
 0x47a   :  { %5117 = vmatpush.msra.mxu3 %v15381_v39  ;;  %18402 = vst [vmem:[#allocation52_spill] sm:$0xff] %v15433_v58 }
 0x47e   :  { %v12606_v23 = vpop.permute.xlu1 %12605 }
 0x47f   :  { %v12607_v19 = vunpack.i.l.bf16 %v12606_v23  ;;  %v12608_v24 = vunpack.i.h.bf16 %v12606_v23 }
 0x481   :  { %11929 = vmatmul.msk.f32.vlgmr.msra.gmra.mxu3 %vm18394_vm4, %v15354_v57  ;;  %v15388_v1 = vsel %vm4860_vm2, %v12607_v19, %v12592_v35  ;;  %v17932_v35 = vunpack.i.l.bf16 %v15397_v3  ;;  %vm18400_vm4 = vmmov %vm18390_vm0 }
 0x482   :  { %18395 = vst [vmem:[#allocation43_spill] sm:$0xff] %v15388_v1  ;;  %4937 = vmatpush.msra.mxu2 %v15388_v1  ;;  %vm18401_vm6 = vmmov %vm18400_vm4 }
 0x483   :  { %11920 = vmatmul.msk.f32.vlgmr.msra.gmra.mxu2 %vm18390_vm0, %v15354_v57  ;;  %vm4809_vm0 = vcmp.lt.s32.totalorder %v18388_v17, 66 }
 0x484   :  { %v12611_v55 = vpop.permute.xlu0 %12610  ;;  %5017 = vmatpush.msrb.mxu2 %v15395_v0  ;;  %v15453_v23 = vsel %vm4809_vm0, %v17932_v35, %v17931_v6 }
 0x485   :  { %v12613_v22 = vunpack.i.h.bf16 %v12611_v55  ;;  %v12612_v42 = vunpack.i.l.bf16 %v12611_v55 }
 0x486   :  { %v15412_v18 = vpop.permute.xlu1 %12620 }
 0x487   :  { %v15402_v30 = vsel %vm4860_vm2, %v12612_v42, %v12613_v22  ;;  %v15406_v41 = vsel %vm4860_vm2, %v12613_v22, %v12607_v19  ;;  %v15410_v45 = vsel %vm4860_vm2, %v12608_v24, %v12612_v42  ;;  %v17930_v2 = vunpack.i.h.bf16 %v15412_v18 }
 0x488   :  { %18397 = vst [vmem:[#allocation45_spill] sm:$0xff] %v15402_v30  ;;  %4897 = vmatpush.msra.mxu0 %v15402_v30  ;;  %4917 = vmatpush.msra.mxu1 %v15406_v41  ;;  %v12622_v10 = vunpack.i.l.bf16 %v15412_v18 }
 0x489   :  { %18398 = vst [vmem:[#allocation46_spill] sm:$0xff] %v15406_v41  ;;  %5197 = vmatpush.msrb.mxu3 %v15410_v45  ;;  %11918 = vmatmul.msk.f32.vlgmr.msra.gmra.mxu0 %vm18400_vm4, %v15354_v57 }
 0x48a   :  { %18399 = vst [vmem:[#allocation51_spill] sm:$0xff] %v15410_v45  ;;  %11919 = vmatmul.msk.f32.vlgmr.msra.gmra.mxu1 %vm18401_vm6, %v15354_v57  ;;  %4977 = vmatpush.msrb.mxu0 %v15425_v32  ;;  %v15439_v53 = vsel %vm4809_vm0, %v12622_v10, %v17930_v2  ;;  %vm18403_vm6 = vmmov %vm18400_vm4  ;;  %v15468_v2 = vpop.permute.xlu2 %12645 }
 0x48b   :  { %4997 = vmatpush.msrb.mxu1 %v15433_v58  ;;  %11933 = vmatmul.msk.f32.vlgmr.msrb.gmra.mxu3 %vm18400_vm4, %v15354_v57  ;;  %v18417_v58 = vunpack.i.h.bf16 %v15412_v18 }
 0x48c   :  { %v12626_v34 = vpop.permute.xlu0 %12625  ;;  %5280 = vmatpush.msra.mxu3 %v15439_v53  ;;  %11924 = vmatmul.msk.f32.vlgmr.msrb.gmra.mxu2 %vm18403_vm6, %v15354_v57  ;;  %vm18407_vm6 = vmmov %vm18400_vm4 }
 0x48d   :  { %v12628_v19 = vunpack.i.h.bf16 %v12626_v34  ;;  %v12627_v62 = vunpack.i.l.bf16 %v12626_v34 }
 0x48e   :  { %5360 = vmatpush.msrb.mxu3 %v15453_v23  ;;  %v12636_v42 = vpop.permute.xlu1 %12635 }
 0x48f   :  { %v15458_v55 = vsel %vm4860_vm2, %v12598_v31, %v12628_v19  ;;  %v15462_v48 = vsel %vm4860_vm2, %v12628_v19, %v12627_v62  ;;  %v15466_v22 = vsel %vm4860_vm2, %v12627_v62, %v12602_v4  ;;  %v15475_v31 = vld [vmem:[%s17850_s4 + $0x48] sm:$0xff]  ;;  %v12638_v34 = vunpack.i.h.bf16 %v12636_v42 }
 0x490   :  { %18404 = vst [vmem:[#allocation47_spill] sm:$0xff] %v15458_v55  ;;  %5057 = vmatpush.msra.mxu0 %v15458_v55  ;;  %5077 = vmatpush.msra.mxu1 %v15462_v48  ;;  %v12637_v6 = vunpack.i.l.bf16 %v12636_v42  ;;  %v12647_v42 = vunpack.i.l.bf16 %v15468_v2 }
 0x491   :  { %18405 = vst [vmem:[#allocation53_spill] sm:$0xff] %v15462_v48  ;;  %5097 = vmatpush.msra.mxu2 %v15466_v22  ;;  %11922 = vmatmul.msk.f32.vlgmr.msrb.gmra.mxu0 %vm18400_vm4, %v15354_v57  ;;  %v15486_v4 = vsel %vm4860_vm2, %v12603_v46, %v12638_v34 }
 0x492   :  { %18406 = vst [vmem:[#allocation54_spill] sm:$0xff] %v15466_v22  ;;  %11923 = vmatmul.msk.f32.vlgmr.msrb.gmra.mxu1 %vm18407_vm6, %v15354_v57  ;;  %v15490_v19 = vsel %vm4860_vm2, %v12638_v34, %v12637_v6  ;;  %v15494_v62 = vsel %vm4860_vm2, %v12637_v6, %v12608_v24  ;;  %5137 = vmatpush.msrb.mxu0 %v15486_v4  ;;  %vm18411_vm2 = vmmov %vm18400_vm4 }
 0x493   :  { %18408 = vst [vmem:[#allocation55_spill] sm:$0xff] %v15486_v4  ;;  %11937 = vmatmul.msk.f32.vlgmr.msra.gmra.mxu3 %vm18400_vm4, %v15475_v31  ;;  %5157 = vmatpush.msrb.mxu1 %v15490_v19  ;;  %v15510_v24 = vsel %vm4809_vm0, %v12647_v42, %v12622_v10  ;;  %vm18412_vm6 = vmmov %vm18411_vm2 }
 0x494   :  { %18409 = vst [vmem:[#allocation66_spill] sm:$0xff] %v15490_v19  ;;  %v15500_v49 = vpop.permute.xlu0 %12640  ;;  %5177 = vmatpush.msrb.mxu2 %v15494_v62  ;;  %vm18413_vm4 = vmmov %vm18411_vm2 }
 0x495   :  { %18410 = vst [vmem:[#allocation67_spill] sm:$0xff] %v15494_v62  ;;  %v17936_v46 = vunpack.i.h.bf16 %v15500_v49  ;;  %v12642_v34 = vunpack.i.l.bf16 %v15500_v49  ;;  %11928 = vmatmul.msk.f32.vlgmr.msra.gmra.mxu2 %vm18411_vm2, %v15354_v57  ;;  %v12648_v62 = vunpack.i.h.bf16 %v15468_v2  ;;  %vm18419_vm5 = vmmov %vm18411_vm2 }
 0x496   :  { %5260 = vmatpush.msra.mxu2 %v15510_v24  ;;  %v12651_v35 = vpop.permute.xlu1 %12650 }
 0x497   :  { %v15517_v6 = vsel %vm4809_vm0, %v12642_v34, %v17936_v46  ;;  %v12653_v19 = vunpack.i.h.bf16 %v12651_v35  ;;  %v12652_v45 = vunpack.i.l.bf16 %v12651_v35  ;;  %v15540_v35 = vpop.permute.xlu2 %12660 }
 0x498   :  { %5440 = vmatpush.msra.mxu3 %v15517_v6  ;;  %v18420_v18 = vunpack.i.h.bf16 %v15540_v35 }
 0x499   :  { %11926 = vmatmul.msk.f32.vlgmr.msra.gmra.mxu0 %vm18412_vm6, %v15354_v57  ;;  %v15527_v10 = vsel %vm4809_vm0, %v12652_v45, %v12653_v19  ;;  %v15531_v46 = vsel %vm4809_vm0, %v12653_v19, %v12647_v42  ;;  %v15535_v2 = vsel %vm4809_vm0, %v12648_v62, %v12652_v45  ;;  %vm18415_vm6 = vmmov %vm18411_vm2  ;;  %v12662_v19 = vunpack.i.l.bf16 %v15540_v35 }
 0x49a   :  { %11927 = vmatmul.msk.f32.vlgmr.msra.gmra.mxu1 %vm18413_vm4, %v15354_v57  ;;  %18414 = vst [vmem:[#allocation56_spill] sm:$0xff] %v15535_v2  ;;  %5220 = vmatpush.msra.mxu0 %v15527_v10  ;;  %v18416_v42 = vunpack.i.l.bf16 %v15397_v3  ;;  %vm5557_vm4 = vcmp.lt.s32.totalorder %v18388_v17, 62 }
 0x49b   :  { %11941 = vmatmul.msk.f32.vlgmr.msrb.gmra.mxu3 %vm18411_vm2, %v15475_v31  ;;  %5240 = vmatpush.msra.mxu1 %v15531_v46 }
 0x49c   :  { %v12656_v22 = vpop.permute.xlu0 %12655  ;;  %5520 = vmatpush.msrb.mxu3 %v15535_v2 }
 0x49d   :  { %v12658_v48 = vunpack.i.h.bf16 %v12656_v22  ;;  %v12657_v39 = vunpack.i.l.bf16 %v12656_v22  ;;  %11932 = vmatmul.msk.f32.vlgmr.msrb.gmra.mxu2 %vm18415_vm6, %v15354_v57  ;;  %vm18418_vm6 = vmmov %vm18411_vm2 }
 0x49e   :  { %v12666_v22 = vpop.permute.xlu1 %12665 }
 0x49f   :  { %v15552_v0 = vsel %vm4809_vm0, %v12657_v39, %v18416_v42  ;;  %v15558_v14 = vsel %vm4809_vm0, %v18417_v58, %v12658_v48  ;;  %v15563_v45 = vsel %vm4809_vm0, %v12658_v48, %v12657_v39  ;;  %v12667_v30 = vunpack.i.l.bf16 %v12666_v22  ;;  %v12676_v41 = vpop.permute.xlu2 %12675 }
 0x4a0   :  { %5340 = vmatpush.msrb.mxu2 %v15552_v0  ;;  %v15578_v39 = vsel %vm5557_vm4, %v12662_v19, %v18420_v18  ;;  %v12668_v48 = vunpack.i.h.bf16 %v12666_v22  ;;  %v12677_v18 = vunpack.i.l.bf16 %v12676_v41 }
 0x4a1   :  { %11930 = vmatmul.msk.f32.vlgmr.msrb.gmra.mxu0 %vm18411_vm2, %v15354_v57  ;;  %18421 = vst [vmem:[#allocation68_spill] sm:$0xff] %v15578_v39  ;;  %v15582_v58 = vsel %vm4809_vm0, %v12667_v30, %v12642_v34  ;;  %v18424_v34 = vunpack.i.h.bf16 %v15397_v3 }
 0x4a2   :  { %11931 = vmatmul.msk.f32.vlgmr.msrb.gmra.mxu1 %vm18418_vm6, %v15354_v57  ;;  %5300 = vmatpush.msrb.mxu0 %v15558_v14  ;;  %18422 = vst [vmem:[#allocation69_spill] sm:$0xff] %v15582_v58  ;;  %vm18426_vm6 = vmmov %vm18411_vm2  ;;  %v15611_v52 = vsel %vm4809_vm0, %v12668_v48, %v12667_v30 }
 0x4a3   :  { %5320 = vmatpush.msrb.mxu1 %v15563_v45  ;;  %11945 = vmatmul.msk.f32.vlgmr.msra.gmra.mxu3 %vm18419_vm5, %v15475_v31  ;;  %vm18423_vm5 = vmmov %vm18411_vm2  ;;  %18427 = vst [vmem:[#allocation58_spill] sm:$0xff] %v15611_v52 }
 0x4a4   :  { %5654 = vmatpush.msra.mxu3 %v15578_v39  ;;  %v15585_v57 = vpop.permute.xlu0 %12670  ;;  %v15598_v39 = vsel %vm4809_vm0, %v18424_v34, %v12668_v48  ;;  %v15623_v34 = vsel %vm4809_vm0, %v12677_v18, %v12648_v62 }
 0x4a5   :  { %v17950_v42 = vunpack.i.h.bf16 %v15585_v57  ;;  %v12672_v1 = vunpack.i.l.bf16 %v15585_v57  ;;  %11936 = vmatmul.msk.f32.vlgmr.msra.gmra.mxu2 %vm18423_vm5, %v15475_v31  ;;  %vm18428_vm5 = vmmov %vm18411_vm2  ;;  %18429 = vst [vmem:[#allocation70_spill] sm:$0xff] %v15623_v34 }
 0x4a6   :  { %5420 = vmatpush.msra.mxu2 %v15582_v58  ;;  %v15617_v3 = vpop.permute.xlu1 %12680 }
 0x4a7   :  { %v15604_v22 = vsel %vm5557_vm4, %v12672_v1, %v17950_v42  ;;  %v12678_v42 = vunpack.i.h.bf16 %v12676_v41  ;;  %v12682_v48 = vunpack.i.l.bf16 %v15617_v3  ;;  %v18431_v41 = vunpack.i.h.bf16 %v15500_v49 }
 0x4a8   :  { %18425 = vst [vmem:[#allocation57_spill] sm:$0xff] %v15604_v22  ;;  %v18434_v49 = vunpack.i.h.bf16 %v15617_v3 }
 0x4a9   :  { %11934 = vmatmul.msk.f32.vlgmr.msra.gmra.mxu0 %vm18411_vm2, %v15475_v31  ;;  %v15642_v62 = vsel %vm4809_vm0, %v18431_v41, %v12678_v42  ;;  %v15649_v30 = vsel %vm4809_vm0, %v12678_v42, %v12677_v18  ;;  %vm18438_vm0 = vmmov %vm18411_vm2 }
 0x4aa   :  { %11935 = vmatmul.msk.f32.vlgmr.msra.gmra.mxu1 %vm18426_vm6, %v15475_v31  ;;  %5380 = vmatpush.msra.mxu0 %v15598_v39  ;;  %vm18430_vm6 = vmmov %vm18411_vm2  ;;  %18433 = vst [vmem:[#allocation71_spill] sm:$0xff] %v15649_v30  ;;  %v15658_v41 = vsel %vm5557_vm4, %v12682_v48, %v18434_v49 }
 0x4ab   :  { %5400 = vmatpush.msra.mxu1 %v15611_v52  ;;  %11949 = vmatmul.msk.f32.vlgmr.msrb.gmra.mxu3 %vm18428_vm5, %v15475_v31  ;;  %vm18432_vm5 = vmmov %vm18411_vm2  ;;  %18435 = vst [vmem:[#allocation59_spill] sm:$0xff] %v15658_v41 }
 0x4ac   :  { %5734 = vmatpush.msrb.mxu3 %v15604_v22  ;;  %v15625_v4 = vpop.permute.xlu0 %12685  ;;  %v15633_v22 = vld [vmem:[%s17850_s4 + $0x58] sm:$0xff] }
 0x4ad   :  { %11940 = vmatmul.msk.f32.vlgmr.msrb.gmra.mxu2 %vm18411_vm2, %v15475_v31  ;;  %v12687_v2 = vunpack.i.l.bf16 %v15625_v4 }
 0x4ae   :  { %5500 = vmatpush.msrb.mxu2 %v15623_v34  ;;  %v12691_v34 = vpop.permute.xlu2 %12690  ;;  %v12696_v18 = vpop.permute.xlu1 %12695 }
 0x4af   :  { %v12693_v55 = vunpack.i.h.bf16 %v12691_v34  ;;  %v12692_v58 = vunpack.i.l.bf16 %v12691_v34  ;;  %v15665_v42 = vsel %vm5557_vm4, %v12687_v2, %v12662_v19  ;;  %v12697_v52 = vunpack.i.l.bf16 %v12696_v18 }
 0x4b0   :  { %18437 = vst [vmem:[#allocation72_spill] sm:$0xff] %v15665_v42 }
 0x4b1   :  { %11938 = vmatmul.msk.f32.vlgmr.msrb.gmra.mxu0 %vm18430_vm6, %v15475_v31  ;;  %vm18436_vm6 = vmmov %vm18411_vm2  ;;  %v15673_v49 = vsel %vm5557_vm4, %v12692_v58, %v12693_v55  ;;  %v15680_v19 = vsel %vm5557_vm4, %v12693_v55, %v12687_v2  ;;  %v15696_v55 = vsel %vm5557_vm4, %v12697_v52, %v12672_v1 }
 0x4b2   :  { %11939 = vmatmul.msk.f32.vlgmr.msrb.gmra.mxu1 %vm18432_vm5, %v15475_v31  ;;  %5460 = vmatpush.msrb.mxu0 %v15642_v62  ;;  %18439 = vst [vmem:[#allocation60_spill] sm:$0xff] %v15673_v49  ;;  %vm18440_vm5 = vmmov %vm18438_vm0  ;;  %v18589_v63 = vld [vmem:[#allocation59_spill] sm:$0xff] }
 0x4b3   :  { %5480 = vmatpush.msrb.mxu1 %v15649_v30  ;;  %11954 = vmatmul.msk.f32.vlgmr.msra.gmra.mxu3 %vm18411_vm2, %v15633_v22  ;;  %v12688_v30 = vunpack.i.h.bf16 %v15625_v4  ;;  %18441 = vst [vmem:[#allocation61_spill] sm:$0xff] %v15680_v19  ;;  %vm18442_vm2 = vmmov %vm18438_vm0 }
 0x4b4   :  { %5814 = vmatpush.msra.mxu3 %v15658_v41  ;;  %v15689_v34 = vpop.permute.xlu0 %12700  ;;  %v12698_v41 = vunpack.i.h.bf16 %v12696_v18  ;;  %18445 = vst [vmem:[#allocation32_spill] sm:$0xff] %v15696_v55 }
 0x4b5   :  { %11944 = vmatmul.msk.f32.vlgmr.msra.gmra.mxu2 %vm18436_vm6, %v15475_v31  ;;  %v15687_v4 = vsel %vm5557_vm4, %v12688_v30, %v12692_v58  ;;  %vm18444_vm6 = vmmov %vm18438_vm0 }
 0x4b6   :  { %5634 = vmatpush.msra.mxu2 %v15665_v42  ;;  %18443 = vst [vmem:[#allocation62_spill] sm:$0xff] %v15687_v4  ;;  %v12706_v58 = vpop.permute.xlu2 %12705  ;;  %v15715_v1 = vsel %vm5557_vm4, %v12698_v41, %v12697_v52 }
 0x4b7   :  { %18449 = vst [vmem:[#allocation63_spill] sm:$0xff] %v15715_v1  ;;  %v12707_v2 = vunpack.i.l.bf16 %v12706_v58 }
 0x4b9   :  { %11942 = vmatmul.msk.f32.vlgmr.msra.gmra.mxu0 %vm18438_vm0, %v15475_v31  ;;  %v15730_v52 = vsel %vm5557_vm4, %v12707_v2, %v12682_v48 }
 0x4ba   :  { %11943 = vmatmul.msk.f32.vlgmr.msra.gmra.mxu1 %vm18440_vm5, %v15475_v31  ;;  %5594 = vmatpush.msra.mxu0 %v15673_v49  ;;  %v12702_v49 = vunpack.i.l.bf16 %v15689_v34  ;;  %vm5947_vm5 = vcmp.lt.s32.totalorder %v18388_v17, 2  ;;  %18452 = vst [vmem:[#allocation48_spill] sm:$0xff] %v15730_v52 }
 0x4bb   :  { %5614 = vmatpush.msra.mxu1 %v15680_v19  ;;  %11958 = vmatmul.msk.f32.vlgmr.msrb.gmra.mxu3 %vm18442_vm2, %v15633_v22  ;;  %vm18448_vm2 = vmmov %vm18438_vm0 }
 0x4bc   :  { %5894 = vmatpush.msrb.mxu3 %v15687_v4  ;;  %v18446_v4 = vunpack.i.h.bf16 %v15540_v35  ;;  %v18451_v35 = vunpack.i.h.bf16 %v15689_v34 }
 0x4bd   :  { %11948 = vmatmul.msk.f32.vlgmr.msrb.gmra.mxu2 %vm18444_vm6, %v15475_v31  ;;  %vm18450_vm6 = vmmov %vm18438_vm0  ;;  %v18600_v37 = vld [vmem:[#allocation62_spill] sm:$0xff] }
 0x4be   :  { %5714 = vmatpush.msrb.mxu2 %v15696_v55  ;;  %v15707_v18 = vsel %vm5557_vm4, %v18446_v4, %v12698_v41  ;;  %v5960_v4 = vsel %vm5947_vm5, %v12702_v49, %v18451_v35  ;;  %v15724_v55 = vpop.permute.xlu1 %12710  ;;  %v12716_v41 = vpop.permute.xlu0 %12715  ;;  %v18454_v35 = vunpack.i.h.bf16 %v15585_v57 }
 0x4bf   :  { %18447 = vst [vmem:[#allocation33_spill] sm:$0xff] %v15707_v18  ;;  %v12712_v42 = vunpack.i.l.bf16 %v15724_v55  ;;  %v12717_v19 = vunpack.i.l.bf16 %v12716_v41  ;;  %v15743_v48 = vpop.permute.xlu2 %12720 }
 0x4c1   :  { %11946 = vmatmul.msk.f32.vlgmr.msrb.gmra.mxu0 %vm18438_vm0, %v15475_v31 }
 0x4c2   :  { %11947 = vmatmul.msk.f32.vlgmr.msrb.gmra.mxu1 %vm18448_vm2, %v15475_v31  ;;  %5674 = vmatpush.msrb.mxu0 %v15707_v18  ;;  %v12708_v31 = vunpack.i.h.bf16 %v12706_v58  ;;  %vm18453_vm2 = vmmov %vm18438_vm0 }
 0x4c3   :  { %5694 = vmatpush.msrb.mxu1 %v15715_v1  ;;  %11962 = vmatmul.msk.f32.vlgmr.msra.gmra.mxu3 %vm18450_vm6, %v15633_v22  ;;  %v17968_v1 = vunpack.i.h.bf16 %v15724_v55  ;;  %vm18456_vm6 = vmmov %vm18438_vm0 }
 0x4c4   :  { %6044 = vmatpush.msra.mxu3 %v5960_v4  ;;  %v15741_v4 = vsel %vm5557_vm4, %v18454_v35, %v12708_v31  ;;  %v15750_v58 = vsel %vm5557_vm4, %v12708_v31, %v12707_v2  ;;  %v12718_v35 = vunpack.i.h.bf16 %v12716_v41 }
 0x4c5   :  { %11953 = vmatmul.msk.f32.vlgmr.msra.gmra.mxu2 %vm18438_vm0, %v15633_v22  ;;  %18455 = vst [vmem:[#allocation49_spill] sm:$0xff] %v15741_v4  ;;  %v5956_v57 = vsel %vm5947_vm5, %v12712_v42, %v17968_v1 }
 0x4c6   :  { %5794 = vmatpush.msra.mxu2 %v15730_v52  ;;  %18457 = vst [vmem:[#allocation64_spill] sm:$0xff] %v15750_v58  ;;  %v15763_v52 = vsel %vm5557_vm4, %v12717_v19, %v12688_v30  ;;  %v15765_v2 = vpop.permute.xlu1 %12725  ;;  %v18461_v30 = vunpack.i.h.bf16 %v15617_v3  ;;  %v15789_v31 = vsel %vm5557_vm4, %v12718_v35, %v12717_v19  ;;  %v18465_v3 = vunpack.i.h.bf16 %v15743_v48  ;;  %v5946_v19 = vpop.permute.xlu0 %5945 }
 0x4c7   :  { %18459 = vst [vmem:[#allocation65_spill] sm:$0xff] %v15763_v52  ;;  %v12727_v41 = vunpack.i.l.bf16 %v15765_v2 }
 0x4c8   :  { %v15782_v1 = vsel %vm5557_vm4, %v18461_v30, %v12718_v35  ;;  %18463 = vst [vmem:[#allocation74_spill] sm:$0xff] %v15789_v31  ;;  %vm18467_vm4 = vmmov %vm18438_vm0 }
 0x4c9   :  { %11951 = vmatmul.msk.f32.vlgmr.msra.gmra.mxu0 %vm18453_vm2, %v15633_v22  ;;  %vm18458_vm2 = vmmov %vm18438_vm0  ;;  %18462 = vst [vmem:[#allocation73_spill] sm:$0xff] %v15782_v1 }
 0x4ca   :  { %11952 = vmatmul.msk.f32.vlgmr.msra.gmra.mxu1 %vm18456_vm6, %v15633_v22  ;;  %5754 = vmatpush.msra.mxu0 %v15741_v4  ;;  %vm18460_vm6 = vmmov %vm18438_vm0 }
 0x4cb   :  { %5774 = vmatpush.msra.mxu1 %v15750_v58  ;;  %11966 = vmatmul.msk.f32.vlgmr.msrb.gmra.mxu3 %vm18438_vm0, %v15633_v22  ;;  %v12722_v58 = vunpack.i.l.bf16 %v15743_v48 }
 0x4cc   :  { %6124 = vmatpush.msrb.mxu3 %v5956_v57  ;;  %v15773_v57 = vld [vmem:[%s17850_s4 + $0x60] sm:$0xff] }
 0x4cd   :  { %11957 = vmatmul.msk.f32.vlgmr.msrb.gmra.mxu2 %vm18458_vm2, %v15633_v22  ;;  %vm18464_vm2 = vmmov %vm18438_vm0  ;;  %v5952_v30 = vsel %vm5947_vm5, %v12722_v58, %v18465_v3 }
 0x4ce   :  { %5874 = vmatpush.msrb.mxu2 %v15763_v52  ;;  %v12731_v52 = vpop.permute.xlu2 %12730  ;;  %v12736_v3 = vpop.permute.xlu1 %12735 }
 0x4cf   :  { %v12732_v35 = vunpack.i.l.bf16 %v12731_v52 }
 0x4d1   :  { %11955 = vmatmul.msk.f32.vlgmr.msrb.gmra.mxu0 %vm18460_vm6, %v15633_v22  ;;  %vm18466_vm6 = vmmov %vm18438_vm0  ;;  %v5963_v4 = vsel %vm5947_vm5, %v5946_v19, %v12732_v35 }
 0x4d2   :  { %11956 = vmatmul.msk.f32.vlgmr.msrb.gmra.mxu1 %vm18438_vm0, %v15633_v22  ;;  %5834 = vmatpush.msrb.mxu0 %v15782_v1  ;;  %v5961_v1 = vsel %vm5947_vm5, %v12727_v41, %v12702_v49  ;;  %v12733_v49 = vunpack.i.h.bf16 %v12731_v52  ;;  %v18471_v52 = vunpack.i.h.bf16 %v15689_v34 }
 0x4d3   :  { %5854 = vmatpush.msrb.mxu1 %v15789_v31  ;;  %11971 = vmatmul.msk.f32.vlgmr.msra.gmra.mxu3 %vm18464_vm2, %v15773_v57  ;;  %v12728_v31 = vunpack.i.h.bf16 %v15765_v2  ;;  %vm18468_vm2 = vmmov %vm18438_vm0  ;;  %v12737_v2 = vunpack.i.l.bf16 %v12736_v3 }
 0x4d4   :  { %6204 = vmatpush.msra.mxu3 %v5952_v30  ;;  %v5962_v30 = vsel %vm5947_vm5, %v12732_v35, %v12727_v41  ;;  %v5957_v18 = vsel %vm5947_vm5, %v12733_v49, %v12712_v42 }
 0x4d5   :  { %11961 = vmatmul.msk.f32.vlgmr.msra.gmra.mxu2 %vm18466_vm6, %v15633_v22  ;;  %vm18469_vm6 = vmmov %vm18438_vm0  ;;  %v5959_v41 = vsel %vm5947_vm5, %v18471_v52, %v12737_v2  ;;  %v5958_v35 = vsel %vm5947_vm5, %v12737_v2, %v12733_v49  ;;  %v18478_v49 = vunpack.i.h.bf16 %v15743_v48 }
 0x4d6   :  { %6024 = vmatpush.msra.mxu2 %v5961_v1  ;;  %v5948_v1 = vsel %vm5947_vm5, %v12728_v31, %v5946_v19  ;;  %v12741_v19 = vpop.permute.xlu0 %12740 }
 0x4d7   :  { %v12742_v42 = vunpack.i.l.bf16 %v12741_v19 }
 0x4d9   :  { %11959 = vmatmul.msk.f32.vlgmr.msra.gmra.mxu0 %vm18467_vm4, %v15633_v22  ;;  %vm18470_vm4 = vmmov %vm18438_vm0 }
 0x4da   :  { %11960 = vmatmul.msk.f32.vlgmr.msra.gmra.mxu1 %vm18438_vm0, %v15633_v22  ;;  %5984 = vmatpush.msra.mxu0 %v5963_v4  ;;  %v12738_v4 = vunpack.i.h.bf16 %v12736_v3 }
 0x4db   :  { %6004 = vmatpush.msra.mxu1 %v5962_v30  ;;  %11975 = vmatmul.msk.f32.vlgmr.msrb.gmra.mxu3 %vm18468_vm2, %v15773_v57  ;;  %vm18472_vm2 = vmmov %vm18438_vm0  ;;  %v15860_v30 = vld [vmem:[%s17850_s4 + $0x68] sm:$0xff] }
 0x4dc   :  { %6284 = vmatpush.msrb.mxu3 %v5948_v1  ;;  %v5953_v34 = vsel %vm5947_vm5, %v12738_v4, %v12722_v58  ;;  %v5940_v58 = vpop.permute.xlu2 %5939 }
 0x4dd   :  { %11965 = vmatmul.msk.f32.vlgmr.msrb.gmra.mxu2 %vm18469_vm6, %v15633_v22  ;;  %vm18473_vm6 = vmmov %vm18438_vm0  ;;  %v5951_v1 = vsel %vm5947_vm5, %v18478_v49, %v5940_v58 }
 0x4de   :  { %6104 = vmatpush.msrb.mxu2 %v5957_v18  ;;  %v18475_v18 = vunpack.i.h.bf16 %v15724_v55 }
 0x4e0   :  { %v5955_v3 = vsel %vm5947_vm5, %v18475_v18, %v12742_v42 }
 0x4e1   :  { %11963 = vmatmul.msk.f32.vlgmr.msrb.gmra.mxu0 %vm18470_vm4, %v15633_v22  ;;  %vm18474_vm4 = vmmov %vm18438_vm0 }
 0x4e2   :  { %11964 = vmatmul.msk.f32.vlgmr.msrb.gmra.mxu1 %vm18438_vm0, %v15633_v22  ;;  %6064 = vmatpush.msrb.mxu0 %v5959_v41  ;;  %v12743_v22 = vunpack.i.h.bf16 %v12741_v19 }
 0x4e3   :  { %6084 = vmatpush.msrb.mxu1 %v5958_v35  ;;  %11979 = vmatmul.msk.f32.vlgmr.msra.gmra.mxu3 %vm18472_vm2, %v15773_v57  ;;  %vm18476_vm2 = vmmov %vm18438_vm0 }
 0x4e4   :  { %11991 = vmatpush.msk.msra.mxu3 %vm15061_vm10, %v15072_v51  ;;  %v5954_v51 = vsel %vm5947_vm5, %v12742_v42, %v12738_v4  ;;  %v5949_v55 = vsel %vm5947_vm5, %v12743_v22, %v12728_v31  ;;  %v15946_v52 = vpop.permute.xlu2 %12755 }
 0x4e5   :  { %11970 = vmatmul.msk.f32.vlgmr.msra.gmra.mxu2 %vm18473_vm6, %v15773_v57  ;;  %vm18477_vm6 = vmmov %vm18438_vm0  ;;  %v12757_v35 = vunpack.i.l.bf16 %v15946_v52 }
 0x4e6   :  { %6184 = vmatpush.msra.mxu2 %v5953_v34 }
 0x4e9   :  { %11968 = vmatmul.msk.f32.vlgmr.msra.gmra.mxu0 %vm18474_vm4, %v15773_v57  ;;  %vm18479_vm4 = vmmov %vm18438_vm0 }
 0x4ea   :  { %11969 = vmatmul.msk.f32.vlgmr.msra.gmra.mxu1 %vm18438_vm0, %v15773_v57  ;;  %6144 = vmatpush.msra.mxu0 %v5955_v3 }
 0x4eb   :  { %6164 = vmatpush.msra.mxu1 %v5954_v51  ;;  %11983 = vmatmul.msk.f32.vlgmr.msrb.gmra.mxu3 %vm18476_vm2, %v15773_v57  ;;  %vm18480_vm2 = vmmov %vm18438_vm0 }
 0x4ec   :  { %11999 = vmatpush.msk.msrb.mxu3 %vm15135_vm12, %v15146_v56  ;;  %v5950_v56 = vsel %vm5947_vm5, %v5940_v58, %v12743_v22  ;;  %vm18483_vm5 = vmmov %vm18438_vm0  ;;  %v15980_v22 = vld [vmem:[%s17850_s4 + $0x70] sm:$0xff]  ;;  %v12766_v3 = vpop.permute.xlu2 %12765 }
 0x4ed   :  { %11974 = vmatmul.msk.f32.vlgmr.msrb.gmra.mxu2 %vm18477_vm6, %v15773_v57  ;;  %vm18481_vm6 = vmmov %vm18438_vm0 }
 0x4ee   :  { %6264 = vmatpush.msrb.mxu2 %v5949_v55 }
 0x4f1   :  { %11972 = vmatmul.msk.f32.vlgmr.msrb.gmra.mxu0 %vm18479_vm4, %v15773_v57  ;;  %vm18482_vm4 = vmmov %vm18438_vm0 }
 0x4f2   :  { %11973 = vmatmul.msk.f32.vlgmr.msrb.gmra.mxu1 %vm18438_vm0, %v15773_v57  ;;  %6224 = vmatpush.msrb.mxu0 %v5951_v1 }
 0x4f3   :  { %6244 = vmatpush.msrb.mxu1 %v5950_v56  ;;  %11992 = vmatmul.msk.f32.vlgmr.msra.gmra.mxu3 %vm18480_vm2, %v15860_v30  ;;  %vm18484_vm2 = vmmov %vm18438_vm0 }
 0x4f4   :  { %12007 = vmatpush.msk.msra.mxu3 %vm15208_vm7, %v15218_v60  ;;  %v15877_v48 = vpop.f32.mrf.mxu3  ;;  %v15896_v60 = vpop.permute.xlu1 %12745  ;;  %vm18495_vm7 = vnez %v18366_v33 }
 0x4f5   :  { %11978 = vmatmul.msk.f32.vlgmr.msra.gmra.mxu2 %vm18481_vm6, %v15773_v57  ;;  %vm18485_vm6 = vmmov %vm18438_vm0 }
 0x4f6   :  { %11989 = vmatpush.msk.msra.mxu2 %vm15056_vm15, %v15054_v5 }
 0x4f9   :  { %11976 = vmatmul.msk.f32.vlgmr.msra.gmra.mxu0 %vm18482_vm4, %v15773_v57  ;;  %vm17974_vm4 = vcmp.lt.s32.totalorder %v18388_v17, 126 }
 0x4fa   :  { %11977 = vmatmul.msk.f32.vlgmr.msra.gmra.mxu1 %vm18483_vm5, %v15773_v57  ;;  %11985 = vmatpush.msk.msra.mxu0 %vm15065_vm13, %v15075_v25  ;;  %v12748_v25 = vunpack.i.h.bf16 %v15896_v60  ;;  %vm18486_vm5 = vmmov %vm18438_vm0 }
 0x4fb   :  { %11987 = vmatpush.msk.msra.mxu1 %vm15080_vm8, %v15078_v47  ;;  %12000 = vmatmul.msk.f32.vlgmr.msrb.gmra.mxu3 %vm18438_vm0, %v15860_v30  ;;  %v12747_v47 = vunpack.i.l.bf16 %v15896_v60 }
 0x4fc   :  { %12015 = vmatpush.msk.msrb.mxu3 %vm15276_vm3, %v15283_v40  ;;  %v15901_v5 = vpop.f32.mrf.mxu3  ;;  %v15927_v40 = vpop.permute.xlu0 %12750 }
 0x4fd   :  { %11982 = vmatmul.msk.f32.vlgmr.msrb.gmra.mxu2 %vm18484_vm2, %v15773_v57  ;;  %vm18487_vm2 = vmmov %vm18438_vm0  ;;  %v12761_v41 = vpop.permute.xlu1 %12760 }
 0x4fe   :  { %11997 = vmatpush.msk.msrb.mxu2 %vm15084_vm14, %v15105_v38  ;;  %v6690_v38 = vsel %vm17974_vm4, %v12747_v47, %v12748_v25  ;;  %v12762_v18 = vunpack.i.l.bf16 %v12761_v41  ;;  %v12763_v51 = vunpack.i.h.bf16 %v12761_v41  ;;  %v12768_v41 = vunpack.i.h.bf16 %v12766_v3 }
 0x501   :  { %11980 = vmatmul.msk.f32.vlgmr.msrb.gmra.mxu0 %vm18485_vm6, %v15773_v57  ;;  %vm18488_vm6 = vmmov %vm18438_vm0 }
 0x502   :  { %11981 = vmatmul.msk.f32.vlgmr.msrb.gmra.mxu1 %vm18486_vm5, %v15773_v57  ;;  %11993 = vmatpush.msk.msrb.mxu0 %vm15139_vm1, %v15149_v26  ;;  %v12752_v57 = vunpack.i.l.bf16 %v15927_v40  ;;  %vm18489_vm5 = vmmov %vm18438_vm0 }
 0x503   :  { %11995 = vmatpush.msk.msrb.mxu1 %vm15151_vm9, %v15160_v27  ;;  %12008 = vmatmul.msk.f32.vlgmr.msra.gmra.mxu3 %vm18438_vm0, %v15860_v30  ;;  %v12753_v27 = vunpack.i.h.bf16 %v15927_v40  ;;  %vm18490_vm0 = vnez %v18360_v7  ;;  %vm18492_vm4 = vmmov %vm18489_vm5  ;;  %v18583_v7 = vld [vmem:[#allocation57_spill] sm:$0xff] }
 0x504   :  { %6775 = vmatpush.msra.mxu3 %v6690_v38  ;;  %v15929_v31 = vpop.f32.mrf.mxu3  ;;  %v6677_v56 = vpop.permute.xlu0 %6676 }
 0x505   :  { %11990 = vmatmul.msk.f32.vlgmr.msra.gmra.mxu2 %vm18487_vm2, %v15860_v30  ;;  %vm18491_vm2 = vnez %v18369_v21 }
 0x506   :  { %v15933_v26 = vpop.f32.mrf.mxu0  ;;  %12005 = vmatpush.msk.msra.mxu2 %vm15172_vm11, %v15183_v61  ;;  %v15942_v4 = vpop.f32.mrf.mxu2  ;;  %vm18499_vm11 = vmmov %vm18492_vm4 }
 0x507   :  { %v15940_v2 = vpop.f32.mrf.mxu1 }
 0x509   :  { %11986 = vmatmul.msk.f32.vlgmr.msra.gmra.mxu0 %vm18488_vm6, %v15860_v30  ;;  %vm18493_vm6 = vcmp.lt.s32.totalorder %v18388_v17, 126 }
 0x50a   :  { %11988 = vmatmul.msk.f32.vlgmr.msra.gmra.mxu1 %vm18489_vm5, %v15860_v30  ;;  %12001 = vmatpush.msk.msra.mxu0 %vm18490_vm0, %v15221_v9  ;;  %v6686_v61 = vsel %vm18493_vm6, %v12752_v57, %v12753_v27  ;;  %vm18494_vm5 = vmmov %vm18492_vm4  ;;  %vm18500_vm0 = vcmp.lt.s32.totalorder %v18388_v17, 126 }
 0x50b   :  { %12003 = vmatpush.msk.msra.mxu1 %vm18491_vm2, %v15240_v12  ;;  %12016 = vmatmul.msk.f32.vlgmr.msrb.gmra.mxu3 %vm18492_vm4, %v15860_v30  ;;  %v17979_v12 = vunpack.i.h.bf16 %v15946_v52  ;;  %vm18496_vm6 = vmmov %vm18492_vm4 }
 0x50c   :  { %6855 = vmatpush.msrb.mxu3 %v6686_v61 }
 0x50d   :  { %11998 = vmatmul.msk.f32.vlgmr.msrb.gmra.mxu2 %vm18494_vm5, %v15860_v30  ;;  %vm18497_vm5 = vnez %v18379_v44  ;;  %v18576_v44 = vld [vmem:[#allocation68_spill] sm:$0xff] }
 0x50e   :  { %v15964_v19 = vpop.f32.mrf.mxu3  ;;  %v15966_v9 = vpop.f32.mrf.mxu0  ;;  %12013 = vmatpush.msk.msrb.mxu2 %vm18495_vm7, %v15251_v43  ;;  %vm18498_vm7 = vnez %v18382_v36  ;;  %v6682_v43 = vsel %vm18500_vm0, %v12757_v35, %v17979_v12 }
 0x50f   :  { %v15973_v42 = vpop.f32.mrf.mxu1  ;;  %v15975_v34 = vpop.f32.mrf.mxu2 }
 0x511   :  { %11994 = vmatmul.msk.f32.vlgmr.msrb.gmra.mxu0 %vm18492_vm4, %v15860_v30 }
 0x512   :  { %11996 = vmatmul.msk.f32.vlgmr.msrb.gmra.mxu1 %vm18496_vm6, %v15860_v30  ;;  %12009 = vmatpush.msk.msrb.mxu0 %vm18497_vm5, %v15299_v16  ;;  %vm18501_vm6 = vmmov %vm18500_vm0 }
 0x513   :  { %12011 = vmatpush.msk.msrb.mxu1 %vm18498_vm7, %v15302_v59  ;;  %12021 = vmatmul.msk.f32.vlgmr.msra.gmra.mxu3 %vm18499_vm11, %v15980_v22  ;;  %v6691_v16 = vsel %vm18501_vm6, %v12762_v18, %v12747_v47  ;;  %v12767_v59 = vunpack.i.l.bf16 %v12766_v3  ;;  %vm18502_vm11 = vmmov %vm18492_vm4  ;;  %v12771_v47 = vpop.permute.xlu1 %12770 }
 0x514   :  { %6935 = vmatpush.msra.mxu3 %v6682_v43  ;;  %vm18503_vm6 = vmmov %vm18500_vm0 }
 0x515   :  { %12006 = vmatmul.msk.f32.vlgmr.msra.gmra.mxu2 %vm18492_vm4, %v15860_v30  ;;  %v6693_v61 = vsel %vm18500_vm0, %v12763_v51, %v12767_v59  ;;  %vm18504_vm5 = vmmov %vm18500_vm0 }
 0x516   :  { %v5282_v55 = vpop.f32.mrf.mxu3  ;;  %v16002_v58 = vpop.f32.mrf.mxu0  ;;  %6755 = vmatpush.msra.mxu2 %v6691_v16  ;;  %v6694_v43 = vsel %vm18504_vm5, %v6677_v56, %v12763_v51  ;;  %vm18505_vm7 = vmmov %vm18492_vm4  ;;  %v12772_v16 = vunpack.i.l.bf16 %v12771_v47 }
 0x517   :  { %v16005_v49 = vadd.f32 %v5282_v55, %v15877_v48  ;;  %v16007_v1 = vpop.f32.mrf.mxu1  ;;  %v6692_v48 = vsel %vm18503_vm6, %v12767_v59, %v12762_v18  ;;  %v6687_v55 = vsel %vm18500_vm0, %v12768_v41, %v12752_v57  ;;  %v12773_v59 = vunpack.i.h.bf16 %v12771_v47  ;;  %vm18508_vm5 = vmmov %vm18500_vm0 }
 0x518   :  { %v16009_v38 = vpop.f32.mrf.mxu2  ;;  %v6689_v57 = vsel %vm18508_vm5, %v12748_v25, %v12772_v16  ;;  %vm18509_vm6 = vmmov %vm18500_vm0 }
 0x519   :  { %12002 = vmatmul.msk.f32.vlgmr.msra.gmra.mxu0 %vm18502_vm11, %v15860_v30  ;;  %vm18506_vm11 = vmmov %vm18492_vm4 }
 0x51a   :  { %12004 = vmatmul.msk.f32.vlgmr.msra.gmra.mxu1 %vm18492_vm4, %v15860_v30  ;;  %6715 = vmatpush.msra.mxu0 %v6693_v61  ;;  %vm18511_vm0 = vmmov %vm18492_vm4 }
 0x51b   :  { %6735 = vmatpush.msra.mxu1 %v6692_v48  ;;  %12025 = vmatmul.msk.f32.vlgmr.msrb.gmra.mxu3 %vm18505_vm7, %v15980_v22  ;;  %vm18507_vm7 = vmmov %vm18492_vm4  ;;  %v12776_v48 = vpop.permute.xlu0 %12775 }
 0x51c   :  { %7015 = vmatpush.msrb.mxu3 %v6694_v43  ;;  %v12777_v47 = vunpack.i.l.bf16 %v12776_v48 }
 0x51d   :  { %12014 = vmatmul.msk.f32.vlgmr.msrb.gmra.mxu2 %vm18506_vm11, %v15860_v30  ;;  %vm18510_vm11 = vmmov %vm18492_vm4 }
 0x51e   :  { %v5362_v61 = vpop.f32.mrf.mxu3  ;;  %v16027_v12 = vpop.f32.mrf.mxu0  ;;  %6835 = vmatpush.msrb.mxu2 %v6687_v55  ;;  %v12778_v55 = vunpack.i.h.bf16 %v12776_v48  ;;  %v16086_v48 = vld [vmem:[%s17850_s4 + $0x78] sm:$0xff] }
 0x51f   :  { %v16030_v18 = vadd.f32 %v5362_v61, %v15901_v5  ;;  %v16032_v3 = vpop.f32.mrf.mxu1  ;;  %v6688_v5 = vsel %vm18509_vm6, %v12772_v16, %v12768_v41  ;;  %v6673_v61 = vpop.permute.xlu2 %6672 }
 0x520   :  { %v16034_v51 = vpop.f32.mrf.mxu2 }
 0x521   :  { %12010 = vmatmul.msk.f32.vlgmr.msrb.gmra.mxu0 %vm18507_vm7, %v15860_v30  ;;  %vm18512_vm7 = vmmov %vm18508_vm5 }
 0x522   :  { %12012 = vmatmul.msk.f32.vlgmr.msrb.gmra.mxu1 %vm18492_vm4, %v15860_v30  ;;  %6795 = vmatpush.msrb.mxu0 %v6689_v57  ;;  %v6683_v60 = vsel %vm18512_vm7, %v12773_v59, %v12757_v35  ;;  %vm18513_vm5 = vmmov %vm18511_vm0 }
 0x523   :  { %6815 = vmatpush.msrb.mxu1 %v6688_v5  ;;  %12029 = vmatmul.msk.f32.vlgmr.msra.gmra.mxu3 %vm18510_vm11, %v15980_v22  ;;  %vm18514_vm4 = vmmov %vm18509_vm6  ;;  %v18519_v5 = vunpack.i.h.bf16 %v15946_v52 }
 0x524   :  { %7116 = vmatpush.msra.mxu3 %v15558_v14  ;;  %v6685_v14 = vsel %vm18514_vm4, %v12753_v27, %v12777_v47  ;;  %vm18515_vm6 = vmmov %vm18511_vm0 }
 0x525   :  { %12020 = vmatmul.msk.f32.vlgmr.msra.gmra.mxu2 %vm18511_vm0, %v15980_v22  ;;  %vm18516_vm11 = vmmov %vm18514_vm4 }
 0x526   :  { %v5442_v25 = vpop.f32.mrf.mxu3  ;;  %v16053_v43 = vpop.f32.mrf.mxu0  ;;  %6915 = vmatpush.msra.mxu2 %v6683_v60  ;;  %vm18517_vm7 = vmmov %vm18511_vm0 }
 0x527   :  { %v16056_v30 = vadd.f32 %v5442_v25, %v15929_v31  ;;  %v16058_v41 = vpop.f32.mrf.mxu1  ;;  %v6684_v31 = vsel %vm18516_vm11, %v12777_v47, %v12773_v59  ;;  %v6681_v47 = vsel %vm18514_vm4, %v18519_v5, %v6673_v61  ;;  %vm18521_vm11 = vmmov %vm18511_vm0  ;;  %v18542_v5 = vld [vmem:[#allocation71_spill] sm:$0xff] }
 0x528   :  { %v5262_v16 = vpop.f32.mrf.mxu2 }
 0x529   :  { %12018 = vmatmul.msk.f32.vlgmr.msra.gmra.mxu0 %vm18513_vm5, %v15980_v22  ;;  %v5263_v35 = vadd.f32 %v5262_v16, %v15942_v4  ;;  %vm18518_vm5 = vmmov %vm18514_vm4 }
 0x52a   :  { %12019 = vmatmul.msk.f32.vlgmr.msra.gmra.mxu1 %vm18515_vm6, %v15980_v22  ;;  %6875 = vmatpush.msra.mxu0 %v6685_v14  ;;  %v6679_v40 = vsel %vm18518_vm5, %v12778_v55, %v6677_v56  ;;  %vm18520_vm6 = vmmov %vm18511_vm0 }
 0x52b   :  { %6895 = vmatpush.msra.mxu1 %v6684_v31  ;;  %12033 = vmatmul.msk.f32.vlgmr.msrb.gmra.mxu3 %vm18511_vm0, %v15980_v22  ;;  %vm18522_vm0 = vmmov %vm18514_vm4 }
 0x52c   :  { %7196 = vmatpush.msrb.mxu3 %v15598_v39  ;;  %vm18524_vm5 = vmmov %vm18520_vm6 }
 0x52d   :  { %12024 = vmatmul.msk.f32.vlgmr.msrb.gmra.mxu2 %vm18517_vm7, %v15980_v22  ;;  %vm18523_vm7 = vmmov %vm18520_vm6 }
 0x52e   :  { %v5522_v27 = vpop.f32.mrf.mxu3  ;;  %v16078_v4 = vpop.f32.mrf.mxu0  ;;  %6995 = vmatpush.msrb.mxu2 %v6679_v40  ;;  %vm18525_vm4 = vmmov %vm18524_vm5  ;;  %v16175_v40 = vld [vmem:[%s17850_s4 + $0x80] sm:$0xff] }
 0x52f   :  { %v5523_v57 = vadd.f32 %v5522_v27, %v15964_v19  ;;  %v16081_v59 = vpop.f32.mrf.mxu1  ;;  %v6680_v19 = vsel %vm18522_vm0, %v6673_v61, %v12778_v55  ;;  %vm18528_vm0 = vmmov %vm18525_vm4 }
 0x530   :  { %v5342_v39 = vpop.f32.mrf.mxu2 }
 0x531   :  { %12022 = vmatmul.msk.f32.vlgmr.msrb.gmra.mxu0 %vm18520_vm6, %v15980_v22  ;;  %v5343_v56 = vadd.f32 %v5342_v39, %v15975_v34  ;;  %vm18526_vm6 = vmmov %vm18525_vm4 }
 0x532   :  { %12023 = vmatmul.msk.f32.vlgmr.msrb.gmra.mxu1 %vm18521_vm11, %v15980_v22  ;;  %6955 = vmatpush.msrb.mxu0 %v6681_v47  ;;  %vm18527_vm11 = vmmov %vm18525_vm4  ;;  %v18545_v47 = vld [vmem:[#allocation55_spill] sm:$0xff] }
 0x533   :  { %6975 = vmatpush.msrb.mxu1 %v6680_v19  ;;  %12038 = vmatmul.msk.f32.vlgmr.msra.gmra.mxu3 %vm18523_vm7, %v16086_v48  ;;  %vm18529_vm7 = vmmov %vm18528_vm0 }
 0x534   :  { %7276 = vmatpush.msra.mxu3 %v15642_v62 }
 0x535   :  { %12028 = vmatmul.msk.f32.vlgmr.msra.gmra.mxu2 %vm18524_vm5, %v15980_v22  ;;  %vm18530_vm5 = vmmov %vm18528_vm0 }
 0x536   :  { %v5656_v52 = vpop.f32.mrf.mxu3  ;;  %v16104_v60 = vpop.f32.mrf.mxu0  ;;  %7096 = vmatpush.msra.mxu2 %v15439_v53 }
 0x537   :  { %v16108_v34 = vadd.f32 %v5656_v52, %v16005_v49  ;;  %v16110_v25 = vpop.f32.mrf.mxu1 }
 0x538   :  { %v5422_v16 = vpop.f32.mrf.mxu2 }
 0x539   :  { %12026 = vmatmul.msk.f32.vlgmr.msra.gmra.mxu0 %vm18525_vm4, %v15980_v22  ;;  %v5423_v55 = vadd.f32 %v5422_v16, %v16009_v38  ;;  %vm18531_vm4 = vmmov %vm18528_vm0 }
 0x53a   :  { %12027 = vmatmul.msk.f32.vlgmr.msra.gmra.mxu1 %vm18526_vm6, %v15980_v22  ;;  %7056 = vmatpush.msra.mxu0 %v15531_v46  ;;  %vm18532_vm6 = vmmov %vm18528_vm0 }
 0x53b   :  { %7076 = vmatpush.msra.mxu1 %v15510_v24  ;;  %12042 = vmatmul.msk.f32.vlgmr.msrb.gmra.mxu3 %vm18527_vm11, %v16086_v48  ;;  %vm18533_vm11 = vmmov %vm18528_vm0 }
 0x53c   :  { %7356 = vmatpush.msrb.mxu3 %v15527_v10 }
 0x53d   :  { %12032 = vmatmul.msk.f32.vlgmr.msrb.gmra.mxu2 %vm18528_vm0, %v15980_v22 }
 0x53e   :  { %v5736_v53 = vpop.f32.mrf.mxu3  ;;  %v16124_v62 = vpop.f32.mrf.mxu0  ;;  %7176 = vmatpush.msrb.mxu2 %v15453_v23 }
 0x53f   :  { %v16128_v49 = vadd.f32 %v5736_v53, %v16030_v18  ;;  %v16130_v38 = vpop.f32.mrf.mxu1 }
 0x540   :  { %v5502_v46 = vpop.f32.mrf.mxu2 }
 0x541   :  { %12030 = vmatmul.msk.f32.vlgmr.msrb.gmra.mxu0 %vm18529_vm7, %v15980_v22  ;;  %v5503_v24 = vadd.f32 %v5502_v46, %v16034_v51  ;;  %v18535_v51 = vld [vmem:[#allocation69_spill] sm:$0xff]  ;;  %vm18536_vm7 = vmmov %vm18528_vm0 }
 0x542   :  { %12031 = vmatmul.msk.f32.vlgmr.msrb.gmra.mxu1 %vm18530_vm5, %v15980_v22  ;;  %7136 = vmatpush.msrb.mxu0 %v15563_v45  ;;  %vm18538_vm5 = vmmov %vm18528_vm0 }
 0x543   :  { %7156 = vmatpush.msrb.mxu1 %v15552_v0  ;;  %12046 = vmatmul.msk.f32.vlgmr.msra.gmra.mxu3 %vm18531_vm4, %v16086_v48  ;;  %vm18540_vm4 = vmmov %vm18528_vm0 }
 0x544   :  { %7457 = vmatpush.msra.mxu3 %v15425_v32  ;;  %v18534_v32 = vld [vmem:[#allocation58_spill] sm:$0xff] }
 0x545   :  { %12037 = vmatmul.msk.f32.vlgmr.msra.gmra.mxu2 %vm18532_vm6, %v16086_v48  ;;  %vm18541_vm6 = vmmov %vm18528_vm0 }
 0x546   :  { %v5816_v23 = vpop.f32.mrf.mxu3  ;;  %v16144_v10 = vpop.f32.mrf.mxu0  ;;  %7256 = vmatpush.msra.mxu2 %v15517_v6  ;;  %v18537_v6 = vld [vmem:[#allocation47_spill] sm:$0xff] }
 0x547   :  { %v16148_v18 = vadd.f32 %v5816_v23, %v16056_v30  ;;  %v16150_v22 = vpop.f32.mrf.mxu1  ;;  %v18549_v23 = vld [vmem:[#allocation46_spill] sm:$0xff] }
 0x548   :  { %v5636_v45 = vpop.f32.mrf.mxu2 }
 0x549   :  { %12035 = vmatmul.msk.f32.vlgmr.msra.gmra.mxu0 %vm18533_vm11, %v16086_v48  ;;  %v16154_v0 = vadd.f32 %v5636_v45, %v5263_v35  ;;  %v18539_v35 = vld [vmem:[#allocation56_spill] sm:$0xff]  ;;  %vm18544_vm11 = vmmov %vm18528_vm0  ;;  %v18550_v45 = vld [vmem:[#allocation43_spill] sm:$0xff] }
 0x54a   :  { %12036 = vmatmul.msk.f32.vlgmr.msra.gmra.mxu1 %vm18528_vm0, %v16086_v48  ;;  %7216 = vmatpush.msra.mxu0 %v18534_v32  ;;  %v18552_v32 = vld [vmem:[#allocation45_spill] sm:$0xff] }
 0x54b   :  { %7236 = vmatpush.msra.mxu1 %v18535_v51  ;;  %12050 = vmatmul.msk.f32.vlgmr.msrb.gmra.mxu3 %vm18536_vm7, %v16086_v48  ;;  %vm18547_vm7 = vmmov %vm18528_vm0 }
 0x54c   :  { %7537 = vmatpush.msrb.mxu3 %v18537_v6 }
 0x54d   :  { %12041 = vmatmul.msk.f32.vlgmr.msrb.gmra.mxu2 %vm18538_vm5, %v16086_v48  ;;  %vm18548_vm5 = vmmov %vm18528_vm0 }
 0x54e   :  { %v5896_v30 = vpop.f32.mrf.mxu3  ;;  %v16165_v14 = vpop.f32.mrf.mxu0  ;;  %7336 = vmatpush.msrb.mxu2 %v18539_v35 }
 0x54f   :  { %v16168_v31 = vadd.f32 %v5896_v30, %v5523_v57  ;;  %v16170_v61 = vpop.f32.mrf.mxu1  ;;  %v18543_v57 = vld [vmem:[#allocation70_spill] sm:$0xff] }
 0x550   :  { %v5716_v27 = vpop.f32.mrf.mxu2 }
 0x551   :  { %12039 = vmatmul.msk.f32.vlgmr.msrb.gmra.mxu0 %vm18540_vm4, %v16086_v48  ;;  %v16179_v39 = vadd.f32 %v5716_v27, %v5343_v56  ;;  %v18546_v56 = vld [vmem:[#allocation40_spill] sm:$0xff]  ;;  %vm18551_vm4 = vmmov %vm18528_vm0 }
 0x552   :  { %12040 = vmatmul.msk.f32.vlgmr.msrb.gmra.mxu1 %vm18541_vm6, %v16086_v48  ;;  %7296 = vmatpush.msrb.mxu0 %v18542_v5  ;;  %vm18553_vm6 = vmmov %vm18528_vm0  ;;  %v18556_v5 = vld [vmem:[#allocation52_spill] sm:$0xff] }
 0x553   :  { %7316 = vmatpush.msrb.mxu1 %v18543_v57  ;;  %12055 = vmatmul.msk.f32.vlgmr.msra.gmra.mxu3 %vm18544_vm11, %v16175_v40  ;;  %vm18555_vm11 = vmmov %vm18528_vm0  ;;  %v18557_v57 = vld [vmem:[#allocation44_spill] sm:$0xff] }
 0x554   :  { %7617 = vmatpush.msra.mxu3 %v18545_v47  ;;  %v18559_v47 = vld [vmem:[#allocation33_spill] sm:$0xff] }
 0x555   :  { %12045 = vmatmul.msk.f32.vlgmr.msra.gmra.mxu2 %vm18528_vm0, %v16086_v48 }
 0x556   :  { %v16190_v19 = vpop.f32.mrf.mxu3  ;;  %v16192_v52 = vpop.f32.mrf.mxu0  ;;  %7437 = vmatpush.msra.mxu2 %v18546_v56  ;;  %v13150_v56 = vmov 2  }
 0x557   :  { %v16195_v16 = vpop.f32.mrf.mxu1  ;;  %12779 = vset.pattern.permute.xlu1 %v13150_v56  ;;  %v18568_v56 = vld [vmem:[#allocation51_spill] sm:$0xff] }
 0x558   :  { %v5796_v53 = vpop.f32.mrf.mxu2 }
 0x559   :  { %12043 = vmatmul.msk.f32.vlgmr.msra.gmra.mxu0 %vm18547_vm7, %v16086_v48  ;;  %v16199_v46 = vadd.f32 %v5796_v53, %v5423_v55  ;;  %v18554_v55 = vld [vmem:[#allocation41_spill] sm:$0xff]  ;;  %vm18558_vm7 = vmmov %vm18528_vm0 }
 0x55a   :  { %12044 = vmatmul.msk.f32.vlgmr.msra.gmra.mxu1 %vm18548_vm5, %v16086_v48  ;;  %7397 = vmatpush.msra.mxu0 %v18549_v23  ;;  %vm18560_vm5 = vmmov %vm18528_vm0  ;;  %v18561_v23 = vld [vmem:[#allocation42_spill] sm:$0xff] }
 0x55b   :  { %7417 = vmatpush.msra.mxu1 %v18550_v45  ;;  %12059 = vmatmul.msk.f32.vlgmr.msrb.gmra.mxu3 %vm18551_vm4, %v16175_v40  ;;  %vm18562_vm4 = vmmov %vm18528_vm0 }
 0x55c   :  { %7697 = vmatpush.msrb.mxu3 %v18552_v32 }
 0x55d   :  { %12049 = vmatmul.msk.f32.vlgmr.msrb.gmra.mxu2 %vm18553_vm6, %v16086_v48  ;;  %vm18563_vm6 = vmmov %vm18528_vm0 }
 0x55e   :  { %v16210_v51 = vpop.f32.mrf.mxu3  ;;  %v16212_v6 = vpop.f32.mrf.mxu0  ;;  %7517 = vmatpush.msrb.mxu2 %v18554_v55  ;;  %v18564_v55 = vld [vmem:[#allocation53_spill] sm:$0xff] }
 0x55f   :  { %v16215_v30 = vpop.f32.mrf.mxu1 }
 0x560   :  { %v5876_v35 = vpop.f32.mrf.mxu2 }
 0x561   :  { %12047 = vmatmul.msk.f32.vlgmr.msrb.gmra.mxu0 %vm18555_vm11, %v16086_v48  ;;  %v16219_v27 = vadd.f32 %v5876_v35, %v5503_v24  ;;  %v13107_v24 = vld [vmem:[%s17851_s5] sm:$0xff]  ;;  %v18565_v35 = vld [vmem:[#allocation54_spill] sm:$0xff]  ;;  %vm18566_vm11 = vmmov %vm18528_vm0 }
 0x562   :  { %12048 = vmatmul.msk.f32.vlgmr.msrb.gmra.mxu1 %vm18528_vm0, %v16086_v48  ;;  %7477 = vmatpush.msrb.mxu0 %v18556_v5  ;;  %v18567_v5 = vld [vmem:[#allocation49_spill] sm:$0xff] }
 0x563   :  { %7497 = vmatpush.msrb.mxu1 %v18557_v57  ;;  %12063 = vmatmul.msk.f32.vlgmr.msra.gmra.mxu3 %vm18558_vm7, %v16175_v40  ;;  %vm18569_vm7 = vmmov %vm18528_vm0 }
 0x564   :  { %7798 = vmatpush.msra.mxu3 %v18559_v47  ;;  %8060 = vperm.xlu1 %12779, %v13107_v24  }
 0x565   :  { %12054 = vmatmul.msk.f32.vlgmr.msra.gmra.mxu2 %vm18560_vm5, %v16175_v40  ;;  %vm18570_vm5 = vmmov %vm18528_vm0 }
 0x566   :  { %v16233_v48 = vpop.f32.mrf.mxu3  ;;  %v16235_v53 = vpop.f32.mrf.mxu0  ;;  %7597 = vmatpush.msra.mxu2 %v18561_v23  ;;  %v16263_v23 = vld [vmem:[%s17850_s4 + $0x88] sm:$0xff] }
 0x567   :  { %v16238_v45 = vpop.f32.mrf.mxu1 }
 0x568   :  { %v16240_v32 = vpop.f32.mrf.mxu2 }
 0x569   :  { %12052 = vmatmul.msk.f32.vlgmr.msra.gmra.mxu0 %vm18562_vm4, %v16175_v40  ;;  %vm18573_vm4 = vmmov %vm18528_vm0 }
 0x56a   :  { %12053 = vmatmul.msk.f32.vlgmr.msra.gmra.mxu1 %vm18563_vm6, %v16175_v40  ;;  %7557 = vmatpush.msra.mxu0 %v18564_v55  ;;  %vm18575_vm6 = vmmov %vm18528_vm0 }
 0x56b   :  { %7577 = vmatpush.msra.mxu1 %v18565_v35  ;;  %12067 = vmatmul.msk.f32.vlgmr.msrb.gmra.mxu3 %vm18566_vm11, %v16175_v40  ;;  %v18571_v35 = vld [vmem:[#allocation66_spill] sm:$0xff]  ;;  %vm18577_vm11 = vmmov %vm18528_vm0 }
 0x56c   :  { %7878 = vmatpush.msrb.mxu3 %v18567_v5  ;;  %v18572_v5 = vld [vmem:[#allocation67_spill] sm:$0xff] }
 0x56d   :  { %12058 = vmatmul.msk.f32.vlgmr.msrb.gmra.mxu2 %vm18528_vm0, %v16175_v40 }
 0x56e   :  { %v16253_v57 = vpop.f32.mrf.mxu3  ;;  %v16255_v47 = vpop.f32.mrf.mxu0  ;;  %7677 = vmatpush.msrb.mxu2 %v18568_v56  ;;  %v18574_v56 = vld [vmem:[#allocation73_spill] sm:$0xff] }
 0x56f   :  { %v16258_v24 = vpop.f32.mrf.mxu1 }
 0x570   :  { %v16265_v55 = vpop.f32.mrf.mxu2 }
 0x571   :  { %12056 = vmatmul.msk.f32.vlgmr.msrb.gmra.mxu0 %vm18569_vm7, %v16175_v40  ;;  %vm18580_vm7 = vmmov %vm18528_vm0 }
 0x572   :  { %12057 = vmatmul.msk.f32.vlgmr.msrb.gmra.mxu1 %vm18570_vm5, %v16175_v40  ;;  %7637 = vmatpush.msrb.mxu0 %v18571_v35  ;;  %v18578_v35 = vld [vmem:[#allocation61_spill] sm:$0xff]  ;;  %vm18582_vm5 = vmmov %vm18528_vm0 }
 0x573   :  { %7657 = vmatpush.msrb.mxu1 %v18572_v5  ;;  %12072 = vmatmul.msk.f32.vlgmr.msra.gmra.mxu3 %vm18573_vm4, %v16263_v23  ;;  %v18579_v5 = vld [vmem:[#allocation72_spill] sm:$0xff]  ;;  %vm18584_vm4 = vmmov %vm18528_vm0 }
 0x574   :  { %7958 = vmatpush.msra.mxu3 %v18574_v56  ;;  %v18581_v56 = vld [vmem:[#allocation60_spill] sm:$0xff] }
 0x575   :  { %12062 = vmatmul.msk.f32.vlgmr.msra.gmra.mxu2 %vm18575_vm6, %v16175_v40  ;;  %vm18585_vm6 = vmmov %vm18528_vm0 }
 0x576   :  { %v16278_v17 = vpop.f32.mrf.mxu3  ;;  %v16280_v33 = vpop.f32.mrf.mxu0  ;;  %7778 = vmatpush.msra.mxu2 %v18576_v44 }
 0x577   :  { %v16283_v36 = vpop.f32.mrf.mxu1 }
 0x578   :  { %v16285_v28 = vpop.f32.mrf.mxu2 }
 0x579   :  { %12060 = vmatmul.msk.f32.vlgmr.msra.gmra.mxu0 %vm18577_vm11, %v16175_v40  ;;  %vm18588_vm11 = vmmov %vm18528_vm0 }
 0x57a   :  { %12061 = vmatmul.msk.f32.vlgmr.msra.gmra.mxu1 %vm18528_vm0, %v16175_v40  ;;  %7738 = vmatpush.msra.mxu0 %v18578_v35  ;;  %v18586_v35 = vld [vmem:[#allocation63_spill] sm:$0xff] }
 0x57b   :  { %7758 = vmatpush.msra.mxu1 %v18579_v5  ;;  %12076 = vmatmul.msk.f32.vlgmr.msrb.gmra.mxu3 %vm18580_vm7, %v16263_v23  ;;  %v18587_v5 = vld [vmem:[#allocation32_spill] sm:$0xff]  ;;  %vm18592_vm7 = vmmov %vm18528_vm0 }
 0x57c   :  { %8038 = vmatpush.msrb.mxu3 %v18581_v56 }
 0x57d   :  { %12066 = vmatmul.msk.f32.vlgmr.msrb.gmra.mxu2 %vm18582_vm5, %v16175_v40  ;;  %vm18593_vm5 = vmmov %vm18528_vm0 }
 0x57e   :  { %v16298_v44 = vpop.f32.mrf.mxu3  ;;  %v16300_v11 = vpop.f32.mrf.mxu0  ;;  %7858 = vmatpush.msrb.mxu2 %v18583_v7 }
 0x57f   :  { %v16303_v21 = vpop.f32.mrf.mxu1 }
 0x580   :  { %v16305_v8 = vpop.f32.mrf.mxu2 }
 0x581   :  { %12064 = vmatmul.msk.f32.vlgmr.msrb.gmra.mxu0 %vm18584_vm4, %v16175_v40  ;;  %vm18596_vm4 = vmmov %vm18528_vm0 }
 0x582   :  { %12065 = vmatmul.msk.f32.vlgmr.msrb.gmra.mxu1 %vm18585_vm6, %v16175_v40  ;;  %7818 = vmatpush.msrb.mxu0 %v18586_v35  ;;  %v18594_v40 = vld [vmem:[#allocation64_spill] sm:$0xff]  ;;  %vm18597_vm6 = vmmov %vm18528_vm0 }
 0x583   :  { %7838 = vmatpush.msrb.mxu1 %v18587_v5  ;;  %12080 = vmatmul.msk.f32.vlgmr.msra.gmra.mxu3 %vm18588_vm11, %v16263_v23  ;;  %v18595_v35 = vld [vmem:[#allocation48_spill] sm:$0xff]  ;;  %vm18603_vm11 = vmmov %vm18528_vm0 }
 0x585   :  { %12071 = vmatmul.msk.f32.vlgmr.msra.gmra.mxu2 %vm18528_vm0, %v16263_v23 }
 0x586   :  { %v16317_v7 = vpop.f32.mrf.mxu3  ;;  %v16319_v56 = vpop.f32.mrf.mxu0  ;;  %7938 = vmatpush.msra.mxu2 %v18589_v63 }
 0x587   :  { %v16322_v15 = vpop.f32.mrf.mxu1 }
 0x588   :  { %18590 = vst [vmem:[#allocation58_spill] sm:$0xff] %v16322_v15  ;;  %v16324_v29 = vpop.f32.mrf.mxu2 }
 0x589   :  { %18591 = vst [vmem:[#allocation69_spill] sm:$0xff] %v16324_v29  ;;  %12069 = vmatmul.msk.f32.vlgmr.msra.gmra.mxu0 %vm18592_vm7, %v16263_v23  ;;  %vm18606_vm7 = vmmov %vm18528_vm0 }
 0x58a   :  { %12070 = vmatmul.msk.f32.vlgmr.msra.gmra.mxu1 %vm18593_vm5, %v16263_v23  ;;  %7898 = vmatpush.msra.mxu0 %v18594_v40  ;;  %v18604_v40 = vld [vmem:[#allocation74_spill] sm:$0xff]  ;;  %vm18610_vm5 = vmmov %vm18528_vm0 }
 0x58b   :  { %7918 = vmatpush.msra.mxu1 %v18595_v35  ;;  %12084 = vmatmul.msk.f32.vlgmr.msrb.gmra.mxu3 %vm18596_vm4, %v16263_v23  ;;  %v18605_v35 = vld [vmem:[#allocation65_spill] sm:$0xff]  ;;  %vm18611_vm4 = vmmov %vm18528_vm0 }
 0x58d   :  { %12075 = vmatmul.msk.f32.vlgmr.msrb.gmra.mxu2 %vm18597_vm6, %v16263_v23  ;;  %vm18612_vm6 = vmmov %vm18528_vm0 }
 0x58e   :  { %v16336_v63 = vpop.f32.mrf.mxu3  ;;  %v16338_v5 = vpop.f32.mrf.mxu0  ;;  %8018 = vmatpush.msrb.mxu2 %v18600_v37 }
 0x58f   :  { %18598 = vst [vmem:[#allocation47_spill] sm:$0xff] %v16336_v63  ;;  %v16341_v20 = vpop.f32.mrf.mxu1 }
 0x590   :  { %18599 = vst [vmem:[#allocation56_spill] sm:$0xff] %v16338_v5  ;;  %v16343_v13 = vpop.f32.mrf.mxu2 }
 0x591   :  { %18601 = vst [vmem:[#allocation71_spill] sm:$0xff] %v16341_v20  ;;  %12073 = vmatmul.msk.f32.vlgmr.msrb.gmra.mxu0 %vm18603_vm11, %v16263_v23  ;;  %vm18617_vm11 = vmmov %vm18528_vm0 }
 0x592   :  { %18602 = vst [vmem:[#allocation70_spill] sm:$0xff] %v16343_v13  ;;  %12074 = vmatmul.msk.f32.vlgmr.msrb.gmra.mxu1 %vm18528_vm0, %v16263_v23  ;;  %7978 = vmatpush.msrb.mxu0 %v18604_v40 }
 0x593   :  { %7998 = vmatpush.msrb.mxu1 %v18605_v35 }
 0x595   :  { %12079 = vmatmul.msk.f32.vlgmr.msra.gmra.mxu2 %vm18606_vm7, %v16263_v23 }
 0x596   :  { %v16353_v50 = vpop.f32.mrf.mxu3  ;;  %v16355_v37 = vpop.f32.mrf.mxu0 }
 0x597   :  { %18607 = vst [vmem:[#allocation55_spill] sm:$0xff] %v16355_v37  ;;  %v16357_v54 = vpop.f32.mrf.mxu1 }
 0x598   :  { %18608 = vst [vmem:[#allocation40_spill] sm:$0xff] %v16357_v54  ;;  %v16359_v13 = vpop.f32.mrf.mxu2 }
 0x599   :  { %18609 = vst [vmem:[#allocation46_spill] sm:$0xff] %v16359_v13  ;;  %12077 = vmatmul.msk.f32.vlgmr.msra.gmra.mxu0 %vm18610_vm5, %v16263_v23 }
 0x59a   :  { %12078 = vmatmul.msk.f32.vlgmr.msra.gmra.mxu1 %vm18611_vm4, %v16263_v23 }
 0x59d   :  { %12083 = vmatmul.msk.f32.vlgmr.msrb.gmra.mxu2 %vm18612_vm6, %v16263_v23 }
 0x59e   :  { %v16367_v40 = vpop.f32.mrf.mxu3  ;;  %v16369_v35 = vpop.f32.mrf.mxu0 }
 0x59f   :  { %18613 = vst [vmem:[#allocation43_spill] sm:$0xff] %v16367_v40  ;;  %v16371_v20 = vpop.f32.mrf.mxu1 }
 0x5a0   :  { %18614 = vst [vmem:[#allocation45_spill] sm:$0xff] %v16369_v35  ;;  %v16373_v37 = vpop.f32.mrf.mxu2 }
 0x5a1   :  { %18615 = vst [vmem:[#allocation41_spill] sm:$0xff] %v16371_v20  ;;  %12081 = vmatmul.msk.f32.vlgmr.msrb.gmra.mxu0 %vm18617_vm11, %v16263_v23 }
 0x5a2   :  { %18616 = vst [vmem:[#allocation52_spill] sm:$0xff] %v16373_v37  ;;  %12082 = vmatmul.msk.f32.vlgmr.msrb.gmra.mxu1 %vm18528_vm0, %v16263_v23 }
 0x5a6   :  { %v16379_v13 = vpop.f32.mrf.mxu3  ;;  %v16381_v54 = vpop.f32.mrf.mxu0 }
 0x5a7   :  { %18618 = vst [vmem:[#allocation44_spill] sm:$0xff] %v16379_v13  ;;  %v16383_v5 = vpop.f32.mrf.mxu1 }
 0x5a8   :  { %18619 = vst [vmem:[#allocation33_spill] sm:$0xff] %v16381_v54  ;;  %v16385_v63 = vpop.f32.mrf.mxu2 }
 0x5a9   :  { %18620 = vst [vmem:[#allocation42_spill] sm:$0xff] %v16383_v5 }
 0x5aa   :  { %18621 = vst [vmem:[#allocation53_spill] sm:$0xff] %v16385_v63 }
 0x5ae   :  { %v16387_v40 = vpop.f32.mrf.mxu3  ;;  %v16389_v35 = vpop.f32.mrf.mxu0 }
 0x5af   :  { %18622 = vst [vmem:[#allocation54_spill] sm:$0xff] %v16387_v40  ;;  %v16391_v20 = vpop.f32.mrf.mxu1 }
 0x5b0   :  { %18623 = vst [vmem:[#allocation49_spill] sm:$0xff] %v16389_v35  ;;  %v16393_v37 = vpop.f32.mrf.mxu2 }
 0x5b1   :  { %18624 = vst [vmem:[#allocation51_spill] sm:$0xff] %v16391_v20 }
 0x5b2   :  { %18625 = vst [vmem:[#allocation66_spill] sm:$0xff] %v16393_v37 }
 0x5b6   :  { %v16395_v29 = vpop.f32.mrf.mxu3  ;;  %v16397_v15 = vpop.f32.mrf.mxu0 }
 0x5b7   :  { %18626 = vst [vmem:[#allocation67_spill] sm:$0xff] %v16395_v29  ;;  %v16399_v23 = vpop.f32.mrf.mxu1 }
 0x5b8   :  { %18627 = vst [vmem:[#allocation73_spill] sm:$0xff] %v16397_v15  ;;  %v16401_v13 = vpop.f32.mrf.mxu2 }
 0x5b9   :  { %18628 = vst [vmem:[#allocation68_spill] sm:$0xff] %v16399_v23 }
 0x5ba   :  { %18629 = vst [vmem:[#allocation61_spill] sm:$0xff] %v16401_v13 }
 0x5be   :  { %v16403_v54 = vpop.f32.mrf.mxu3  ;;  %v16405_v5 = vpop.f32.mrf.mxu0 }
 0x5bf   :  { %18630 = vst [vmem:[#allocation72_spill] sm:$0xff] %v16403_v54  ;;  %v16407_v63 = vpop.f32.mrf.mxu1 }
 0x5c0   :  { %18631 = vst [vmem:[#allocation60_spill] sm:$0xff] %v16405_v5  ;;  %v16409_v40 = vpop.f32.mrf.mxu2 }
 0x5c1   :  { %18632 = vst [vmem:[#allocation57_spill] sm:$0xff] %v16407_v63 }
 0x5c2   :  { %18633 = vst [vmem:[#allocation63_spill] sm:$0xff] %v16409_v40 }
 0x5c6   :  { %v16411_v35 = vpop.f32.mrf.mxu3  ;;  %v16413_v20 = vpop.f32.mrf.mxu0 }
 0x5c7   :  { %18634 = vst [vmem:[#allocation32_spill] sm:$0xff] %v16411_v35  ;;  %v16415_v37 = vpop.f32.mrf.mxu1 }
 0x5c8   :  { %18635 = vst [vmem:[#allocation59_spill] sm:$0xff] %v16413_v20  ;;  %v16417_v29 = vpop.f32.mrf.mxu2 }
 0x5c9   :  { %18636 = vst [vmem:[#allocation64_spill] sm:$0xff] %v16415_v37 }
 0x5ca   :  { %18637 = vst [vmem:[#allocation48_spill] sm:$0xff] %v16417_v29 }
 0x5ce   :  { %v16419_v15 = vpop.f32.mrf.mxu3  ;;  %v16421_v23 = vpop.f32.mrf.mxu0 }
 0x5cf   :  { %18638 = vst [vmem:[#allocation62_spill] sm:$0xff] %v16419_v15  ;;  %v16423_v13 = vpop.f32.mrf.mxu1 }
 0x5d0   :  { %18639 = vst [vmem:[#allocation74_spill] sm:$0xff] %v16421_v23  ;;  %v16425_v54 = vpop.f32.mrf.mxu2 }
 0x5d1   :  { %18640 = vst [vmem:[#allocation65_spill] sm:$0xff] %v16423_v13 }
 0x5d2   :  { %18641 = vst [vmem:[#allocation75_spill] sm:$0xff] %v16425_v54 }
 0x5d6   :  { %v16427_v5 = vpop.f32.mrf.mxu3  ;;  %v16429_v63 = vpop.f32.mrf.mxu0 }
 0x5d7   :  { %18642 = vst [vmem:[#allocation76_spill] sm:$0xff] %v16427_v5  ;;  %v16431_v40 = vpop.f32.mrf.mxu1 }
 0x5d8   :  { %18643 = vst [vmem:[#allocation77_spill] sm:$0xff] %v16429_v63  ;;  %v16433_v35 = vpop.f32.mrf.mxu2 }
 0x5d9   :  { %18644 = vst [vmem:[#allocation78_spill] sm:$0xff] %v16431_v40 }
 0x5da   :  { %18645 = vst [vmem:[#allocation79_spill] sm:$0xff] %v16433_v35 }
 0x5de   :  { %v16435_v20 = vpop.f32.mrf.mxu3  ;;  %v16437_v37 = vpop.f32.mrf.mxu0 }
 0x5df   :  { %18646 = vst [vmem:[#allocation80_spill] sm:$0xff] %v16435_v20  ;;  %v16439_v29 = vpop.f32.mrf.mxu1 }
 0x5e0   :  { %18647 = vst [vmem:[#allocation81_spill] sm:$0xff] %v16437_v37  ;;  %v16441_v15 = vpop.f32.mrf.mxu2  ;;  %v5303_v37 = vadd.f32 %v16078_v4, %v15966_v9  ;;  %v6292_v4 = vadd.f32 %v16190_v19, %v16108_v34 }
 0x5e1   :  { %18648 = vst [vmem:[#allocation82_spill] sm:$0xff] %v16439_v29  ;;  %v5223_v29 = vadd.f32 %v16053_v43, %v15933_v26  ;;  %v5463_v26 = vadd.f32 %v16124_v62, %v16027_v12  ;;  %v6291_v62 = vadd.f32 %v16240_v32, %v16154_v0  ;;  %v18661_v32 = vld [vmem:[#allocation70_spill] sm:$0xff] }
 0x5e2   :  { %18649 = vst [vmem:[#allocation83_spill] sm:$0xff] %v16441_v15  ;;  %v5243_v15 = vadd.f32 %v16058_v41, %v15940_v2  ;;  %v5483_v2 = vadd.f32 %v16130_v38, %v16032_v3 }
 0x5e3   :  { %v5899_v9 = vadd.f32 %v16144_v10, %v5223_v29  ;;  %v6296_v29 = vadd.f32 %v16210_v51, %v16128_v49  ;;  %v5911_v3 = vadd.f32 %v16212_v6, %v5463_v26  ;;  %v6633_v49 = vadd.f32 %v16278_v17, %v6292_v4  ;;  %v18656_v51 = vld [vmem:[#allocation69_spill] sm:$0xff]  ;;  %v18666_v26 = vld [vmem:[#allocation76_spill] sm:$0xff] }
 0x5e4   :  { %v6632_v6 = vadd.f32 %v18656_v51, %v6291_v62  ;;  %v18669_v4 = vld [vmem:[#allocation41_spill] sm:$0xff] }
 0x5e5   :  { %v6637_v0 = vadd.f32 %v16298_v44, %v6296_v29  ;;  %v7023_v19 = vadd.f32 %v16353_v50, %v6633_v49  ;;  %v18658_v50 = vld [vmem:[#allocation67_spill] sm:$0xff]  ;;  %v18663_v44 = vld [vmem:[#allocation40_spill] sm:$0xff] }
 0x5e6   :  { %v16443_v23 = vpop.f32.mrf.mxu3  ;;  %v16445_v13 = vpop.f32.mrf.mxu0 }
 0x5e7   :  { %18650 = vst [vmem:[#allocation84_spill] sm:$0xff] %v16443_v23  ;;  %v16447_v54 = vpop.f32.mrf.mxu1  ;;  %v5323_v23 = vadd.f32 %v16081_v59, %v15973_v42  ;;  %v5900_v42 = vadd.f32 %v16150_v22, %v5243_v15  ;;  %v5912_v15 = vadd.f32 %v16215_v30, %v5483_v2  ;;  %v6295_v22 = vadd.f32 %v16265_v55, %v16179_v39 }
 0x5e8   :  { %v16449_v5 = vpop.f32.mrf.mxu2 }
 0x5e9   :  { %18651 = vst [vmem:[#allocation85_spill] sm:$0xff] %v16449_v5  ;;  %v5904_v41 = vadd.f32 %v16170_v61, %v5323_v23  ;;  %v6290_v34 = vadd.f32 %v16238_v45, %v5900_v42  ;;  %v6299_v61 = vadd.f32 %v16285_v28, %v16199_v46  ;;  %v6302_v17 = vadd.f32 %v16303_v21, %v5912_v15  ;;  %v18655_v28 = vld [vmem:[#allocation58_spill] sm:$0xff] }
 0x5eb   :  { %v6294_v10 = vadd.f32 %v16258_v24, %v5904_v41  ;;  %v6631_v46 = vadd.f32 %v18655_v28, %v6290_v34  ;;  %v18673_v34 = vld [vmem:[#allocation59_spill] sm:$0xff]  ;;  %v18680_v28 = vld [vmem:[#allocation48_spill] sm:$0xff] }
 0x5ee   :  { %v16451_v63 = vpop.f32.mrf.mxu3  ;;  %v16453_v40 = vpop.f32.mrf.mxu0 }
 0x5ef   :  { %18652 = vst [vmem:[#allocation86_spill] sm:$0xff] %v16451_v63  ;;  %v16455_v35 = vpop.f32.mrf.mxu1  ;;  %v5383_v63 = vadd.f32 %v16104_v60, %v16002_v58  ;;  %v5903_v58 = vadd.f32 %v16165_v14, %v5303_v37  ;;  %v6300_v60 = vadd.f32 %v16233_v48, %v16148_v18  ;;  %v7364_v48 = vadd.f32 %v18658_v50, %v7023_v19  ;;  %v18665_v37 = vld [vmem:[#allocation33_spill] sm:$0xff]  ;;  %v18678_v19 = vld [vmem:[#allocation51_spill] sm:$0xff] }
 0x5f0   :  { %18653 = vst [vmem:[#allocation87_spill] sm:$0xff] %v16453_v40  ;;  %v16457_v20 = vpop.f32.mrf.mxu2  ;;  %v18683_v50 = vld [vmem:[#allocation61_spill] sm:$0xff] }
 0x5f1   :  { %18654 = vst [vmem:[#allocation88_spill] sm:$0xff] %v16457_v20  ;;  %v5403_v20 = vadd.f32 %v16110_v25, %v16007_v1  ;;  %v5907_v12 = vadd.f32 %v16192_v52, %v5383_v63  ;;  %v6289_v25 = vadd.f32 %v16235_v53, %v5899_v9  ;;  %v6293_v38 = vadd.f32 %v16255_v47, %v5903_v58  ;;  %v18659_v53 = vld [vmem:[#allocation56_spill] sm:$0xff]  ;;  %v18662_v47 = vld [vmem:[#allocation55_spill] sm:$0xff]  ;;  %v18668_v58 = vld [vmem:[#allocation45_spill] sm:$0xff] }
 0x5f2   :  { %v6303_v52 = vadd.f32 %v16305_v8, %v16219_v27  ;;  %v6641_v39 = vadd.f32 %v16317_v7, %v6300_v60  ;;  %v18660_v27 = vld [vmem:[#allocation71_spill] sm:$0xff]  ;;  %v7705_v2 = vadd.f32 %v18666_v26, %v7364_v48  ;;  %v18672_v60 = vld [vmem:[#allocation53_spill] sm:$0xff] }
 0x5f3   :  { %v5908_v59 = vadd.f32 %v16195_v16, %v5403_v20  ;;  %v6304_v20 = vadd.f32 %v16253_v57, %v16168_v31  ;;  %v6297_v18 = vadd.f32 %v16280_v33, %v5907_v12  ;;  %v6301_v31 = vadd.f32 %v16300_v11, %v5911_v3  ;;  %v18657_v11 = vld [vmem:[#allocation47_spill] sm:$0xff]  ;;  %v18671_v3 = vld [vmem:[#allocation52_spill] sm:$0xff] }
 0x5f4   :  { %v6630_v33 = vadd.f32 %v16319_v56, %v6289_v25  ;;  %v6634_v8 = vadd.f32 %v18659_v53, %v6293_v38  ;;  %v6635_v45 = vadd.f32 %v18660_v27, %v6294_v10  ;;  %v6636_v57 = vadd.f32 %v18661_v32, %v6295_v22  ;;  %v18664_v56 = vld [vmem:[#allocation46_spill] sm:$0xff]  ;;  %v18667_v9 = vld [vmem:[#allocation43_spill] sm:$0xff]  ;;  %v18674_v38 = vld [vmem:[#allocation44_spill] sm:$0xff] }
 0x5f5   :  { %v6298_v14 = vadd.f32 %v16283_v36, %v5908_v59  ;;  %v6645_v30 = vadd.f32 %v18657_v11, %v6304_v20  ;;  %v6638_v24 = vadd.f32 %v18662_v47, %v6297_v18  ;;  %v6640_v63 = vadd.f32 %v18664_v56, %v6299_v61  ;;  %v18670_v59 = vld [vmem:[#allocation42_spill] sm:$0xff]  ;;  %v18676_v18 = vld [vmem:[#allocation49_spill] sm:$0xff]  ;;  %v18677_v61 = vld [vmem:[#allocation64_spill] sm:$0xff] }
 0x5f6   :  { %v7800_v40 = vpop.f32.mrf.mxu3  ;;  %v16469_v5 = vpop.f32.mrf.mxu0  ;;  %v7020_v23 = vadd.f32 %v18665_v37, %v6630_v33  ;;  %v7027_v42 = vadd.f32 %v18667_v9, %v6637_v0  ;;  %v6642_v41 = vadd.f32 %v18668_v58, %v6301_v31  ;;  %v6643_v12 = vadd.f32 %v18669_v4, %v6302_v17  ;;  %v18675_v10 = vld [vmem:[#allocation54_spill] sm:$0xff]  ;;  %v18682_v11 = vld [vmem:[#allocation68_spill] sm:$0xff] }
 0x5f7   :  { %v16478_v43 = vpop.f32.mrf.mxu1  ;;  %v6639_v7 = vadd.f32 %v18663_v44, %v6298_v14  ;;  %v7021_v29 = vadd.f32 %v18670_v59, %v6631_v46  ;;  %v16543_v15 = vadd.f32 %v18671_v3, %v6303_v52  ;;  %v7022_v25 = vadd.f32 %v18672_v60, %v6632_v6  ;;  %v16551_v31 = vpop.permute.xlu1 %8060  ;;  %v18679_v33 = vld [vmem:[#allocation66_spill] sm:$0xff]  ;;  %v18681_v6 = vld [vmem:[#allocation73_spill] sm:$0xff]  ;;  %v18684_v27 = vld [vmem:[#allocation72_spill] sm:$0xff] }
 0x5f8   :  { %v16485_v1 = vpop.f32.mrf.mxu2  ;;  %v7361_v62 = vadd.f32 %v18673_v34, %v7020_v23  ;;  %v8046_v20 = vadd.f32 %v7800_v40, %v7705_v2  ;;  %v7031_v49 = vadd.f32 %v18674_v38, %v6641_v39  ;;  %v7035_v22 = vadd.f32 %v18675_v10, %v6645_v30  ;;  %v18689_v2 = vld [vmem:[#allocation62_spill] sm:$0xff]  ;;  %v18692_v60 = vld [vmem:[#allocation75_spill] sm:$0xff] }
 0x5f9   :  { %v7024_v14 = vadd.f32 %v18676_v18, %v6634_v8  ;;  %v7362_v0 = vadd.f32 %v18677_v61, %v7021_v29  ;;  %v7025_v17 = vadd.f32 %v18678_v19, %v6635_v45  ;;  %v7026_v52 = vadd.f32 %v18679_v33, %v6636_v57  ;;  %v18685_v45 = vld [vmem:[#allocation85_spill] sm:$0xff] }
 0x5fa   :  { %v7363_v46 = vadd.f32 %v18680_v28, %v7022_v25  ;;  %v7702_v51 = vadd.f32 %v16445_v13, %v7361_v62  ;;  %v7028_v40 = vadd.f32 %v18681_v6, %v6638_v24  ;;  %v7029_v39 = vadd.f32 %v18682_v11, %v6639_v7  ;;  %v18686_v13 = vld [vmem:[#allocation60_spill] sm:$0xff]  ;;  %v18687_v7 = vld [vmem:[#allocation57_spill] sm:$0xff]  ;;  %v18694_v62 = vld [vmem:[#allocation86_spill] sm:$0xff] }
 0x5fb   :  { %v7030_v30 = vadd.f32 %v18683_v50, %v6640_v63  ;;  %v7703_v48 = vadd.f32 %v16447_v54, %v7362_v0  ;;  %v7368_v32 = vadd.f32 %v18684_v27, %v7027_v42  ;;  %v16566_v56 = vadd.f32 %v16551_v31, %v8046_v20  ;;  %v18688_v63 = vld [vmem:[#allocation32_spill] sm:$0xff]  ;;  %v18690_v42 = vld [vmem:[#allocation74_spill] sm:$0xff]  ;;  %v18691_v29 = vld [vmem:[#allocation65_spill] sm:$0xff] }
 0x5fc   :  { %v7704_v47 = vadd.f32 %v18685_v45, %v7363_v46  ;;  %v16569_v24 = vadd.f32 %v18686_v13, %v6642_v41  ;;  %v16572_v37 = vadd.f32 %v18687_v7, %v6643_v12  ;;  %v7372_v54 = vadd.f32 %v18688_v63, %v7031_v49  ;;  %v18693_v25 = vld [vmem:[#allocation80_spill] sm:$0xff]  ;;  %v18701_v7 = vld [vmem:[#allocation77_spill] sm:$0xff] }
 0x5fd   :  { %v7376_v9 = vadd.f32 %v18689_v2, %v7035_v22  ;;  %v7365_v58 = vadd.f32 %v18690_v42, %v7024_v14  ;;  %v7366_v3 = vadd.f32 %v18691_v29, %v7025_v17  ;;  %v7367_v41 = vadd.f32 %v18692_v60, %v7026_v52  ;;  %v18697_v14 = vld [vmem:[#allocation87_spill] sm:$0xff] }
 0x5fe   :  { %v16518_v16 = vpop.f32.mrf.mxu3  ;;  %v16520_v36 = vpop.f32.mrf.mxu0  ;;  %v7709_v34 = vadd.f32 %v18693_v25, %v7368_v32  ;;  %v8082_v18 = vsel %vm15061_vm10, %v16566_v56, 0.0  ;;  %v7369_v63 = vadd.f32 %v18701_v7, %v7028_v40  ;;  %v18703_v42 = vld [vmem:[#allocation63_spill] sm:$0xff]  ;;  %v18706_v25 = vld [vmem:[#allocation37_spill] sm:$0xff] }
 0x5ff   :  { %v16526_v21 = vpop.f32.mrf.mxu1  ;;  %v7717_v20 = vadd.f32 %v18694_v62, %v7376_v9  ;;  %v7706_v61 = vadd.f32 %v18697_v14, %v7365_v58  ;;  %v7707_v0 = vadd.f32 %v16455_v35, %v7366_v3  ;;  %v7034_v58 = vadd.f32 %v18703_v42, %v16543_v15  ;;  %v18705_v3 = vld [vmem:[#allocation84_spill] sm:$0xff] }
 0x600   :  { %v16532_v55 = vpop.f32.mrf.mxu2  ;;  %v8050_v11 = vadd.f32 %v16518_v16, %v7709_v34  ;;  %v7713_v60 = vadd.f32 %v18705_v3, %v7372_v54  ;;  %v7710_v40 = vadd.f32 %v16469_v5, %v7369_v63  ;;  %v18713_v63 = vld [vmem:[#allocation83_spill] sm:$0xff] }
 0x602   :  { %v16627_v2 = vadd.f32 %v16551_v31, %v8050_v11 }
 0x604   :  { %v8086_v14 = vsel %vm15135_vm12, %v16627_v2, 0.0 }
 0x606   :  { %v16561_v53 = vpop.f32.mrf.mxu3  ;;  %v7740_v8 = vpop.f32.mrf.mxu0 }
 0x607   :  { %v8043_v57 = vadd.f32 %v7740_v8, %v7702_v51  ;;  %v7760_v44 = vpop.f32.mrf.mxu1  ;;  %v18700_v51 = vld [vmem:[#allocation88_spill] sm:$0xff] }
 0x608   :  { %v8044_v23 = vadd.f32 %v7760_v44, %v7703_v48  ;;  %v7780_v26 = vpop.f32.mrf.mxu2  ;;  %v7708_v6 = vadd.f32 %v18700_v51, %v7367_v41 }
 0x609   :  { %v16578_v4 = vadd.f32 %v16551_v31, %v8043_v57  ;;  %v8045_v59 = vadd.f32 %v7780_v26, %v7704_v47 }
 0x60a   :  { %v16584_v12 = vadd.f32 %v16551_v31, %v8044_v23  ;;  %v18702_v23 = vld [vmem:[#allocation78_spill] sm:$0xff] }
 0x60b   :  { %v8079_v49 = vsel %vm15065_vm13, %v16578_v4, 0.0  ;;  %v16591_v10 = vadd.f32 %v16551_v31, %v8045_v59  ;;  %v7370_v26 = vadd.f32 %v18702_v23, %v7029_v39  ;;  %v18704_v59 = vld [vmem:[#allocation79_spill] sm:$0xff]  ;;  %v7375_v23 = vadd.f32 %v18713_v63, %v7034_v58 }
 0x60c   :  { %v8080_v17 = vsel %vm15080_vm8, %v16584_v12, 0.0  ;;  %v16601_v33 = vpack.i.bf16 %v8082_v18, %v8079_v49  ;;  %v7371_v29 = vadd.f32 %v18704_v59, %v7030_v30  ;;  %v18719_v58 = vld [vmem:[#allocation31_spill] sm:$0xff] }
 0x60d   :  { %v8081_v28 = vsel %vm15056_vm15, %v16591_v10, 0.0  ;;  %v16606_v46 = vpack.i.bf16 %v8080_v17, %v8079_v49  ;;  %v7711_v39 = vadd.f32 %v16478_v43, %v7370_v26  ;;  %vm18720_vm4 = vnez %v18719_v58 }
 0x60e   :  { %v8040_v50 = vpop.f32.mrf.mxu3  ;;  %12786 = vrot.lane.b32.xlu2 %v16601_v33, %s13142_s14  ;;  %v7820_v35 = vpop.f32.mrf.mxu0  ;;  %v16612_v48 = vpack.i.bf16 %v8081_v28, %v8080_v17  ;;  %v16614_v45 = vpack.i.bf16 %v8082_v18, %v8081_v28  ;;  %v7712_v15 = vadd.f32 %v16485_v1, %v7371_v29  ;;  %v18715_v29 = vld [vmem:[#allocation35_spill] sm:$0xff] }
 0x60f   :  { %v8058_v8 = vadd.f32 %v8040_v50, %v7717_v20  ;;  %v8047_v27 = vadd.f32 %v7820_v35, %v7706_v61  ;;  %v7840_v32 = vpop.f32.mrf.mxu1  ;;  %v8054_v61 = vadd.f32 %v16561_v53, %v7713_v60  ;;  %vm18716_vm7 = vnez %v18715_v29  ;;  %v18717_v60 = vld [vmem:[#allocation30_spill] sm:$0xff] }
 0x610   :  { %v8048_v47 = vadd.f32 %v7840_v32, %v7707_v0  ;;  %v7860_v57 = vpop.f32.mrf.mxu2  ;;  %12781 = vrot.lane.b32.xlu0 %v16612_v48, %s13142_s14  ;;  %vm18718_vm5 = vnez %v18717_v60 }
 0x611   :  { %v16619_v44 = vadd.f32 %v16551_v31, %v8058_v8  ;;  %v16622_v16 = vadd.f32 %v16551_v31, %v8047_v27  ;;  %v8049_v13 = vadd.f32 %v7860_v57, %v7708_v6  ;;  %v18711_v8 = vld [vmem:[#allocation81_spill] sm:$0xff]  ;;  %v16676_v32 = vadd.f32 %v16551_v31, %v8054_v61  ;;  %v18712_v57 = vld [vmem:[#allocation82_spill] sm:$0xff] }
 0x612   :  { %v16630_v9 = vadd.f32 %v16551_v31, %v8048_v47  ;;  %v7373_v27 = vadd.f32 %v18711_v8, %v16569_v24  ;;  %v18723_v8 = vld [vmem:[#allocation38_spill] sm:$0xff] }
 0x613   :  { %v16637_v41 = vadd.f32 %v16551_v31, %v8049_v13  ;;  %v8094_v34 = vsel %vm15276_vm3, %v16619_v44, 0.0  ;;  %v8083_v54 = vsel %vm15139_vm1, %v16622_v16, 0.0  ;;  %v7374_v13 = vadd.f32 %v18712_v57, %v16572_v37  ;;  %v18725_v57 = vld [vmem:[#allocation50_spill] sm:$0xff] }
 0x614   :  { %v8084_v20 = vsel %vm15151_vm9, %v16630_v9, 0.0  ;;  %v7714_v26 = vadd.f32 %v16520_v36, %v7373_v27  ;;  %v8090_v36 = vsel %vm18720_vm4, %v16676_v32, 0.0  ;;  %vm18724_vm11 = vnez %v18723_v8 }
 0x615   :  { %v8085_v5 = vsel %vm15084_vm14, %v16637_v41, 0.0  ;;  %v16654_v18 = vpack.i.bf16 %v8084_v20, %v8094_v34  ;;  %v16666_v6 = vpack.i.bf16 %v8084_v20, %v8086_v14  ;;  %v7715_v59 = vadd.f32 %v16526_v21, %v7374_v13 }
 0x616   :  { %v7900_v0 = vpop.f32.mrf.mxu0  ;;  %v16660_v17 = vpack.i.bf16 %v8083_v54, %v8085_v5  ;;  %v16664_v51 = vpack.i.bf16 %v8085_v5, %v8083_v54  ;;  %vm18726_vm0 = vnez %v18725_v57 }
 0x617   :  { %v8051_v1 = vadd.f32 %v7900_v0, %v7710_v40  ;;  %12791 = vrot.lane.b32.xlu1 %v16654_v18, %s13142_s14  ;;  %v7920_v28 = vpop.f32.mrf.mxu1 }
 0x618   :  { %v8052_v11 = vadd.f32 %v7920_v28, %v7711_v39  ;;  %v7940_v50 = vpop.f32.mrf.mxu2  ;;  %12796 = vrot.lane.b32.xlu0 %v16660_v17, %s13142_s14  ;;  %v7716_v39 = vadd.f32 %v16532_v55, %v7375_v23 }
 0x619   :  { %v16671_v35 = vadd.f32 %v16551_v31, %v8051_v1  ;;  %v8053_v53 = vadd.f32 %v7940_v50, %v7712_v15  ;;  %v18721_v50 = vld [vmem:[#allocation39_spill] sm:$0xff] }
 0x61a   :  { %v16679_v47 = vadd.f32 %v16551_v31, %v8052_v11  ;;  %vm18722_vm6 = vnez %v18721_v50 }
 0x61b   :  { %v16684_v7 = vadd.f32 %v16551_v31, %v8053_v53  ;;  %v8087_v3 = vsel %vm18716_vm7, %v16671_v35, 0.0  ;;  %vm18739_vm7 = vcmask 64512  }
 0x61c   :  { %v8088_v24 = vsel %vm18491_vm2, %v16679_v47, 0.0 }
 0x61d   :  { %v8089_v37 = vsel %vm18718_vm5, %v16684_v7, 0.0  ;;  %v12800_v40 = vpack.i.bf16 %v8088_v24, %v8086_v14  ;;  %v16705_v61 = vpack.i.bf16 %v8088_v24, %v8090_v36 }
 0x61e   :  { %v7980_v20 = vpop.f32.mrf.mxu0  ;;  %v12805_v15 = vpack.i.bf16 %v8087_v3, %v8089_v37  ;;  %v16703_v5 = vpack.i.bf16 %v8089_v37, %v8087_v3 }
 0x61f   :  { %v8055_v54 = vadd.f32 %v7980_v20, %v7714_v26  ;;  %12801 = vrot.lane.b32.xlu2 %v12800_v40, %s13142_s14  ;;  %v8000_v21 = vpop.f32.mrf.mxu1 }
 0x620   :  { %v8056_v0 = vadd.f32 %v8000_v21, %v7715_v59  ;;  %v8020_v1 = vpop.f32.mrf.mxu2  ;;  %12806 = vrot.lane.b32.xlu1 %v12805_v15, %s13142_s14  ;;  %v18727_v59 = vld [vmem:[#allocation23_spill] sm:$0xff] }
 0x621   :  { %v16709_v55 = vadd.f32 %v16551_v31, %v8055_v54  ;;  %v8057_v14 = vadd.f32 %v8020_v1, %v7716_v39  ;;  %vm18728_vm3 = vcmp.lt.s32.totalorder %v18727_v59, 96  ;;  %v16765_v39 = vld [vmem:[%s17850_s4 + $0x98] sm:$0xff] }
 0x622   :  { %v16712_v28 = vadd.f32 %v16551_v31, %v8056_v0 }
 0x623   :  { %v16715_v11 = vadd.f32 %v16551_v31, %v8057_v14  ;;  %v8091_v27 = vsel %vm18724_vm11, %v16709_v55, 0.0  ;;  %vm18729_vm11 = vmmov %vm18728_vm3 }
 0x624   :  { %v8092_v53 = vsel %vm18722_vm6, %v16712_v28, 0.0 }
 0x625   :  { %v8093_v13 = vsel %vm18726_vm0, %v16715_v11, 0.0  ;;  %v12810_v63 = vpack.i.bf16 %v8092_v53, %v8090_v36  ;;  %v16729_v31 = vpack.i.bf16 %v8092_v53, %v8094_v34  ;;  %vm18730_vm0 = vmmov %vm18728_vm3 }
 0x626   :  { %v12815_v23 = vpack.i.bf16 %v8091_v27, %v8093_v13  ;;  %v16727_v26 = vpack.i.bf16 %v8093_v13, %v8091_v27 }
 0x627   :  { %12811 = vrot.lane.b32.xlu0 %v12810_v63, %s13142_s14 }
 0x628   :  { %12816 = vrot.lane.b32.xlu2 %v12815_v23, %s13142_s14  ;;  %12821 = vrot.lane.b32.xlu1 %v16612_v48, %s13151_s15  ;;  %s13153_s14 = smov 3  }
 0x62f   :  { %12826 = vrot.lane.b32.xlu0 %v16601_v33, %s13151_s15 }
 0x630   :  { %12831 = vrot.lane.b32.xlu2 %v16654_v18, %s13151_s15  ;;  %12836 = vrot.lane.b32.xlu1 %v16660_v17, %s13151_s15 }
 0x637   :  { %12841 = vrot.lane.b32.xlu0 %v12800_v40, %s13151_s15 }
 0x638   :  { %12846 = vrot.lane.b32.xlu2 %v12805_v15, %s13151_s15  ;;  %12851 = vrot.lane.b32.xlu1 %v12810_v63, %s13151_s15 }
 0x63f   :  { %12856 = vrot.lane.b32.xlu0 %v12815_v23, %s13151_s15  ;;  %s13158_s15 = smov 120  }
 0x640   :  { %12861 = vrot.lane.b32.xlu2 %v16612_v48, %s13152_s16  ;;  %12866 = vrot.lane.b32.xlu1 %v16601_v33, %s13152_s16 }
 0x647   :  { %12871 = vrot.lane.b32.xlu0 %v16654_v18, %s13152_s16 }
 0x648   :  { %12876 = vrot.lane.b32.xlu2 %v16660_v17, %s13152_s16  ;;  %12881 = vrot.lane.b32.xlu1 %v12800_v40, %s13152_s16 }
 0x64f   :  { %12886 = vrot.lane.b32.xlu0 %v12805_v15, %s13152_s16 }
 0x650   :  { %12891 = vrot.lane.b32.xlu2 %v12810_v63, %s13152_s16  ;;  %12896 = vrot.lane.b32.xlu1 %v12815_v23, %s13152_s16 }
 0x657   :  { %12901 = vrot.lane.b32.xlu0 %v16612_v48, %s13153_s14 }
 0x658   :  { %12906 = vrot.lane.b32.xlu2 %v16601_v33, %s13153_s14  ;;  %12911 = vrot.lane.b32.xlu1 %v16654_v18, %s13153_s14 }
 0x65f   :  { %12916 = vrot.lane.b32.xlu0 %v16660_v17, %s13153_s14 }
 0x660   :  { %12921 = vrot.lane.b32.xlu2 %v12800_v40, %s13153_s14  ;;  %12926 = vrot.lane.b32.xlu1 %v12805_v15, %s13153_s14 }
 0x667   :  { %12931 = vrot.lane.b32.xlu0 %v12810_v63, %s13153_s14 }
 0x668   :  { %12936 = vrot.lane.b32.xlu2 %v12815_v23, %s13153_s14  ;;  %12941 = vrot.lane.b32.xlu1 %v16614_v45, %s13154_s17  ;;  %v12787_v33 = vpop.permute.xlu2 %12786 }
 0x669   :  { %v12789_v34 = vunpack.i.h.bf16 %v12787_v33  ;;  %v12788_v18 = vunpack.i.l.bf16 %v12787_v33 }
 0x66f   :  { %12946 = vrot.lane.b32.xlu0 %v16606_v46, %s13154_s17 }
 0x670   :  { %12951 = vrot.lane.b32.xlu2 %v16664_v51, %s13154_s17  ;;  %12956 = vrot.lane.b32.xlu1 %v16666_v6, %s13154_s17 }
 0x677   :  { %12961 = vrot.lane.b32.xlu0 %v16703_v5, %s13154_s17 }
 0x678   :  { %12966 = vrot.lane.b32.xlu2 %v16705_v61, %s13154_s17  ;;  %12971 = vrot.lane.b32.xlu1 %v16727_v26, %s13154_s17 }
 0x679   :  { %v12802_v36 = vpop.permute.xlu2 %12801 }
 0x67a   :  { %v12803_v21 = vunpack.i.l.bf16 %v12802_v36 }
 0x67f   :  { %12976 = vrot.lane.b32.xlu0 %v16729_v31, %s13154_s17  ;;  %s11668_s17 = sshll.u32 %s17853_s7, 4  ;;  %s11669_s17 = int_to_ptr.hbm [resolvable:$true] %s11668_s17 }
 0x680   :  { %12981 = vrot.lane.b32.xlu2 %v16614_v45, %s13155_s18  ;;  %12986 = vrot.lane.b32.xlu1 %v16606_v46, %s13155_s18 }
 0x682   :  { %v12782_v48 = vpop.permute.xlu0 %12781 }
 0x683   :  { %v12784_v17 = vunpack.i.h.bf16 %v12782_v48  ;;  %v12783_v24 = vunpack.i.l.bf16 %v12782_v48  ;;  %v12804_v48 = vunpack.i.h.bf16 %v12802_v36 }
 0x685   :  { %v8192_v3 = vsel %vm18728_vm3, %v12788_v18, %v12783_v24  ;;  %v8191_v37 = vsel %vm18729_vm11, %v12783_v24, %v12784_v17  ;;  %v8190_v40 = vsel %vm18730_vm0, %v12784_v17, %v12789_v34  ;;  %vm18731_vm3 = vcmask 64512  }
 0x686   :  { %8234 = vmatpush.msra.mxu1 %v8192_v3  ;;  %8254 = vmatpush.msra.mxu2 %v8191_v37  ;;  %vm18732_vm11 = vmmov %vm18731_vm3 }
 0x687   :  { %12991 = vrot.lane.b32.xlu0 %v16664_v51, %s13155_s18  ;;  %8274 = vmatpush.msra.mxu3 %v8190_v40  ;;  %vm18733_vm0 = vmmov %vm18731_vm3 }
 0x688   :  { %12088 = vmatmul.msk.f32.vlgmr.msra.gmra.mxu1 %vm18731_vm3, %v16765_v39  ;;  %12089 = vmatmul.msk.f32.vlgmr.msra.gmra.mxu2 %vm18732_vm11, %v16765_v39  ;;  %vm18734_vm3 = vcmp.lt.s32.totalorder %v18727_v59, 96 }
 0x689   :  { %v16773_v20 = vpop.permute.xlu1 %12791  ;;  %12996 = vrot.lane.b32.xlu2 %v16666_v6, %s13155_s18  ;;  %13001 = vrot.lane.b32.xlu1 %v16703_v5, %s13155_s18  ;;  %vm18735_vm11 = vmmov %vm18734_vm3 }
 0x68a   :  { %v12793_v15 = vunpack.i.l.bf16 %v16773_v20  ;;  %v12797_v54 = vpop.permute.xlu0 %12796  ;;  %12090 = vmatmul.msk.f32.vlgmr.msra.gmra.mxu3 %vm18733_vm0, %v16765_v39  ;;  %v12794_v0 = vunpack.i.h.bf16 %v16773_v20  ;;  %vm18736_vm6 = vmmov %vm18734_vm3 }
 0x68b   :  { %v12799_v1 = vunpack.i.h.bf16 %v12797_v54  ;;  %v12798_v14 = vunpack.i.l.bf16 %v12797_v54  ;;  %vm18737_vm4 = vmmov %vm18734_vm3 }
 0x68c   :  { %v8193_v53 = vsel %vm18734_vm3, %v12793_v15, %v12788_v18  ;;  %vm18738_vm0 = vmmov %vm18734_vm3 }
 0x68d   :  { %8214 = vmatpush.msra.mxu0 %v8193_v53  ;;  %v8189_v27 = vsel %vm18735_vm11, %v12789_v34, %v12799_v1  ;;  %v8188_v13 = vsel %vm18736_vm6, %v12799_v1, %v12794_v0  ;;  %v8187_v63 = vsel %vm18737_vm4, %v12794_v0, %v12798_v14  ;;  %v8186_v23 = vsel %vm18738_vm0, %v12798_v14, %v12803_v21  ;;  %vm18740_vm3 = vmmov %vm18739_vm7  ;;  %v12817_v34 = vpop.permute.xlu2 %12816 }
 0x68e   :  { %12087 = vmatmul.msk.f32.vlgmr.msra.gmra.mxu0 %vm18739_vm7, %v16765_v39  ;;  %8314 = vmatpush.msrb.mxu1 %v8188_v13  ;;  %vm18741_vm6 = vmmov %vm18740_vm3  ;;  %v12819_v36 = vunpack.i.h.bf16 %v12817_v34  ;;  %v12818_v54 = vunpack.i.l.bf16 %v12817_v34 }
 0x68f   :  { %13006 = vrot.lane.b32.xlu0 %v16705_v61, %s13155_s18  ;;  %8294 = vmatpush.msrb.mxu0 %v8189_v27  ;;  %vm18742_vm7 = vmmov %vm18740_vm3 }
 0x690   :  { %8334 = vmatpush.msrb.mxu2 %v8187_v63  ;;  %8354 = vmatpush.msrb.mxu3 %v8186_v23  ;;  %vm18743_vm4 = vmmov %vm18738_vm0  ;;  %v8178_v34 = vsel %vm18738_vm0, %v12818_v54, %v12793_v15 }
 0x691   :  { %12092 = vmatmul.msk.f32.vlgmr.msrb.gmra.mxu1 %vm18740_vm3, %v16765_v39  ;;  %12093 = vmatmul.msk.f32.vlgmr.msrb.gmra.mxu2 %vm18741_vm6, %v16765_v39  ;;  %vm18744_vm11 = vmmov %vm18738_vm0 }
 0x692   :  { %13011 = vrot.lane.b32.xlu2 %v16727_v26, %s13155_s18  ;;  %13016 = vrot.lane.b32.xlu1 %v16729_v31, %s13155_s18  ;;  %v12807_v33 = vpop.permute.xlu1 %12806  ;;  %vm18745_vm6 = vmmov %vm18740_vm3  ;;  %s13159_s18 = smov [#allocation3]  }
 0x693   :  { %v12809_v18 = vunpack.i.h.bf16 %v12807_v33  ;;  %v12808_v17 = vunpack.i.l.bf16 %v12807_v33  ;;  %12094 = vmatmul.msk.f32.vlgmr.msrb.gmra.mxu3 %vm18742_vm7, %v16765_v39  ;;  %vm18746_vm7 = vmmov %vm18740_vm3  ;;  %s11666_s19 = sshll.u32 %s13159_s18, 4  ;;  %s11667_s19 = int_to_ptr.vmem [resolvable:$true] %s11666_s19 }
 0x695   :  { %v8185_v24 = vsel %vm18743_vm4, %v12803_v21, %v12809_v18  ;;  %v8184_v3 = vsel %vm18744_vm11, %v12809_v18, %v12804_v48  ;;  %v8183_v37 = vsel %vm18738_vm0, %v12804_v48, %v12808_v17  ;;  %vm8127_vm4 = vcmp.lt.s32.totalorder %v18727_v59, 99  ;;  %vm18747_vm11 = vmmov %vm18738_vm0  ;;  %v16836_v33 = vpop.permute.xlu2 %12831 }
 0x696   :  { %12091 = vmatmul.msk.f32.vlgmr.msrb.gmra.mxu0 %vm18740_vm3, %v16765_v39  ;;  %8394 = vmatpush.msra.mxu1 %v8184_v3  ;;  %vm18748_vm3 = vmmov %vm18738_vm0  ;;  %v12834_v15 = vunpack.i.h.bf16 %v16836_v33 }
 0x697   :  { %13021 = vrot.lane.b32.xlu0 %v16614_v45, %s13136_s3  ;;  %8374 = vmatpush.msra.mxu0 %v8185_v24 }
 0x698   :  { %8414 = vmatpush.msra.mxu2 %v8183_v37 }
 0x699   :  { %v12812_v40 = vpop.permute.xlu0 %12811  ;;  %12096 = vmatmul.msk.f32.vlgmr.msra.gmra.mxu1 %vm18745_vm6, %v16765_v39  ;;  %12097 = vmatmul.msk.f32.vlgmr.msra.gmra.mxu2 %vm18746_vm7, %v16765_v39  ;;  %vm18749_vm6 = vmmov %vm18738_vm0 }
 0x69a   :  { %v12814_v21 = vunpack.i.h.bf16 %v12812_v40  ;;  %v12813_v0 = vunpack.i.l.bf16 %v12812_v40  ;;  %13026 = vrot.lane.b32.xlu2 %v16606_v46, %s13136_s3  ;;  %13031 = vrot.lane.b32.xlu1 %v16664_v51, %s13136_s3  ;;  %v12822_v1 = vpop.permute.xlu1 %12821 }
 0x69b   :  { %v12824_v14 = vunpack.i.h.bf16 %v12822_v1  ;;  %v12823_v53 = vunpack.i.l.bf16 %v12822_v1 }
 0x69c   :  { %v8182_v27 = vsel %vm18747_vm11, %v12808_v17, %v12813_v0  ;;  %v8181_v13 = vsel %vm18738_vm0, %v12813_v0, %v12819_v36  ;;  %v8180_v63 = vsel %vm18748_vm3, %v12819_v36, %v12814_v21  ;;  %v8179_v23 = vsel %vm18749_vm6, %v12814_v21, %v12818_v54  ;;  %vm18750_vm11 = vmmov %vm18746_vm7 }
 0x69d   :  { %8434 = vmatpush.msra.mxu3 %v8182_v27  ;;  %8454 = vmatpush.msrb.mxu0 %v8181_v13  ;;  %v8141_v48 = vsel %vm8127_vm4, %v12823_v53, %v12824_v14  ;;  %vm18751_vm3 = vmmov %vm18746_vm7  ;;  %v12833_v17 = vunpack.i.l.bf16 %v16836_v33  ;;  %v12847_v13 = vpop.permute.xlu2 %12846 }
 0x69e   :  { %8474 = vmatpush.msrb.mxu1 %v8180_v63  ;;  %8494 = vmatpush.msrb.mxu2 %v8179_v23  ;;  %vm18752_vm6 = vmmov %vm18751_vm3  ;;  %v12849_v63 = vunpack.i.h.bf16 %v12847_v13  ;;  %v12848_v23 = vunpack.i.l.bf16 %v12847_v13 }
 0x69f   :  { %12095 = vmatmul.msk.f32.vlgmr.msra.gmra.mxu0 %vm18746_vm7, %v16765_v39  ;;  %12098 = vmatmul.msk.f32.vlgmr.msra.gmra.mxu3 %vm18750_vm11, %v16765_v39  ;;  %vm18753_vm7 = vmmov %vm18751_vm3 }
 0x6a0   :  { %8514 = vmatpush.msrb.mxu3 %v8178_v34  ;;  %13036 = vrot.lane.b32.xlu0 %v16666_v6, %s13136_s3  ;;  %vm18754_vm11 = vmmov %vm18751_vm3 }
 0x6a1   :  { %v12827_v18 = vpop.permute.xlu0 %12826  ;;  %8577 = vmatpush.msra.mxu2 %v8141_v48  ;;  %12100 = vmatmul.msk.f32.vlgmr.msrb.gmra.mxu1 %vm18751_vm3, %v16765_v39  ;;  %vm18755_vm0 = vmmov %vm18751_vm3 }
 0x6a2   :  { %v12829_v24 = vunpack.i.h.bf16 %v12827_v18  ;;  %v12828_v3 = vunpack.i.l.bf16 %v12827_v18  ;;  %12101 = vmatmul.msk.f32.vlgmr.msrb.gmra.mxu2 %vm18752_vm6, %v16765_v39  ;;  %13041 = vrot.lane.b32.xlu2 %v16703_v5, %s13136_s3  ;;  %v12837_v20 = vpop.permute.xlu1 %12836  ;;  %vm18756_vm3 = vmmov %vm18755_vm0 }
 0x6a3   :  { %13046 = vrot.lane.b32.xlu1 %v16705_v61, %s13136_s3  ;;  %v12839_v37 = vunpack.i.h.bf16 %v12837_v20  ;;  %v12838_v40 = vunpack.i.l.bf16 %v12837_v20  ;;  %vm18757_vm6 = vmmov %vm18755_vm0 }
 0x6a4   :  { %v8143_v36 = vsel %vm8127_vm4, %v12833_v17, %v12828_v3  ;;  %v8142_v54 = vsel %vm8127_vm4, %v12828_v3, %v12823_v53  ;;  %v8140_v21 = vsel %vm8127_vm4, %v12824_v14, %v12829_v24  ;;  %v16877_v53 = vld [vmem:[%s17850_s4 + $0x90] sm:$0xff] }
 0x6a5   :  { %8537 = vmatpush.msra.mxu0 %v8143_v36  ;;  %8557 = vmatpush.msra.mxu1 %v8142_v54  ;;  %v8139_v0 = vsel %vm8127_vm4, %v12829_v24, %v12839_v37  ;;  %v8138_v1 = vsel %vm8127_vm4, %v12839_v37, %v12834_v15  ;;  %v8137_v27 = vsel %vm8127_vm4, %v12834_v15, %v12838_v40 }
 0x6a6   :  { %8597 = vmatpush.msra.mxu3 %v8140_v21  ;;  %8657 = vmatpush.msrb.mxu2 %v8137_v27 }
 0x6a7   :  { %8637 = vmatpush.msrb.mxu1 %v8138_v1  ;;  %12099 = vmatmul.msk.f32.vlgmr.msrb.gmra.mxu0 %vm18753_vm7, %v16765_v39  ;;  %vm18758_vm7 = vmmov %vm18755_vm0 }
 0x6a8   :  { %12102 = vmatmul.msk.f32.vlgmr.msrb.gmra.mxu3 %vm18754_vm11, %v16765_v39  ;;  %13051 = vrot.lane.b32.xlu0 %v16727_v26, %s13136_s3  ;;  %vm18759_vm11 = vmmov %vm18755_vm0 }
 0x6a9   :  { %8617 = vmatpush.msrb.mxu0 %v8139_v0  ;;  %v12842_v14 = vpop.permute.xlu0 %12841  ;;  %12104 = vmatmul.msk.f32.vlgmr.msra.gmra.mxu1 %vm18755_vm0, %v16877_v53 }
 0x6aa   :  { %v12844_v48 = vunpack.i.h.bf16 %v12842_v14  ;;  %v12843_v34 = vunpack.i.l.bf16 %v12842_v14  ;;  %12105 = vmatmul.msk.f32.vlgmr.msra.gmra.mxu2 %vm18756_vm3, %v16877_v53  ;;  %13056 = vrot.lane.b32.xlu2 %v16729_v31, %s13136_s3  ;;  %v12852_v39 = vpop.permute.xlu1 %12851  ;;  %vm8874_vm3 = vcmp.lt.s32.totalorder %v18727_v59, 93 }
 0x6ab   :  { %13061 = vrot.lane.b32.xlu1 %v16614_v45, %s13156_s1  ;;  %v12853_v18 = vunpack.i.l.bf16 %v12852_v39  ;;  %v12854_v36 = vunpack.i.h.bf16 %v12852_v39 }
 0x6ac   :  { %v8136_v24 = vsel %vm8127_vm4, %v12838_v40, %v12843_v34  ;;  %v8134_v3 = vsel %vm8127_vm4, %v12849_v63, %v12844_v48  ;;  %v8133_v20 = vsel %vm8127_vm4, %v12844_v48, %v12848_v23  ;;  %v8135_v15 = vsel %vm8127_vm4, %v12843_v34, %v12849_v63  ;;  %v12862_v40 = vpop.permute.xlu2 %12861 }
 0x6ad   :  { %8677 = vmatpush.msrb.mxu3 %v8136_v24  ;;  %8717 = vmatpush.msra.mxu1 %v8134_v3  ;;  %v8132_v37 = vsel %vm8127_vm4, %v12848_v23, %v12853_v18  ;;  %v12863_v13 = vunpack.i.l.bf16 %v12862_v40  ;;  %v12864_v63 = vunpack.i.h.bf16 %v12862_v40 }
 0x6ae   :  { %8737 = vmatpush.msra.mxu2 %v8133_v20 }
 0x6af   :  { %12103 = vmatmul.msk.f32.vlgmr.msra.gmra.mxu0 %vm18757_vm6, %v16877_v53  ;;  %vm18760_vm6 = vmmov %vm18755_vm0  ;;  %v8888_v23 = vsel %vm8874_vm3, %v12863_v13, %v12864_v63 }
 0x6b0   :  { %12106 = vmatmul.msk.f32.vlgmr.msra.gmra.mxu3 %vm18758_vm7, %v16877_v53  ;;  %8697 = vmatpush.msra.mxu0 %v8135_v15  ;;  %vm18761_vm7 = vmmov %vm18755_vm0 }
 0x6b1   :  { %13066 = vrot.lane.b32.xlu0 %v16606_v46, %s13156_s1  ;;  %v12857_v45 = vpop.permute.xlu0 %12856  ;;  %8757 = vmatpush.msra.mxu3 %v8132_v37 }
 0x6b2   :  { %12108 = vmatmul.msk.f32.vlgmr.msrb.gmra.mxu1 %vm18759_vm11, %v16877_v53  ;;  %v12859_v54 = vunpack.i.h.bf16 %v12857_v45  ;;  %v12858_v21 = vunpack.i.l.bf16 %v12857_v45  ;;  %12109 = vmatmul.msk.f32.vlgmr.msrb.gmra.mxu2 %vm18755_vm0, %v16877_v53  ;;  %v12867_v0 = vpop.permute.xlu1 %12866  ;;  %vm18763_vm11 = vmmov %vm18755_vm0 }
 0x6b3   :  { %13071 = vrot.lane.b32.xlu2 %v16664_v51, %s13156_s1  ;;  %13076 = vrot.lane.b32.xlu1 %v16666_v6, %s13156_s1  ;;  %v12868_v46 = vunpack.i.l.bf16 %v12867_v0  ;;  %v12869_v48 = vunpack.i.h.bf16 %v12867_v0 }
 0x6b4   :  { %v8130_v1 = vsel %vm8127_vm4, %v12859_v54, %v12854_v36  ;;  %v8129_v27 = vsel %vm8127_vm4, %v12854_v36, %v12858_v21  ;;  %v8131_v14 = vsel %vm8127_vm4, %v12853_v18, %v12859_v54  ;;  %v8128_v51 = vsel %vm8127_vm4, %v12858_v21, %v12833_v17  ;;  %vm18762_vm4 = vmmov %vm18755_vm0 }
 0x6b5   :  { %8797 = vmatpush.msrb.mxu1 %v8130_v1  ;;  %8817 = vmatpush.msrb.mxu2 %v8129_v27  ;;  %v8889_v6 = vsel %vm8874_vm3, %v12868_v46, %v12863_v13 }
 0x6b7   :  { %12107 = vmatmul.msk.f32.vlgmr.msrb.gmra.mxu0 %vm18760_vm6, %v16877_v53  ;;  %vm18764_vm6 = vmmov %vm18755_vm0 }
 0x6b8   :  { %12110 = vmatmul.msk.f32.vlgmr.msrb.gmra.mxu3 %vm18761_vm7, %v16877_v53  ;;  %8777 = vmatpush.msrb.mxu0 %v8131_v14  ;;  %vm18765_vm7 = vmmov %vm18755_vm0 }
 0x6b9   :  { %8837 = vmatpush.msrb.mxu3 %v8128_v51  ;;  %13081 = vrot.lane.b32.xlu0 %v16703_v5, %s13156_s1  ;;  %v16936_v33 = vpop.permute.xlu0 %12871  ;;  %v12877_v5 = vpop.permute.xlu2 %12876 }
 0x6ba   :  { %12112 = vmatmul.msk.f32.vlgmr.msra.gmra.mxu1 %vm18762_vm4, %v16877_v53  ;;  %v12873_v17 = vunpack.i.l.bf16 %v16936_v33  ;;  %12113 = vmatmul.msk.f32.vlgmr.msra.gmra.mxu2 %vm18763_vm11, %v16877_v53  ;;  %v12874_v34 = vunpack.i.h.bf16 %v16936_v33  ;;  %v12879_v18 = vunpack.i.h.bf16 %v12877_v5  ;;  %v12878_v24 = vunpack.i.l.bf16 %v12877_v5  ;;  %v12882_v3 = vpop.permute.xlu1 %12881  ;;  %vm18766_vm4 = vmmov %vm18755_vm0 }
 0x6bb   :  { %8931 = vmatpush.msra.mxu1 %v8889_v6  ;;  %8951 = vmatpush.msra.mxu2 %v8888_v23  ;;  %v12883_v37 = vunpack.i.l.bf16 %v12882_v3  ;;  %v12884_v36 = vunpack.i.h.bf16 %v12882_v3  ;;  %vm18767_vm11 = vmmov %vm18755_vm0 }
 0x6bc   :  { %13086 = vrot.lane.b32.xlu2 %v16705_v61, %s13156_s1  ;;  %13091 = vrot.lane.b32.xlu1 %v16727_v26, %s13156_s1  ;;  %v8890_v39 = vsel %vm8874_vm3, %v12873_v17, %v12868_v46  ;;  %v8887_v61 = vsel %vm8874_vm3, %v12864_v63, %v12869_v48  ;;  %v8885_v26 = vsel %vm8874_vm3, %v12879_v18, %v12874_v34 }
 0x6bd   :  { %v8884_v15 = vsel %vm8874_vm3, %v12874_v34, %v12878_v24  ;;  %v8886_v54 = vsel %vm8874_vm3, %v12869_v48, %v12879_v18  ;;  %v8883_v21 = vsel %vm8874_vm3, %v12878_v24, %v12883_v37 }
 0x6bf   :  { %12111 = vmatmul.msk.f32.vlgmr.msra.gmra.mxu0 %vm18755_vm0, %v16877_v53 }
 0x6c0   :  { %12114 = vmatmul.msk.f32.vlgmr.msra.gmra.mxu3 %vm18764_vm6, %v16877_v53  ;;  %8911 = vmatpush.msra.mxu0 %v8890_v39  ;;  %vm18768_vm6 = vmmov %vm18755_vm0 }
 0x6c1   :  { %8971 = vmatpush.msra.mxu3 %v8887_v61  ;;  %13096 = vrot.lane.b32.xlu0 %v16729_v31, %s13156_s1  ;;  %v12887_v20 = vpop.permute.xlu0 %12886  ;;  %v16973_v31 = vld [vmem:[%s17850_s4 + $0xa0] sm:$0xff]  ;;  %v12892_v46 = vpop.permute.xlu2 %12891 }
 0x6c2   :  { %12116 = vmatmul.msk.f32.vlgmr.msrb.gmra.mxu1 %vm18765_vm7, %v16877_v53  ;;  %12117 = vmatmul.msk.f32.vlgmr.msrb.gmra.mxu2 %vm18766_vm4, %v16877_v53  ;;  %v12889_v45 = vunpack.i.h.bf16 %v12887_v20  ;;  %v12888_v40 = vunpack.i.l.bf16 %v12887_v20  ;;  %v12897_v1 = vpop.permute.xlu1 %12896  ;;  %vm18769_vm7 = vmmov %vm18755_vm0  ;;  %v12893_v27 = vunpack.i.l.bf16 %v12892_v46  ;;  %v12894_v51 = vunpack.i.h.bf16 %v12892_v46 }
 0x6c3   :  { %9011 = vmatpush.msrb.mxu1 %v8885_v26  ;;  %9031 = vmatpush.msrb.mxu2 %v8884_v15  ;;  %v12899_v13 = vunpack.i.h.bf16 %v12897_v1  ;;  %v12898_v14 = vunpack.i.l.bf16 %v12897_v1  ;;  %vm18770_vm4 = vmmov %vm18755_vm0 }
 0x6c4   :  { %v8881_v0 = vsel %vm8874_vm3, %v12889_v45, %v12884_v36  ;;  %v8882_v63 = vsel %vm8874_vm3, %v12883_v37, %v12889_v45  ;;  %v8879_v6 = vsel %vm8874_vm3, %v12888_v40, %v12893_v27 }
 0x6c5   :  { %v8877_v48 = vsel %vm8874_vm3, %v12899_v13, %v12894_v51  ;;  %v8876_v5 = vsel %vm8874_vm3, %v12894_v51, %v12898_v14  ;;  %v8878_v24 = vsel %vm8874_vm3, %v12893_v27, %v12899_v13  ;;  %v8875_v3 = vsel %vm8874_vm3, %v12898_v14, %v12873_v17  ;;  %v12136_v51 = vld [vmem:[%s17850_s4 + $0xa8] sm:$0xff] }
 0x6c7   :  { %12115 = vmatmul.msk.f32.vlgmr.msrb.gmra.mxu0 %vm18767_vm11, %v16877_v53  ;;  %vm18771_vm11 = vmmov %vm18755_vm0 }
 0x6c8   :  { %12118 = vmatmul.msk.f32.vlgmr.msrb.gmra.mxu3 %vm18755_vm0, %v16877_v53  ;;  %8991 = vmatpush.msrb.mxu0 %v8886_v54  ;;  %v8880_v53 = vsel %vm8874_vm3, %v12884_v36, %v12888_v40  ;;  %vm18776_vm3 = vmmov %vm18755_vm0 }
 0x6c9   :  { %9051 = vmatpush.msrb.mxu3 %v8883_v21  ;;  %v12902_v23 = vpop.permute.xlu0 %12901  ;;  %v12907_v34 = vpop.permute.xlu2 %12906 }
 0x6ca   :  { %12121 = vmatmul.msk.f32.vlgmr.msra.gmra.mxu1 %vm18768_vm6, %v16973_v31  ;;  %12122 = vmatmul.msk.f32.vlgmr.msra.gmra.mxu2 %vm18769_vm7, %v16973_v31  ;;  %vm18772_vm6 = vmmov %vm18755_vm0  ;;  %v12903_v39 = vunpack.i.l.bf16 %v12902_v23  ;;  %v12904_v18 = vunpack.i.h.bf16 %v12902_v23  ;;  %vm9264_vm7 = vcmp.lt.s32.totalorder %v18727_v59, 3  ;;  %v12908_v61 = vunpack.i.l.bf16 %v12907_v34  ;;  %v17018_v26 = vpop.permute.xlu1 %12911 }
 0x6cb   :  { %9091 = vmatpush.msra.mxu1 %v8881_v0  ;;  %9111 = vmatpush.msra.mxu2 %v8880_v53  ;;  %v12913_v17 = vunpack.i.l.bf16 %v17018_v26  ;;  %v12909_v37 = vunpack.i.h.bf16 %v12907_v34  ;;  %v12914_v36 = vunpack.i.h.bf16 %v17018_v26 }
 0x6cc   :  { %v9279_v20 = vsel %vm9264_vm7, %v12908_v61, %v12903_v39  ;;  %v9278_v33 = vsel %vm9264_vm7, %v12903_v39, %v12904_v18 }
 0x6cd   :  { %v9280_v54 = vsel %vm9264_vm7, %v12913_v17, %v12908_v61  ;;  %v9277_v21 = vsel %vm9264_vm7, %v12904_v18, %v12909_v37 }
 0x6cf   :  { %12120 = vmatmul.msk.f32.vlgmr.msra.gmra.mxu0 %vm18770_vm4, %v16973_v31  ;;  %vm18773_vm4 = vmmov %vm18755_vm0 }
 0x6d0   :  { %12123 = vmatmul.msk.f32.vlgmr.msra.gmra.mxu3 %vm18771_vm11, %v16973_v31  ;;  %9071 = vmatpush.msra.mxu0 %v8882_v63  ;;  %vm18774_vm11 = vmmov %vm18755_vm0 }
 0x6d1   :  { %9131 = vmatpush.msra.mxu3 %v8879_v6  ;;  %v12917_v15 = vpop.permute.xlu0 %12916  ;;  %v12922_v46 = vpop.permute.xlu2 %12921 }
 0x6d2   :  { %12125 = vmatmul.msk.f32.vlgmr.msrb.gmra.mxu1 %vm18755_vm0, %v16973_v31  ;;  %12126 = vmatmul.msk.f32.vlgmr.msrb.gmra.mxu2 %vm18772_vm6, %v16973_v31  ;;  %vm18775_vm6 = vmmov %vm18755_vm0  ;;  %v12919_v45 = vunpack.i.h.bf16 %v12917_v15  ;;  %v12918_v40 = vunpack.i.l.bf16 %v12917_v15  ;;  %v12927_v1 = vpop.permute.xlu1 %12926  ;;  %v12923_v27 = vunpack.i.l.bf16 %v12922_v46  ;;  %v12924_v63 = vunpack.i.h.bf16 %v12922_v46  ;;  %v17224_v46 = vld [vmem:[%s17850_s4 + $0xb8] sm:$0xff] }
 0x6d3   :  { %9171 = vmatpush.msrb.mxu1 %v8877_v48  ;;  %9191 = vmatpush.msrb.mxu2 %v8876_v5  ;;  %v12929_v13 = vunpack.i.h.bf16 %v12927_v1  ;;  %v12928_v14 = vunpack.i.l.bf16 %v12927_v1 }
 0x6d4   :  { %v9275_v0 = vsel %vm9264_vm7, %v12919_v45, %v12914_v36  ;;  %v9274_v53 = vsel %vm9264_vm7, %v12914_v36, %v12918_v40  ;;  %v9276_v6 = vsel %vm9264_vm7, %v12909_v37, %v12919_v45  ;;  %v9273_v23 = vsel %vm9264_vm7, %v12918_v40, %v12923_v27 }
 0x6d5   :  { %v9271_v5 = vsel %vm9264_vm7, %v12929_v13, %v12924_v63 }
 0x6d7   :  { %12124 = vmatmul.msk.f32.vlgmr.msrb.gmra.mxu0 %vm18773_vm4, %v16973_v31  ;;  %vm18777_vm4 = vmmov %vm18755_vm0 }
 0x6d8   :  { %12127 = vmatmul.msk.f32.vlgmr.msrb.gmra.mxu3 %vm18774_vm11, %v16973_v31  ;;  %9151 = vmatpush.msrb.mxu0 %v8878_v24  ;;  %vm18778_vm11 = vmmov %vm18755_vm0  ;;  %v9272_v24 = vsel %vm9264_vm7, %v12923_v27, %v12929_v13 }
 0x6d9   :  { %9211 = vmatpush.msrb.mxu3 %v8875_v3  ;;  %v12932_v48 = vpop.permute.xlu0 %12931  ;;  %v12937_v39 = vpop.permute.xlu2 %12936 }
 0x6da   :  { %12129 = vmatmul.msk.f32.vlgmr.msra.gmra.mxu1 %vm18755_vm0, %v16973_v31  ;;  %12130 = vmatmul.msk.f32.vlgmr.msra.gmra.mxu2 %vm18775_vm6, %v16973_v31  ;;  %vm18779_vm6 = vmmov %vm18755_vm0  ;;  %v12933_v34 = vunpack.i.l.bf16 %v12932_v48  ;;  %v12934_v18 = vunpack.i.h.bf16 %v12932_v48  ;;  %v12939_v61 = vunpack.i.h.bf16 %v12937_v39  ;;  %v12938_v26 = vunpack.i.l.bf16 %v12937_v39  ;;  %v12942_v19 = vpop.permute.xlu1 %12941 }
 0x6db   :  { %9321 = vmatpush.msra.mxu1 %v9279_v20  ;;  %9341 = vmatpush.msra.mxu2 %v9278_v33  ;;  %v12943_v62 = vunpack.i.l.bf16 %v12942_v19 }
 0x6dc   :  { %v9269_v3 = vsel %vm9264_vm7, %v12928_v14, %v12933_v34  ;;  %v9267_v20 = vsel %vm9264_vm7, %v12939_v61, %v12934_v18  ;;  %v9266_v15 = vsel %vm9264_vm7, %v12934_v18, %v12938_v26  ;;  %v9268_v33 = vsel %vm9264_vm7, %v12933_v34, %v12939_v61 }
 0x6dd   :  { %v9265_v37 = vsel %vm9264_vm7, %v12938_v26, %v12913_v17 }
 0x6df   :  { %12128 = vmatmul.msk.f32.vlgmr.msra.gmra.mxu0 %vm18776_vm3, %v16973_v31  ;;  %vm18780_vm3 = vmmov %vm18755_vm0 }
 0x6e0   :  { %12131 = vmatmul.msk.f32.vlgmr.msra.gmra.mxu3 %vm18777_vm4, %v16973_v31  ;;  %9301 = vmatpush.msra.mxu0 %v9280_v54  ;;  %vm18781_vm4 = vmmov %vm18755_vm0 }
 0x6e1   :  { %9361 = vmatpush.msra.mxu3 %v9277_v21  ;;  %v17150_v52 = vpop.permute.xlu0 %12946 }
 0x6e2   :  { %12133 = vmatmul.msk.f32.vlgmr.msrb.gmra.mxu1 %vm18778_vm11, %v16973_v31  ;;  %12134 = vmatmul.msk.f32.vlgmr.msrb.gmra.mxu2 %vm18755_vm0, %v16973_v31  ;;  %vm18782_vm11 = vmmov %vm18755_vm0 }
 0x6e3   :  { %9401 = vmatpush.msrb.mxu1 %v9275_v0  ;;  %9421 = vmatpush.msrb.mxu2 %v9274_v53 }
 0x6e7   :  { %12132 = vmatmul.msk.f32.vlgmr.msrb.gmra.mxu0 %vm18779_vm6, %v16973_v31  ;;  %vm18783_vm6 = vmmov %vm18755_vm0 }
 0x6e8   :  { %12135 = vmatmul.msk.f32.vlgmr.msrb.gmra.mxu3 %vm18780_vm3, %v16973_v31  ;;  %9381 = vmatpush.msrb.mxu0 %v9276_v6  ;;  %v9270_v31 = vsel %vm9264_vm7, %v12924_v63, %v12928_v14  ;;  %vm18784_vm3 = vmmov %vm18755_vm0 }
 0x6e9   :  { %9441 = vmatpush.msrb.mxu3 %v9273_v23  ;;  %vm18791_vm7 = vmmov %vm18755_vm0 }
 0x6ea   :  { %12138 = vmatmul.msk.f32.vlgmr.msra.gmra.mxu1 %vm18781_vm4, %v12136_v51  ;;  %12139 = vmatmul.msk.f32.vlgmr.msra.gmra.mxu2 %vm18782_vm11, %v12136_v51  ;;  %vm18785_vm4 = vmmov %vm18755_vm0 }
 0x6eb   :  { %9481 = vmatpush.msra.mxu1 %v9271_v5  ;;  %9501 = vmatpush.msra.mxu2 %v9270_v31  ;;  %vm18786_vm11 = vmmov %vm18755_vm0 }
 0x6ef   :  { %12137 = vmatmul.msk.f32.vlgmr.msra.gmra.mxu0 %vm18755_vm0, %v12136_v51 }
 0x6f0   :  { %12140 = vmatmul.msk.f32.vlgmr.msra.gmra.mxu3 %vm18783_vm6, %v12136_v51  ;;  %9461 = vmatpush.msra.mxu0 %v9272_v24  ;;  %vm18787_vm6 = vmmov %vm18755_vm0 }
 0x6f1   :  { %9521 = vmatpush.msra.mxu3 %v9269_v3 }
 0x6f2   :  { %12142 = vmatmul.msk.f32.vlgmr.msrb.gmra.mxu1 %vm18784_vm3, %v12136_v51  ;;  %12143 = vmatmul.msk.f32.vlgmr.msrb.gmra.mxu2 %vm18785_vm4, %v12136_v51  ;;  %vm18788_vm3 = vmmov %vm18755_vm0 }
 0x6f3   :  { %9561 = vmatpush.msrb.mxu1 %v9267_v20  ;;  %9581 = vmatpush.msrb.mxu2 %v9266_v15  ;;  %vm18789_vm4 = vmmov %vm18755_vm0 }
 0x6f7   :  { %12141 = vmatmul.msk.f32.vlgmr.msrb.gmra.mxu0 %vm18786_vm11, %v12136_v51  ;;  %vm18790_vm11 = vmmov %vm18755_vm0 }
 0x6f8   :  { %12144 = vmatmul.msk.f32.vlgmr.msrb.gmra.mxu3 %vm18755_vm0, %v12136_v51  ;;  %9541 = vmatpush.msrb.mxu0 %v9268_v33 }
 0x6f9   :  { %9601 = vmatpush.msrb.mxu3 %v9265_v37 }
 0x6fa   :  { %12146 = vmatmul.msk.f32.vlgmr.msra.gmra.mxu1 %vm18787_vm6, %v12136_v51  ;;  %12147 = vmatmul.msk.f32.vlgmr.msra.gmra.mxu2 %vm18788_vm3, %v12136_v51  ;;  %vm18802_vm6 = vnez %v18721_v50  ;;  %vm18803_vm3 = vnez %v18725_v57  ;;  %v12962_v50 = vpop.permute.xlu0 %12961 }
 0x6fb   :  { %12156 = vmatpush.msk.msra.mxu1 %vm15080_vm8, %v16584_v12  ;;  %12158 = vmatpush.msk.msra.mxu2 %vm15056_vm15, %v16591_v10  ;;  %vm18792_vm15 = vmmov %vm18755_vm0  ;;  %vm18798_vm8 = vnez %v18715_v29  ;;  %v12963_v45 = vunpack.i.l.bf16 %v12962_v50  ;;  %v12964_v54 = vunpack.i.h.bf16 %v12962_v50 }
 0x6ff   :  { %12145 = vmatmul.msk.f32.vlgmr.msra.gmra.mxu0 %vm18789_vm4, %v12136_v51  ;;  %vm18804_vm4 = vmmov %vm18755_vm0 }
 0x700   :  { %12148 = vmatmul.msk.f32.vlgmr.msra.gmra.mxu3 %vm18790_vm11, %v12136_v51  ;;  %12154 = vmatpush.msk.msra.mxu0 %vm15065_vm13, %v16578_v4  ;;  %v17110_v4 = vld [vmem:[%s17850_s4 + $0xb0] sm:$0xff]  ;;  %vm18795_vm13 = vmmov %vm18755_vm0 }
 0x701   :  { %12160 = vmatpush.msk.msra.mxu3 %vm15061_vm10, %v16566_v56  ;;  %vm18793_vm10 = vmmov %vm18755_vm0 }
 0x702   :  { %12150 = vmatmul.msk.f32.vlgmr.msrb.gmra.mxu1 %vm18791_vm7, %v12136_v51  ;;  %12151 = vmatmul.msk.f32.vlgmr.msrb.gmra.mxu2 %vm18755_vm0, %v12136_v51  ;;  %vm18805_vm11 = vmmov %vm18755_vm0  ;;  %vm9995_vm7 = vcmp.lt.s32.totalorder %v18727_v59, 125  ;;  %v12977_v63 = vpop.permute.xlu0 %12976 }
 0x703   :  { %12164 = vmatpush.msk.msrb.mxu1 %vm15151_vm9, %v16630_v9  ;;  %12166 = vmatpush.msk.msrb.mxu2 %vm15084_vm14, %v16637_v41  ;;  %vm18794_vm9 = vmmov %vm18755_vm0  ;;  %vm18799_vm14 = vnez %v18719_v58  ;;  %v12949_v9 = vunpack.i.h.bf16 %v17150_v52  ;;  %v12944_v41 = vunpack.i.h.bf16 %v12942_v19  ;;  %v12979_v31 = vunpack.i.h.bf16 %v12977_v63 }
 0x704   :  { %v12978_v39 = vunpack.i.l.bf16 %v12977_v63 }
 0x705   :  { %v17105_v12 = vpop.f32.mrf.mxu1  ;;  %v10009_v43 = vsel %vm9995_vm7, %v12949_v9, %v12943_v62 }
 0x707   :  { %12149 = vmatmul.msk.f32.vlgmr.msrb.gmra.mxu0 %vm18792_vm15, %v12136_v51  ;;  %vm18807_vm15 = vnez %v18706_v25  ;;  %v12948_v25 = vunpack.i.l.bf16 %v17150_v52 }
 0x708   :  { %12152 = vmatmul.msk.f32.vlgmr.msrb.gmra.mxu3 %vm18793_vm10, %v12136_v51  ;;  %12162 = vmatpush.msk.msrb.mxu0 %vm15139_vm1, %v16622_v16  ;;  %vm18796_vm1 = vmmov %vm18755_vm0 }
 0x709   :  { %12168 = vmatpush.msk.msrb.mxu3 %vm15135_vm12, %v16627_v2  ;;  %vm18797_vm12 = vmmov %vm18755_vm0 }
 0x70a   :  { %12157 = vmatmul.msk.f32.vlgmr.msra.gmra.mxu1 %vm18794_vm9, %v17110_v4  ;;  %12159 = vmatmul.msk.f32.vlgmr.msra.gmra.mxu2 %vm18795_vm13, %v17110_v4  ;;  %vm18808_vm10 = vmmov %vm18796_vm1 }
 0x70b   :  { %12172 = vmatpush.msk.msra.mxu1 %vm18491_vm2, %v16679_v47  ;;  %12174 = vmatpush.msk.msra.mxu2 %vm18718_vm5, %v16684_v7  ;;  %v17130_v56 = vpop.f32.mrf.mxu0  ;;  %v17132_v38 = vpop.f32.mrf.mxu2  ;;  %vm18800_vm2 = vmmov %vm18755_vm0  ;;  %v10008_v47 = vsel %vm9995_vm7, %v12943_v62, %v12944_v41 }
 0x70c   :  { %vm18801_vm5 = vmmov %vm18755_vm0  ;;  %vm18806_vm0 = vnez %v18723_v8 }
 0x70d   :  { %v17136_v22 = vpop.f32.mrf.mxu3  ;;  %vm18809_vm9 = vmmov %vm18796_vm1 }
 0x70e   :  { %v17134_v10 = vpop.f32.mrf.mxu1  ;;  %vm18810_vm13 = vmmov %vm18796_vm1 }
 0x70f   :  { %12155 = vmatmul.msk.f32.vlgmr.msra.gmra.mxu0 %vm18796_vm1, %v17110_v4 }
 0x710   :  { %12161 = vmatmul.msk.f32.vlgmr.msra.gmra.mxu3 %vm18797_vm12, %v17110_v4  ;;  %12170 = vmatpush.msk.msra.mxu0 %vm18798_vm8, %v16671_v35  ;;  %v12952_v35 = vpop.permute.xlu2 %12951  ;;  %vm18811_vm12 = vmmov %vm18796_vm1 }
 0x711   :  { %12176 = vmatpush.msk.msra.mxu3 %vm18799_vm14, %v16676_v32  ;;  %v12957_v32 = vpop.permute.xlu1 %12956  ;;  %v12953_v42 = vunpack.i.l.bf16 %v12952_v35  ;;  %vm18812_vm8 = vmmov %vm18796_vm1 }
 0x712   :  { %12165 = vmatmul.msk.f32.vlgmr.msrb.gmra.mxu1 %vm18800_vm2, %v17110_v4  ;;  %12167 = vmatmul.msk.f32.vlgmr.msrb.gmra.mxu2 %vm18801_vm5, %v17110_v4  ;;  %v12959_v29 = vunpack.i.h.bf16 %v12957_v32  ;;  %v12958_v60 = vunpack.i.l.bf16 %v12957_v32  ;;  %vm18813_vm14 = vmmov %vm18796_vm1 }
 0x713   :  { %12180 = vmatpush.msk.msrb.mxu1 %vm18802_vm6, %v16712_v28  ;;  %12182 = vmatpush.msk.msrb.mxu2 %vm18803_vm3, %v16715_v11  ;;  %v17160_v16 = vpop.f32.mrf.mxu0  ;;  %v10010_v28 = vsel %vm9995_vm7, %v12948_v25, %v12949_v9  ;;  %v10007_v11 = vsel %vm9995_vm7, %v12944_v41, %v12953_v42  ;;  %vm18814_vm2 = vmmov %vm18796_vm1 }
 0x714   :  { %v17162_v2 = vpop.f32.mrf.mxu2  ;;  %v10006_v53 = vsel %vm9995_vm7, %v12953_v42, %v12959_v29  ;;  %v10003_v27 = vsel %vm9995_vm7, %v12958_v60, %v12963_v45  ;;  %vm18815_vm5 = vmmov %vm18796_vm1 }
 0x715   :  { %vm18816_vm6 = vmmov %vm18796_vm1 }
 0x716   :  { %v17165_v30 = vpop.f32.mrf.mxu1  ;;  %v17178_v49 = vpop.f32.mrf.mxu3  ;;  %vm18817_vm3 = vmmov %vm18796_vm1 }
 0x717   :  { %12163 = vmatmul.msk.f32.vlgmr.msrb.gmra.mxu0 %vm18804_vm4, %v17110_v4  ;;  %vm18818_vm4 = vmmov %vm18796_vm1 }
 0x718   :  { %12169 = vmatmul.msk.f32.vlgmr.msrb.gmra.mxu3 %vm18805_vm11, %v17110_v4  ;;  %12178 = vmatpush.msk.msrb.mxu0 %vm18806_vm0, %v16709_v55  ;;  %v12954_v55 = vunpack.i.h.bf16 %v12952_v35  ;;  %v12967_v40 = vpop.permute.xlu2 %12966  ;;  %vm18819_vm11 = vmmov %vm18796_vm1 }
 0x719   :  { %12184 = vmatpush.msk.msrb.mxu3 %vm18807_vm15, %v16619_v44  ;;  %v12969_v1 = vunpack.i.h.bf16 %v12967_v40  ;;  %v12968_v13 = vunpack.i.l.bf16 %v12967_v40  ;;  %v12972_v14 = vpop.permute.xlu1 %12971  ;;  %vm18820_vm0 = vmmov %vm18796_vm1 }
 0x71a   :  { %12173 = vmatmul.msk.f32.vlgmr.msra.gmra.mxu1 %vm18808_vm10, %v17110_v4  ;;  %12175 = vmatmul.msk.f32.vlgmr.msra.gmra.mxu2 %vm18809_vm9, %v17110_v4  ;;  %v10005_v8 = vsel %vm9995_vm7, %v12959_v29, %v12954_v55  ;;  %v10004_v17 = vsel %vm9995_vm7, %v12954_v55, %v12958_v60  ;;  %v12973_v48 = vunpack.i.l.bf16 %v12972_v14  ;;  %v12974_v24 = vunpack.i.h.bf16 %v12972_v14  ;;  %vm18821_vm15 = vmmov %vm18820_vm0 }
 0x71b   :  { %10052 = vmatpush.msra.mxu1 %v10009_v43  ;;  %10072 = vmatpush.msra.mxu2 %v10008_v47  ;;  %v10001_v51 = vsel %vm9995_vm7, %v12969_v1, %v12964_v54  ;;  %v10000_v23 = vsel %vm9995_vm7, %v12964_v54, %v12968_v13  ;;  %v10002_v3 = vsel %vm9995_vm7, %v12963_v45, %v12969_v1  ;;  %vm18822_vm10 = vmmov %vm18820_vm0  ;;  %vm10385_vm9 = vcmp.lt.s32.totalorder %v18727_v59, 35 }
 0x71c   :  { %v17189_v44 = vpop.f32.mrf.mxu0  ;;  %v17191_v7 = vpop.f32.mrf.mxu2  ;;  %v9999_v26 = vsel %vm9995_vm7, %v12968_v13, %v12973_v48  ;;  %v9997_v15 = vsel %vm9995_vm7, %v12979_v31, %v12974_v24  ;;  %v10011_v47 = vsel %vm9995_vm7, %v12978_v39, %v12948_v25 }
 0x71e   :  { %v17193_v58 = vpop.f32.mrf.mxu1 }
 0x71f   :  { %12171 = vmatmul.msk.f32.vlgmr.msra.gmra.mxu0 %vm18810_vm13, %v17110_v4  ;;  %vm18823_vm13 = vmmov %vm18820_vm0 }
 0x720   :  { %12177 = vmatmul.msk.f32.vlgmr.msra.gmra.mxu3 %vm18796_vm1, %v17110_v4  ;;  %10032 = vmatpush.msra.mxu0 %v10010_v28  ;;  %v12982_v20 = vpop.permute.xlu2 %12981  ;;  %vm18824_vm1 = vmmov %vm18820_vm0 }
 0x721   :  { %10092 = vmatpush.msra.mxu3 %v10007_v11  ;;  %v17263_v33 = vpop.permute.xlu1 %12986  ;;  %v12984_v62 = vunpack.i.h.bf16 %v12982_v20  ;;  %v12983_v43 = vunpack.i.l.bf16 %v12982_v20 }
 0x722   :  { %12181 = vmatmul.msk.f32.vlgmr.msrb.gmra.mxu1 %vm18811_vm12, %v17110_v4  ;;  %v17209_v57 = vpop.f32.mrf.mxu3  ;;  %12183 = vmatmul.msk.f32.vlgmr.msrb.gmra.mxu2 %vm18812_vm8, %v17110_v4  ;;  %v12989_v9 = vunpack.i.h.bf16 %v17263_v33  ;;  %v12988_v25 = vunpack.i.l.bf16 %v17263_v33  ;;  %vm18826_vm12 = vmmov %vm18820_vm0 }
 0x723   :  { %10132 = vmatpush.msrb.mxu1 %v10005_v8  ;;  %10152 = vmatpush.msrb.mxu2 %v10004_v17  ;;  %v10398_v52 = vsel %vm10385_vm9, %v12983_v43, %v12984_v62  ;;  %vm18827_vm8 = vmmov %vm18820_vm0 }
 0x724   :  { %v17215_v36 = vpop.f32.mrf.mxu0  ;;  %v10399_v42 = vsel %vm10385_vm9, %v12989_v9, %v12983_v43 }
 0x725   :  { %v17217_v21 = vpop.f32.mrf.mxu2 }
 0x726   :  { %v17219_v0 = vpop.f32.mrf.mxu1 }
 0x727   :  { %12179 = vmatmul.msk.f32.vlgmr.msrb.gmra.mxu0 %vm18813_vm14, %v17110_v4  ;;  %vm18828_vm14 = vmmov %vm18820_vm0 }
 0x728   :  { %12185 = vmatmul.msk.f32.vlgmr.msrb.gmra.mxu3 %vm18814_vm2, %v17110_v4  ;;  %10112 = vmatpush.msrb.mxu0 %v10006_v53  ;;  %v9996_v4 = vsel %vm9995_vm7, %v12974_v24, %v12978_v39  ;;  %v12997_v28 = vpop.permute.xlu2 %12996  ;;  %vm18829_vm2 = vmmov %vm18820_vm0 }
 0x729   :  { %10172 = vmatpush.msrb.mxu3 %v10003_v27  ;;  %v12999_v40 = vunpack.i.h.bf16 %v12997_v28  ;;  %v12998_v1 = vunpack.i.l.bf16 %v12997_v28 }
 0x72a   :  { %12188 = vmatmul.msk.f32.vlgmr.msra.gmra.mxu1 %vm18815_vm5, %v17224_v46  ;;  %12189 = vmatmul.msk.f32.vlgmr.msra.gmra.mxu2 %vm18816_vm6, %v17224_v46  ;;  %vm18830_vm5 = vmmov %vm18820_vm0 }
 0x72b   :  { %v17238_v6 = vpop.f32.mrf.mxu3  ;;  %10212 = vmatpush.msra.mxu1 %v10001_v51  ;;  %10232 = vmatpush.msra.mxu2 %v10000_v23  ;;  %vm18831_vm6 = vmmov %vm18820_vm0 }
 0x72c   :  { %v17244_v5 = vpop.f32.mrf.mxu0 }
 0x72d   :  { %v8579_v34 = vpop.f32.mrf.mxu2 }
 0x72e   :  { %v17247_v18 = vadd.f32 %v8579_v34, %v17132_v38 }
 0x72f   :  { %v17249_v61 = vpop.f32.mrf.mxu1  ;;  %12187 = vmatmul.msk.f32.vlgmr.msra.gmra.mxu0 %vm18817_vm3, %v17224_v46  ;;  %vm18832_vm3 = vmmov %vm18820_vm0 }
 0x730   :  { %12190 = vmatmul.msk.f32.vlgmr.msra.gmra.mxu3 %vm18818_vm4, %v17224_v46  ;;  %10192 = vmatpush.msra.mxu0 %v10002_v3  ;;  %v17341_v3 = vld [vmem:[%s17850_s4 + $0xc0] sm:$0xff]  ;;  %v13012_v20 = vpop.permute.xlu2 %13011  ;;  %vm18833_vm4 = vmmov %vm18820_vm0 }
 0x731   :  { %10252 = vmatpush.msra.mxu3 %v9999_v26 }
 0x732   :  { %12192 = vmatmul.msk.f32.vlgmr.msrb.gmra.mxu1 %vm18819_vm11, %v17224_v46  ;;  %12193 = vmatmul.msk.f32.vlgmr.msrb.gmra.mxu2 %vm18820_vm0, %v17224_v46  ;;  %vm18834_vm11 = vmmov %vm18820_vm0 }
 0x733   :  { %v8599_v37 = vpop.f32.mrf.mxu3  ;;  %10292 = vmatpush.msrb.mxu1 %v9997_v15  ;;  %10312 = vmatpush.msrb.mxu2 %v9996_v4 }
 0x734   :  { %v17270_v38 = vadd.f32 %v8599_v37, %v17136_v22  ;;  %v17272_v19 = vpop.f32.mrf.mxu0  ;;  %v9998_v22 = vsel %vm9995_vm7, %v12973_v48, %v12979_v31  ;;  %vm18825_vm7 = vmmov %vm18820_vm0 }
 0x735   :  { %v8659_v41 = vpop.f32.mrf.mxu2 }
 0x736   :  { %v17276_v35 = vadd.f32 %v8659_v41, %v17162_v2  ;;  %v12992_v2 = vpop.permute.xlu0 %12991 }
 0x737   :  { %v17278_v32 = vpop.f32.mrf.mxu1  ;;  %12191 = vmatmul.msk.f32.vlgmr.msrb.gmra.mxu0 %vm18821_vm15, %v17224_v46  ;;  %v12993_v60 = vunpack.i.l.bf16 %v12992_v2  ;;  %v12994_v50 = vunpack.i.h.bf16 %v12992_v2  ;;  %vm18835_vm15 = vmmov %vm18820_vm0 }
 0x738   :  { %12194 = vmatmul.msk.f32.vlgmr.msrb.gmra.mxu3 %vm18822_vm10, %v17224_v46  ;;  %10272 = vmatpush.msrb.mxu0 %v9998_v22  ;;  %vm18836_vm10 = vmmov %vm18820_vm0 }
 0x739   :  { %10332 = vmatpush.msrb.mxu3 %v10011_v47  ;;  %v10397_v54 = vsel %vm10385_vm9, %v12984_v62, %v12993_v60  ;;  %v10395_v53 = vsel %vm10385_vm9, %v12999_v40, %v12994_v50  ;;  %v10394_v14 = vsel %vm10385_vm9, %v12994_v50, %v12998_v1  ;;  %v13013_v62 = vunpack.i.l.bf16 %v13012_v20 }
 0x73a   :  { %12196 = vmatmul.msk.f32.vlgmr.msra.gmra.mxu1 %vm18823_vm13, %v17224_v46  ;;  %12197 = vmatmul.msk.f32.vlgmr.msra.gmra.mxu2 %vm18824_vm1, %v17224_v46  ;;  %vm18837_vm13 = vmmov %vm18820_vm0 }
 0x73b   :  { %v8679_v29 = vpop.f32.mrf.mxu3  ;;  %10442 = vmatpush.msra.mxu1 %v10399_v42  ;;  %10462 = vmatpush.msra.mxu2 %v10398_v52  ;;  %vm18838_vm1 = vmmov %vm18820_vm0 }
 0x73c   :  { %v17301_v55 = vadd.f32 %v8679_v29, %v17178_v49  ;;  %v17303_v11 = vpop.f32.mrf.mxu0  ;;  %v10400_v49 = vsel %vm10385_vm9, %v12988_v25, %v12989_v9  ;;  %v13014_v29 = vunpack.i.h.bf16 %v13012_v20 }
 0x73d   :  { %v8739_v8 = vpop.f32.mrf.mxu2 }
 0x73e   :  { %v17306_v17 = vadd.f32 %v8739_v8, %v17191_v7  ;;  %v13002_v7 = vpop.permute.xlu1 %13001  ;;  %v13007_v27 = vpop.permute.xlu0 %13006 }
 0x73f   :  { %v17308_v45 = vpop.f32.mrf.mxu1  ;;  %12195 = vmatmul.msk.f32.vlgmr.msra.gmra.mxu0 %vm18825_vm7, %v17224_v46  ;;  %v13003_v51 = vunpack.i.l.bf16 %v13002_v7  ;;  %v13009_v48 = vunpack.i.h.bf16 %v13007_v27  ;;  %v13008_v34 = vunpack.i.l.bf16 %v13007_v27  ;;  %v13004_v26 = vunpack.i.h.bf16 %v13002_v7 }
 0x740   :  { %12198 = vmatmul.msk.f32.vlgmr.msra.gmra.mxu3 %vm18826_vm12, %v17224_v46  ;;  %10422 = vmatpush.msra.mxu0 %v10400_v49  ;;  %vm18839_vm7 = vcmp.lt.s32.totalorder %v18727_v59, 32  ;;  %vm18840_vm12 = vmmov %vm18820_vm0 }
 0x741   :  { %10482 = vmatpush.msra.mxu3 %v10397_v54  ;;  %v10391_v15 = vsel %vm10385_vm9, %v13009_v48, %v13004_v26  ;;  %v10389_v52 = vsel %vm10385_vm9, %v13008_v34, %v13013_v62 }
 0x742   :  { %12200 = vmatmul.msk.f32.vlgmr.msrb.gmra.mxu1 %vm18827_vm8, %v17224_v46  ;;  %12201 = vmatmul.msk.f32.vlgmr.msrb.gmra.mxu2 %vm18828_vm14, %v17224_v46  ;;  %vm18841_vm8 = vmmov %vm18839_vm7 }
 0x743   :  { %v8759_v13 = vpop.f32.mrf.mxu3  ;;  %10522 = vmatpush.msrb.mxu1 %v10395_v53  ;;  %10542 = vmatpush.msrb.mxu2 %v10394_v14  ;;  %vm18843_vm14 = vmmov %vm18820_vm0 }
 0x744   :  { %v17329_v63 = vadd.f32 %v8759_v13, %v17209_v57  ;;  %v17331_v23 = vpop.f32.mrf.mxu0  ;;  %v10396_v57 = vsel %vm10385_vm9, %v12993_v60, %v12999_v40  ;;  %v17388_v40 = vpop.permute.xlu2 %13026 }
 0x745   :  { %v8819_v31 = vpop.f32.mrf.mxu2  ;;  %v13029_v13 = vunpack.i.h.bf16 %v17388_v40 }
 0x746   :  { %v17334_v39 = vadd.f32 %v8819_v31, %v17217_v21  ;;  %v10393_v21 = vsel %vm10385_vm9, %v12998_v1, %v13003_v51  ;;  %v13017_v37 = vpop.permute.xlu1 %13016  ;;  %v13022_v60 = vpop.permute.xlu0 %13021 }
 0x747   :  { %v17336_v24 = vpop.f32.mrf.mxu1  ;;  %12199 = vmatmul.msk.f32.vlgmr.msrb.gmra.mxu0 %vm18829_vm2, %v17224_v46  ;;  %v13019_v43 = vunpack.i.h.bf16 %v13017_v37  ;;  %v13018_v47 = vunpack.i.l.bf16 %v13017_v37  ;;  %v13023_v54 = vunpack.i.l.bf16 %v13022_v60  ;;  %v13024_v7 = vunpack.i.h.bf16 %v13022_v60  ;;  %vm18844_vm2 = vmmov %vm18839_vm7 }
 0x748   :  { %12202 = vmatmul.msk.f32.vlgmr.msrb.gmra.mxu3 %vm18830_vm5, %v17224_v46  ;;  %10502 = vmatpush.msrb.mxu0 %v10396_v57  ;;  %v10390_v46 = vsel %vm10385_vm9, %v13004_v26, %v13008_v34  ;;  %vm18845_vm5 = vmmov %vm18844_vm2 }
 0x749   :  { %10562 = vmatpush.msrb.mxu3 %v10393_v21  ;;  %v10386_v50 = vsel %vm10385_vm9, %v13014_v29, %v13018_v47  ;;  %v10401_v14 = vsel %vm10385_vm9, %v13018_v47, %v12988_v25  ;;  %v10787_v33 = vsel %vm18841_vm8, %v13023_v54, %v13024_v7  ;;  %v13028_v25 = vunpack.i.l.bf16 %v17388_v40  ;;  %vm18856_vm8 = vmmov %vm18844_vm2 }
 0x74a   :  { %12205 = vmatmul.msk.f32.vlgmr.msra.gmra.mxu1 %vm18831_vm6, %v17341_v3  ;;  %12206 = vmatmul.msk.f32.vlgmr.msra.gmra.mxu2 %vm18832_vm3, %v17341_v3  ;;  %vm18846_vm6 = vmmov %vm18820_vm0 }
 0x74b   :  { %v8839_v4 = vpop.f32.mrf.mxu3  ;;  %10602 = vmatpush.msra.mxu1 %v10391_v15  ;;  %10622 = vmatpush.msra.mxu2 %v10390_v46  ;;  %vm18847_vm3 = vmmov %vm18844_vm2 }
 0x74c   :  { %v17360_v9 = vadd.f32 %v8839_v4, %v17238_v6  ;;  %v17362_v41 = vpop.f32.mrf.mxu0  ;;  %v10392_v6 = vsel %vm10385_vm9, %v13003_v51, %v13009_v48  ;;  %v10788_v51 = vsel %vm18839_vm7, %v13029_v13, %v13023_v54  ;;  %vm18854_vm7 = vmmov %vm18844_vm2 }
 0x74d   :  { %v8953_v22 = vpop.f32.mrf.mxu2 }
 0x74e   :  { %v17365_v2 = vadd.f32 %v8953_v22, %v17247_v18  ;;  %v10387_v18 = vsel %vm10385_vm9, %v13019_v43, %v13014_v29  ;;  %v13037_v48 = vpop.permute.xlu0 %13036 }
 0x74f   :  { %v17367_v42 = vpop.f32.mrf.mxu1  ;;  %12204 = vmatmul.msk.f32.vlgmr.msra.gmra.mxu0 %vm18833_vm4, %v17341_v3  ;;  %v13039_v21 = vunpack.i.h.bf16 %v13037_v48  ;;  %v13038_v15 = vunpack.i.l.bf16 %v13037_v48  ;;  %vm18848_vm4 = vmmov %vm18820_vm0  ;;  %v8640_v48 = vadd.f32 %v17249_v61, %v17134_v10 }
 0x750   :  { %12207 = vmatmul.msk.f32.vlgmr.msra.gmra.mxu3 %vm18834_vm11, %v17341_v3  ;;  %10582 = vmatpush.msra.mxu0 %v10392_v6  ;;  %vm18849_vm11 = vmmov %vm18844_vm2 }
 0x751   :  { %10642 = vmatpush.msra.mxu3 %v10389_v52 }
 0x752   :  { %12209 = vmatmul.msk.f32.vlgmr.msrb.gmra.mxu1 %vm18820_vm0, %v17341_v3  ;;  %12210 = vmatmul.msk.f32.vlgmr.msrb.gmra.mxu2 %vm18835_vm15, %v17341_v3  ;;  %vm18850_vm15 = vmmov %vm18820_vm0 }
 0x753   :  { %v8973_v28 = vpop.f32.mrf.mxu3  ;;  %10682 = vmatpush.msrb.mxu1 %v10387_v18  ;;  %10702 = vmatpush.msrb.mxu2 %v10386_v50 }
 0x754   :  { %v17386_v8 = vadd.f32 %v8973_v28, %v17270_v38  ;;  %v17390_v49 = vpop.f32.mrf.mxu0  ;;  %v10388_v38 = vsel %vm10385_vm9, %v13013_v62, %v13019_v43  ;;  %vm18842_vm9 = vmmov %vm18820_vm0 }
 0x755   :  { %v9033_v1 = vpop.f32.mrf.mxu2 }
 0x756   :  { %v17393_v53 = vadd.f32 %v9033_v1, %v17276_v35  ;;  %v13032_v35 = vpop.permute.xlu1 %13031 }
 0x757   :  { %v17395_v27 = vpop.f32.mrf.mxu1  ;;  %12208 = vmatmul.msk.f32.vlgmr.msrb.gmra.mxu0 %vm18836_vm10, %v17341_v3  ;;  %v13033_v34 = vunpack.i.l.bf16 %v13032_v35  ;;  %v13034_v46 = vunpack.i.h.bf16 %v13032_v35  ;;  %vm18851_vm10 = vmmov %vm18844_vm2 }
 0x758   :  { %12211 = vmatmul.msk.f32.vlgmr.msrb.gmra.mxu3 %vm18837_vm13, %v17341_v3  ;;  %10662 = vmatpush.msrb.mxu0 %v10388_v38  ;;  %vm18852_vm13 = vmmov %vm18844_vm2  ;;  %v13052_v38 = vpop.permute.xlu0 %13051 }
 0x759   :  { %10722 = vmatpush.msrb.mxu3 %v10401_v14  ;;  %v10786_v62 = vsel %vm18845_vm5, %v13024_v7, %v13033_v34  ;;  %v10784_v43 = vsel %vm18847_vm3, %v13039_v21, %v13034_v46  ;;  %v10783_v29 = vsel %vm18849_vm11, %v13034_v46, %v13038_v15  ;;  %v17458_v7 = vld [vmem:[%s17850_s4 + $0xc8] sm:$0xff]  ;;  %vm18859_vm5 = vmmov %vm18844_vm2 }
 0x75a   :  { %12213 = vmatmul.msk.f32.vlgmr.msra.gmra.mxu1 %vm18838_vm1, %v17341_v3  ;;  %12214 = vmatmul.msk.f32.vlgmr.msra.gmra.mxu2 %vm18840_vm12, %v17341_v3  ;;  %vm18853_vm1 = vmmov %vm18820_vm0 }
 0x75b   :  { %v9053_v31 = vpop.f32.mrf.mxu3  ;;  %10831 = vmatpush.msra.mxu1 %v10788_v51  ;;  %10851 = vmatpush.msra.mxu2 %v10787_v33  ;;  %vm18855_vm12 = vmmov %vm18820_vm0  ;;  %v13053_v51 = vunpack.i.l.bf16 %v13052_v38 }
 0x75c   :  { %v17418_v26 = vadd.f32 %v9053_v31, %v17301_v55  ;;  %v17420_v57 = vpop.f32.mrf.mxu0  ;;  %v10789_v55 = vsel %vm18844_vm2, %v13028_v25, %v13029_v13  ;;  %vm18861_vm3 = vmmov %vm18844_vm2 }
 0x75d   :  { %v9113_v20 = vpop.f32.mrf.mxu2  ;;  %vm18863_vm11 = vmmov %vm18844_vm2 }
 0x75e   :  { %v17423_v37 = vadd.f32 %v9113_v20, %v17306_v17  ;;  %v13042_v17 = vpop.permute.xlu2 %13041  ;;  %v13047_v22 = vpop.permute.xlu1 %13046  ;;  %v9221_v20 = vadd.f32 %v17367_v42, %v8640_v48 }
 0x75f   :  { %v17425_v4 = vpop.f32.mrf.mxu1  ;;  %12212 = vmatmul.msk.f32.vlgmr.msra.gmra.mxu0 %vm18842_vm9, %v17341_v3  ;;  %v13043_v60 = vunpack.i.l.bf16 %v13042_v17  ;;  %v13049_v18 = vunpack.i.h.bf16 %v13047_v22  ;;  %v13048_v50 = vunpack.i.l.bf16 %v13047_v22  ;;  %v13044_v13 = vunpack.i.h.bf16 %v13042_v17  ;;  %vm18857_vm9 = vmmov %vm18820_vm0 }
 0x760   :  { %12215 = vmatmul.msk.f32.vlgmr.msra.gmra.mxu3 %vm18843_vm14, %v17341_v3  ;;  %10811 = vmatpush.msra.mxu0 %v10789_v55  ;;  %vm18858_vm14 = vmmov %vm18820_vm0  ;;  %v17503_v22 = vpop.permute.xlu0 %13066 }
 0x761   :  { %10871 = vmatpush.msra.mxu3 %v10786_v62  ;;  %v10780_v14 = vsel %vm18854_vm7, %v13049_v18, %v13044_v13  ;;  %v10781_v10 = vsel %vm18844_vm2, %v13043_v60, %v13049_v18  ;;  %v10778_v61 = vsel %vm18859_vm5, %v13048_v50, %v13053_v51  ;;  %vm18867_vm7 = vmmov %vm18820_vm0 }
 0x762   :  { %12217 = vmatmul.msk.f32.vlgmr.msrb.gmra.mxu1 %vm18846_vm6, %v17341_v3  ;;  %12218 = vmatmul.msk.f32.vlgmr.msrb.gmra.mxu2 %vm18848_vm4, %v17341_v3  ;;  %vm18860_vm6 = vmmov %vm18820_vm0 }
 0x763   :  { %v9133_v47 = vpop.f32.mrf.mxu3  ;;  %10911 = vmatpush.msrb.mxu1 %v10784_v43  ;;  %10931 = vmatpush.msrb.mxu2 %v10783_v29  ;;  %vm18862_vm4 = vmmov %vm18820_vm0 }
 0x764   :  { %v17446_v6 = vadd.f32 %v9133_v47, %v17329_v63  ;;  %v17448_v52 = vpop.f32.mrf.mxu0  ;;  %v10785_v63 = vsel %vm18851_vm10, %v13033_v34, %v13039_v21  ;;  %v13054_v21 = vunpack.i.h.bf16 %v13052_v38  ;;  %vm18865_vm10 = vmmov %vm18844_vm2 }
 0x765   :  { %v9193_v28 = vpop.f32.mrf.mxu2  ;;  %vm18873_vm5 = vmmov %vm18820_vm0 }
 0x766   :  { %v17451_v54 = vadd.f32 %v9193_v28, %v17334_v39  ;;  %v10782_v39 = vsel %vm18852_vm13, %v13038_v15, %v13043_v60  ;;  %v13057_v33 = vpop.permute.xlu2 %13056  ;;  %v13062_v17 = vpop.permute.xlu1 %13061  ;;  %v8720_v60 = vadd.f32 %v17278_v32, %v17165_v30  ;;  %v13069_v28 = vunpack.i.h.bf16 %v17503_v22  ;;  %vm18866_vm13 = vmmov %vm18844_vm2 }
 0x767   :  { %v17453_v1 = vpop.f32.mrf.mxu1  ;;  %12216 = vmatmul.msk.f32.vlgmr.msrb.gmra.mxu0 %vm18820_vm0, %v17341_v3  ;;  %v13059_v62 = vunpack.i.h.bf16 %v13057_v33  ;;  %v13058_v42 = vunpack.i.l.bf16 %v13057_v33  ;;  %v13063_v38 = vunpack.i.l.bf16 %v13062_v17  ;;  %vm18872_vm2 = vmmov %vm18820_vm0 }
 0x768   :  { %12219 = vmatmul.msk.f32.vlgmr.msrb.gmra.mxu3 %vm18850_vm15, %v17341_v3  ;;  %10891 = vmatpush.msrb.mxu0 %v10785_v63  ;;  %v10779_v3 = vsel %vm18856_vm8, %v13044_v13, %v13048_v50  ;;  %v9225_v50 = vadd.f32 %v17395_v27, %v8720_v60  ;;  %vm18864_vm15 = vmmov %vm18820_vm0  ;;  %v8700_v27 = vadd.f32 %v17303_v11, %v17189_v44 }
 0x769   :  { %10951 = vmatpush.msrb.mxu3 %v10782_v39  ;;  %v10776_v43 = vsel %vm18861_vm3, %v13059_v62, %v13054_v21  ;;  %v10775_v29 = vsel %vm18863_vm11, %v13054_v21, %v13058_v42  ;;  %v13064_v39 = vunpack.i.h.bf16 %v13062_v17  ;;  %v10777_v32 = vsel %vm18865_vm10, %v13053_v51, %v13059_v62  ;;  %vm18869_vm8 = vmmov %vm18820_vm0 }
 0x76a   :  { %12222 = vmatmul.msk.f32.vlgmr.msra.gmra.mxu1 %vm18853_vm1, %v17458_v7  ;;  %12223 = vmatmul.msk.f32.vlgmr.msra.gmra.mxu2 %vm18855_vm12, %v17458_v7  ;;  %vm11164_vm1 = vcmp.lt.s32.totalorder %v18727_v59, 29  ;;  %vm18868_vm12 = vmmov %vm18820_vm0  ;;  %v13068_v51 = vunpack.i.l.bf16 %v17503_v22  ;;  %v8800_v44 = vadd.f32 %v17308_v45, %v17193_v58  ;;  %v9224_v11 = vadd.f32 %v17420_v57, %v8700_v27 }
 0x76b   :  { %v9213_v35 = vpop.f32.mrf.mxu3  ;;  %10991 = vmatpush.msra.mxu1 %v10780_v14  ;;  %11011 = vmatpush.msra.mxu2 %v10779_v3  ;;  %v8780_v17 = vadd.f32 %v17331_v23, %v17215_v36  ;;  %vm18875_vm3 = vmmov %vm18820_vm0 }
 0x76c   :  { %v17479_v31 = vadd.f32 %v9213_v35, %v17360_v9  ;;  %v17481_v34 = vpop.f32.mrf.mxu0  ;;  %v11178_v35 = vsel %vm11164_vm1, %v13069_v28, %v13063_v38  ;;  %v11179_v45 = vsel %vm11164_vm1, %v13068_v51, %v13069_v28  ;;  %vm18877_vm11 = vmmov %vm18820_vm0 }
 0x76d   :  { %v9343_v15 = vpop.f32.mrf.mxu2  ;;  %vm18879_vm10 = vmmov %vm18820_vm0 }
 0x76e   :  { %v17485_v46 = vadd.f32 %v9343_v15, %v17365_v2  ;;  %v8620_v2 = vadd.f32 %v17272_v19, %v17160_v16  ;;  %v13077_v40 = vpop.permute.xlu1 %13076  ;;  %v9229_v15 = vadd.f32 %v17425_v4, %v8800_v44  ;;  %v8560_v4 = vadd.f32 %v17219_v0, %v17105_v12 }
 0x76f   :  { %v9403_v55 = vpop.f32.mrf.mxu1  ;;  %12221 = vmatmul.msk.f32.vlgmr.msra.gmra.mxu0 %vm18857_vm9, %v17458_v7  ;;  %vm18870_vm9 = vmmov %vm18820_vm0  ;;  %v9228_v0 = vadd.f32 %v17448_v52, %v8780_v17 }
 0x770   :  { %12224 = vmatmul.msk.f32.vlgmr.msra.gmra.mxu3 %vm18858_vm14, %v17458_v7  ;;  %v17495_v9 = vadd.f32 %v9403_v55, %v9221_v20  ;;  %10971 = vmatpush.msra.mxu0 %v10781_v10  ;;  %v9220_v16 = vadd.f32 %v17390_v49, %v8620_v2  ;;  %v13079_v20 = vunpack.i.h.bf16 %v13077_v40  ;;  %v13078_v10 = vunpack.i.l.bf16 %v13077_v40  ;;  %vm18871_vm14 = vmmov %vm18820_vm0 }
 0x771   :  { %11031 = vmatpush.msra.mxu3 %v10778_v61  ;;  %v9217_v12 = vadd.f32 %v17336_v24, %v8560_v4 }
 0x772   :  { %12226 = vmatmul.msk.f32.vlgmr.msrb.gmra.mxu1 %vm18860_vm6, %v17458_v7  ;;  %12227 = vmatmul.msk.f32.vlgmr.msrb.gmra.mxu2 %vm18862_vm4, %v17458_v7  ;;  %vm18874_vm6 = vmmov %vm18820_vm0 }
 0x773   :  { %v9363_v47 = vpop.f32.mrf.mxu3  ;;  %11071 = vmatpush.msrb.mxu1 %v10776_v43  ;;  %11091 = vmatpush.msrb.mxu2 %v10775_v29  ;;  %vm18876_vm4 = vmmov %vm18820_vm0 }
 0x774   :  { %v17513_v19 = vadd.f32 %v9363_v47, %v17386_v8  ;;  %v9383_v18 = vpop.f32.mrf.mxu0  ;;  %v10790_v8 = vsel %vm18866_vm13, %v13058_v42, %v13028_v25  ;;  %v11177_v25 = vsel %vm11164_vm1, %v13063_v38, %v13064_v39  ;;  %v8540_v38 = vadd.f32 %v17244_v5, %v17130_v56  ;;  %vm18880_vm13 = vmmov %vm18820_vm0 }
 0x775   :  { %v17517_v13 = vadd.f32 %v9383_v18, %v9220_v16  ;;  %v9423_v63 = vpop.f32.mrf.mxu2  ;;  %v9607_v18 = vadd.f32 %v17453_v1, %v9217_v12 }
 0x776   :  { %v17520_v14 = vadd.f32 %v9423_v63, %v17393_v53  ;;  %v13072_v53 = vpop.permute.xlu2 %13071 }
 0x777   :  { %v9483_v30 = vpop.f32.mrf.mxu1  ;;  %12225 = vmatmul.msk.f32.vlgmr.msrb.gmra.mxu0 %vm18820_vm0, %v17458_v7  ;;  %v13073_v21 = vunpack.i.l.bf16 %v13072_v53  ;;  %v13074_v58 = vunpack.i.h.bf16 %v13072_v53 }
 0x778   :  { %12228 = vmatmul.msk.f32.vlgmr.msrb.gmra.mxu3 %vm18864_vm15, %v17458_v7  ;;  %v17532_v49 = vadd.f32 %v9483_v30, %v9225_v50  ;;  %11051 = vmatpush.msrb.mxu0 %v10777_v32  ;;  %v13092_v32 = vpop.permute.xlu1 %13091  ;;  %vm18878_vm15 = vmmov %vm18820_vm0 }
 0x779   :  { %11111 = vmatpush.msrb.mxu3 %v10790_v8  ;;  %v11174_v2 = vsel %vm11164_vm1, %v13079_v20, %v13074_v58  ;;  %v11173_v47 = vsel %vm11164_vm1, %v13074_v58, %v13078_v10  ;;  %v11175_v24 = vsel %vm11164_vm1, %v13073_v21, %v13079_v20  ;;  %v9216_v8 = vadd.f32 %v17362_v41, %v8540_v38  ;;  %v13108_v58 = vld [vmem:[%s17851_s5] sm:$0xff] }
 0x77a   :  { %12230 = vmatmul.msk.f32.vlgmr.msra.gmra.mxu1 %vm18867_vm7, %v17458_v7  ;;  %12231 = vmatmul.msk.f32.vlgmr.msra.gmra.mxu2 %vm18868_vm12, %v17458_v7  ;;  %v13093_v27 = vunpack.i.l.bf16 %v13092_v32  ;;  %v13094_v20 = vunpack.i.h.bf16 %v13092_v32  ;;  %vm18881_vm7 = vmmov %vm18820_vm0 }
 0x77b   :  { %v9443_v3 = vpop.f32.mrf.mxu3  ;;  %11221 = vmatpush.msra.mxu1 %v11178_v35  ;;  %11241 = vmatpush.msra.mxu2 %v11177_v25  ;;  %v9606_v35 = vadd.f32 %v17481_v34, %v9216_v8  ;;  %vm18882_vm12 = vmmov %vm18820_vm0 }
 0x77c   :  { %v17550_v48 = vadd.f32 %v9443_v3, %v17418_v26  ;;  %v9463_v33 = vpop.f32.mrf.mxu0  ;;  %v11176_v26 = vsel %vm11164_vm1, %v13064_v39, %v13073_v21 }
 0x77d   :  { %v17553_v55 = vadd.f32 %v9463_v33, %v9224_v11  ;;  %v9503_v62 = vpop.f32.mrf.mxu2 }
 0x77e   :  { %v17556_v61 = vadd.f32 %v9503_v62, %v17423_v37  ;;  %v13082_v37 = vpop.permute.xlu0 %13081  ;;  %v13087_v23 = vpop.permute.xlu2 %13086  ;;  %v13157_v62 = vmov 3  }
 0x77f   :  { %v9563_v42 = vpop.f32.mrf.mxu1  ;;  %12229 = vmatmul.msk.f32.vlgmr.msra.gmra.mxu0 %vm18869_vm8, %v17458_v7  ;;  %v13083_v29 = vunpack.i.l.bf16 %v13082_v37  ;;  %v13084_v16 = vunpack.i.h.bf16 %v13082_v37  ;;  %v13089_v52 = vunpack.i.h.bf16 %v13087_v23  ;;  %v13088_v30 = vunpack.i.l.bf16 %v13087_v23  ;;  %13100 = vset.pattern.permute.xlu2 %v13157_v62  ;;  %vm18883_vm8 = vmmov %vm18820_vm0 }
 0x780   :  { %12232 = vmatmul.msk.f32.vlgmr.msra.gmra.mxu3 %vm18870_vm9, %v17458_v7  ;;  %v17568_v57 = vadd.f32 %v9563_v42, %v9229_v15  ;;  %11201 = vmatpush.msra.mxu0 %v11179_v45  ;;  %vm18885_vm9 = vmmov %vm18820_vm0 }
 0x781   :  { %11261 = vmatpush.msra.mxu3 %v11176_v26  ;;  %v11170_v56 = vsel %vm11164_vm1, %v13089_v52, %v13084_v16  ;;  %v11168_v34 = vsel %vm11164_vm1, %v13088_v30, %v13093_v27  ;;  %11523 = vperm.xlu2 %13100, %v13108_v58  }
 0x782   :  { %12234 = vmatmul.msk.f32.vlgmr.msrb.gmra.mxu1 %vm18871_vm14, %v17458_v7  ;;  %12235 = vmatmul.msk.f32.vlgmr.msrb.gmra.mxu2 %vm18872_vm2, %v17458_v7  ;;  %vm18886_vm14 = vmmov %vm18820_vm0 }
 0x783   :  { %v9523_v43 = vpop.f32.mrf.mxu3  ;;  %11301 = vmatpush.msrb.mxu1 %v11174_v2  ;;  %11321 = vmatpush.msrb.mxu2 %v11173_v47  ;;  %vm18887_vm2 = vmmov %vm18820_vm0 }
 0x784   :  { %v17585_v36 = vadd.f32 %v9523_v43, %v17446_v6  ;;  %v9543_v60 = vpop.f32.mrf.mxu0  ;;  %v17598_v6 = vld [vmem:[%s17850_s4 + $0xd0] sm:$0xff]  ;;  %13101 = vset.pattern.permute.xlu0 %v13157_v62 }
 0x785   :  { %v17588_v28 = vadd.f32 %v9543_v60, %v9228_v0  ;;  %v9583_v50 = vpop.f32.mrf.mxu2 }
 0x786   :  { %v17591_v63 = vadd.f32 %v9583_v50, %v17451_v54  ;;  %v11172_v54 = vsel %vm11164_vm1, %v13078_v10, %v13083_v29  ;;  %v13097_v5 = vpop.permute.xlu0 %13096 }
 0x787   :  { %v9664_v39 = vpop.f32.mrf.mxu1  ;;  %12233 = vmatmul.msk.f32.vlgmr.msrb.gmra.mxu0 %vm18873_vm5, %v17458_v7  ;;  %v13099_v3 = vunpack.i.h.bf16 %v13097_v5  ;;  %v13098_v11 = vunpack.i.l.bf16 %v13097_v5  ;;  %vm18888_vm5 = vmmov %vm18820_vm0 }
 0x788   :  { %12236 = vmatmul.msk.f32.vlgmr.msrb.gmra.mxu3 %vm18874_vm6, %v17458_v7  ;;  %v17608_v1 = vadd.f32 %v9664_v39, %v9607_v18  ;;  %11281 = vmatpush.msrb.mxu0 %v11175_v24  ;;  %v11169_v7 = vsel %vm11164_vm1, %v13084_v16, %v13088_v30  ;;  %vm18889_vm6 = vmmov %vm18820_vm0 }
 0x789   :  { %11341 = vmatpush.msrb.mxu3 %v11172_v54  ;;  %v11165_v42 = vsel %vm11164_vm1, %v13094_v20, %v13098_v11  ;;  %v11180_v2 = vsel %vm11164_vm1, %v13098_v11, %v13068_v51 }
 0x78a   :  { %12239 = vmatmul.msk.f32.vlgmr.msra.gmra.mxu1 %vm18875_vm3, %v17598_v6  ;;  %12240 = vmatmul.msk.f32.vlgmr.msra.gmra.mxu2 %vm18876_vm4, %v17598_v6 }
 0x78b   :  { %v9603_v53 = vpop.f32.mrf.mxu3  ;;  %11381 = vmatpush.msra.mxu1 %v11170_v56  ;;  %11401 = vmatpush.msra.mxu2 %v11169_v7 }
 0x78c   :  { %v17621_v41 = vadd.f32 %v9603_v53, %v17479_v31  ;;  %v9644_v40 = vpop.f32.mrf.mxu0  ;;  %v11171_v31 = vsel %vm11164_vm1, %v13083_v29, %v13089_v52 }
 0x78d   :  { %v17623_v25 = vadd.f32 %v9644_v40, %v9606_v35  ;;  %v9684_v44 = vpop.f32.mrf.mxu2 }
 0x78e   :  { %v17626_v33 = vadd.f32 %v9684_v44, %v17485_v46  ;;  %v11166_v46 = vsel %vm11164_vm1, %v13099_v3, %v13094_v20 }
 0x78f   :  { %v9744_v21 = vpop.f32.mrf.mxu1  ;;  %12238 = vmatmul.msk.f32.vlgmr.msra.gmra.mxu0 %vm18877_vm11, %v17598_v6 }
 0x790   :  { %12241 = vmatmul.msk.f32.vlgmr.msra.gmra.mxu3 %vm18820_vm0, %v17598_v6  ;;  %v9952_v15 = vadd.f32 %v9744_v21, %v17495_v9  ;;  %11361 = vmatpush.msra.mxu0 %v11171_v31 }
 0x791   :  { %11421 = vmatpush.msra.mxu3 %v11168_v34 }
 0x792   :  { %12243 = vmatmul.msk.f32.vlgmr.msrb.gmra.mxu1 %vm18878_vm15, %v17598_v6  ;;  %12244 = vmatmul.msk.f32.vlgmr.msrb.gmra.mxu2 %vm18879_vm10, %v17598_v6 }
 0x793   :  { %v9704_v10 = vpop.f32.mrf.mxu3  ;;  %11461 = vmatpush.msrb.mxu1 %v11166_v46  ;;  %11481 = vmatpush.msrb.mxu2 %v11165_v42 }
 0x794   :  { %v9950_v9 = vadd.f32 %v9704_v10, %v17513_v19  ;;  %v9724_v45 = vpop.f32.mrf.mxu0  ;;  %v11167_v19 = vsel %vm11164_vm1, %v13093_v27, %v13099_v3  ;;  %vm18884_vm1 = vmmov %vm18820_vm0 }
 0x795   :  { %v9951_v26 = vadd.f32 %v9724_v45, %v17517_v13  ;;  %v9764_v37 = vpop.f32.mrf.mxu2 }
 0x796   :  { %v9953_v4 = vadd.f32 %v9764_v37, %v17520_v14 }
 0x797   :  { %v9824_v17 = vpop.f32.mrf.mxu1  ;;  %12242 = vmatmul.msk.f32.vlgmr.msrb.gmra.mxu0 %vm18880_vm13, %v17598_v6 }
 0x798   :  { %12245 = vmatmul.msk.f32.vlgmr.msrb.gmra.mxu3 %vm18881_vm7, %v17598_v6  ;;  %v9956_v13 = vadd.f32 %v9824_v17, %v17532_v49  ;;  %11441 = vmatpush.msrb.mxu0 %v11167_v19 }
 0x799   :  { %11501 = vmatpush.msrb.mxu3 %v11180_v2 }
 0x79a   :  { %12247 = vmatmul.msk.f32.vlgmr.msra.gmra.mxu1 %vm18882_vm12, %v17598_v6  ;;  %12248 = vmatmul.msk.f32.vlgmr.msra.gmra.mxu2 %vm18883_vm8, %v17598_v6 }
 0x79b   :  { %v9784_v14 = vpop.f32.mrf.mxu3 }
 0x79c   :  { %v9954_v43 = vadd.f32 %v9784_v14, %v17550_v48  ;;  %v9804_v47 = vpop.f32.mrf.mxu0 }
 0x79d   :  { %v9955_v29 = vadd.f32 %v9804_v47, %v17553_v55  ;;  %v9844_v22 = vpop.f32.mrf.mxu2 }
 0x79e   :  { %v9957_v59 = vadd.f32 %v9844_v22, %v17556_v61 }
 0x79f   :  { %v9904_v51 = vpop.f32.mrf.mxu1  ;;  %12246 = vmatmul.msk.f32.vlgmr.msra.gmra.mxu0 %vm18884_vm1, %v17598_v6 }
 0x7a0   :  { %12249 = vmatmul.msk.f32.vlgmr.msra.gmra.mxu3 %vm18885_vm9, %v17598_v6  ;;  %v9960_v49 = vadd.f32 %v9904_v51, %v17568_v57 }
 0x7a2   :  { %12251 = vmatmul.msk.f32.vlgmr.msrb.gmra.mxu1 %vm18886_vm14, %v17598_v6  ;;  %12252 = vmatmul.msk.f32.vlgmr.msrb.gmra.mxu2 %vm18887_vm2, %v17598_v6 }
 0x7a3   :  { %v9864_v12 = vpop.f32.mrf.mxu3 }
 0x7a4   :  { %v9958_v48 = vadd.f32 %v9864_v12, %v17585_v36  ;;  %v9884_v55 = vpop.f32.mrf.mxu0 }
 0x7a5   :  { %v9959_v61 = vadd.f32 %v9884_v55, %v17588_v28  ;;  %v9924_v0 = vpop.f32.mrf.mxu2 }
 0x7a6   :  { %v9961_v23 = vadd.f32 %v9924_v0, %v17591_v63 }
 0x7a7   :  { %v10054_v60 = vpop.f32.mrf.mxu1  ;;  %12250 = vmatmul.msk.f32.vlgmr.msrb.gmra.mxu0 %vm18888_vm5, %v17598_v6 }
 0x7a8   :  { %12253 = vmatmul.msk.f32.vlgmr.msrb.gmra.mxu3 %vm18889_vm6, %v17598_v6  ;;  %v10338_v57 = vadd.f32 %v10054_v60, %v17608_v1 }
 0x7ab   :  { %v9944_v16 = vpop.f32.mrf.mxu3 }
 0x7ac   :  { %v9962_v18 = vadd.f32 %v9944_v16, %v17621_v41  ;;  %v10034_v50 = vpop.f32.mrf.mxu0 }
 0x7ad   :  { %v17688_v36 = vadd.f32 %v10034_v50, %v17623_v25  ;;  %v10074_v28 = vpop.f32.mrf.mxu2 }
 0x7ae   :  { %v17691_v24 = vadd.f32 %v10074_v28, %v17626_v33 }
 0x7af   :  { %v10134_v63 = vpop.f32.mrf.mxu1 }
 0x7b0   :  { %v17693_v39 = vadd.f32 %v10134_v63, %v9952_v15 }
 0x7b3   :  { %v10094_v52 = vpop.f32.mrf.mxu3 }
 0x7b4   :  { %v17695_v38 = vadd.f32 %v10094_v52, %v9950_v9  ;;  %v10114_v6 = vpop.f32.mrf.mxu0 }
 0x7b5   :  { %v17697_v54 = vadd.f32 %v10114_v6, %v9951_v26  ;;  %v10154_v1 = vpop.f32.mrf.mxu2 }
 0x7b6   :  { %v17699_v30 = vadd.f32 %v10154_v1, %v9953_v4 }
 0x7b7   :  { %v10214_v32 = vpop.f32.mrf.mxu1 }
 0x7b8   :  { %v17701_v8 = vadd.f32 %v10214_v32, %v9956_v13 }
 0x7bb   :  { %v10174_v56 = vpop.f32.mrf.mxu3 }
 0x7bc   :  { %v17703_v5 = vadd.f32 %v10174_v56, %v9954_v43  ;;  %v10194_v53 = vpop.f32.mrf.mxu0 }
 0x7bd   :  { %v17705_v7 = vadd.f32 %v10194_v53, %v9955_v29  ;;  %v10234_v27 = vpop.f32.mrf.mxu2 }
 0x7be   :  { %v17707_v35 = vadd.f32 %v10234_v27, %v9957_v59 }
 0x7bf   :  { %v10294_v41 = vpop.f32.mrf.mxu1 }
 0x7c0   :  { %v17709_v40 = vadd.f32 %v10294_v41, %v9960_v49 }
 0x7c3   :  { %v10254_v3 = vpop.f32.mrf.mxu3 }
 0x7c4   :  { %v17711_v25 = vadd.f32 %v10254_v3, %v9958_v48  ;;  %v10274_v44 = vpop.f32.mrf.mxu0 }
 0x7c5   :  { %v17713_v11 = vadd.f32 %v10274_v44, %v9959_v61  ;;  %v10314_v33 = vpop.f32.mrf.mxu2 }
 0x7c6   :  { %v17715_v21 = vadd.f32 %v10314_v33, %v9961_v23  ;;  %v18890_v33 = vld [vmem:[#allocation7_spill] sm:$0xff] }
 0x7c7   :  { %v10444_v20 = vpop.f32.mrf.mxu1  ;;  %vm18891_vm3 = vnez %v18890_v33 }
 0x7c8   :  { %v10728_v23 = vadd.f32 %v10444_v20, %v10338_v57 }
 0x7cb   :  { %v10334_v31 = vpop.f32.mrf.mxu3 }
 0x7cc   :  { %v17717_v34 = vadd.f32 %v10334_v31, %v9962_v18  ;;  %v10424_v15 = vpop.f32.mrf.mxu0 }
 0x7cd   :  { %v10464_v46 = vpop.f32.mrf.mxu2  ;;  %v10727_v52 = vadd.f32 %v10424_v15, %v17688_v36 }
 0x7ce   :  { %v10729_v1 = vadd.f32 %v10464_v46, %v17691_v24 }
 0x7cf   :  { %v10524_v62 = vpop.f32.mrf.mxu1 }
 0x7d0   :  { %v10732_v56 = vadd.f32 %v10524_v62, %v17693_v39 }
 0x7d3   :  { %v10484_v10 = vpop.f32.mrf.mxu3 }
 0x7d4   :  { %v10504_v42 = vpop.f32.mrf.mxu0 }
 0x7d5   :  { %v10544_v9 = vpop.f32.mrf.mxu2  ;;  %v10731_v62 = vadd.f32 %v10504_v42, %v17697_v54  ;;  %v18894_v54 = vld [vmem:[#allocation8_spill] sm:$0xff] }
 0x7d6   :  { %vm18895_vm11 = vnez %v18894_v54 }
 0x7d7   :  { %v10604_v58 = vpop.f32.mrf.mxu1 }
 0x7db   :  { %v17719_v45 = vpop.f32.mrf.mxu3  ;;  %v17749_v28 = vpop.permute.xlu2 %11523 }
 0x7dc   :  { %v17721_v26 = vpop.f32.mrf.mxu0 }
 0x7dd   :  { %v17723_v37 = vpop.f32.mrf.mxu2 }
 0x7df   :  { %v17725_v4 = vpop.f32.mrf.mxu1 }
 0x7e3   :  { %v17727_v17 = vpop.f32.mrf.mxu3 }
 0x7e4   :  { %v17729_v19 = vpop.f32.mrf.mxu0 }
 0x7e5   :  { %v17731_v2 = vpop.f32.mrf.mxu2 }
 0x7e7   :  { %v10833_v13 = vpop.f32.mrf.mxu1 }
 0x7e8   :  { %v11117_v16 = vadd.f32 %v10833_v13, %v10728_v23  ;;  %v10730_v13 = vadd.f32 %v10484_v10, %v17695_v38  ;;  %v10733_v23 = vadd.f32 %v10544_v9, %v17699_v30  ;;  %v18896_v30 = vld [vmem:[#allocation11_spill] sm:$0xff] }
 0x7e9   :  { %vm18897_vm0 = vnez %v18896_v30 }
 0x7eb   :  { %v17733_v14 = vpop.f32.mrf.mxu3 }
 0x7ec   :  { %v10813_v43 = vpop.f32.mrf.mxu0 }
 0x7ed   :  { %v10853_v47 = vpop.f32.mrf.mxu2  ;;  %v11116_v57 = vadd.f32 %v10813_v43, %v10727_v52 }
 0x7ee   :  { %v11118_v27 = vadd.f32 %v10853_v47, %v10729_v1 }
 0x7ef   :  { %v10913_v29 = vpop.f32.mrf.mxu1 }
 0x7f0   :  { %v11121_v3 = vadd.f32 %v10913_v29, %v10732_v56 }
 0x7f3   :  { %v10873_v22 = vpop.f32.mrf.mxu3 }
 0x7f4   :  { %v10893_v59 = vpop.f32.mrf.mxu0  ;;  %v11119_v43 = vadd.f32 %v10873_v22, %v10730_v13 }
 0x7f5   :  { %v10933_v51 = vpop.f32.mrf.mxu2  ;;  %v11120_v52 = vadd.f32 %v10893_v59, %v10731_v62 }
 0x7f6   :  { %v11122_v56 = vadd.f32 %v10933_v51, %v10733_v23  ;;  %v10734_v51 = vadd.f32 %v17719_v45, %v17703_v5  ;;  %v10737_v5 = vadd.f32 %v17723_v37, %v17707_v35  ;;  %v10740_v45 = vadd.f32 %v17725_v4, %v17709_v40  ;;  %v18904_v4 = vld [vmem:[#allocation15_spill] sm:$0xff] }
 0x7f7   :  { %v10993_v49 = vpop.f32.mrf.mxu1  ;;  %vm18905_vm7 = vnez %v18904_v4 }
 0x7fb   :  { %v17735_v12 = vpop.f32.mrf.mxu3 }
 0x7fc   :  { %v17737_v48 = vpop.f32.mrf.mxu0 }
 0x7fd   :  { %v17739_v55 = vpop.f32.mrf.mxu2 }
 0x7fe   :  { %v11126_v23 = vadd.f32 %v17739_v55, %v10737_v5 }
 0x7ff   :  { %v17741_v61 = vpop.f32.mrf.mxu1 }
 0x800   :  { %v11129_v40 = vadd.f32 %v17741_v61, %v10740_v45  ;;  %v10739_v61 = vadd.f32 %v17729_v19, %v17713_v11  ;;  %v18908_v19 = vld [vmem:[#allocation13_spill] sm:$0xff] }
 0x801   :  { %vm18909_vm8 = vnez %v18908_v19 }
 0x803   :  { %v17743_v0 = vpop.f32.mrf.mxu3 }
 0x804   :  { %v17745_v60 = vpop.f32.mrf.mxu0 }
 0x805   :  { %v17747_v18 = vpop.f32.mrf.mxu2  ;;  %v11128_v11 = vadd.f32 %v17745_v60, %v10739_v61 }
 0x807   :  { %v11223_v50 = vpop.f32.mrf.mxu1 }
 0x808   :  { %v11507_v63 = vadd.f32 %v11223_v50, %v11117_v16  ;;  %v10736_v16 = vadd.f32 %v10604_v58, %v17701_v8 }
 0x80a   :  { %v11527_v6 = vadd.f32 %v17749_v28, %v11507_v63 }
 0x80b   :  { %v17754_v32 = vpop.f32.mrf.mxu3 }
 0x80c   :  { %v11543_v53 = vmax.f32 %v11527_v6, 0.0  ;;  %v11203_v41 = vpop.f32.mrf.mxu0  ;;  %v18892_v6 = vld [vmem:[#allocation6_spill] sm:$0xff] }
 0x80d   :  { %v11506_v44 = vadd.f32 %v11203_v41, %v11116_v57  ;;  %v11243_v31 = vpop.f32.mrf.mxu2  ;;  %vm18893_vm4 = vnez %v18892_v6 }
 0x80e   :  { %v11559_v20 = vsel %vm18891_vm3, %v11543_v53, 0.0  ;;  %v11508_v36 = vadd.f32 %v11243_v31, %v11118_v27  ;;  %v11125_v53 = vadd.f32 %v10993_v49, %v10736_v16  ;;  %v10735_v49 = vadd.f32 %v17721_v26, %v17705_v7 }
 0x80f   :  { %11575 = vst [vmem:[#allocation3 + $0x8] sm:$0xff] %v11559_v20  ;;  %v11303_v15 = vpop.f32.mrf.mxu1  ;;  %v11526_v24 = vadd.f32 %v17749_v28, %v11506_v44  ;;  %vm18922_vm3 = vcmask 64512  }
 0x810   :  { %v11511_v46 = vadd.f32 %v11303_v15, %v11121_v3  ;;  %v11528_v39 = vadd.f32 %v17749_v28, %v11508_v36  ;;  %v11123_v36 = vadd.f32 %v17735_v12, %v10734_v51  ;;  %v18898_v15 = vld [vmem:[#allocation9_spill] sm:$0xff]  ;;  %v11124_v26 = vadd.f32 %v17737_v48, %v10735_v49 }
 0x811   :  { %v11542_v47 = vmax.f32 %v11526_v24, 0.0  ;;  %vm18899_vm15 = vnez %v18898_v15 }
 0x812   :  { %v11531_v29 = vadd.f32 %v17749_v28, %v11511_v46  ;;  %v11544_v50 = vmax.f32 %v11528_v39, 0.0 }
 0x813   :  { %v11263_v63 = vpop.f32.mrf.mxu3  ;;  %v11558_v38 = vsel %vm18893_vm4, %v11542_v47, 0.0  ;;  %vm18923_vm4 = vmmov %vm18922_vm3 }
 0x814   :  { %v11547_v10 = vmax.f32 %v11531_v29, 0.0  ;;  %v11509_v1 = vadd.f32 %v11263_v63, %v11119_v43  ;;  %11574 = vst [vmem:[#allocation3] sm:$0xff] %v11558_v38  ;;  %v11591_v57 = vadd.f32 %v11559_v20, %v11558_v38  ;;  %v11560_v42 = vsel %vm18895_vm11, %v11544_v50, 0.0  ;;  %v11283_v22 = vpop.f32.mrf.mxu0  ;;  %v18900_v43 = vld [vmem:[#allocation10_spill] sm:$0xff]  ;;  %v18902_v50 = vld [vmem:[#allocation12_spill] sm:$0xff] }
 0x815   :  { %11576 = vst [vmem:[#allocation3 + $0x10] sm:$0xff] %v11560_v42  ;;  %v11510_v58 = vadd.f32 %v11283_v22, %v11120_v52  ;;  %v11323_v59 = vpop.f32.mrf.mxu2  ;;  %vm18901_vm10 = vnez %v18900_v43  ;;  %vm18903_vm13 = vnez %v18902_v50  ;;  %vm11627_vm11 = vcmask 3072  }
 0x816   :  { %v11563_v8 = vsel %vm18897_vm0, %v11547_v10, 0.0  ;;  %v11529_v9 = vadd.f32 %v17749_v28, %v11509_v1  ;;  %v11592_v27 = vadd.f32 %v11591_v57, %v11560_v42  ;;  %v11512_v41 = vadd.f32 %v11323_v59, %v11122_v56 }
 0x817   :  { %11579 = vst [vmem:[#allocation3 + $0x28] sm:$0xff] %v11563_v8  ;;  %v11383_v3 = vpop.f32.mrf.mxu1  ;;  %v11530_v33 = vadd.f32 %v17749_v28, %v11510_v58  ;;  %v10738_v1 = vadd.f32 %v17727_v17, %v17711_v25  ;;  %v18906_v58 = vld [vmem:[#allocation14_spill] sm:$0xff]  ;;  %v10741_v25 = vadd.f32 %v17731_v2, %v17715_v21  ;;  %v18912_v21 = vld [vmem:[#allocation20_spill] sm:$0xff] }
 0x818   :  { %v11545_v44 = vmax.f32 %v11529_v9, 0.0  ;;  %v11515_v20 = vadd.f32 %v11383_v3, %v11125_v53  ;;  %v11532_v31 = vadd.f32 %v17749_v28, %v11512_v41  ;;  %vm18907_vm12 = vnez %v18906_v58 }
 0x819   :  { %v11546_v24 = vmax.f32 %v11530_v33, 0.0  ;;  %v11127_v53 = vadd.f32 %v17743_v0, %v10738_v1  ;;  %v11130_v51 = vadd.f32 %v17747_v18, %v10741_v25  ;;  %v18910_v33 = vld [vmem:[#allocation16_spill] sm:$0xff]  ;;  %vm18913_vm9 = vnez %v18912_v21 }
 0x81a   :  { %v11561_v13 = vsel %vm18899_vm15, %v11545_v44, 0.0  ;;  %v11535_v46 = vadd.f32 %v17749_v28, %v11515_v20  ;;  %v11548_v62 = vmax.f32 %v11532_v31, 0.0  ;;  %vm18911_vm1 = vnez %v18910_v33 }
 0x81b   :  { %11577 = vst [vmem:[#allocation3 + $0x18] sm:$0xff] %v11561_v13  ;;  %v11593_v39 = vadd.f32 %v11592_v27, %v11561_v13  ;;  %v11343_v7 = vpop.f32.mrf.mxu3  ;;  %v11562_v12 = vsel %vm18901_vm10, %v11546_v24, 0.0  ;;  %v10742_v18 = vadd.f32 %v17733_v14, %v17717_v34  ;;  %v18918_v14 = vld [vmem:[#allocation21_spill] sm:$0xff] }
 0x81c   :  { %v11551_v47 = vmax.f32 %v11535_v46, 0.0  ;;  %v11513_v29 = vadd.f32 %v11343_v7, %v11123_v36  ;;  %11578 = vst [vmem:[#allocation3 + $0x20] sm:$0xff] %v11562_v12  ;;  %v11564_v35 = vsel %vm18903_vm13, %v11548_v62, 0.0  ;;  %v11363_v37 = vpop.f32.mrf.mxu0  ;;  %vm18919_vm5 = vnez %v18918_v14 }
 0x81d   :  { %v11594_v16 = vadd.f32 %v11593_v39, %v11562_v12  ;;  %11580 = vst [vmem:[#allocation3 + $0x30] sm:$0xff] %v11564_v35  ;;  %v11514_v52 = vadd.f32 %v11363_v37, %v11124_v26  ;;  %v11403_v6 = vpop.f32.mrf.mxu2  ;;  %v11131_v45 = vadd.f32 %v17754_v32, %v10742_v18  ;;  %v18914_v39 = vld [vmem:[#allocation17_spill] sm:$0xff] }
 0x81e   :  { %v11567_v63 = vsel %vm18905_vm7, %v11551_v47, 0.0  ;;  %v11533_v48 = vadd.f32 %v17749_v28, %v11513_v29  ;;  %v11516_v38 = vadd.f32 %v11403_v6, %v11126_v23  ;;  %vm18915_vm14 = vnez %v18914_v39  ;;  %v18916_v47 = vld [vmem:[#allocation19_spill] sm:$0xff] }
 0x81f   :  { %11583 = vst [vmem:[#allocation3 + $0x48] sm:$0xff] %v11567_v63  ;;  %v11463_v10 = vpop.f32.mrf.mxu1  ;;  %v11595_v55 = vadd.f32 %v11594_v16, %v11563_v8  ;;  %v11534_v57 = vadd.f32 %v17749_v28, %v11514_v52  ;;  %vm18917_vm2 = vnez %v18916_v47 }
 0x820   :  { %v11549_v56 = vmax.f32 %v11533_v48, 0.0  ;;  %v11519_v54 = vadd.f32 %v11463_v10, %v11129_v40  ;;  %v11536_v42 = vadd.f32 %v17749_v28, %v11516_v38  ;;  %v18920_v40 = vld [vmem:[#allocation22_spill] sm:$0xff]  ;;  %v11590_v48 = vld [vmem:[%s17852_s6] sm:$0xf] }
 0x821   :  { %v11596_v22 = vadd.f32 %v11595_v55, %v11564_v35  ;;  %v11550_v30 = vmax.f32 %v11534_v57, 0.0  ;;  %vm18921_vm6 = vnez %v18920_v40  ;;  %11602 = vrot.lane.b32.xlu2 %v11590_v48, %s13158_s15 }
 0x822   :  { %v11539_v9 = vadd.f32 %v17749_v28, %v11519_v54  ;;  %v11565_v8 = vsel %vm18907_vm12, %v11549_v56, 0.0  ;;  %v11552_v17 = vmax.f32 %v11536_v42, 0.0 }
 0x823   :  { %v11423_v59 = vpop.f32.mrf.mxu3  ;;  %11581 = vst [vmem:[#allocation3 + $0x38] sm:$0xff] %v11565_v8  ;;  %v11597_v27 = vadd.f32 %v11596_v22, %v11565_v8  ;;  %v11566_v41 = vsel %vm18909_vm8, %v11550_v30, 0.0 }
 0x824   :  { %v11555_v3 = vmax.f32 %v11539_v9, 0.0  ;;  %v11517_v0 = vadd.f32 %v11423_v59, %v11127_v53  ;;  %11582 = vst [vmem:[#allocation3 + $0x40] sm:$0xff] %v11566_v41  ;;  %v11629_v44 = vadd.f32 %v11567_v63, %v11566_v41  ;;  %v11568_v20 = vsel %vm18911_vm1, %v11552_v17, 0.0  ;;  %v11443_v49 = vpop.f32.mrf.mxu0 }
 0x825   :  { %11598 = vadd.xlane.f32.xlu1 %v11597_v27  ;;  %11584 = vst [vmem:[#allocation3 + $0x50] sm:$0xff] %v11568_v20  ;;  %v11518_v31 = vadd.f32 %v11443_v49, %v11128_v11  ;;  %v11483_v36 = vpop.f32.mrf.mxu2 }
 0x826   :  { %v11571_v2 = vsel %vm18913_vm9, %v11555_v3, 0.0  ;;  %v11537_v60 = vadd.f32 %v17749_v28, %v11517_v0  ;;  %v11630_v15 = vadd.f32 %v11629_v44, %v11568_v20  ;;  %v11520_v13 = vadd.f32 %v11483_v36, %v11130_v51 }
 0x827   :  { %11587 = vst [vmem:[#allocation3 + $0x68] sm:$0xff] %v11571_v2  ;;  %v11538_v46 = vadd.f32 %v17749_v28, %v11518_v31 }
 0x828   :  { %v11553_v24 = vmax.f32 %v11537_v60, 0.0  ;;  %v11540_v5 = vadd.f32 %v17749_v28, %v11520_v13 }
 0x829   :  { %v11554_v7 = vmax.f32 %v11538_v46, 0.0 }
 0x82a   :  { %v11569_v62 = vsel %vm18915_vm14, %v11553_v24, 0.0  ;;  %v11556_v43 = vmax.f32 %v11540_v5, 0.0 }
 0x82b   :  { %11585 = vst [vmem:[#allocation3 + $0x58] sm:$0xff] %v11569_v62  ;;  %v11631_v26 = vadd.f32 %v11630_v15, %v11569_v62  ;;  %v11503_v12 = vpop.f32.mrf.mxu3  ;;  %v11570_v29 = vsel %vm18917_vm2, %v11554_v7, 0.0 }
 0x82c   :  { %v11521_v23 = vadd.f32 %v11503_v12, %v11131_v45  ;;  %11586 = vst [vmem:[#allocation3 + $0x60] sm:$0xff] %v11570_v29  ;;  %v11572_v16 = vsel %vm18919_vm5, %v11556_v43, 0.0 }
 0x82d   :  { %v11632_v34 = vadd.f32 %v11631_v26, %v11570_v29  ;;  %11588 = vst [vmem:[#allocation3 + $0x70] sm:$0xff] %v11572_v16 }
 0x82e   :  { %v11541_v32 = vadd.f32 %v17749_v28, %v11521_v23 }
 0x82f   :  { %v11633_v50 = vadd.f32 %v11632_v34, %v11571_v2 }
 0x830   :  { %v11557_v35 = vmax.f32 %v11541_v32, 0.0 }
 0x831   :  { %v11634_v37 = vadd.f32 %v11633_v50, %v11572_v16 }
 0x832   :  { %v11573_v4 = vsel %vm18921_vm6, %v11557_v35, 0.0 }
 0x833   :  { %11589 = vst [vmem:[#allocation3 + $0x78] sm:$0xff] %v11573_v4  ;;  %v11635_v63 = vadd.f32 %v11634_v37, %v11573_v4 }
 0x834   :  { %11671 = dma.vmem_to_hbm [thread:$0]  %s11667_s19, 2048, %s11669_s17, [#allocation4]  }
 0x835   :  { %11636 = vadd.xlane.f32.xlu0 %v11635_v63 }
 0x87b   :  { %v11603_v10 = vpop.permute.xlu2 %11602 }
 0x898   :  { %v11599_v52 = vpop.xlane.xlu1 %11598 }
 0x899   :  { %v11600_v6 = vmul.f32 0.00390625, %v11599_v52 }
 0x89b   :  { %11622 = vmatpush.msra.mxu0 %v11600_v6 }
 0x89c   :  { %12254 = vmatmul.msk.f32.vlgmr.msra.gmra.mxu0 %vm18922_vm3, %v11590_v48 }
 0x8a8   :  { %v11637_v28 = vpop.xlane.xlu0 %11636 }
 0x8a9   :  { %v11638_v38 = vmul.f32 0.00390625, %v11637_v28 }
 0x8ab   :  { %11654 = vmatpush.msra.mxu1 %v11638_v38 }
 0x8ac   :  { %12255 = vmatmul.msk.f32.vlgmr.msra.gmra.mxu1 %vm18923_vm4, %v11590_v48 }
 0x919   :  { %v11624_v55 = vpop.f32.mrf.mxu0 }
 0x91a   :  { %v11625_v1 = vadd.f32 %v11624_v55, %v11603_v10 }
 0x91c   :  { %11628 = vst.msk [vmem:[%s17854_s8] sm:$0xf] %vm11627_vm11, %v11625_v1 }
 0x929   :  { %v11656_v56 = vpop.f32.mrf.mxu1 }
 0x92a   :  { %v11657_v57 = vadd.f32 %v11656_v56, %v11603_v10 }
 0x92c   :  { %12256 = vst.msk [vmem:[%s17854_s8 + $0x4] sm:$0xf] %vm11627_vm11, %v11657_v57 }
 0x92d   :  { %13133 = dma.done.wait [#allocation4], 2048  }
 0x92e   :  { %13134 = vsyncadd [#allocation4], 4294965248 }
 0x92f   :  { %11680 = vsyncpa [#allocation4], 1 }

</bundles_post_ra>
